<compile_context>
chip_gen: v7x
topology: tpu7x:2x2x1
jax: 0.10.0
libtpu: 0.0.40
codegen_flags: <defaults>
</compile_context>

<pallas_src>
import jax
import jax.numpy as jnp
from jax.experimental import pallas as pl
from jax.experimental.pallas import tpu as pltpu

BN_EPS = 1e-5
LANE = 128
LPAD = 16          # left pad inside the halo scratch == bf16 sublane tile -> aligned interior store


# --------------------------------------------------------------------------
# small helpers
# --------------------------------------------------------------------------
def _round_up(n, m):
    return (n + m - 1) // m * m


def _pad_channels(a, cp):
    pad = cp - a.shape[-1]
    if pad == 0:
        return a
    cfg = [(0, 0)] * (a.ndim - 1) + [(0, pad)]
    return jnp.pad(a, cfg)


def _pack_weight(w_hwio, cp):
    """(3,3,Cin,Cout) -> channel-padded (9*cp, cp) bf16, row index = (dy*3+dx)*cp + ci."""
    kh, kw, cin, cout = w_hwio.shape
    wp = jnp.pad(w_hwio, ((0, 0), (0, 0), (0, cp - cin), (0, cp - cout)))
    return wp.reshape(kh * kw * cp, cp).astype(jnp.bfloat16)


def _physical_vmem_bytes():
    try:
        return int(pltpu.get_tpu_info().vmem_capacity_bytes)
    except Exception:
        return 64 * 2 ** 20        # conservative: v7x per-core VMEM


def _vmem_limit(step_bytes):
    """Generation-aware scoped-VMEM limit: room for double-buffering + headroom,
    capped at 3/4 of the physical VMEM of the chip we are actually running on
    (128 MiB on v5e/v6e, 64 MiB on v7x)."""
    cap = _physical_vmem_bytes() * 3 // 4
    want = max(32 * 2 ** 20, 4 * step_bytes)
    return int(min(cap, want))


def _elu(h):
    # exp only on the (clamped) negative branch -> no overflow on the dead lane
    return jnp.where(h > 0.0, h, jnp.exp(jnp.minimum(h, 0.0)) - 1.0)


def _stats_chunk_rows(h, w):
    """Rows of H per stats chunk so each chunk is <= 128 flat rows (<= ~16 f32 vregs)."""
    for ch in (64, 32, 16, 8, 4, 2, 1):
        if ch <= h and h % ch == 0 and ch * w <= 128:
            return ch
    return 1


# --------------------------------------------------------------------------
# conv kernel: [optional fused BN+ELU prologue] -> in-kernel halo -> VMEM
# im2col panel -> one K=9*Cp MXU matmul -> raw conv output + per-image stats
# --------------------------------------------------------------------------
def _make_conv_kernel(H, W, Cp, apply_bn_elu, stats_rows):
    HW = H * W

    def kernel(*refs):
        if apply_bn_elu:
            (x_ref, scale_ref, shift_ref, w_ref,
             y_ref, sum_ref, ssq_ref, halo_ref, panel_ref) = refs
        else:
            (x_ref, w_ref,
             y_ref, sum_ref, ssq_ref, halo_ref, panel_ref) = refs

        # ---- prologue: (optionally) previous layer's BN-apply + ELU, bf16 cast,
        # ---- write into a zeroed halo scratch (halo border stays 0 == SAME pad).
        halo_ref[...] = jnp.zeros_like(halo_ref)          # cheap VMEM fill each step
        h = x_ref[0]                                      # (H, W, Cp) f32
        if apply_bn_elu:
            h = (h * scale_ref[...].reshape(1, 1, Cp)
                 + shift_ref[...].reshape(1, 1, Cp))
            h = _elu(h)
        # LPAD (=16) aligned interior store; rows offset 1 is the free leading dim.
        halo_ref[1:H + 1, LPAD:LPAD + W, :] = h.astype(jnp.bfloat16)

        # ---- im2col panel in VMEM: 9 shifted taps, aligned lane-offset stores.
        for dy in range(3):
            for dx in range(3):
                k = dy * 3 + dx
                tap = halo_ref[dy:dy + H, LPAD - 1 + dx:LPAD - 1 + dx + W, :]
                panel_ref[:, k * Cp:(k + 1) * Cp] = tap.reshape(HW, Cp)

        # ---- one MXU matmul, K = 9*Cp (fills the 256-wide MXU on v6e/v7x).
        y = jnp.dot(panel_ref[...], w_ref[...], preferred_element_type=jnp.float32)
        y_ref[0] = y.reshape(H, W, Cp)

        # ---- per-image BN statistics, chunked read-back (low vreg pressure).
        s = jnp.zeros((1, Cp), jnp.float32)
        q = jnp.zeros((1, Cp), jnp.float32)
        for h0 in range(0, H, stats_rows):
            blk = y_ref[0, h0:h0 + stats_rows, :, :].reshape(stats_rows * W, Cp)
            s = s + jnp.sum(blk, axis=0, keepdims=True)
            q = q + jnp.sum(blk * blk, axis=0, keepdims=True)
        sum_ref[0] = s
        ssq_ref[0] = q

    return kernel


def conv3x3_bn_stats(x, w_packed, scale=None, shift=None):
    """3x3 SAME conv of x: (N,H,W,Cp) f32 with w_packed: (9*Cp,Cp) bf16.
    If scale/shift are given, ELU(x*scale+shift) (the previous layer's fused
    BN-apply + ELU) is applied on the fly before the conv (never hits HBM).
    Returns (y f32 (N,H,W,Cp), per-image channel sums, per-image channel sum-of-squares)."""
    N, H, W, Cp = x.shape
    HW = H * W
    apply_bn = scale is not None
    kernel = _make_conv_kernel(H, W, Cp, apply_bn, _stats_chunk_rows(H, W))

    in_specs = [pl.BlockSpec((1, H, W, Cp), lambda n: (n, 0, 0, 0))]
    args = [x]
    if apply_bn:
        in_specs += [pl.BlockSpec((1, Cp), lambda n: (0, 0)),
                     pl.BlockSpec((1, Cp), lambda n: (0, 0))]
        args += [scale, shift]
    in_specs += [pl.BlockSpec((9 * Cp, Cp), lambda n: (0, 0))]   # constant block: 1 DMA
    args += [w_packed]

    halo_w = LPAD + W + 1
    step_bytes = (2 * HW * Cp * 4            # input block (double-buffered)
                  + 9 * Cp * Cp * 2          # packed weights (bf16)
                  + 2 * HW * Cp * 4          # output block (double-buffered)
                  + (H + 2) * halo_w * Cp * 2   # halo scratch (bf16)
                  + HW * 9 * Cp * 2)         # im2col panel scratch (bf16)

    return pl.pallas_call(
        kernel,
        out_shape=(jax.ShapeDtypeStruct((N, H, W, Cp), jnp.float32),
                   jax.ShapeDtypeStruct((N, 1, Cp), jnp.float32),
                   jax.ShapeDtypeStruct((N, 1, Cp), jnp.float32)),
        grid=(N,),
        in_specs=in_specs,
        out_specs=(pl.BlockSpec((1, H, W, Cp), lambda n: (n, 0, 0, 0)),
                   pl.BlockSpec((1, 1, Cp), lambda n: (n, 0, 0)),
                   pl.BlockSpec((1, 1, Cp), lambda n: (n, 0, 0))),
        scratch_shapes=[pltpu.VMEM((H + 2, halo_w, Cp), jnp.bfloat16),
                        pltpu.VMEM((HW, 9 * Cp), jnp.bfloat16)],
        compiler_params=pltpu.CompilerParams(
            dimension_semantics=("parallel",),
            vmem_limit_bytes=_vmem_limit(step_bytes)),
    )(*args)


def _bn_coeffs(sums, ssqs, gamma, beta, count):
    """Fold per-image (sum, sum-of-squares) into BN (scale, shift), each (1,Cp).
    Note: E[y^2]-E[y]^2 in f32 can cancel if the conv-output mean is large vs.
    its std; acceptable here (zero-mean-ish conv outputs), flagged in review."""
    s = jnp.sum(sums, axis=0)                       # (1, Cp)
    q = jnp.sum(ssqs, axis=0)                       # (1, Cp)
    mean = s / count
    var = jnp.maximum(q / count - mean * mean, 0.0)
    scale = gamma * jax.lax.rsqrt(var + BN_EPS)
    shift = beta - mean * scale
    return scale, shift


# --------------------------------------------------------------------------
# final kernel: BN2-apply + ELU, * alpha + identity shortcut (ReZero residual)
# --------------------------------------------------------------------------
def _bn_elu_rezero_kernel(alpha_ref, y_ref, scale_ref, shift_ref, sc_ref, o_ref):
    h = y_ref[...] * scale_ref[...] + shift_ref[...]
    h = _elu(h)
    o_ref[...] = (h * alpha_ref[0] + sc_ref[...]).astype(o_ref.dtype)


def _choose_row_tile(r, cp, n_arrays):
    """Largest row tile that divides R and keeps ~<=4 MiB of f32 traffic per step
    (single grid step is fine for small R; per-step overhead is pure loss)."""
    budget_rows = max(8, (4 * 2 ** 20) // (n_arrays * cp * 4))
    for tm in (8192, 4096, 2048, 1024, 512, 256, 128, 64, 32, 16, 8):
        if tm <= budget_rows and r % tm == 0:
            return tm
    return r


def bn_elu_rezero(y_flat, scale, shift, alpha1, shortcut_flat):
    R, Cp = y_flat.shape
    tm = _choose_row_tile(R, Cp, 3)
    step_bytes = 2 * 3 * tm * Cp * 4 + 2 * Cp * 4
    return pl.pallas_call(
        _bn_elu_rezero_kernel,
        out_shape=jax.ShapeDtypeStruct((R, Cp), jnp.float32),
        grid=(R // tm,),
        in_specs=[
            pl.BlockSpec(memory_space=pltpu.MemorySpace.SMEM),  # alpha (1,) scalar
            pl.BlockSpec((tm, Cp), lambda i: (i, 0)),
            pl.BlockSpec((1, Cp), lambda i: (0, 0)),            # constant block: 1 DMA
            pl.BlockSpec((1, Cp), lambda i: (0, 0)),
            pl.BlockSpec((tm, Cp), lambda i: (i, 0)),            # shortcut tile
        ],
        out_specs=pl.BlockSpec((tm, Cp), lambda i: (i, 0)),
        compiler_params=pltpu.CompilerParams(
            dimension_semantics=("parallel",),
            vmem_limit_bytes=_vmem_limit(step_bytes)),
    )(alpha1, y_flat, scale, shift, shortcut_flat)


# --------------------------------------------------------------------------
# forward pass (stride=1 path, Cin == Cout -> identity shortcut)
# --------------------------------------------------------------------------
@jax.jit
def rezero_forward(x_nchw, w1, w2, g1, b1, g2, b2, alpha):
    x = jnp.transpose(x_nchw, (0, 2, 3, 1)).astype(jnp.float32)   # NCHW -> NHWC
    N, H, W, Cin = x.shape
    Cout = w1.shape[-1]
    assert Cin == Cout, "identity shortcut requires Cin == Cout (stride=1 path)"
    Cp = _round_up(max(Cin, Cout), LANE)          # lane-dense channel padding
    R = N * H * W

    xp = _pad_channels(x, Cp)                     # (N,H,W,Cp) f32: conv1 input + residual
    w1p = _pack_weight(w1, Cp)                    # (9*Cp, Cp) bf16
    w2p = _pack_weight(w2, Cp)
    g1p = _pad_channels(g1.reshape(1, -1).astype(jnp.float32), Cp)
    b1p = _pad_channels(b1.reshape(1, -1).astype(jnp.float32), Cp)
    g2p = _pad_channels(g2.reshape(1, -1).astype(jnp.float32), Cp)
    b2p = _pad_channels(b2.reshape(1, -1).astype(jnp.float32), Cp)

    # ---- conv1 -> BN1 batch statistics ---------------------------------
    y1, s1, q1 = conv3x3_bn_stats(xp, w1p)
    sc1, sh1 = _bn_coeffs(s1, q1, g1p, b1p, R)

    # ---- fused [BN1-apply + ELU] -> conv2 -> BN2 stats (h1 stays on-chip)
    y2, s2, q2 = conv3x3_bn_stats(y1, w2p, scale=sc1, shift=sh1)
    sc2, sh2 = _bn_coeffs(s2, q2, g2p, b2p, R)

    # ---- BN2-apply + ELU, * alpha + identity shortcut -------------------
    out = bn_elu_rezero(y2.reshape(R, Cp), sc2, sh2,
                        jnp.reshape(alpha, (1,)).astype(jnp.float32),
                        xp.reshape(R, Cp))

    out = out.reshape(N, H, W, Cp)[..., :Cout]
    return jnp.transpose(out, (0, 3, 1, 2))       # NHWC -> NCHW


# --------------------------------------------------------------------------
# pure-JAX reference (same bf16 conv inputs / f32 accumulation as the kernels)
# --------------------------------------------------------------------------
def reference_forward(x_nchw, w1, w2, g1, b1, g2, b2, alpha):
    x = jnp.transpose(x_nchw, (0, 2, 3, 1)).astype(jnp.float32)

    def conv(h, w):
        return jax.lax.conv_general_dilated(
            h.astype(jnp.bfloat16), w.astype(jnp.bfloat16), (1, 1), 'SAME',
            dimension_numbers=('NHWC', 'HWIO', 'NHWC'),
            preferred_element_type=jnp.float32)

    def bn_elu_ref(h, g, b):
        m = h.mean(axis=(0, 1, 2))
        v = ((h - m) ** 2).mean(axis=(0, 1, 2))
        h = (h - m) * jax.lax.rsqrt(v + BN_EPS) * g + b
        return jnp.where(h > 0.0, h, jnp.exp(jnp.minimum(h, 0.0)) - 1.0)

    y = bn_elu_ref(conv(x, w1), g1, b1)
    y = bn_elu_ref(conv(y, w2), g2, b2)
    out = y * alpha + x
    return jnp.transpose(out, (0, 3, 1, 2))


if __name__ == "__main__":
    key = jax.random.PRNGKey(0)
    k1, k2, kx = jax.random.split(key, 3)

    N, C, H, W = 2, 4, 16, 16            # small shapes consistent with the module
    x_nchw = jax.random.normal(kx, (N, C, H, W), jnp.float32)

    # Parameters (shapes per __init__); conv weights in HWIO layout.
    w1 = 0.1 * jax.random.normal(k1, (3, 3, C, C), jnp.float32)
    w2 = 0.1 * jax.random.normal(k2, (3, 3, C, C), jnp.float32)
    g1 = jnp.ones((C,), jnp.float32); b1 = jnp.zeros((C,), jnp.float32)
    g2 = jnp.ones((C,), jnp.float32); b2 = jnp.zeros((C,), jnp.float32)

    # alpha = 0 (the module's actual init): output must equal the shortcut.
    out0 = jax.block_until_ready(
        rezero_forward(x_nchw, w1, w2, g1, b1, g2, b2, jnp.float32(0.0)))
    assert out0.shape == (N, C, H, W)
    assert jnp.allclose(out0, x_nchw, atol=1e-6)

    # Nonzero alpha: validate the full conv/BN/ELU/residual path vs reference.
    alpha_test = jnp.float32(0.7)
    out_k = jax.block_until_ready(
        rezero_forward(x_nchw, w1, w2, g1, b1, g2, b2, alpha_test))
    out_r = reference_forward(x_nchw, w1, w2, g1, b1, g2, b2, alpha_test)
    max_err = float(jnp.max(jnp.abs(out_k - out_r)))
    # bf16 MXU inputs on both paths; small slack for bf16 rounding-boundary flips.
    assert max_err < 5e-3, f"max abs error {max_err}"

    print("KERNEL_OK")
</pallas_src>

<mosaic_0001>
module attributes {stable_mosaic.version = 11 : i64} {
  func.func @kernel(%arg0: i32, %arg1: memref<1x16x16x128xf32, #tpu.memory_space<vmem>>, %arg2: memref<1152x128xbf16, #tpu.memory_space<vmem>>, %arg3: memref<1x16x16x128xf32, #tpu.memory_space<vmem>>, %arg4: memref<1x1x128xf32, #tpu.memory_space<vmem>>, %arg5: memref<1x1x128xf32, #tpu.memory_space<vmem>>, %arg6: memref<18x33x128xbf16, #tpu.memory_space<vmem>>, %arg7: memref<256x1152xbf16, #tpu.memory_space<vmem>>) attributes {dimension_semantics = [#tpu.dimension_semantics<parallel>], iteration_bounds = array<i64: 2>, scalar_prefetch = 0 : i64, scratch_operands = 2 : i64, tpu.core_type = #tpu.core_type<tc>, window_params = [{transform_indices = @transform_0, window_bounds = array<i64: 1, 16, 16, 128>}, {pipeline_mode = #tpu.pipeline_mode<synchronous>, transform_indices = @transform_1, window_bounds = array<i64: 1152, 128>}, {transform_indices = @transform_2, window_bounds = array<i64: 1, 16, 16, 128>}, {transform_indices = @transform_3, window_bounds = array<i64: 1, 1, 128>}, {transform_indices = @transform_4, window_bounds = array<i64: 1, 1, 128>}]} {
    %cst = arith.constant 0.000000e+00 : bf16
    %0 = vector.broadcast %cst : bf16 to vector<18x33x128xbf16>
    %c0 = arith.constant 0 : index
    %c0_0 = arith.constant 0 : index
    %c0_1 = arith.constant 0 : index
    %1 = vector.load %arg6[%c0, %c0_0, %c0_1] : memref<18x33x128xbf16, #tpu.memory_space<vmem>>, vector<18x33x128xbf16>
    tpu.vector_store %arg6[%c0, %c0_0, %c0_1], %0 {strides = array<i32>} : memref<18x33x128xbf16, #tpu.memory_space<vmem>>, vector<18x33x128xbf16>,
    %c0_2 = arith.constant 0 : index
    %c0_3 = arith.constant 0 : index
    %c0_4 = arith.constant 0 : index
    %c0_5 = arith.constant 0 : index
    %2 = vector.load %arg1[%c0_2, %c0_3, %c0_4, %c0_5] : memref<1x16x16x128xf32, #tpu.memory_space<vmem>>, vector<1x16x16x128xf32>
    %3 = vector.shape_cast %2 : vector<1x16x16x128xf32> to vector<16x16x128xf32>
    %4 = arith.truncf %3 : vector<16x16x128xf32> to vector<16x16x128xbf16>
    %c1 = arith.constant 1 : index
    %c16 = arith.constant 16 : index
    %c0_6 = arith.constant 0 : index
    %5 = vector.load %arg6[%c1, %c16, %c0_6] : memref<18x33x128xbf16, #tpu.memory_space<vmem>>, vector<16x16x128xbf16>
    tpu.vector_store %arg6[%c1, %c16, %c0_6], %4 {strides = array<i32>} : memref<18x33x128xbf16, #tpu.memory_space<vmem>>, vector<16x16x128xbf16>,
    %c0_7 = arith.constant 0 : index
    %c15 = arith.constant 15 : index
    %c0_8 = arith.constant 0 : index
    %6 = vector.load %arg6[%c0_7, %c15, %c0_8] : memref<18x33x128xbf16, #tpu.memory_space<vmem>>, vector<16x16x128xbf16>
    %7 = vector.shape_cast %6 : vector<16x16x128xbf16> to vector<256x128xbf16>
    %c0_9 = arith.constant 0 : index
    %c0_10 = arith.constant 0 : index
    %8 = vector.load %arg7[%c0_9, %c0_10] : memref<256x1152xbf16, #tpu.memory_space<vmem>>, vector<256x128xbf16>
    tpu.vector_store %arg7[%c0_9, %c0_10], %7 {strides = array<i32>} : memref<256x1152xbf16, #tpu.memory_space<vmem>>, vector<256x128xbf16>,
    %c0_11 = arith.constant 0 : index
    %c16_12 = arith.constant 16 : index
    %c0_13 = arith.constant 0 : index
    %9 = vector.load %arg6[%c0_11, %c16_12, %c0_13] : memref<18x33x128xbf16, #tpu.memory_space<vmem>>, vector<16x16x128xbf16>
    %10 = vector.shape_cast %9 : vector<16x16x128xbf16> to vector<256x128xbf16>
    %c0_14 = arith.constant 0 : index
    %c128 = arith.constant 128 : index
    %11 = vector.load %arg7[%c0_14, %c128] : memref<256x1152xbf16, #tpu.memory_space<vmem>>, vector<256x128xbf16>
    tpu.vector_store %arg7[%c0_14, %c128], %10 {strides = array<i32>} : memref<256x1152xbf16, #tpu.memory_space<vmem>>, vector<256x128xbf16>,
    %c0_15 = arith.constant 0 : index
    %c17 = arith.constant 17 : index
    %c0_16 = arith.constant 0 : index
    %12 = vector.load %arg6[%c0_15, %c17, %c0_16] : memref<18x33x128xbf16, #tpu.memory_space<vmem>>, vector<16x16x128xbf16>
    %13 = vector.shape_cast %12 : vector<16x16x128xbf16> to vector<256x128xbf16>
    %c0_17 = arith.constant 0 : index
    %c256 = arith.constant 256 : index
    %14 = vector.load %arg7[%c0_17, %c256] : memref<256x1152xbf16, #tpu.memory_space<vmem>>, vector<256x128xbf16>
    tpu.vector_store %arg7[%c0_17, %c256], %13 {strides = array<i32>} : memref<256x1152xbf16, #tpu.memory_space<vmem>>, vector<256x128xbf16>,
    %c1_18 = arith.constant 1 : index
    %c15_19 = arith.constant 15 : index
    %c0_20 = arith.constant 0 : index
    %15 = vector.load %arg6[%c1_18, %c15_19, %c0_20] : memref<18x33x128xbf16, #tpu.memory_space<vmem>>, vector<16x16x128xbf16>
    %16 = vector.shape_cast %15 : vector<16x16x128xbf16> to vector<256x128xbf16>
    %c0_21 = arith.constant 0 : index
    %c384 = arith.constant 384 : index
    %17 = vector.load %arg7[%c0_21, %c384] : memref<256x1152xbf16, #tpu.memory_space<vmem>>, vector<256x128xbf16>
    tpu.vector_store %arg7[%c0_21, %c384], %16 {strides = array<i32>} : memref<256x1152xbf16, #tpu.memory_space<vmem>>, vector<256x128xbf16>,
    %c1_22 = arith.constant 1 : index
    %c16_23 = arith.constant 16 : index
    %c0_24 = arith.constant 0 : index
    %18 = vector.load %arg6[%c1_22, %c16_23, %c0_24] : memref<18x33x128xbf16, #tpu.memory_space<vmem>>, vector<16x16x128xbf16>
    %19 = vector.shape_cast %18 : vector<16x16x128xbf16> to vector<256x128xbf16>
    %c0_25 = arith.constant 0 : index
    %c512 = arith.constant 512 : index
    %20 = vector.load %arg7[%c0_25, %c512] : memref<256x1152xbf16, #tpu.memory_space<vmem>>, vector<256x128xbf16>
    tpu.vector_store %arg7[%c0_25, %c512], %19 {strides = array<i32>} : memref<256x1152xbf16, #tpu.memory_space<vmem>>, vector<256x128xbf16>,
    %c1_26 = arith.constant 1 : index
    %c17_27 = arith.constant 17 : index
    %c0_28 = arith.constant 0 : index
    %21 = vector.load %arg6[%c1_26, %c17_27, %c0_28] : memref<18x33x128xbf16, #tpu.memory_space<vmem>>, vector<16x16x128xbf16>
    %22 = vector.shape_cast %21 : vector<16x16x128xbf16> to vector<256x128xbf16>
    %c0_29 = arith.constant 0 : index
    %c640 = arith.constant 640 : index
    %23 = vector.load %arg7[%c0_29, %c640] : memref<256x1152xbf16, #tpu.memory_space<vmem>>, vector<256x128xbf16>
    tpu.vector_store %arg7[%c0_29, %c640], %22 {strides = array<i32>} : memref<256x1152xbf16, #tpu.memory_space<vmem>>, vector<256x128xbf16>,
    %c2 = arith.constant 2 : index
    %c15_30 = arith.constant 15 : index
    %c0_31 = arith.constant 0 : index
    %24 = vector.load %arg6[%c2, %c15_30, %c0_31] : memref<18x33x128xbf16, #tpu.memory_space<vmem>>, vector<16x16x128xbf16>
    %25 = vector.shape_cast %24 : vector<16x16x128xbf16> to vector<256x128xbf16>
    %c0_32 = arith.constant 0 : index
    %c768 = arith.constant 768 : index
    %26 = vector.load %arg7[%c0_32, %c768] : memref<256x1152xbf16, #tpu.memory_space<vmem>>, vector<256x128xbf16>
    tpu.vector_store %arg7[%c0_32, %c768], %25 {strides = array<i32>} : memref<256x1152xbf16, #tpu.memory_space<vmem>>, vector<256x128xbf16>,
    %c2_33 = arith.constant 2 : index
    %c16_34 = arith.constant 16 : index
    %c0_35 = arith.constant 0 : index
    %27 = vector.load %arg6[%c2_33, %c16_34, %c0_35] : memref<18x33x128xbf16, #tpu.memory_space<vmem>>, vector<16x16x128xbf16>
    %28 = vector.shape_cast %27 : vector<16x16x128xbf16> to vector<256x128xbf16>
    %c0_36 = arith.constant 0 : index
    %c896 = arith.constant 896 : index
    %29 = vector.load %arg7[%c0_36, %c896] : memref<256x1152xbf16, #tpu.memory_space<vmem>>, vector<256x128xbf16>
    tpu.vector_store %arg7[%c0_36, %c896], %28 {strides = array<i32>} : memref<256x1152xbf16, #tpu.memory_space<vmem>>, vector<256x128xbf16>,
    %c2_37 = arith.constant 2 : index
    %c17_38 = arith.constant 17 : index
    %c0_39 = arith.constant 0 : index
    %30 = vector.load %arg6[%c2_37, %c17_38, %c0_39] : memref<18x33x128xbf16, #tpu.memory_space<vmem>>, vector<16x16x128xbf16>
    %31 = vector.shape_cast %30 : vector<16x16x128xbf16> to vector<256x128xbf16>
    %c0_40 = arith.constant 0 : index
    %c1024 = arith.constant 1024 : index
    %32 = vector.load %arg7[%c0_40, %c1024] : memref<256x1152xbf16, #tpu.memory_space<vmem>>, vector<256x128xbf16>
    tpu.vector_store %arg7[%c0_40, %c1024], %31 {strides = array<i32>} : memref<256x1152xbf16, #tpu.memory_space<vmem>>, vector<256x128xbf16>,
    %c0_41 = arith.constant 0 : index
    %c0_42 = arith.constant 0 : index
    %33 = vector.load %arg7[%c0_41, %c0_42] : memref<256x1152xbf16, #tpu.memory_space<vmem>>, vector<256x1152xbf16>
    %c0_43 = arith.constant 0 : index
    %c0_44 = arith.constant 0 : index
    %34 = vector.load %arg2[%c0_43, %c0_44] : memref<1152x128xbf16, #tpu.memory_space<vmem>>, vector<1152x128xbf16>
    %cst_45 = arith.constant dense<0.000000e+00> : vector<256x128xf32>
    %35 = tpu.matmul %33, %34, %cst_45 {dimension_numbers = #tpu.dot_dimension_numbers<[1], [0], [0], [1], [0, 0, 1, 1], [], []>} : vector<256x1152xbf16>, vector<1152x128xbf16>, vector<256x128xf32> -> vector<256x128xf32>
    %36 = vector.shape_cast %35 : vector<256x128xf32> to vector<16x16x128xf32>
    %c0_46 = arith.constant 0 : index
    %c0_47 = arith.constant 0 : index
    %c0_48 = arith.constant 0 : index
    %c0_49 = arith.constant 0 : index
    %37 = vector.load %arg3[%c0_46, %c0_47, %c0_48, %c0_49] : memref<1x16x16x128xf32, #tpu.memory_space<vmem>>, vector<1x16x16x128xf32>
    %38 = vector.shape_cast %37 : vector<1x16x16x128xf32> to vector<16x16x128xf32>
    %39 = vector.shape_cast %36 : vector<16x16x128xf32> to vector<1x16x16x128xf32>
    tpu.vector_store %arg3[%c0_46, %c0_47, %c0_48, %c0_49], %39 {strides = array<i32>} : memref<1x16x16x128xf32, #tpu.memory_space<vmem>>, vector<1x16x16x128xf32>,
    %cst_50 = arith.constant 0.000000e+00 : f32
    %40 = vector.broadcast %cst_50 : f32 to vector<1x128xf32>
    %cst_51 = arith.constant 0.000000e+00 : f32
    %41 = vector.broadcast %cst_51 : f32 to vector<1x128xf32>
    %c0_52 = arith.constant 0 : index
    %c0_53 = arith.constant 0 : index
    %c0_54 = arith.constant 0 : index
    %c0_55 = arith.constant 0 : index
    %42 = vector.load %arg3[%c0_52, %c0_53, %c0_54, %c0_55] : memref<1x16x16x128xf32, #tpu.memory_space<vmem>>, vector<1x8x16x128xf32>
    %43 = vector.shape_cast %42 : vector<1x8x16x128xf32> to vector<8x16x128xf32>
    %44 = vector.shape_cast %43 : vector<8x16x128xf32> to vector<128x128xf32>
    %cst_56 = arith.constant dense<0.000000e+00> : vector<128xf32>
    %45 = vector.multi_reduction <add>, %44, %cst_56 [0] : vector<128x128xf32> to vector<128xf32>
    %46 = vector.shape_cast %45 : vector<128xf32> to vector<1x128xf32>
    %47 = arith.addf %40, %46 : vector<1x128xf32>
    %48 = arith.mulf %44, %44 : vector<128x128xf32>
    %cst_57 = arith.constant dense<0.000000e+00> : vector<128xf32>
    %49 = vector.multi_reduction <add>, %48, %cst_57 [0] : vector<128x128xf32> to vector<128xf32>
    %50 = vector.shape_cast %49 : vector<128xf32> to vector<1x128xf32>
    %51 = arith.addf %41, %50 : vector<1x128xf32>
    %c0_58 = arith.constant 0 : index
    %c8 = arith.constant 8 : index
    %c0_59 = arith.constant 0 : index
    %c0_60 = arith.constant 0 : index
    %52 = vector.load %arg3[%c0_58, %c8, %c0_59, %c0_60] : memref<1x16x16x128xf32, #tpu.memory_space<vmem>>, vector<1x8x16x128xf32>
    %53 = vector.shape_cast %52 : vector<1x8x16x128xf32> to vector<8x16x128xf32>
    %54 = vector.shape_cast %53 : vector<8x16x128xf32> to vector<128x128xf32>
    %cst_61 = arith.constant dense<0.000000e+00> : vector<128xf32>
    %55 = vector.multi_reduction <add>, %54, %cst_61 [0] : vector<128x128xf32> to vector<128xf32>
    %56 = vector.shape_cast %55 : vector<128xf32> to vector<1x128xf32>
    %57 = arith.addf %47, %56 : vector<1x128xf32>
    %58 = arith.mulf %54, %54 : vector<128x128xf32>
    %cst_62 = arith.constant dense<0.000000e+00> : vector<128xf32>
    %59 = vector.multi_reduction <add>, %58, %cst_62 [0] : vector<128x128xf32> to vector<128xf32>
    %60 = vector.shape_cast %59 : vector<128xf32> to vector<1x128xf32>
    %61 = arith.addf %51, %60 : vector<1x128xf32>
    %c0_63 = arith.constant 0 : index
    %c0_64 = arith.constant 0 : index
    %c0_65 = arith.constant 0 : index
    %62 = vector.load %arg4[%c0_63, %c0_64, %c0_65] : memref<1x1x128xf32, #tpu.memory_space<vmem>>, vector<1x1x128xf32>
    %63 = vector.shape_cast %62 : vector<1x1x128xf32> to vector<1x128xf32>
    %64 = vector.shape_cast %57 : vector<1x128xf32> to vector<1x1x128xf32>
    tpu.vector_store %arg4[%c0_63, %c0_64, %c0_65], %64 {strides = array<i32>} : memref<1x1x128xf32, #tpu.memory_space<vmem>>, vector<1x1x128xf32>,
    %c0_66 = arith.constant 0 : index
    %c0_67 = arith.constant 0 : index
    %c0_68 = arith.constant 0 : index
    %65 = vector.load %arg5[%c0_66, %c0_67, %c0_68] : memref<1x1x128xf32, #tpu.memory_space<vmem>>, vector<1x1x128xf32>
    %66 = vector.shape_cast %65 : vector<1x1x128xf32> to vector<1x128xf32>
    %67 = vector.shape_cast %61 : vector<1x128xf32> to vector<1x1x128xf32>
    tpu.vector_store %arg5[%c0_66, %c0_67, %c0_68], %67 {strides = array<i32>} : memref<1x1x128xf32, #tpu.memory_space<vmem>>, vector<1x1x128xf32>,
    return
  }
  func.func @transform_0(%arg0: i32) -> (i32, i32, i32, i32) {
    %c0_i32 = arith.constant 0 : i32
    %c0_i32_0 = arith.constant 0 : i32
    %c0_i32_1 = arith.constant 0 : i32
    %c0_i32_2 = arith.constant 0 : i32
    return %arg0, %c0_i32, %c0_i32_0, %c0_i32_1 : i32, i32, i32, i32
  }
  func.func @transform_1(%arg0: i32) -> (i32, i32) {
    %c0_i32 = arith.constant 0 : i32
    %c0_i32_0 = arith.constant 0 : i32
    %c0_i32_1 = arith.constant 0 : i32
    return %c0_i32, %c0_i32_0 : i32, i32
  }
  func.func @transform_2(%arg0: i32) -> (i32, i32, i32, i32) {
    %c0_i32 = arith.constant 0 : i32
    %c0_i32_0 = arith.constant 0 : i32
    %c0_i32_1 = arith.constant 0 : i32
    %c0_i32_2 = arith.constant 0 : i32
    return %arg0, %c0_i32, %c0_i32_0, %c0_i32_1 : i32, i32, i32, i32
  }
  func.func @transform_3(%arg0: i32) -> (i32, i32, i32) {
    %c0_i32 = arith.constant 0 : i32
    %c0_i32_0 = arith.constant 0 : i32
    %c0_i32_1 = arith.constant 0 : i32
    return %arg0, %c0_i32, %c0_i32_0 : i32, i32, i32
  }
  func.func @transform_4(%arg0: i32) -> (i32, i32, i32) {
    %c0_i32 = arith.constant 0 : i32
    %c0_i32_0 = arith.constant 0 : i32
    %c0_i32_1 = arith.constant 0 : i32
    return %arg0, %c0_i32, %c0_i32_0 : i32, i32, i32
  }
}

module attributes {stable_mosaic.version = 11 : i64} {
  func.func @kernel(%arg0: i32, %arg1: memref<1x16x16x128xf32, #tpu.memory_space<vmem>>, %arg2: memref<1x128xf32, #tpu.memory_space<vmem>>, %arg3: memref<1x128xf32, #tpu.memory_space<vmem>>, %arg4: memref<1152x128xbf16, #tpu.memory_space<vmem>>, %arg5: memref<1x16x16x128xf32, #tpu.memory_space<vmem>>, %arg6: memref<1x1x128xf32, #tpu.memory_space<vmem>>, %arg7: memref<1x1x128xf32, #tpu.memory_space<vmem>>, %arg8: memref<18x33x128xbf16, #tpu.memory_space<vmem>>, %arg9: memref<256x1152xbf16, #tpu.memory_space<vmem>>) attributes {dimension_semantics = [#tpu.dimension_semantics<parallel>], iteration_bounds = array<i64: 2>, scalar_prefetch = 0 : i64, scratch_operands = 2 : i64, tpu.core_type = #tpu.core_type<tc>, window_params = [{transform_indices = @transform_0, window_bounds = array<i64: 1, 16, 16, 128>}, {pipeline_mode = #tpu.pipeline_mode<synchronous>, transform_indices = @transform_1, window_bounds = array<i64: 1, 128>}, {pipeline_mode = #tpu.pipeline_mode<synchronous>, transform_indices = @transform_2, window_bounds = array<i64: 1, 128>}, {pipeline_mode = #tpu.pipeline_mode<synchronous>, transform_indices = @transform_3, window_bounds = array<i64: 1152, 128>}, {transform_indices = @transform_4, window_bounds = array<i64: 1, 16, 16, 128>}, {transform_indices = @transform_5, window_bounds = array<i64: 1, 1, 128>}, {transform_indices = @transform_6, window_bounds = array<i64: 1, 1, 128>}]} {
    %cst = arith.constant 0.000000e+00 : bf16
    %0 = vector.broadcast %cst : bf16 to vector<18x33x128xbf16>
    %c0 = arith.constant 0 : index
    %c0_0 = arith.constant 0 : index
    %c0_1 = arith.constant 0 : index
    %1 = vector.load %arg8[%c0, %c0_0, %c0_1] : memref<18x33x128xbf16, #tpu.memory_space<vmem>>, vector<18x33x128xbf16>
    tpu.vector_store %arg8[%c0, %c0_0, %c0_1], %0 {strides = array<i32>} : memref<18x33x128xbf16, #tpu.memory_space<vmem>>, vector<18x33x128xbf16>,
    %c0_2 = arith.constant 0 : index
    %c0_3 = arith.constant 0 : index
    %c0_4 = arith.constant 0 : index
    %c0_5 = arith.constant 0 : index
    %2 = vector.load %arg1[%c0_2, %c0_3, %c0_4, %c0_5] : memref<1x16x16x128xf32, #tpu.memory_space<vmem>>, vector<1x16x16x128xf32>
    %3 = vector.shape_cast %2 : vector<1x16x16x128xf32> to vector<16x16x128xf32>
    %c0_6 = arith.constant 0 : index
    %c0_7 = arith.constant 0 : index
    %4 = vector.load %arg2[%c0_6, %c0_7] : memref<1x128xf32, #tpu.memory_space<vmem>>, vector<1x128xf32>
    %5 = vector.shape_cast %4 : vector<1x128xf32> to vector<1x1x128xf32>
    %6 = vector.broadcast %5 : vector<1x1x128xf32> to vector<16x16x128xf32>
    %7 = arith.mulf %3, %6 : vector<16x16x128xf32>
    %c0_8 = arith.constant 0 : index
    %c0_9 = arith.constant 0 : index
    %8 = vector.load %arg3[%c0_8, %c0_9] : memref<1x128xf32, #tpu.memory_space<vmem>>, vector<1x128xf32>
    %9 = vector.shape_cast %8 : vector<1x128xf32> to vector<1x1x128xf32>
    %10 = vector.broadcast %9 : vector<1x1x128xf32> to vector<16x16x128xf32>
    %11 = arith.addf %7, %10 : vector<16x16x128xf32>
    %cst_10 = arith.constant 0.000000e+00 : f32
    %12 = vector.broadcast %cst_10 : f32 to vector<16x16x128xf32>
    %13 = arith.cmpf ogt, %11, %12 : vector<16x16x128xf32>
    %cst_11 = arith.constant 0.000000e+00 : f32
    %14 = vector.broadcast %cst_11 : f32 to vector<16x16x128xf32>
    %15 = arith.minimumf %11, %14 : vector<16x16x128xf32>
    %16 = math.exp %15 : vector<16x16x128xf32>
    %cst_12 = arith.constant 1.000000e+00 : f32
    %17 = vector.broadcast %cst_12 : f32 to vector<16x16x128xf32>
    %18 = arith.subf %16, %17 : vector<16x16x128xf32>
    %19 = arith.select %13, %11, %18 : vector<16x16x128xi1>, vector<16x16x128xf32>
    %20 = arith.truncf %19 : vector<16x16x128xf32> to vector<16x16x128xbf16>
    %c1 = arith.constant 1 : index
    %c16 = arith.constant 16 : index
    %c0_13 = arith.constant 0 : index
    %21 = vector.load %arg8[%c1, %c16, %c0_13] : memref<18x33x128xbf16, #tpu.memory_space<vmem>>, vector<16x16x128xbf16>
    tpu.vector_store %arg8[%c1, %c16, %c0_13], %20 {strides = array<i32>} : memref<18x33x128xbf16, #tpu.memory_space<vmem>>, vector<16x16x128xbf16>,
    %c0_14 = arith.constant 0 : index
    %c15 = arith.constant 15 : index
    %c0_15 = arith.constant 0 : index
    %22 = vector.load %arg8[%c0_14, %c15, %c0_15] : memref<18x33x128xbf16, #tpu.memory_space<vmem>>, vector<16x16x128xbf16>
    %23 = vector.shape_cast %22 : vector<16x16x128xbf16> to vector<256x128xbf16>
    %c0_16 = arith.constant 0 : index
    %c0_17 = arith.constant 0 : index
    %24 = vector.load %arg9[%c0_16, %c0_17] : memref<256x1152xbf16, #tpu.memory_space<vmem>>, vector<256x128xbf16>
    tpu.vector_store %arg9[%c0_16, %c0_17], %23 {strides = array<i32>} : memref<256x1152xbf16, #tpu.memory_space<vmem>>, vector<256x128xbf16>,
    %c0_18 = arith.constant 0 : index
    %c16_19 = arith.constant 16 : index
    %c0_20 = arith.constant 0 : index
    %25 = vector.load %arg8[%c0_18, %c16_19, %c0_20] : memref<18x33x128xbf16, #tpu.memory_space<vmem>>, vector<16x16x128xbf16>
    %26 = vector.shape_cast %25 : vector<16x16x128xbf16> to vector<256x128xbf16>
    %c0_21 = arith.constant 0 : index
    %c128 = arith.constant 128 : index
    %27 = vector.load %arg9[%c0_21, %c128] : memref<256x1152xbf16, #tpu.memory_space<vmem>>, vector<256x128xbf16>
    tpu.vector_store %arg9[%c0_21, %c128], %26 {strides = array<i32>} : memref<256x1152xbf16, #tpu.memory_space<vmem>>, vector<256x128xbf16>,
    %c0_22 = arith.constant 0 : index
    %c17 = arith.constant 17 : index
    %c0_23 = arith.constant 0 : index
    %28 = vector.load %arg8[%c0_22, %c17, %c0_23] : memref<18x33x128xbf16, #tpu.memory_space<vmem>>, vector<16x16x128xbf16>
    %29 = vector.shape_cast %28 : vector<16x16x128xbf16> to vector<256x128xbf16>
    %c0_24 = arith.constant 0 : index
    %c256 = arith.constant 256 : index
    %30 = vector.load %arg9[%c0_24, %c256] : memref<256x1152xbf16, #tpu.memory_space<vmem>>, vector<256x128xbf16>
    tpu.vector_store %arg9[%c0_24, %c256], %29 {strides = array<i32>} : memref<256x1152xbf16, #tpu.memory_space<vmem>>, vector<256x128xbf16>,
    %c1_25 = arith.constant 1 : index
    %c15_26 = arith.constant 15 : index
    %c0_27 = arith.constant 0 : index
    %31 = vector.load %arg8[%c1_25, %c15_26, %c0_27] : memref<18x33x128xbf16, #tpu.memory_space<vmem>>, vector<16x16x128xbf16>
    %32 = vector.shape_cast %31 : vector<16x16x128xbf16> to vector<256x128xbf16>
    %c0_28 = arith.constant 0 : index
    %c384 = arith.constant 384 : index
    %33 = vector.load %arg9[%c0_28, %c384] : memref<256x1152xbf16, #tpu.memory_space<vmem>>, vector<256x128xbf16>
    tpu.vector_store %arg9[%c0_28, %c384], %32 {strides = array<i32>} : memref<256x1152xbf16, #tpu.memory_space<vmem>>, vector<256x128xbf16>,
    %c1_29 = arith.constant 1 : index
    %c16_30 = arith.constant 16 : index
    %c0_31 = arith.constant 0 : index
    %34 = vector.load %arg8[%c1_29, %c16_30, %c0_31] : memref<18x33x128xbf16, #tpu.memory_space<vmem>>, vector<16x16x128xbf16>
    %35 = vector.shape_cast %34 : vector<16x16x128xbf16> to vector<256x128xbf16>
    %c0_32 = arith.constant 0 : index
    %c512 = arith.constant 512 : index
    %36 = vector.load %arg9[%c0_32, %c512] : memref<256x1152xbf16, #tpu.memory_space<vmem>>, vector<256x128xbf16>
    tpu.vector_store %arg9[%c0_32, %c512], %35 {strides = array<i32>} : memref<256x1152xbf16, #tpu.memory_space<vmem>>, vector<256x128xbf16>,
    %c1_33 = arith.constant 1 : index
    %c17_34 = arith.constant 17 : index
    %c0_35 = arith.constant 0 : index
    %37 = vector.load %arg8[%c1_33, %c17_34, %c0_35] : memref<18x33x128xbf16, #tpu.memory_space<vmem>>, vector<16x16x128xbf16>
    %38 = vector.shape_cast %37 : vector<16x16x128xbf16> to vector<256x128xbf16>
    %c0_36 = arith.constant 0 : index
    %c640 = arith.constant 640 : index
    %39 = vector.load %arg9[%c0_36, %c640] : memref<256x1152xbf16, #tpu.memory_space<vmem>>, vector<256x128xbf16>
    tpu.vector_store %arg9[%c0_36, %c640], %38 {strides = array<i32>} : memref<256x1152xbf16, #tpu.memory_space<vmem>>, vector<256x128xbf16>,
    %c2 = arith.constant 2 : index
    %c15_37 = arith.constant 15 : index
    %c0_38 = arith.constant 0 : index
    %40 = vector.load %arg8[%c2, %c15_37, %c0_38] : memref<18x33x128xbf16, #tpu.memory_space<vmem>>, vector<16x16x128xbf16>
    %41 = vector.shape_cast %40 : vector<16x16x128xbf16> to vector<256x128xbf16>
    %c0_39 = arith.constant 0 : index
    %c768 = arith.constant 768 : index
    %42 = vector.load %arg9[%c0_39, %c768] : memref<256x1152xbf16, #tpu.memory_space<vmem>>, vector<256x128xbf16>
    tpu.vector_store %arg9[%c0_39, %c768], %41 {strides = array<i32>} : memref<256x1152xbf16, #tpu.memory_space<vmem>>, vector<256x128xbf16>,
    %c2_40 = arith.constant 2 : index
    %c16_41 = arith.constant 16 : index
    %c0_42 = arith.constant 0 : index
    %43 = vector.load %arg8[%c2_40, %c16_41, %c0_42] : memref<18x33x128xbf16, #tpu.memory_space<vmem>>, vector<16x16x128xbf16>
    %44 = vector.shape_cast %43 : vector<16x16x128xbf16> to vector<256x128xbf16>
    %c0_43 = arith.constant 0 : index
    %c896 = arith.constant 896 : index
    %45 = vector.load %arg9[%c0_43, %c896] : memref<256x1152xbf16, #tpu.memory_space<vmem>>, vector<256x128xbf16>
    tpu.vector_store %arg9[%c0_43, %c896], %44 {strides = array<i32>} : memref<256x1152xbf16, #tpu.memory_space<vmem>>, vector<256x128xbf16>,
    %c2_44 = arith.constant 2 : index
    %c17_45 = arith.constant 17 : index
    %c0_46 = arith.constant 0 : index
    %46 = vector.load %arg8[%c2_44, %c17_45, %c0_46] : memref<18x33x128xbf16, #tpu.memory_space<vmem>>, vector<16x16x128xbf16>
    %47 = vector.shape_cast %46 : vector<16x16x128xbf16> to vector<256x128xbf16>
    %c0_47 = arith.constant 0 : index
    %c1024 = arith.constant 1024 : index
    %48 = vector.load %arg9[%c0_47, %c1024] : memref<256x1152xbf16, #tpu.memory_space<vmem>>, vector<256x128xbf16>
    tpu.vector_store %arg9[%c0_47, %c1024], %47 {strides = array<i32>} : memref<256x1152xbf16, #tpu.memory_space<vmem>>, vector<256x128xbf16>,
    %c0_48 = arith.constant 0 : index
    %c0_49 = arith.constant 0 : index
    %49 = vector.load %arg9[%c0_48, %c0_49] : memref<256x1152xbf16, #tpu.memory_space<vmem>>, vector<256x1152xbf16>
    %c0_50 = arith.constant 0 : index
    %c0_51 = arith.constant 0 : index
    %50 = vector.load %arg4[%c0_50, %c0_51] : memref<1152x128xbf16, #tpu.memory_space<vmem>>, vector<1152x128xbf16>
    %cst_52 = arith.constant dense<0.000000e+00> : vector<256x128xf32>
    %51 = tpu.matmul %49, %50, %cst_52 {dimension_numbers = #tpu.dot_dimension_numbers<[1], [0], [0], [1], [0, 0, 1, 1], [], []>} : vector<256x1152xbf16>, vector<1152x128xbf16>, vector<256x128xf32> -> vector<256x128xf32>
    %52 = vector.shape_cast %51 : vector<256x128xf32> to vector<16x16x128xf32>
    %c0_53 = arith.constant 0 : index
    %c0_54 = arith.constant 0 : index
    %c0_55 = arith.constant 0 : index
    %c0_56 = arith.constant 0 : index
    %53 = vector.load %arg5[%c0_53, %c0_54, %c0_55, %c0_56] : memref<1x16x16x128xf32, #tpu.memory_space<vmem>>, vector<1x16x16x128xf32>
    %54 = vector.shape_cast %53 : vector<1x16x16x128xf32> to vector<16x16x128xf32>
    %55 = vector.shape_cast %52 : vector<16x16x128xf32> to vector<1x16x16x128xf32>
    tpu.vector_store %arg5[%c0_53, %c0_54, %c0_55, %c0_56], %55 {strides = array<i32>} : memref<1x16x16x128xf32, #tpu.memory_space<vmem>>, vector<1x16x16x128xf32>,
    %cst_57 = arith.constant 0.000000e+00 : f32
    %56 = vector.broadcast %cst_57 : f32 to vector<1x128xf32>
    %cst_58 = arith.constant 0.000000e+00 : f32
    %57 = vector.broadcast %cst_58 : f32 to vector<1x128xf32>
    %c0_59 = arith.constant 0 : index
    %c0_60 = arith.constant 0 : index
    %c0_61 = arith.constant 0 : index
    %c0_62 = arith.constant 0 : index
    %58 = vector.load %arg5[%c0_59, %c0_60, %c0_61, %c0_62] : memref<1x16x16x128xf32, #tpu.memory_space<vmem>>, vector<1x8x16x128xf32>
    %59 = vector.shape_cast %58 : vector<1x8x16x128xf32> to vector<8x16x128xf32>
    %60 = vector.shape_cast %59 : vector<8x16x128xf32> to vector<128x128xf32>
    %cst_63 = arith.constant dense<0.000000e+00> : vector<128xf32>
    %61 = vector.multi_reduction <add>, %60, %cst_63 [0] : vector<128x128xf32> to vector<128xf32>
    %62 = vector.shape_cast %61 : vector<128xf32> to vector<1x128xf32>
    %63 = arith.addf %56, %62 : vector<1x128xf32>
    %64 = arith.mulf %60, %60 : vector<128x128xf32>
    %cst_64 = arith.constant dense<0.000000e+00> : vector<128xf32>
    %65 = vector.multi_reduction <add>, %64, %cst_64 [0] : vector<128x128xf32> to vector<128xf32>
    %66 = vector.shape_cast %65 : vector<128xf32> to vector<1x128xf32>
    %67 = arith.addf %57, %66 : vector<1x128xf32>
    %c0_65 = arith.constant 0 : index
    %c8 = arith.constant 8 : index
    %c0_66 = arith.constant 0 : index
    %c0_67 = arith.constant 0 : index
    %68 = vector.load %arg5[%c0_65, %c8, %c0_66, %c0_67] : memref<1x16x16x128xf32, #tpu.memory_space<vmem>>, vector<1x8x16x128xf32>
    %69 = vector.shape_cast %68 : vector<1x8x16x128xf32> to vector<8x16x128xf32>
    %70 = vector.shape_cast %69 : vector<8x16x128xf32> to vector<128x128xf32>
    %cst_68 = arith.constant dense<0.000000e+00> : vector<128xf32>
    %71 = vector.multi_reduction <add>, %70, %cst_68 [0] : vector<128x128xf32> to vector<128xf32>
    %72 = vector.shape_cast %71 : vector<128xf32> to vector<1x128xf32>
    %73 = arith.addf %63, %72 : vector<1x128xf32>
    %74 = arith.mulf %70, %70 : vector<128x128xf32>
    %cst_69 = arith.constant dense<0.000000e+00> : vector<128xf32>
    %75 = vector.multi_reduction <add>, %74, %cst_69 [0] : vector<128x128xf32> to vector<128xf32>
    %76 = vector.shape_cast %75 : vector<128xf32> to vector<1x128xf32>
    %77 = arith.addf %67, %76 : vector<1x128xf32>
    %c0_70 = arith.constant 0 : index
    %c0_71 = arith.constant 0 : index
    %c0_72 = arith.constant 0 : index
    %78 = vector.load %arg6[%c0_70, %c0_71, %c0_72] : memref<1x1x128xf32, #tpu.memory_space<vmem>>, vector<1x1x128xf32>
    %79 = vector.shape_cast %78 : vector<1x1x128xf32> to vector<1x128xf32>
    %80 = vector.shape_cast %73 : vector<1x128xf32> to vector<1x1x128xf32>
    tpu.vector_store %arg6[%c0_70, %c0_71, %c0_72], %80 {strides = array<i32>} : memref<1x1x128xf32, #tpu.memory_space<vmem>>, vector<1x1x128xf32>,
    %c0_73 = arith.constant 0 : index
    %c0_74 = arith.constant 0 : index
    %c0_75 = arith.constant 0 : index
    %81 = vector.load %arg7[%c0_73, %c0_74, %c0_75] : memref<1x1x128xf32, #tpu.memory_space<vmem>>, vector<1x1x128xf32>
    %82 = vector.shape_cast %81 : vector<1x1x128xf32> to vector<1x128xf32>
    %83 = vector.shape_cast %77 : vector<1x128xf32> to vector<1x1x128xf32>
    tpu.vector_store %arg7[%c0_73, %c0_74, %c0_75], %83 {strides = array<i32>} : memref<1x1x128xf32, #tpu.memory_space<vmem>>, vector<1x1x128xf32>,
    return
  }
  func.func @transform_0(%arg0: i32) -> (i32, i32, i32, i32) {
    %c0_i32 = arith.constant 0 : i32
    %c0_i32_0 = arith.constant 0 : i32
    %c0_i32_1 = arith.constant 0 : i32
    %c0_i32_2 = arith.constant 0 : i32
    return %arg0, %c0_i32, %c0_i32_0, %c0_i32_1 : i32, i32, i32, i32
  }
  func.func @transform_1(%arg0: i32) -> (i32, i32) {
    %c0_i32 = arith.constant 0 : i32
    %c0_i32_0 = arith.constant 0 : i32
    %c0_i32_1 = arith.constant 0 : i32
    return %c0_i32, %c0_i32_0 : i32, i32
  }
  func.func @transform_2(%arg0: i32) -> (i32, i32) {
    %c0_i32 = arith.constant 0 : i32
    %c0_i32_0 = arith.constant 0 : i32
    %c0_i32_1 = arith.constant 0 : i32
    return %c0_i32, %c0_i32_0 : i32, i32
  }
  func.func @transform_3(%arg0: i32) -> (i32, i32) {
    %c0_i32 = arith.constant 0 : i32
    %c0_i32_0 = arith.constant 0 : i32
    %c0_i32_1 = arith.constant 0 : i32
    return %c0_i32, %c0_i32_0 : i32, i32
  }
  func.func @transform_4(%arg0: i32) -> (i32, i32, i32, i32) {
    %c0_i32 = arith.constant 0 : i32
    %c0_i32_0 = arith.constant 0 : i32
    %c0_i32_1 = arith.constant 0 : i32
    %c0_i32_2 = arith.constant 0 : i32
    return %arg0, %c0_i32, %c0_i32_0, %c0_i32_1 : i32, i32, i32, i32
  }
  func.func @transform_5(%arg0: i32) -> (i32, i32, i32) {
    %c0_i32 = arith.constant 0 : i32
    %c0_i32_0 = arith.constant 0 : i32
    %c0_i32_1 = arith.constant 0 : i32
    return %arg0, %c0_i32, %c0_i32_0 : i32, i32, i32
  }
  func.func @transform_6(%arg0: i32) -> (i32, i32, i32) {
    %c0_i32 = arith.constant 0 : i32
    %c0_i32_0 = arith.constant 0 : i32
    %c0_i32_1 = arith.constant 0 : i32
    return %arg0, %c0_i32, %c0_i32_0 : i32, i32, i32
  }
}

module attributes {stable_mosaic.version = 11 : i64} {
  func.func @_bn_elu_rezero_kernel(%arg0: i32, %arg1: memref<1xf32, #tpu.memory_space<smem>>, %arg2: memref<512x128xf32, #tpu.memory_space<vmem>>, %arg3: memref<1x128xf32, #tpu.memory_space<vmem>>, %arg4: memref<1x128xf32, #tpu.memory_space<vmem>>, %arg5: memref<512x128xf32, #tpu.memory_space<vmem>>, %arg6: memref<512x128xf32, #tpu.memory_space<vmem>>) attributes {dimension_semantics = [#tpu.dimension_semantics<parallel>], iteration_bounds = array<i64: 1>, scalar_prefetch = 0 : i64, scratch_operands = 0 : i64, tpu.core_type = #tpu.core_type<tc>, window_params = [{transform_indices = @transform_0, window_bounds = array<i64: 1>}, {transform_indices = @transform_1, window_bounds = array<i64: 512, 128>}, {pipeline_mode = #tpu.pipeline_mode<synchronous>, transform_indices = @transform_2, window_bounds = array<i64: 1, 128>}, {pipeline_mode = #tpu.pipeline_mode<synchronous>, transform_indices = @transform_3, window_bounds = array<i64: 1, 128>}, {transform_indices = @transform_4, window_bounds = array<i64: 512, 128>}, {transform_indices = @transform_5, window_bounds = array<i64: 512, 128>}]} {
    %c0 = arith.constant 0 : index
    %c0_0 = arith.constant 0 : index
    %0 = vector.load %arg2[%c0, %c0_0] : memref<512x128xf32, #tpu.memory_space<vmem>>, vector<512x128xf32>
    %c0_1 = arith.constant 0 : index
    %c0_2 = arith.constant 0 : index
    %1 = vector.load %arg3[%c0_1, %c0_2] : memref<1x128xf32, #tpu.memory_space<vmem>>, vector<1x128xf32>
    %2 = vector.broadcast %1 : vector<1x128xf32> to vector<512x128xf32>
    %3 = arith.mulf %0, %2 : vector<512x128xf32>
    %c0_3 = arith.constant 0 : index
    %c0_4 = arith.constant 0 : index
    %4 = vector.load %arg4[%c0_3, %c0_4] : memref<1x128xf32, #tpu.memory_space<vmem>>, vector<1x128xf32>
    %5 = vector.broadcast %4 : vector<1x128xf32> to vector<512x128xf32>
    %6 = arith.addf %3, %5 : vector<512x128xf32>
    %cst = arith.constant 0.000000e+00 : f32
    %7 = vector.broadcast %cst : f32 to vector<512x128xf32>
    %8 = arith.cmpf ogt, %6, %7 : vector<512x128xf32>
    %cst_5 = arith.constant 0.000000e+00 : f32
    %9 = vector.broadcast %cst_5 : f32 to vector<512x128xf32>
    %10 = arith.minimumf %6, %9 : vector<512x128xf32>
    %11 = math.exp %10 : vector<512x128xf32>
    %cst_6 = arith.constant 1.000000e+00 : f32
    %12 = vector.broadcast %cst_6 : f32 to vector<512x128xf32>
    %13 = arith.subf %11, %12 : vector<512x128xf32>
    %14 = arith.select %8, %6, %13 : vector<512x128xi1>, vector<512x128xf32>
    %c0_7 = arith.constant 0 : index
    %15 = memref.load %arg1[%c0_7] : memref<1xf32, #tpu.memory_space<smem>>
    %16 = vector.broadcast %15 : f32 to vector<512x128xf32>
    %17 = arith.mulf %14, %16 : vector<512x128xf32>
    %c0_8 = arith.constant 0 : index
    %c0_9 = arith.constant 0 : index
    %18 = vector.load %arg5[%c0_8, %c0_9] : memref<512x128xf32, #tpu.memory_space<vmem>>, vector<512x128xf32>
    %19 = arith.addf %17, %18 : vector<512x128xf32>
    %c0_10 = arith.constant 0 : index
    %c0_11 = arith.constant 0 : index
    %20 = vector.load %arg6[%c0_10, %c0_11] : memref<512x128xf32, #tpu.memory_space<vmem>>, vector<512x128xf32>
    tpu.vector_store %arg6[%c0_10, %c0_11], %19 {strides = array<i32>} : memref<512x128xf32, #tpu.memory_space<vmem>>, vector<512x128xf32>,
    return
  }
  func.func @transform_0(%arg0: i32) -> i32 {
    %c0_i32 = arith.constant 0 : i32
    %c0_i32_0 = arith.constant 0 : i32
    return %c0_i32 : i32
  }
  func.func @transform_1(%arg0: i32) -> (i32, i32) {
    %c0_i32 = arith.constant 0 : i32
    %c0_i32_0 = arith.constant 0 : i32
    return %arg0, %c0_i32 : i32, i32
  }
  func.func @transform_2(%arg0: i32) -> (i32, i32) {
    %c0_i32 = arith.constant 0 : i32
    %c0_i32_0 = arith.constant 0 : i32
    %c0_i32_1 = arith.constant 0 : i32
    return %c0_i32, %c0_i32_0 : i32, i32
  }
  func.func @transform_3(%arg0: i32) -> (i32, i32) {
    %c0_i32 = arith.constant 0 : i32
    %c0_i32_0 = arith.constant 0 : i32
    %c0_i32_1 = arith.constant 0 : i32
    return %c0_i32, %c0_i32_0 : i32, i32
  }
  func.func @transform_4(%arg0: i32) -> (i32, i32) {
    %c0_i32 = arith.constant 0 : i32
    %c0_i32_0 = arith.constant 0 : i32
    return %arg0, %c0_i32 : i32, i32
  }
  func.func @transform_5(%arg0: i32) -> (i32, i32) {
    %c0_i32 = arith.constant 0 : i32
    %c0_i32_0 = arith.constant 0 : i32
    return %arg0, %c0_i32 : i32, i32
  }
}

</mosaic_0001>

<bundles_post_ra>
// kernel: rezero_forward.5
= control target key start
LH: loop header
LB: loop body
LE: loop exit
PB: predicated region body
PF: predicated region fallthrough
CT: control target
= control target key end

     0   :  { %s2322_s1 = inlined_call_operand.vmem [shape: f32[512,128], index: 1, kind: input, shape index: {}]   ;;  %s2323_s2 = inlined_call_operand.vmem [shape: f32[1,128], index: 2, kind: input, shape index: {}]   ;;  %s2324_s3 = inlined_call_operand.vmem [shape: f32[1,128], index: 3, kind: input, shape index: {}]   ;;  %s2325_s0 = inlined_call_operand.<no memory space> [shape: f32[1], index: 0, kind: input, shape index: {}]   ;;  %s2326_s4 = inlined_call_operand.vmem [shape: f32[512,128], index: 4, kind: input, shape index: {}]   ;;  %s2327_s5 = inlined_call_operand.vmem [shape: f32[512,128], index: 5, kind: output, shape index: {}]  }
   0x1   :  { %v21_v0 = vld [vmem:[%s2322_s1] sm:$0xff]  ;;  %v22_v4 = vld [vmem:[%s2322_s1 + $0x8] sm:$0xff]  ;;  %v23_v6 = vld [vmem:[%s2322_s1 + $0x10] sm:$0xff]  ;;  %v1160_v25 = vstv %s2325_s0 }
   0x2   :  { %v1105_v1 = vld [vmem:[%s2323_s2] ss:$0 sm:$0xff]  ;;  %v24_v7 = vld [vmem:[%s2322_s1 + $0x18] sm:$0xff]  ;;  %v26_v14 = vld [vmem:[%s2322_s1 + $0x28] sm:$0xff] }
   0x3   :  { %v1110_v2 = vld [vmem:[%s2324_s3] ss:$0 sm:$0xff]  ;;  %v92_v3 = vmul.f32 %v1105_v1, %v21_v0  ;;  %v93_v5 = vmul.f32 %v1105_v1, %v22_v4  ;;  %v94_v9 = vmul.f32 %v1105_v1, %v23_v6  ;;  %v95_v10 = vmul.f32 %v1105_v1, %v24_v7  ;;  %v27_v21 = vld [vmem:[%s2322_s1 + $0x30] sm:$0xff]  ;;  %v28_v24 = vld [vmem:[%s2322_s1 + $0x38] sm:$0xff] }
   0x4   :  { %v25_v11 = vld [vmem:[%s2322_s1 + $0x20] sm:$0xff]  ;;  %v97_v20 = vmul.f32 %v1105_v1, %v26_v14  ;;  %v98_v31 = vmul.f32 %v1105_v1, %v27_v21  ;;  %v30_v33 = vld [vmem:[%s2322_s1 + $0x48] sm:$0xff]  ;;  %v99_v36 = vmul.f32 %v1105_v1, %v28_v24  ;;  %v31_v42 = vld [vmem:[%s2322_s1 + $0x50] sm:$0xff] }
   0x5   :  { %v1124_v8 = vadd.f32 %v1110_v2, %v92_v3  ;;  %v1132_v12 = vadd.f32 %v1110_v2, %v93_v5  ;;  %v96_v13 = vmul.f32 %v1105_v1, %v25_v11  ;;  %v1140_v16 = vadd.f32 %v1110_v2, %v94_v9  ;;  %v29_v32 = vld [vmem:[%s2322_s1 + $0x40] sm:$0xff]  ;;  %v32_v43 = vld [vmem:[%s2322_s1 + $0x58] sm:$0xff]  ;;  %v34_v53 = vld [vmem:[%s2322_s1 + $0x68] sm:$0xff] }
   0x6   :  { %v1143_v17 = vadd.f32 %v1110_v2, %v95_v10  ;;  %v1165_v30 = vadd.f32 %v1110_v2, %v97_v20  ;;  %v1178_v38 = vadd.f32 %v1110_v2, %v98_v31  ;;  %v1181_v39 = vadd.f32 %v1110_v2, %v99_v36  ;;  %v33_v52 = vld [vmem:[%s2322_s1 + $0x60] sm:$0xff] }
   0x7   :  { %v291_v15 = vmin.f32 %v1124_v8, 0.0  ;;  %v292_v18 = vmin.f32 %v1132_v12, 0.0  ;;  %v1147_v19 = vadd.f32 %v1110_v2, %v96_v13  ;;  %v293_v23 = vmin.f32 %v1140_v16, 0.0  ;;  %v677_v14 = vld [vmem:[%s2326_s4] sm:$0xff] }
   0x8   :  { %v294_v27 = vmin.f32 %v1143_v17, 0.0  ;;  %vm227_vm0 = vcmp.gt.f32.partialorder %v1124_v8, 0.0  ;;  %v296_v37 = vmin.f32 %v1165_v30, 0.0  ;;  %v100_v40 = vmul.f32 %v1105_v1, %v29_v32 }
   0x9   :  { %v355_v22 = vmul.f32 1.442695, %v291_v15  ;;  %v357_v26 = vmul.f32 1.442695, %v292_v18  ;;  %v295_v28 = vmin.f32 %v1147_v19, 0.0  ;;  %v101_v41 = vmul.f32 %v1105_v1, %v30_v33 }
   0xa   :  { %v359_v29 = vmul.f32 1.442695, %v293_v23  ;;  %v361_v34 = vmul.f32 1.442695, %v294_v27  ;;  %vm228_vm1 = vcmp.gt.f32.partialorder %v1132_v12, 0.0  ;;  %v297_v45 = vmin.f32 %v1178_v38, 0.0 }
   0xb   :  { %939 = vpow2.f32 %v355_v22  ;;  %v363_v35 = vmul.f32 1.442695, %v295_v28  ;;  %v365_v44 = vmul.f32 1.442695, %v296_v37  ;;  %vm229_vm2 = vcmp.gt.f32.partialorder %v1140_v16, 0.0  ;;  %v679_v28 = vld [vmem:[%s2326_s4 + $0x10] sm:$0xff] }
   0xc   :  { %941 = vpow2.f32 %v357_v26  ;;  %v298_v46 = vmin.f32 %v1181_v39, 0.0  ;;  %v1196_v47 = vadd.f32 %v1110_v2, %v100_v40  ;;  %v1199_v48 = vadd.f32 %v1110_v2, %v101_v41  ;;  %v681_v40 = vld [vmem:[%s2326_s4 + $0x20] sm:$0xff] }
   0xd   :  { %943 = vpow2.f32 %v359_v29  ;;  %v367_v49 = vmul.f32 1.442695, %v297_v45  ;;  %v102_v50 = vmul.f32 %v1105_v1, %v31_v42  ;;  %v103_v51 = vmul.f32 %v1105_v1, %v32_v43  ;;  %v36_v45 = vld [vmem:[%s2322_s1 + $0x78] sm:$0xff] }
   0xe   :  { %945 = vpow2.f32 %v361_v34  ;;  %vm230_vm3 = vcmp.gt.f32.partialorder %v1143_v17, 0.0  ;;  %vm231_vm4 = vcmp.gt.f32.partialorder %v1147_v19, 0.0  ;;  %v369_v54 = vmul.f32 1.442695, %v298_v46  ;;  %v680_v34 = vld [vmem:[%s2326_s4 + $0x18] sm:$0xff] }
   0xf   :  { %947 = vpow2.f32 %v363_v35  ;;  %v299_v55 = vmin.f32 %v1196_v47, 0.0  ;;  %v300_v56 = vmin.f32 %v1199_v48, 0.0  ;;  %v1214_v57 = vadd.f32 %v1110_v2, %v102_v50 }
  0x10   :  { %949 = vpow2.f32 %v365_v44  ;;  %v1217_v58 = vadd.f32 %v1110_v2, %v103_v51  ;;  %v104_v60 = vmul.f32 %v1105_v1, %v33_v52  ;;  %v105_v61 = vmul.f32 %v1105_v1, %v34_v53  ;;  %v682_v51 = vld [vmem:[%s2326_s4 + $0x28] sm:$0xff] }
  0x11   :  { %951 = vpow2.f32 %v367_v49  ;;  %v371_v59 = vmul.f32 1.442695, %v299_v55  ;;  %vm232_vm5 = vcmp.gt.f32.partialorder %v1165_v30, 0.0  ;;  %vm233_vm6 = vcmp.gt.f32.partialorder %v1178_v38, 0.0 }
  0x12   :  { %953 = vpow2.f32 %v369_v54  ;;  %v373_v63 = vmul.f32 1.442695, %v300_v56  ;;  %v301_v0 = vmin.f32 %v1214_v57, 0.0  ;;  %vm234_vm7 = vcmp.gt.f32.partialorder %v1181_v39, 0.0 }
  0x13   :  { %955 = vpow2.f32 %v371_v59  ;;  %v302_v5 = vmin.f32 %v1217_v58, 0.0  ;;  %v1227_v10 = vadd.f32 %v1110_v2, %v104_v60  ;;  %vm235_vm8 = vcmp.gt.f32.partialorder %v1196_v47, 0.0  ;;  %v683_v60 = vld [vmem:[%s2326_s4 + $0x30] sm:$0xff] }
  0x14   :  { %957 = vpow2.f32 %v373_v63  ;;  %v375_v9 = vmul.f32 1.442695, %v301_v0  ;;  %v1237_v20 = vadd.f32 %v1110_v2, %v105_v61  ;;  %vm236_vm9 = vcmp.gt.f32.partialorder %v1199_v48, 0.0  ;;  %v37_v0 = vld [vmem:[%s2322_s1 + $0x80] sm:$0xff] }
  0x15   :  { %v940_v62 = vpop.eup %939  ;;  %v377_v18 = vmul.f32 1.442695, %v302_v5  ;;  %vm237_vm10 = vcmp.gt.f32.partialorder %v1214_v57, 0.0  ;;  %vm238_vm11 = vcmp.gt.f32.partialorder %v1217_v58, 0.0  ;;  %v107_v63 = vmul.f32 %v1105_v1, %v36_v45 }
  0x16   :  { %v942_v3 = vpop.eup %941  ;;  %v875_v4 = vadd.f32 -1.0, %v940_v62  ;;  %959 = vpow2.f32 %v375_v9  ;;  %v304_v53 = vmin.f32 %v1237_v20, 0.0  ;;  %vm239_vm12 = vcmp.gt.f32.partialorder %v1227_v10, 0.0 }
  0x17   :  { %v944_v6 = vpop.eup %943  ;;  %v876_v7 = vadd.f32 -1.0, %v942_v3  ;;  %961 = vpow2.f32 %v377_v18  ;;  %v685_v18 = vld [vmem:[%s2326_s4 + $0x40] sm:$0xff]  ;;  %vm240_vm13 = vcmp.gt.f32.partialorder %v1237_v20, 0.0 }
  0x18   :  { %v946_v11 = vpop.eup %945  ;;  %v547_v13 = vsel %vm227_vm0, %v1124_v8, %v875_v4  ;;  %v877_v15 = vadd.f32 -1.0, %v944_v6  ;;  %v678_v8 = vld [vmem:[%s2326_s4 + $0x8] sm:$0xff]  ;;  %v381_v61 = vmul.f32 1.442695, %v304_v53  ;;  %v684_v6 = vld [vmem:[%s2326_s4 + $0x38] sm:$0xff]  ;;  %v43_v53 = vld [vmem:[%s2322_s1 + $0xb0] sm:$0xff] }
  0x19   :  { %v948_v21 = vpop.eup %947  ;;  %v613_v22 = vmul.f32 %v1160_v25, %v547_v13  ;;  %v548_v23 = vsel %vm228_vm1, %v1132_v12, %v876_v7  ;;  %v878_v24 = vadd.f32 -1.0, %v946_v11 }
  0x1a   :  { %v614_v26 = vmul.f32 %v1160_v25, %v548_v23  ;;  %v549_v27 = vsel %vm229_vm2, %v1140_v16, %v877_v15  ;;  %v879_v29 = vadd.f32 -1.0, %v948_v21  ;;  %v950_v12 = vpop.eup %949  ;;  %v303_v16 = vmin.f32 %v1227_v10, 0.0 }
  0x1b   :  { %v741_v31 = vadd.f32 %v677_v14, %v613_v22  ;;  %v615_v32 = vmul.f32 %v1160_v25, %v549_v27  ;;  %v550_v33 = vsel %vm230_vm3, %v1143_v17, %v878_v24  ;;  %v880_v17 = vadd.f32 -1.0, %v950_v12  ;;  %v952_v41 = vpop.eup %951 }
  0x1c   :  { %v742_v35 = vadd.f32 %v678_v8, %v614_v26  ;;  %v616_v36 = vmul.f32 %v1160_v25, %v550_v33  ;;  %v551_v37 = vsel %vm231_vm4, %v1147_v19, %v879_v29  ;;  %v379_v44 = vmul.f32 1.442695, %v303_v16  ;;  %v35_v19 = vld [vmem:[%s2322_s1 + $0x70] sm:$0xff]  ;;  %v954_v46 = vpop.eup %953 }
  0x1d   :  { %805 = vst [vmem:[%s2327_s5] sm:$0xff] %v741_v31  ;;  %v743_v42 = vadd.f32 %v679_v28, %v615_v32  ;;  %v617_v43 = vmul.f32 %v1160_v25, %v551_v37  ;;  %v552_v50 = vsel %vm232_vm5, %v1165_v30, %v880_v17  ;;  %v881_v52 = vadd.f32 -1.0, %v952_v41  ;;  %v956_v59 = vpop.eup %955  ;;  %v38_v31 = vld [vmem:[%s2322_s1 + $0x88] sm:$0xff]  ;;  %v687_v33 = vld [vmem:[%s2326_s4 + $0x50] sm:$0xff] }
  0x1e   :  { %806 = vst [vmem:[%s2327_s5 + $0x8] sm:$0xff] %v742_v35  ;;  %v744_v49 = vadd.f32 %v680_v34, %v616_v36  ;;  %v618_v55 = vmul.f32 %v1160_v25, %v552_v50  ;;  %v882_v56 = vadd.f32 -1.0, %v954_v46  ;;  %963 = vpow2.f32 %v379_v44  ;;  %v958_v3 = vpop.eup %957  ;;  %v39_v16 = vld [vmem:[%s2322_s1 + $0x90] sm:$0xff]  ;;  %v40_v35 = vld [vmem:[%s2322_s1 + $0x98] sm:$0xff]  ;;  %v42_v50 = vld [vmem:[%s2322_s1 + $0xa8] sm:$0xff] }
  0x1f   :  { %807 = vst [vmem:[%s2327_s5 + $0x10] sm:$0xff] %v743_v42  ;;  %v745_v54 = vadd.f32 %v681_v40, %v617_v43  ;;  %v553_v30 = vsel %vm233_vm6, %v1178_v38, %v881_v52  ;;  %v106_v62 = vmul.f32 %v1105_v1, %v35_v19  ;;  %v883_v7 = vadd.f32 -1.0, %v956_v59  ;;  %v688_v40 = vld [vmem:[%s2326_s4 + $0x58] sm:$0xff] }
  0x20   :  { %808 = vst [vmem:[%s2327_s5 + $0x18] sm:$0xff] %v744_v49  ;;  %v746_v4 = vadd.f32 %v682_v51, %v618_v55  ;;  %v619_v38 = vmul.f32 %v1160_v25, %v553_v30  ;;  %v554_v5 = vsel %vm234_vm7, %v1181_v39, %v882_v56  ;;  %v884_v11 = vadd.f32 -1.0, %v958_v3  ;;  %v960_v14 = vpop.eup %959  ;;  %v41_v49 = vld [vmem:[%s2322_s1 + $0xa0] sm:$0xff] }
  0x21   :  { %809 = vst [vmem:[%s2327_s5 + $0x20] sm:$0xff] %v745_v54  ;;  %v620_v9 = vmul.f32 %v1160_v25, %v554_v5  ;;  %965 = vpow2.f32 %v381_v61  ;;  %v1321_v13 = vadd.f32 %v1110_v2, %v106_v62  ;;  %v555_v39 = vsel %vm235_vm8, %v1196_v47, %v883_v7  ;;  %v962_v23 = vpop.eup %961  ;;  %v686_v47 = vld [vmem:[%s2326_s4 + $0x48] sm:$0xff]  ;;  %v689_v61 = vld [vmem:[%s2326_s4 + $0x60] sm:$0xff] }
  0x22   :  { %810 = vst [vmem:[%s2327_s5 + $0x28] sm:$0xff] %v746_v4  ;;  %v747_v15 = vadd.f32 %v683_v60, %v619_v38  ;;  %v1333_v21 = vadd.f32 %v1110_v2, %v107_v63  ;;  %v108_v22 = vmul.f32 %v1105_v1, %v37_v0  ;;  %v621_v24 = vmul.f32 %v1160_v25, %v555_v39 }
  0x23   :  { %v748_v8 = vadd.f32 %v684_v6, %v620_v9  ;;  %v556_v26 = vsel %vm236_vm9, %v1199_v48, %v884_v11  ;;  %v885_v27 = vadd.f32 -1.0, %v960_v14  ;;  %v886_v29 = vadd.f32 -1.0, %v962_v23  ;;  %v44_v6 = vld [vmem:[%s2322_s1 + $0xb8] sm:$0xff]  ;;  %v690_v11 = vld [vmem:[%s2326_s4 + $0x68] sm:$0xff] }
  0x24   :  { %811 = vst [vmem:[%s2327_s5 + $0x30] sm:$0xff] %v747_v15  ;;  %v622_v28 = vmul.f32 %v1160_v25, %v556_v26  ;;  %v305_v12 = vmin.f32 %v1321_v13, 0.0  ;;  %v749_v48 = vadd.f32 %v685_v18, %v621_v24  ;;  %v306_v34 = vmin.f32 %v1333_v21, 0.0 }
  0x25   :  { %812 = vst [vmem:[%s2327_s5 + $0x38] sm:$0xff] %v748_v8  ;;  %v557_v32 = vsel %vm237_vm10, %v1214_v57, %v885_v27  ;;  %v558_v57 = vsel %vm238_vm11, %v1217_v58, %v886_v29  ;;  %v1380_v43 = vadd.f32 %v1110_v2, %v108_v22  ;;  %v109_v44 = vmul.f32 %v1105_v1, %v38_v31  ;;  %v45_v27 = vld [vmem:[%s2322_s1 + $0xc0] sm:$0xff] }
  0x26   :  { %v750_v36 = vadd.f32 %v686_v47, %v622_v28  ;;  %v623_v37 = vmul.f32 %v1160_v25, %v557_v32  ;;  %v383_v17 = vmul.f32 1.442695, %v305_v12  ;;  %813 = vst [vmem:[%s2327_s5 + $0x40] sm:$0xff] %v749_v48  ;;  %v624_v41 = vmul.f32 %v1160_v25, %v558_v57  ;;  %v46_v12 = vld [vmem:[%s2322_s1 + $0xc8] sm:$0xff]  ;;  %v691_v57 = vld [vmem:[%s2326_s4 + $0x70] sm:$0xff] }
  0x27   :  { %v385_v42 = vmul.f32 1.442695, %v306_v34  ;;  %v110_v45 = vmul.f32 %v1105_v1, %v39_v16  ;;  %v111_v46 = vmul.f32 %v1105_v1, %v40_v35  ;;  %v307_v54 = vmin.f32 %v1380_v43, 0.0 }
  0x28   :  { %v964_v19 = vpop.eup %963  ;;  %814 = vst [vmem:[%s2327_s5 + $0x48] sm:$0xff] %v750_v36  ;;  %v751_v58 = vadd.f32 %v687_v33, %v623_v37  ;;  %967 = vpow2.f32 %v383_v17  ;;  %v752_v51 = vadd.f32 %v688_v40, %v624_v41  ;;  %v1402_v55 = vadd.f32 %v1110_v2, %v109_v44  ;;  %v47_v41 = vld [vmem:[%s2322_s1 + $0xd0] sm:$0xff] }
  0x29   :  { %v887_v52 = vadd.f32 -1.0, %v964_v19  ;;  %969 = vpow2.f32 %v385_v42  ;;  %v1405_v56 = vadd.f32 %v1110_v2, %v110_v45  ;;  %v1408_v59 = vadd.f32 %v1110_v2, %v111_v46  ;;  %v48_v42 = vld [vmem:[%s2322_s1 + $0xd8] sm:$0xff] }
  0x2a   :  { %815 = vst [vmem:[%s2327_s5 + $0x50] sm:$0xff] %v751_v58  ;;  %816 = vst [vmem:[%s2327_s5 + $0x58] sm:$0xff] %v752_v51  ;;  %v112_v62 = vmul.f32 %v1105_v1, %v41_v49  ;;  %v113_v63 = vmul.f32 %v1105_v1, %v42_v50  ;;  %v387_v4 = vmul.f32 1.442695, %v307_v54  ;;  %v114_v38 = vmul.f32 %v1105_v1, %v43_v53  ;;  %v692_v19 = vld [vmem:[%s2326_s4 + $0x78] sm:$0xff] }
  0x2b   :  { %v966_v30 = vpop.eup %965  ;;  %v559_v60 = vsel %vm239_vm12, %v1227_v10, %v887_v52  ;;  %v308_v5 = vmin.f32 %v1402_v55, 0.0  ;;  %v309_v10 = vmin.f32 %v1405_v56, 0.0  ;;  %v310_v14 = vmin.f32 %v1408_v59, 0.0 }
  0x2c   :  { %v625_v0 = vmul.f32 %v1160_v25, %v559_v60  ;;  %v888_v3 = vadd.f32 -1.0, %v966_v30  ;;  %971 = vpow2.f32 %v387_v4  ;;  %v1436_v22 = vadd.f32 %v1110_v2, %v112_v62  ;;  %v693_v4 = vld [vmem:[%s2326_s4 + $0x80] sm:$0xff] }
  0x2d   :  { %v389_v39 = vmul.f32 1.442695, %v308_v5  ;;  %v391_v18 = vmul.f32 1.442695, %v309_v10  ;;  %v393_v23 = vmul.f32 1.442695, %v310_v14  ;;  %v1445_v8 = vadd.f32 %v1110_v2, %v114_v38 }
  0x2e   :  { %v753_v7 = vadd.f32 %v689_v61, %v625_v0  ;;  %v560_v9 = vsel %vm240_vm13, %v1237_v20, %v888_v3  ;;  %v1442_v20 = vadd.f32 %v1110_v2, %v113_v63  ;;  %v115_v24 = vmul.f32 %v1105_v1, %v44_v6  ;;  %v49_v63 = vld [vmem:[%s2322_s1 + $0xe0] sm:$0xff] }
  0x2f   :  { %v626_v15 = vmul.f32 %v1160_v25, %v560_v9  ;;  %vm241_vm14 = vcmp.gt.f32.partialorder %v1321_v13, 0.0  ;;  %973 = vpow2.f32 %v389_v39  ;;  %v311_v47 = vmin.f32 %v1436_v22, 0.0 }
  0x30   :  { %817 = vst [vmem:[%s2327_s5 + $0x60] sm:$0xff] %v753_v7  ;;  %vm242_vm15 = vcmp.gt.f32.partialorder %v1333_v21, 0.0  ;;  %vm243_vm0 = vcmp.gt.f32.partialorder %v1380_v43, 0.0  ;;  %975 = vpow2.f32 %v391_v18  ;;  %v312_v29 = vmin.f32 %v1442_v20, 0.0 }
  0x31   :  { %v754_v26 = vadd.f32 %v690_v11, %v626_v15  ;;  %vm244_vm1 = vcmp.gt.f32.partialorder %v1402_v55, 0.0  ;;  %977 = vpow2.f32 %v393_v23  ;;  %v395_v32 = vmul.f32 1.442695, %v311_v47  ;;  %v694_v23 = vld [vmem:[%s2326_s4 + $0x88] sm:$0xff] }
  0x32   :  { %v968_v28 = vpop.eup %967  ;;  %v313_v33 = vmin.f32 %v1445_v8, 0.0  ;;  %vm245_vm2 = vcmp.gt.f32.partialorder %v1405_v56, 0.0  ;;  %v397_v16 = vmul.f32 1.442695, %v312_v29  ;;  %v1466_v35 = vadd.f32 %v1110_v2, %v115_v24 }
  0x33   :  { %v970_v31 = vpop.eup %969  ;;  %818 = vst [vmem:[%s2327_s5 + $0x68] sm:$0xff] %v754_v26  ;;  %v889_v48 = vadd.f32 -1.0, %v968_v28  ;;  %v116_v36 = vmul.f32 %v1105_v1, %v45_v27  ;;  %979 = vpow2.f32 %v395_v32  ;;  %v117_v17 = vmul.f32 %v1105_v1, %v46_v12  ;;  %v695_v28 = vld [vmem:[%s2326_s4 + $0x90] sm:$0xff] }
  0x34   :  { %v890_v34 = vadd.f32 -1.0, %v970_v31  ;;  %v399_v40 = vmul.f32 1.442695, %v313_v33  ;;  %vm246_vm3 = vcmp.gt.f32.partialorder %v1408_v59, 0.0  ;;  %981 = vpow2.f32 %v397_v16 }
  0x35   :  { %v561_v37 = vsel %vm241_vm14, %v1321_v13, %v889_v48  ;;  %v314_v45 = vmin.f32 %v1466_v35, 0.0  ;;  %v1493_v46 = vadd.f32 %v1110_v2, %v116_v36  ;;  %v1496_v51 = vadd.f32 %v1110_v2, %v117_v17 }
  0x36   :  { %v627_v44 = vmul.f32 %v1160_v25, %v561_v37  ;;  %v562_v13 = vsel %vm242_vm15, %v1333_v21, %v890_v34  ;;  %983 = vpow2.f32 %v399_v40  ;;  %v972_v49 = vpop.eup %971  ;;  %v118_v21 = vmul.f32 %v1105_v1, %v47_v41  ;;  %v50_v37 = vld [vmem:[%s2322_s1 + $0xe8] sm:$0xff]  ;;  %v697_v40 = vld [vmem:[%s2326_s4 + $0xa0] sm:$0xff] }
  0x37   :  { %v628_v58 = vmul.f32 %v1160_v25, %v562_v13  ;;  %v119_v52 = vmul.f32 %v1105_v1, %v48_v42  ;;  %v891_v54 = vadd.f32 -1.0, %v972_v49  ;;  %vm247_vm4 = vcmp.gt.f32.partialorder %v1436_v22, 0.0  ;;  %v699_v49 = vld [vmem:[%s2326_s4 + $0xb0] sm:$0xff] }
  0x38   :  { %v755_v50 = vadd.f32 %v691_v57, %v627_v44  ;;  %v401_v30 = vmul.f32 1.442695, %v314_v45  ;;  %vm248_vm5 = vcmp.gt.f32.partialorder %v1442_v20, 0.0  ;;  %v315_v60 = vmin.f32 %v1493_v46, 0.0 }
  0x39   :  { %v756_v53 = vadd.f32 %v692_v19, %v628_v58  ;;  %v316_v61 = vmin.f32 %v1496_v51, 0.0  ;;  %v1508_v62 = vadd.f32 %v1110_v2, %v118_v21  ;;  %v974_v0 = vpop.eup %973  ;;  %v563_v3 = vsel %vm243_vm0, %v1380_v43, %v891_v54  ;;  %v51_v58 = vld [vmem:[%s2322_s1 + $0xf0] sm:$0xff]  ;;  %v52_v21 = vld [vmem:[%s2322_s1 + $0xf8] sm:$0xff] }
  0x3a   :  { %819 = vst [vmem:[%s2327_s5 + $0x70] sm:$0xff] %v755_v50  ;;  %vm249_vm6 = vcmp.gt.f32.partialorder %v1445_v8, 0.0  ;;  %985 = vpow2.f32 %v401_v30  ;;  %v1524_v38 = vadd.f32 %v1110_v2, %v119_v52  ;;  %v976_v5 = vpop.eup %975  ;;  %v629_v10 = vmul.f32 %v1160_v25, %v563_v3  ;;  %v53_v30 = vld [vmem:[%s2322_s1 + $0x100] sm:$0xff] }
  0x3b   :  { %820 = vst [vmem:[%s2327_s5 + $0x78] sm:$0xff] %v756_v53  ;;  %v892_v6 = vadd.f32 -1.0, %v974_v0  ;;  %v403_v7 = vmul.f32 1.442695, %v315_v60  ;;  %v405_v9 = vmul.f32 1.442695, %v316_v61  ;;  %v978_v11 = vpop.eup %977  ;;  %v120_v15 = vmul.f32 %v1105_v1, %v49_v63 }
  0x3c   :  { %v893_v14 = vadd.f32 -1.0, %v976_v5  ;;  %vm250_vm7 = vcmp.gt.f32.partialorder %v1466_v35, 0.0  ;;  %v317_v43 = vmin.f32 %v1508_v62, 0.0  ;;  %v757_v39 = vadd.f32 %v693_v4, %v629_v10 }
  0x3d   :  { %v564_v18 = vsel %vm244_vm1, %v1402_v55, %v892_v6  ;;  %v894_v24 = vadd.f32 -1.0, %v978_v11  ;;  %987 = vpow2.f32 %v403_v7  ;;  %v980_v26 = vpop.eup %979  ;;  %v318_v32 = vmin.f32 %v1524_v38, 0.0  ;;  %v700_v7 = vld [vmem:[%s2326_s4 + $0xb8] sm:$0xff] }
  0x3e   :  { %v630_v47 = vmul.f32 %v1160_v25, %v564_v18  ;;  %v565_v27 = vsel %vm245_vm2, %v1405_v56, %v893_v14  ;;  %989 = vpow2.f32 %v405_v9  ;;  %v407_v29 = vmul.f32 1.442695, %v317_v43  ;;  %v982_v55 = vpop.eup %981  ;;  %821 = vst [vmem:[%s2327_s5 + $0x80] sm:$0xff] %v757_v39  ;;  %v696_v56 = vld [vmem:[%s2326_s4 + $0x98] sm:$0xff] }
  0x3f   :  { %v631_v12 = vmul.f32 %v1160_v25, %v565_v27  ;;  %v566_v31 = vsel %vm246_vm3, %v1408_v59, %v894_v24  ;;  %v895_v48 = vadd.f32 -1.0, %v980_v26  ;;  %v896_v36 = vadd.f32 -1.0, %v982_v55  ;;  %v54_v55 = vld [vmem:[%s2322_s1 + $0x108] sm:$0xff] }
  0x40   :  { %v984_v33 = vpop.eup %983  ;;  %v758_v34 = vadd.f32 %v694_v23, %v630_v47  ;;  %v632_v16 = vmul.f32 %v1160_v25, %v566_v31  ;;  %991 = vpow2.f32 %v407_v29  ;;  %v409_v41 = vmul.f32 1.442695, %v318_v32 }
  0x41   :  { %v759_v57 = vadd.f32 %v695_v28, %v631_v12  ;;  %v567_v59 = vsel %vm247_vm4, %v1436_v22, %v895_v48  ;;  %v897_v17 = vadd.f32 -1.0, %v984_v33  ;;  %v568_v13 = vsel %vm248_vm5, %v1442_v20, %v896_v36  ;;  %v698_v22 = vld [vmem:[%s2326_s4 + $0xa8] sm:$0xff]  ;;  %v701_v28 = vld [vmem:[%s2326_s4 + $0xc0] sm:$0xff]  ;;  %v55_v12 = vld [vmem:[%s2322_s1 + $0x110] sm:$0xff] }
  0x42   :  { %822 = vst [vmem:[%s2327_s5 + $0x88] sm:$0xff] %v758_v34  ;;  %v760_v42 = vadd.f32 %v696_v56, %v632_v16  ;;  %v633_v44 = vmul.f32 %v1160_v25, %v567_v59  ;;  %v1575_v19 = vadd.f32 %v1110_v2, %v120_v15  ;;  %v634_v45 = vmul.f32 %v1160_v25, %v568_v13  ;;  %v702_v56 = vld [vmem:[%s2326_s4 + $0xc8] sm:$0xff] }
  0x43   :  { %823 = vst [vmem:[%s2327_s5 + $0x90] sm:$0xff] %v759_v57  ;;  %v569_v20 = vsel %vm249_vm6, %v1445_v8, %v897_v17  ;;  %993 = vpow2.f32 %v409_v41  ;;  %v121_v50 = vmul.f32 %v1105_v1, %v50_v37  ;;  %vm251_vm8 = vcmp.gt.f32.partialorder %v1493_v46, 0.0  ;;  %v703_v57 = vld [vmem:[%s2326_s4 + $0xd0] sm:$0xff]  ;;  %v56_v17 = vld [vmem:[%s2322_s1 + $0x118] sm:$0xff] }
  0x44   :  { %v986_v52 = vpop.eup %985  ;;  %824 = vst [vmem:[%s2327_s5 + $0x98] sm:$0xff] %v760_v42  ;;  %v761_v53 = vadd.f32 %v697_v40, %v633_v44  ;;  %v635_v54 = vmul.f32 %v1160_v25, %v569_v20  ;;  %v319_v8 = vmin.f32 %v1575_v19, 0.0  ;;  %v762_v60 = vadd.f32 %v698_v22, %v634_v45  ;;  %v57_v22 = vld [vmem:[%s2322_s1 + $0x120] sm:$0xff]  ;;  %v704_v20 = vld [vmem:[%s2326_s4 + $0xd8] sm:$0xff] }
  0x45   :  { %v898_v61 = vadd.f32 -1.0, %v986_v52  ;;  %v1604_v63 = vadd.f32 %v1110_v2, %v121_v50  ;;  %v122_v0 = vmul.f32 %v1105_v1, %v51_v58  ;;  %vm252_vm9 = vcmp.gt.f32.partialorder %v1496_v51, 0.0 }
  0x46   :  { %825 = vst [vmem:[%s2327_s5 + $0xa0] sm:$0xff] %v761_v53  ;;  %v763_v3 = vadd.f32 %v699_v49, %v635_v54  ;;  %v411_v4 = vmul.f32 1.442695, %v319_v8  ;;  %v123_v5 = vmul.f32 %v1105_v1, %v52_v21  ;;  %826 = vst [vmem:[%s2327_s5 + $0xa8] sm:$0xff] %v762_v60  ;;  %v124_v14 = vmul.f32 %v1105_v1, %v53_v30  ;;  %v58_v60 = vld [vmem:[%s2322_s1 + $0x128] sm:$0xff] }
  0x47   :  { %v988_v10 = vpop.eup %987  ;;  %v570_v6 = vsel %vm250_vm7, %v1466_v35, %v898_v61  ;;  %v320_v9 = vmin.f32 %v1604_v63, 0.0  ;;  %v1623_v11 = vadd.f32 %v1110_v2, %v122_v0  ;;  %vm253_vm10 = vcmp.gt.f32.partialorder %v1508_v62, 0.0  ;;  %v59_v61 = vld [vmem:[%s2322_s1 + $0x130] sm:$0xff] }
  0x48   :  { %v990_v43 = vpop.eup %989  ;;  %827 = vst [vmem:[%s2327_s5 + $0xb0] sm:$0xff] %v763_v3  ;;  %v636_v15 = vmul.f32 %v1160_v25, %v570_v6  ;;  %v899_v39 = vadd.f32 -1.0, %v988_v10  ;;  %995 = vpow2.f32 %v411_v4  ;;  %v1631_v35 = vadd.f32 %v1110_v2, %v123_v5 }
  0x49   :  { %v900_v18 = vadd.f32 -1.0, %v990_v43  ;;  %v413_v23 = vmul.f32 1.442695, %v320_v9  ;;  %v321_v24 = vmin.f32 %v1623_v11, 0.0  ;;  %vm254_vm11 = vcmp.gt.f32.partialorder %v1524_v38, 0.0 }
  0x4a   :  { %v992_v26 = vpop.eup %991  ;;  %v764_v47 = vadd.f32 %v700_v7, %v636_v15  ;;  %v571_v27 = vsel %vm251_vm8, %v1493_v46, %v899_v39  ;;  %v322_v29 = vmin.f32 %v1631_v35, 0.0  ;;  %v1661_v16 = vadd.f32 %v1110_v2, %v124_v14  ;;  %v705_v14 = vld [vmem:[%s2326_s4 + $0xe0] sm:$0xff]  ;;  %v60_v39 = vld [vmem:[%s2322_s1 + $0x138] sm:$0xff] }
  0x4b   :  { %v637_v31 = vmul.f32 %v1160_v25, %v571_v27  ;;  %v572_v46 = vsel %vm252_vm9, %v1496_v51, %v900_v18  ;;  %v901_v48 = vadd.f32 -1.0, %v992_v26  ;;  %997 = vpow2.f32 %v413_v23 }
  0x4c   :  { %828 = vst [vmem:[%s2327_s5 + $0xb8] sm:$0xff] %v764_v47  ;;  %v638_v32 = vmul.f32 %v1160_v25, %v572_v46  ;;  %v415_v33 = vmul.f32 1.442695, %v321_v24  ;;  %v417_v34 = vmul.f32 1.442695, %v322_v29  ;;  %v125_v59 = vmul.f32 %v1105_v1, %v54_v55  ;;  %v706_v55 = vld [vmem:[%s2326_s4 + $0xe8] sm:$0xff] }
  0x4d   :  { %v994_v36 = vpop.eup %993  ;;  %v765_v37 = vadd.f32 %v701_v28, %v637_v31  ;;  %v573_v51 = vsel %vm253_vm10, %v1508_v62, %v901_v48  ;;  %v126_v40 = vmul.f32 %v1105_v1, %v55_v12  ;;  %vm255_vm12 = vcmp.gt.f32.partialorder %v1575_v19, 0.0 }
  0x4e   :  { %v766_v41 = vadd.f32 %v702_v56, %v638_v32  ;;  %v639_v42 = vmul.f32 %v1160_v25, %v573_v51  ;;  %v902_v44 = vadd.f32 -1.0, %v994_v36  ;;  %999 = vpow2.f32 %v415_v33  ;;  %v707_v51 = vld [vmem:[%s2326_s4 + $0xf0] sm:$0xff] }
  0x4f   :  { %829 = vst [vmem:[%s2327_s5 + $0xc0] sm:$0xff] %v765_v37  ;;  %1001 = vpow2.f32 %v417_v34  ;;  %v323_v62 = vmin.f32 %v1661_v16, 0.0  ;;  %v1681_v13 = vadd.f32 %v1110_v2, %v125_v59  ;;  %v1696_v49 = vadd.f32 %v1110_v2, %v126_v40  ;;  %v61_v34 = vld [vmem:[%s2322_s1 + $0x140] sm:$0xff]  ;;  %v62_v59 = vld [vmem:[%s2322_s1 + $0x148] sm:$0xff] }
  0x50   :  { %830 = vst [vmem:[%s2327_s5 + $0xc8] sm:$0xff] %v766_v41  ;;  %v767_v58 = vadd.f32 %v703_v57, %v639_v42  ;;  %v574_v45 = vsel %vm254_vm11, %v1524_v38, %v902_v44  ;;  %v127_v50 = vmul.f32 %v1105_v1, %v56_v17  ;;  %vm256_vm13 = vcmp.gt.f32.partialorder %v1604_v63, 0.0 }
  0x51   :  { %v640_v21 = vmul.f32 %v1160_v25, %v574_v45  ;;  %v419_v52 = vmul.f32 1.442695, %v323_v62  ;;  %v324_v53 = vmin.f32 %v1681_v13, 0.0  ;;  %vm257_vm14 = vcmp.gt.f32.partialorder %v1623_v11, 0.0 }
  0x52   :  { %v996_v54 = vpop.eup %995  ;;  %831 = vst [vmem:[%s2327_s5 + $0xd0] sm:$0xff] %v767_v58  ;;  %v325_v38 = vmin.f32 %v1696_v49, 0.0  ;;  %v1708_v8 = vadd.f32 %v1110_v2, %v127_v50  ;;  %v128_v30 = vmul.f32 %v1105_v1, %v57_v22  ;;  %vm258_vm15 = vcmp.gt.f32.partialorder %v1631_v35, 0.0 }
  0x53   :  { %v768_v0 = vadd.f32 %v704_v20, %v640_v21  ;;  %v903_v3 = vadd.f32 -1.0, %v996_v54  ;;  %1003 = vpow2.f32 %v419_v52  ;;  %v421_v4 = vmul.f32 1.442695, %v324_v53 }
  0x54   :  { %v423_v5 = vmul.f32 1.442695, %v325_v38  ;;  %v326_v10 = vmin.f32 %v1708_v8, 0.0  ;;  %v1720_v6 = vadd.f32 %v1110_v2, %v128_v30  ;;  %v129_v43 = vmul.f32 %v1105_v1, %v58_v60 }
  0x55   :  { %v998_v7 = vpop.eup %997  ;;  %832 = vst [vmem:[%s2327_s5 + $0xd8] sm:$0xff] %v768_v0  ;;  %v575_v9 = vsel %vm255_vm12, %v1575_v19, %v903_v3  ;;  %1005 = vpow2.f32 %v421_v4  ;;  %v130_v15 = vmul.f32 %v1105_v1, %v59_v61  ;;  %vm259_vm0 = vcmp.gt.f32.partialorder %v1661_v16, 0.0  ;;  %v1808_v61 = vld [vmem:[%s2324_s3] ss:$0 sm:$0xff] }
  0x56   :  { %v641_v18 = vmul.f32 %v1160_v25, %v575_v9  ;;  %v904_v23 = vadd.f32 -1.0, %v998_v7  ;;  %1007 = vpow2.f32 %v423_v5  ;;  %v425_v24 = vmul.f32 1.442695, %v326_v10  ;;  %v1816_v0 = vld [vmem:[%s2323_s2] ss:$0 sm:$0xff]  ;;  %v710_v7 = vld [vmem:[%s2326_s4 + $0x108] sm:$0xff] }
  0x57   :  { %v327_v19 = vmin.f32 %v1720_v6, 0.0  ;;  %v1740_v26 = vadd.f32 %v1110_v2, %v129_v43  ;;  %v1743_v47 = vadd.f32 %v1110_v2, %v130_v15  ;;  %v131_v12 = vmul.f32 %v1105_v1, %v60_v39  ;;  %v64_v43 = vld [vmem:[%s2322_s1 + $0x158] sm:$0xff]  ;;  %v65_v15 = vld [vmem:[%s2322_s1 + $0x160] sm:$0xff] }
  0x58   :  { %v1000_v27 = vpop.eup %999  ;;  %v769_v28 = vadd.f32 %v705_v14, %v641_v18  ;;  %v576_v29 = vsel %vm256_vm13, %v1604_v63, %v904_v23  ;;  %1009 = vpow2.f32 %v425_v24  ;;  %vm260_vm1 = vcmp.gt.f32.partialorder %v1681_v13, 0.0  ;;  %v711_v23 = vld [vmem:[%s2326_s4 + $0x110] sm:$0xff] }
  0x59   :  { %v1002_v31 = vpop.eup %1001  ;;  %v642_v46 = vmul.f32 %v1160_v25, %v576_v29  ;;  %v905_v56 = vadd.f32 -1.0, %v1000_v27  ;;  %v427_v48 = vmul.f32 1.442695, %v327_v19  ;;  %vm261_vm2 = vcmp.gt.f32.partialorder %v1696_v49, 0.0 }
  0x5a   :  { %833 = vst [vmem:[%s2327_s5 + $0xe0] sm:$0xff] %v769_v28  ;;  %v906_v32 = vadd.f32 -1.0, %v1002_v31  ;;  %v328_v63 = vmin.f32 %v1740_v26, 0.0  ;;  %v329_v33 = vmin.f32 %v1743_v47, 0.0  ;;  %v1770_v57 = vadd.f32 %v1110_v2, %v131_v12  ;;  %v712_v31 = vld [vmem:[%s2326_s4 + $0x118] sm:$0xff] }
  0x5b   :  { %v770_v36 = vadd.f32 %v706_v55, %v642_v46  ;;  %v577_v37 = vsel %vm257_vm14, %v1623_v11, %v905_v56  ;;  %1011 = vpow2.f32 %v427_v48  ;;  %v708_v11 = vld [vmem:[%s2326_s4 + $0xf8] sm:$0xff]  ;;  %vm262_vm3 = vcmp.gt.f32.partialorder %v1708_v8, 0.0  ;;  %v66_v48 = vld [vmem:[%s2322_s1 + $0x168] sm:$0xff] }
  0x5c   :  { %v643_v40 = vmul.f32 %v1160_v25, %v577_v37  ;;  %v578_v17 = vsel %vm258_vm15, %v1631_v35, %v906_v32  ;;  %v429_v41 = vmul.f32 1.442695, %v328_v63  ;;  %v431_v42 = vmul.f32 1.442695, %v329_v33  ;;  %v63_v35 = vld [vmem:[%s2322_s1 + $0x150] sm:$0xff] }
  0x5d   :  { %v1004_v44 = vpop.eup %1003  ;;  %834 = vst [vmem:[%s2327_s5 + $0xe8] sm:$0xff] %v770_v36  ;;  %v644_v62 = vmul.f32 %v1160_v25, %v578_v17  ;;  %v330_v22 = vmin.f32 %v1770_v57, 0.0  ;;  %v132_v58 = vmul.f32 %v1105_v1, %v61_v34  ;;  %v133_v50 = vmul.f32 %v1105_v1, %v62_v59  ;;  %v709_v1 = vld [vmem:[%s2326_s4 + $0x100] sm:$0xff] }
  0x5e   :  { %v771_v45 = vadd.f32 %v707_v51, %v643_v40  ;;  %v907_v20 = vadd.f32 -1.0, %v1004_v44  ;;  %1013 = vpow2.f32 %v429_v41  ;;  %vm263_vm4 = vcmp.gt.f32.partialorder %v1720_v6, 0.0  ;;  %v713_v59 = vld [vmem:[%s2326_s4 + $0x120] sm:$0xff] }
  0x5f   :  { %v1006_v21 = vpop.eup %1005  ;;  %v772_v52 = vadd.f32 %v708_v11, %v644_v62  ;;  %1015 = vpow2.f32 %v431_v42  ;;  %v433_v53 = vmul.f32 1.442695, %v330_v22  ;;  %v1794_v54 = vadd.f32 %v1110_v2, %v132_v58 }
  0x60   :  { %v1008_v38 = vpop.eup %1007  ;;  %835 = vst [vmem:[%s2327_s5 + $0xf0] sm:$0xff] %v771_v45  ;;  %v579_v30 = vsel %vm259_vm0, %v1661_v16, %v907_v20  ;;  %v908_v60 = vadd.f32 -1.0, %v1006_v21  ;;  %v1811_v2 = vadd.f32 %v1808_v61, %v133_v50  ;;  %v134_v16 = vmul.f32 %v1816_v0, %v63_v35  ;;  %v714_v20 = vld [vmem:[%s2326_s4 + $0x128] sm:$0xff]  ;;  %v67_v21 = vld [vmem:[%s2322_s1 + $0x170] sm:$0xff] }
  0x61   :  { %836 = vst [vmem:[%s2327_s5 + $0xf8] sm:$0xff] %v772_v52  ;;  %v645_v3 = vmul.f32 %v1160_v25, %v579_v30  ;;  %v909_v4 = vadd.f32 -1.0, %v1008_v38  ;;  %1017 = vpow2.f32 %v433_v53  ;;  %vm264_vm5 = vcmp.gt.f32.partialorder %v1740_v26, 0.0 }
  0x62   :  { %v1010_v5 = vpop.eup %1009  ;;  %v580_v10 = vsel %vm260_vm1, %v1681_v13, %v908_v60  ;;  %v331_v9 = vmin.f32 %v1794_v54, 0.0  ;;  %v332_v14 = vmin.f32 %v1811_v2, 0.0  ;;  %v1848_v29 = vadd.f32 %v1808_v61, %v134_v16 }
  0x63   :  { %v773_v39 = vadd.f32 %v709_v1, %v645_v3  ;;  %v646_v13 = vmul.f32 %v1160_v25, %v580_v10  ;;  %v581_v18 = vsel %vm261_vm2, %v1696_v49, %v909_v4  ;;  %v910_v24 = vadd.f32 -1.0, %v1010_v5  ;;  %v68_v1 = vld [vmem:[%s2322_s1 + $0x178] sm:$0xff]  ;;  %v69_v3 = vld [vmem:[%s2322_s1 + $0x180] sm:$0xff]  ;;  %v70_v4 = vld [vmem:[%s2322_s1 + $0x188] sm:$0xff] }
  0x64   :  { %v647_v19 = vmul.f32 %v1160_v25, %v581_v18  ;;  %v435_v27 = vmul.f32 1.442695, %v331_v9  ;;  %v437_v28 = vmul.f32 1.442695, %v332_v14  ;;  %v135_v46 = vmul.f32 %v1816_v0, %v64_v43  ;;  %v71_v14 = vld [vmem:[%s2322_s1 + $0x190] sm:$0xff] }
  0x65   :  { %v1012_v55 = vpop.eup %1011  ;;  %837 = vst [vmem:[%s2327_s5 + $0x100] sm:$0xff] %v773_v39  ;;  %v774_v12 = vadd.f32 %v710_v7, %v646_v13  ;;  %v582_v49 = vsel %vm262_vm3, %v1708_v8, %v910_v24  ;;  %v136_v56 = vmul.f32 %v1816_v0, %v65_v15  ;;  %vm265_vm6 = vcmp.gt.f32.partialorder %v1743_v47, 0.0  ;;  %v716_v7 = vld [vmem:[%s2326_s4 + $0x138] sm:$0xff] }
  0x66   :  { %v775_v32 = vadd.f32 %v711_v23, %v647_v19  ;;  %v648_v63 = vmul.f32 %v1160_v25, %v582_v49  ;;  %v911_v33 = vadd.f32 -1.0, %v1012_v55  ;;  %1019 = vpow2.f32 %v435_v27 }
  0x67   :  { %838 = vst [vmem:[%s2327_s5 + $0x108] sm:$0xff] %v774_v12  ;;  %1021 = vpow2.f32 %v437_v28  ;;  %v333_v8 = vmin.f32 %v1848_v29, 0.0  ;;  %v1871_v34 = vadd.f32 %v1808_v61, %v135_v46  ;;  %v1883_v40 = vadd.f32 %v1808_v61, %v136_v56  ;;  %v717_v56 = vld [vmem:[%s2326_s4 + $0x140] sm:$0xff] }
  0x68   :  { %v1014_v36 = vpop.eup %1013  ;;  %839 = vst [vmem:[%s2327_s5 + $0x110] sm:$0xff] %v775_v32  ;;  %v776_v37 = vadd.f32 %v712_v31, %v648_v63  ;;  %v583_v51 = vsel %vm263_vm4, %v1720_v6, %v911_v33  ;;  %v137_v17 = vmul.f32 %v1816_v0, %v66_v48  ;;  %vm266_vm7 = vcmp.gt.f32.partialorder %v1770_v57, 0.0 }
  0x69   :  { %v1016_v11 = vpop.eup %1015  ;;  %v649_v41 = vmul.f32 %v1160_v25, %v583_v51  ;;  %v912_v42 = vadd.f32 -1.0, %v1014_v36  ;;  %v439_v44 = vmul.f32 1.442695, %v333_v8  ;;  %vm267_vm8 = vcmp.gt.f32.partialorder %v1794_v54, 0.0 }
  0x6a   :  { %840 = vst [vmem:[%s2327_s5 + $0x118] sm:$0xff] %v776_v37  ;;  %v913_v6 = vadd.f32 -1.0, %v1016_v11  ;;  %v334_v62 = vmin.f32 %v1871_v34, 0.0  ;;  %v335_v22 = vmin.f32 %v1883_v40, 0.0  ;;  %v1901_v50 = vadd.f32 %v1808_v61, %v137_v17 }
  0x6b   :  { %v1018_v58 = vpop.eup %1017  ;;  %v777_v35 = vadd.f32 %v713_v59, %v649_v41  ;;  %v584_v45 = vsel %vm264_vm5, %v1740_v26, %v912_v42  ;;  %1023 = vpow2.f32 %v439_v44  ;;  %v715_v26 = vld [vmem:[%s2326_s4 + $0x130] sm:$0xff]  ;;  %vm268_vm9 = vcmp.gt.f32.partialorder %v1811_v2, 0.0 }
  0x6c   :  { %v650_v52 = vmul.f32 %v1160_v25, %v584_v45  ;;  %v585_v53 = vsel %vm265_vm6, %v1743_v47, %v913_v6  ;;  %v914_v38 = vadd.f32 -1.0, %v1018_v58  ;;  %v441_v30 = vmul.f32 1.442695, %v334_v62 }
  0x6d   :  { %841 = vst [vmem:[%s2327_s5 + $0x120] sm:$0xff] %v777_v35  ;;  %v651_v60 = vmul.f32 %v1160_v25, %v585_v53  ;;  %v443_v16 = vmul.f32 1.442695, %v335_v22  ;;  %v336_v47 = vmin.f32 %v1901_v50, 0.0  ;;  %v138_v9 = vmul.f32 %v1816_v0, %v67_v21  ;;  %v719_v35 = vld [vmem:[%s2326_s4 + $0x150] sm:$0xff]  ;;  %v73_v21 = vld [vmem:[%s2322_s1 + $0x1a0] sm:$0xff] }
  0x6e   :  { %v778_v5 = vadd.f32 %v714_v20, %v650_v52  ;;  %v586_v10 = vsel %vm266_vm7, %v1770_v57, %v914_v38  ;;  %1025 = vpow2.f32 %v441_v30  ;;  %v139_v18 = vmul.f32 %v1816_v0, %v68_v1 }
  0x6f   :  { %v779_v43 = vadd.f32 %v715_v26, %v651_v60  ;;  %v652_v15 = vmul.f32 %v1160_v25, %v586_v10  ;;  %1027 = vpow2.f32 %v443_v16  ;;  %v445_v39 = vmul.f32 1.442695, %v336_v47  ;;  %v75_v10 = vld [vmem:[%s2322_s1 + $0x1b0] sm:$0xff] }
  0x70   :  { %v1020_v13 = vpop.eup %1019  ;;  %842 = vst [vmem:[%s2327_s5 + $0x128] sm:$0xff] %v778_v5  ;;  %v1943_v57 = vadd.f32 %v1808_v61, %v138_v9  ;;  %v140_v23 = vmul.f32 %v1816_v0, %v69_v3  ;;  %v141_v24 = vmul.f32 %v1816_v0, %v70_v4  ;;  %v142_v55 = vmul.f32 %v1816_v0, %v71_v14  ;;  %v720_v3 = vld [vmem:[%s2326_s4 + $0x158] sm:$0xff]  ;;  %v74_v5 = vld [vmem:[%s2322_s1 + $0x1a8] sm:$0xff]  ;;  %v721_v9 = vld [vmem:[%s2326_s4 + $0x160] sm:$0xff] }
  0x71   :  { %v1022_v19 = vpop.eup %1021  ;;  %843 = vst [vmem:[%s2327_s5 + $0x130] sm:$0xff] %v779_v43  ;;  %v780_v27 = vadd.f32 %v716_v7, %v652_v15  ;;  %v915_v28 = vadd.f32 -1.0, %v1020_v13  ;;  %1029 = vpow2.f32 %v445_v39  ;;  %v1954_v31 = vadd.f32 %v1808_v61, %v139_v18 }
  0x72   :  { %v916_v12 = vadd.f32 -1.0, %v1022_v19  ;;  %v337_v49 = vmin.f32 %v1943_v57, 0.0  ;;  %vm269_vm10 = vcmp.gt.f32.partialorder %v1848_v29, 0.0  ;;  %v1967_v48 = vadd.f32 %v1808_v61, %v140_v23  ;;  %v722_v23 = vld [vmem:[%s2326_s4 + $0x168] sm:$0xff] }
  0x73   :  { %844 = vst [vmem:[%s2327_s5 + $0x138] sm:$0xff] %v780_v27  ;;  %v587_v46 = vsel %vm267_vm8, %v1794_v54, %v915_v28  ;;  %v1970_v32 = vadd.f32 %v1808_v61, %v141_v24  ;;  %v718_v54 = vld [vmem:[%s2326_s4 + $0x148] sm:$0xff]  ;;  %v1980_v36 = vadd.f32 %v1808_v61, %v142_v55  ;;  %vm270_vm11 = vcmp.gt.f32.partialorder %v1871_v34, 0.0  ;;  %v77_v27 = vld [vmem:[%s2322_s1 + $0x1c0] sm:$0xff] }
  0x74   :  { %v653_v63 = vmul.f32 %v1160_v25, %v587_v46  ;;  %v588_v33 = vsel %vm268_vm9, %v1811_v2, %v916_v12  ;;  %v447_v8 = vmul.f32 1.442695, %v337_v49  ;;  %v338_v59 = vmin.f32 %v1954_v31, 0.0  ;;  %v72_v2 = vld [vmem:[%s2322_s1 + $0x198] sm:$0xff] }
  0x75   :  { %v1024_v37 = vpop.eup %1023  ;;  %v654_v51 = vmul.f32 %v1160_v25, %v588_v33  ;;  %v339_v17 = vmin.f32 %v1967_v48, 0.0  ;;  %vm271_vm12 = vcmp.gt.f32.partialorder %v1883_v40, 0.0  ;;  %v340_v62 = vmin.f32 %v1970_v32, 0.0 }
  0x76   :  { %v781_v11 = vadd.f32 %v717_v56, %v653_v63  ;;  %v917_v41 = vadd.f32 -1.0, %v1024_v37  ;;  %1031 = vpow2.f32 %v447_v8  ;;  %v449_v44 = vmul.f32 1.442695, %v338_v59 }
  0x77   :  { %v782_v42 = vadd.f32 %v718_v54, %v654_v51  ;;  %v451_v6 = vmul.f32 1.442695, %v339_v17  ;;  %vm272_vm13 = vcmp.gt.f32.partialorder %v1901_v50, 0.0  ;;  %v341_v45 = vmin.f32 %v1980_v36, 0.0 }
  0x78   :  { %v1026_v22 = vpop.eup %1025  ;;  %845 = vst [vmem:[%s2327_s5 + $0x140] sm:$0xff] %v781_v11  ;;  %v589_v58 = vsel %vm269_vm10, %v1848_v29, %v917_v41  ;;  %v143_v20 = vmul.f32 %v1816_v0, %v72_v2  ;;  %1033 = vpow2.f32 %v449_v44  ;;  %v453_v26 = vmul.f32 1.442695, %v340_v62  ;;  %v723_v2 = vld [vmem:[%s2326_s4 + $0x170] sm:$0xff] }
  0x79   :  { %v1028_v52 = vpop.eup %1027  ;;  %846 = vst [vmem:[%s2327_s5 + $0x148] sm:$0xff] %v782_v42  ;;  %v655_v29 = vmul.f32 %v1160_v25, %v589_v58  ;;  %v918_v53 = vadd.f32 -1.0, %v1026_v22  ;;  %1035 = vpow2.f32 %v451_v6  ;;  %v455_v30 = vmul.f32 1.442695, %v341_v45 }
  0x7a   :  { %v919_v38 = vadd.f32 -1.0, %v1028_v52  ;;  %v2011_v1 = vadd.f32 %v1808_v61, %v143_v20  ;;  %1037 = vpow2.f32 %v453_v26  ;;  %v144_v4 = vmul.f32 %v1816_v0, %v73_v21 }
  0x7b   :  { %v1030_v60 = vpop.eup %1029  ;;  %v783_v16 = vadd.f32 %v719_v35, %v655_v29  ;;  %v590_v47 = vsel %vm270_vm11, %v1871_v34, %v918_v53  ;;  %1039 = vpow2.f32 %v455_v30  ;;  %vm273_vm14 = vcmp.gt.f32.partialorder %v1943_v57, 0.0  ;;  %v724_v29 = vld [vmem:[%s2326_s4 + $0x178] sm:$0xff]  ;;  %v725_v30 = vld [vmem:[%s2326_s4 + $0x180] sm:$0xff] }
  0x7c   :  { %v656_v7 = vmul.f32 %v1160_v25, %v590_v47  ;;  %v591_v34 = vsel %vm271_vm12, %v1883_v40, %v919_v38  ;;  %v920_v14 = vadd.f32 -1.0, %v1030_v60  ;;  %v342_v15 = vmin.f32 %v2011_v1, 0.0  ;;  %v76_v40 = vld [vmem:[%s2322_s1 + $0x1b8] sm:$0xff]  ;;  %v726_v47 = vld [vmem:[%s2326_s4 + $0x188] sm:$0xff] }
  0x7d   :  { %847 = vst [vmem:[%s2327_s5 + $0x150] sm:$0xff] %v783_v16  ;;  %v657_v43 = vmul.f32 %v1160_v25, %v591_v34  ;;  %v2040_v39 = vadd.f32 %v1808_v61, %v144_v4  ;;  %v145_v24 = vmul.f32 %v1816_v0, %v74_v5  ;;  %v146_v19 = vmul.f32 %v1816_v0, %v75_v10  ;;  %v79_v4 = vld [vmem:[%s2322_s1 + $0x1d0] sm:$0xff]  ;;  %v80_v5 = vld [vmem:[%s2322_s1 + $0x1d8] sm:$0xff] }
  0x7e   :  { %v784_v13 = vadd.f32 %v720_v3, %v656_v7  ;;  %v592_v18 = vsel %vm272_vm13, %v1901_v50, %v920_v14  ;;  %vm274_vm15 = vcmp.gt.f32.partialorder %v1954_v31, 0.0  ;;  %v457_v12 = vmul.f32 1.442695, %v342_v15  ;;  %v727_v34 = vld [vmem:[%s2326_s4 + $0x190] sm:$0xff]  ;;  %v81_v14 = vld [vmem:[%s2322_s1 + $0x1e0] sm:$0xff] }
  0x7f   :  { %v785_v28 = vadd.f32 %v721_v9, %v657_v43  ;;  %v658_v55 = vmul.f32 %v1160_v25, %v592_v18  ;;  %v343_v50 = vmin.f32 %v2040_v39, 0.0  ;;  %v2063_v46 = vadd.f32 %v1808_v61, %v145_v24 }
  0x80   :  { %v1032_v49 = vpop.eup %1031  ;;  %848 = vst [vmem:[%s2327_s5 + $0x158] sm:$0xff] %v784_v13  ;;  %v2066_v56 = vadd.f32 %v1808_v61, %v146_v19  ;;  %v147_v63 = vmul.f32 %v1816_v0, %v76_v40  ;;  %1041 = vpow2.f32 %v457_v12  ;;  %v148_v8 = vmul.f32 %v1816_v0, %v77_v27  ;;  %v82_v19 = vld [vmem:[%s2322_s1 + $0x1e8] sm:$0xff] }
  0x81   :  { %849 = vst [vmem:[%s2327_s5 + $0x160] sm:$0xff] %v785_v28  ;;  %v786_v33 = vadd.f32 %v722_v23, %v658_v55  ;;  %v921_v54 = vadd.f32 -1.0, %v1032_v49  ;;  %vm275_vm0 = vcmp.gt.f32.partialorder %v1967_v48, 0.0  ;;  %vm276_vm1 = vcmp.gt.f32.partialorder %v1970_v32, 0.0 }
  0x82   :  { %v459_v37 = vmul.f32 1.442695, %v343_v50  ;;  %v344_v51 = vmin.f32 %v2063_v46, 0.0  ;;  %v1034_v59 = vpop.eup %1033  ;;  %vm277_vm2 = vcmp.gt.f32.partialorder %v1980_v36, 0.0  ;;  %v345_v11 = vmin.f32 %v2066_v56, 0.0 }
  0x83   :  { %850 = vst [vmem:[%s2327_s5 + $0x168] sm:$0xff] %v786_v33  ;;  %v593_v17 = vsel %vm273_vm14, %v1943_v57, %v921_v54  ;;  %v2088_v41 = vadd.f32 %v1808_v61, %v147_v63  ;;  %v1036_v42 = vpop.eup %1035  ;;  %v922_v6 = vadd.f32 -1.0, %v1034_v59  ;;  %v2093_v45 = vadd.f32 %v1808_v61, %v148_v8  ;;  %v728_v54 = vld [vmem:[%s2326_s4 + $0x198] sm:$0xff] }
  0x84   :  { %v659_v44 = vmul.f32 %v1160_v25, %v593_v17  ;;  %1043 = vpow2.f32 %v459_v37  ;;  %v461_v62 = vmul.f32 1.442695, %v344_v51  ;;  %v1038_v22 = vpop.eup %1037  ;;  %v923_v58 = vadd.f32 -1.0, %v1036_v42 }
  0x85   :  { %v463_v57 = vmul.f32 1.442695, %v345_v11  ;;  %v346_v35 = vmin.f32 %v2088_v41, 0.0  ;;  %v1040_v20 = vpop.eup %1039  ;;  %v594_v52 = vsel %vm274_vm15, %v1954_v31, %v922_v6  ;;  %v924_v53 = vadd.f32 -1.0, %v1038_v22  ;;  %v78_v31 = vld [vmem:[%s2322_s1 + $0x1c8] sm:$0xff]  ;;  %v729_v22 = vld [vmem:[%s2326_s4 + $0x1a0] sm:$0xff] }
  0x86   :  { %v787_v21 = vadd.f32 %v723_v2, %v659_v44  ;;  %1045 = vpow2.f32 %v461_v62  ;;  %v660_v26 = vmul.f32 %v1160_v25, %v594_v52  ;;  %v595_v38 = vsel %vm275_vm0, %v1967_v48, %v923_v58 }
  0x87   :  { %v925_v60 = vadd.f32 -1.0, %v1040_v20  ;;  %1047 = vpow2.f32 %v463_v57  ;;  %v661_v16 = vmul.f32 %v1160_v25, %v595_v38  ;;  %v596_v48 = vsel %vm276_vm1, %v1970_v32, %v924_v53  ;;  %v84_v38 = vld [vmem:[%s2322_s1 + $0x1f8] sm:$0xff] }
  0x88   :  { %851 = vst [vmem:[%s2327_s5 + $0x170] sm:$0xff] %v787_v21  ;;  %vm278_vm3 = vcmp.gt.f32.partialorder %v2011_v1, 0.0  ;;  %v465_v3 = vmul.f32 1.442695, %v346_v35  ;;  %v788_v10 = vadd.f32 %v724_v29, %v660_v26  ;;  %v662_v7 = vmul.f32 %v1160_v25, %v596_v48  ;;  %v83_v26 = vld [vmem:[%s2322_s1 + $0x1f0] sm:$0xff] }
  0x89   :  { %v597_v32 = vsel %vm277_vm2, %v1980_v36, %v925_v60  ;;  %v347_v9 = vmin.f32 %v2093_v45, 0.0  ;;  %v789_v43 = vadd.f32 %v725_v30, %v661_v16  ;;  %v149_v40 = vmul.f32 %v1816_v0, %v78_v31  ;;  %v731_v16 = vld [vmem:[%s2326_s4 + $0x1b0] sm:$0xff] }
  0x8a   :  { %v663_v15 = vmul.f32 %v1160_v25, %v597_v32  ;;  %1049 = vpow2.f32 %v465_v3  ;;  %v1042_v13 = vpop.eup %1041  ;;  %852 = vst [vmem:[%s2327_s5 + $0x178] sm:$0xff] %v788_v10  ;;  %v790_v36 = vadd.f32 %v726_v47, %v662_v7  ;;  %v150_v23 = vmul.f32 %v1816_v0, %v79_v4 }
  0x8b   :  { %v467_v18 = vmul.f32 1.442695, %v347_v9  ;;  %v151_v24 = vmul.f32 %v1816_v0, %v80_v5  ;;  %853 = vst [vmem:[%s2327_s5 + $0x180] sm:$0xff] %v789_v43  ;;  %v926_v28 = vadd.f32 -1.0, %v1042_v13  ;;  %v2153_v55 = vadd.f32 %v1808_v61, %v149_v40  ;;  %v732_v9 = vld [vmem:[%s2326_s4 + $0x1b8] sm:$0xff] }
  0x8c   :  { %v791_v27 = vadd.f32 %v727_v34, %v663_v15  ;;  %v152_v12 = vmul.f32 %v1816_v0, %v81_v14  ;;  %854 = vst [vmem:[%s2327_s5 + $0x188] sm:$0xff] %v790_v36  ;;  %vm279_vm4 = vcmp.gt.f32.partialorder %v2040_v39, 0.0  ;;  %v2161_v49 = vadd.f32 %v1808_v61, %v150_v23  ;;  %v733_v36 = vld [vmem:[%s2326_s4 + $0x1c0] sm:$0xff] }
  0x8d   :  { %1051 = vpow2.f32 %v467_v18  ;;  %v2164_v50 = vadd.f32 %v1808_v61, %v151_v24  ;;  %v598_v33 = vsel %vm278_vm3, %v2011_v1, %v926_v28  ;;  %vm280_vm5 = vcmp.gt.f32.partialorder %v2063_v46, 0.0 }
  0x8e   :  { %v1044_v63 = vpop.eup %1043  ;;  %855 = vst [vmem:[%s2327_s5 + $0x190] sm:$0xff] %v791_v27  ;;  %v348_v8 = vmin.f32 %v2153_v55, 0.0  ;;  %v153_v37 = vmul.f32 %v1816_v0, %v82_v19  ;;  %v664_v51 = vmul.f32 %v1160_v25, %v598_v33  ;;  %v349_v17 = vmin.f32 %v2161_v49, 0.0 }
  0x8f   :  { %v927_v59 = vadd.f32 -1.0, %v1044_v63  ;;  %v2181_v2 = vadd.f32 %v1808_v61, %v152_v12  ;;  %vm281_vm6 = vcmp.gt.f32.partialorder %v2066_v56, 0.0  ;;  %vm282_vm7 = vcmp.gt.f32.partialorder %v2088_v41, 0.0 }
  0x90   :  { %v1046_v11 = vpop.eup %1045  ;;  %v469_v1 = vmul.f32 1.442695, %v348_v8  ;;  %v350_v42 = vmin.f32 %v2164_v50, 0.0  ;;  %v792_v6 = vadd.f32 %v728_v54, %v664_v51  ;;  %v471_v57 = vmul.f32 1.442695, %v349_v17  ;;  %v734_v8 = vld [vmem:[%s2326_s4 + $0x1c8] sm:$0xff] }
  0x91   :  { %v1048_v44 = vpop.eup %1047  ;;  %v599_v62 = vsel %vm279_vm4, %v2040_v39, %v927_v59  ;;  %v928_v58 = vadd.f32 -1.0, %v1046_v11  ;;  %v730_v39 = vld [vmem:[%s2326_s4 + $0x1a8] sm:$0xff]  ;;  %v351_v29 = vmin.f32 %v2181_v2, 0.0  ;;  %v2204_v53 = vadd.f32 %v1808_v61, %v153_v37  ;;  %v735_v17 = vld [vmem:[%s2326_s4 + $0x1d0] sm:$0xff] }
  0x92   :  { %v665_v35 = vmul.f32 %v1160_v25, %v599_v62  ;;  %v929_v20 = vadd.f32 -1.0, %v1048_v44  ;;  %1053 = vpow2.f32 %v469_v1  ;;  %v473_v21 = vmul.f32 1.442695, %v350_v42  ;;  %856 = vst [vmem:[%s2327_s5 + $0x198] sm:$0xff] %v792_v6  ;;  %v736_v42 = vld [vmem:[%s2326_s4 + $0x1d8] sm:$0xff] }
  0x93   :  { %v600_v52 = vsel %vm280_vm5, %v2063_v46, %v928_v58  ;;  %1055 = vpow2.f32 %v471_v57  ;;  %v475_v3 = vmul.f32 1.442695, %v351_v29  ;;  %v352_v5 = vmin.f32 %v2204_v53, 0.0 }
  0x94   :  { %v1050_v30 = vpop.eup %1049  ;;  %v793_v46 = vadd.f32 %v729_v22, %v665_v35  ;;  %v666_v60 = vmul.f32 %v1160_v25, %v600_v52  ;;  %v601_v31 = vsel %vm281_vm6, %v2066_v56, %v929_v20  ;;  %1057 = vpow2.f32 %v473_v21  ;;  %v738_v52 = vld [vmem:[%s2326_s4 + $0x1e8] sm:$0xff] }
  0x95   :  { %v667_v48 = vmul.f32 %v1160_v25, %v601_v31  ;;  %v930_v47 = vadd.f32 -1.0, %v1050_v30  ;;  %v154_v10 = vmul.f32 %v1816_v0, %v83_v26  ;;  %v155_v56 = vmul.f32 %v1816_v0, %v84_v38 }
  0x96   :  { %857 = vst [vmem:[%s2327_s5 + $0x1a0] sm:$0xff] %v793_v46  ;;  %v794_v4 = vadd.f32 %v730_v39, %v666_v60  ;;  %vm283_vm8 = vcmp.gt.f32.partialorder %v2093_v45, 0.0  ;;  %1059 = vpow2.f32 %v475_v3  ;;  %v477_v43 = vmul.f32 1.442695, %v352_v5  ;;  %v739_v60 = vld [vmem:[%s2326_s4 + $0x1f0] sm:$0xff] }
  0x97   :  { %v1052_v7 = vpop.eup %1051  ;;  %v795_v32 = vadd.f32 %v731_v16, %v667_v48  ;;  %v602_v34 = vsel %vm282_vm7, %v2088_v41, %v930_v47  ;;  %v2238_v15 = vadd.f32 %v1808_v61, %v154_v10  ;;  %v2244_v41 = vadd.f32 %v1808_v61, %v155_v56  ;;  %v740_v48 = vld [vmem:[%s2326_s4 + $0x1f8] sm:$0xff] }
  0x98   :  { %858 = vst [vmem:[%s2327_s5 + $0x1a8] sm:$0xff] %v794_v4  ;;  %v668_v14 = vmul.f32 %v1160_v25, %v602_v34  ;;  %v931_v0 = vadd.f32 -1.0, %v1052_v7  ;;  %1061 = vpow2.f32 %v477_v43  ;;  %vm284_vm9 = vcmp.gt.f32.partialorder %v2153_v55, 0.0 }
  0x99   :  { %859 = vst [vmem:[%s2327_s5 + $0x1b0] sm:$0xff] %v795_v32  ;;  %v353_v23 = vmin.f32 %v2238_v15, 0.0  ;;  %v354_v24 = vmin.f32 %v2244_v41, 0.0  ;;  %vm285_vm10 = vcmp.gt.f32.partialorder %v2161_v49, 0.0  ;;  %vm286_vm11 = vcmp.gt.f32.partialorder %v2164_v50, 0.0 }
  0x9a   :  { %v796_v40 = vadd.f32 %v732_v9, %v668_v14  ;;  %v603_v13 = vsel %vm283_vm8, %v2093_v45, %v931_v0  ;;  %vm287_vm12 = vcmp.gt.f32.partialorder %v2181_v2, 0.0  ;;  %vm288_vm13 = vcmp.gt.f32.partialorder %v2204_v53, 0.0 }
  0x9b   :  { %v669_v18 = vmul.f32 %v1160_v25, %v603_v13  ;;  %v479_v28 = vmul.f32 1.442695, %v353_v23  ;;  %v481_v12 = vmul.f32 1.442695, %v354_v24  ;;  %vm289_vm14 = vcmp.gt.f32.partialorder %v2238_v15, 0.0 }
  0x9c   :  { %v1054_v19 = vpop.eup %1053  ;;  %860 = vst [vmem:[%s2327_s5 + $0x1b8] sm:$0xff] %v796_v40  ;;  %vm290_vm15 = vcmp.gt.f32.partialorder %v2244_v41, 0.0 }
  0x9d   :  { %v1056_v61 = vpop.eup %1055  ;;  %v797_v45 = vadd.f32 %v733_v36, %v669_v18  ;;  %v932_v27 = vadd.f32 -1.0, %v1054_v19  ;;  %1063 = vpow2.f32 %v479_v28 }
  0x9e   :  { %v1058_v63 = vpop.eup %1057  ;;  %v933_v33 = vadd.f32 -1.0, %v1056_v61  ;;  %1065 = vpow2.f32 %v481_v12 }
  0x9f   :  { %861 = vst [vmem:[%s2327_s5 + $0x1c0] sm:$0xff] %v797_v45  ;;  %v604_v54 = vsel %vm284_vm9, %v2153_v55, %v932_v27  ;;  %v934_v37 = vadd.f32 -1.0, %v1058_v63 }
  0xa0   :  { %v670_v51 = vmul.f32 %v1160_v25, %v604_v54  ;;  %v605_v59 = vsel %vm285_vm10, %v2161_v49, %v933_v33  ;;  %v1060_v11 = vpop.eup %1059 }
  0xa1   :  { %v671_v1 = vmul.f32 %v1160_v25, %v605_v59  ;;  %v606_v55 = vsel %vm286_vm11, %v2164_v50, %v934_v37  ;;  %v935_v49 = vadd.f32 -1.0, %v1060_v11  ;;  %v737_v50 = vld [vmem:[%s2326_s4 + $0x1e0] sm:$0xff] }
  0xa2   :  { %v798_v44 = vadd.f32 %v734_v8, %v670_v51  ;;  %v672_v6 = vmul.f32 %v1160_v25, %v606_v55  ;;  %v1062_v22 = vpop.eup %1061 }
  0xa3   :  { %v799_v62 = vadd.f32 %v735_v17, %v671_v1  ;;  %v607_v57 = vsel %vm287_vm12, %v2181_v2, %v935_v49  ;;  %v936_v20 = vadd.f32 -1.0, %v1062_v22 }
  0xa4   :  { %862 = vst [vmem:[%s2327_s5 + $0x1c8] sm:$0xff] %v798_v44  ;;  %v800_v58 = vadd.f32 %v736_v42, %v672_v6  ;;  %v673_v35 = vmul.f32 %v1160_v25, %v607_v57 }
  0xa5   :  { %863 = vst [vmem:[%s2327_s5 + $0x1d0] sm:$0xff] %v799_v62  ;;  %v608_v2 = vsel %vm288_vm13, %v2204_v53, %v936_v20 }
  0xa6   :  { %864 = vst [vmem:[%s2327_s5 + $0x1d8] sm:$0xff] %v800_v58  ;;  %v801_v21 = vadd.f32 %v737_v50, %v673_v35  ;;  %v674_v39 = vmul.f32 %v1160_v25, %v608_v2 }
  0xa7   :  { %v1064_v29 = vpop.eup %1063 }
  0xa8   :  { %865 = vst [vmem:[%s2327_s5 + $0x1e0] sm:$0xff] %v801_v21  ;;  %v1066_v26 = vpop.eup %1065  ;;  %v802_v38 = vadd.f32 %v738_v52, %v674_v39  ;;  %v937_v30 = vadd.f32 -1.0, %v1064_v29 }
  0xa9   :  { %v938_v46 = vadd.f32 -1.0, %v1066_v26 }
  0xaa   :  { %866 = vst [vmem:[%s2327_s5 + $0x1e8] sm:$0xff] %v802_v38  ;;  %v609_v53 = vsel %vm289_vm14, %v2238_v15, %v937_v30 }
  0xab   :  { %v675_v31 = vmul.f32 %v1160_v25, %v609_v53  ;;  %v610_v16 = vsel %vm290_vm15, %v2244_v41, %v938_v46 }
  0xac   :  { %v676_v47 = vmul.f32 %v1160_v25, %v610_v16 }
  0xad   :  { %v803_v3 = vadd.f32 %v739_v60, %v675_v31 }
  0xae   :  { %v804_v4 = vadd.f32 %v740_v48, %v676_v47 }
  0xaf   :  { %867 = vst [vmem:[%s2327_s5 + $0x1f0] sm:$0xff] %v803_v3 }
  0xb0   :  { %868 = vst [vmem:[%s2327_s5 + $0x1f8] sm:$0xff] %v804_v4 }

// kernel: rezero_forward.3
= control target key start
LH: loop header
LB: loop body
LE: loop exit
PB: predicated region body
PF: predicated region fallthrough
CT: control target
= control target key end

     0   :  { %s6873_s15 = smov 0   ;;  %s8371_s0 = inlined_call_operand.vmem [shape: f32[2,16,16,128], index: 0, kind: input, shape index: {}]   ;;  %s8372_s1 = inlined_call_operand.vmem [shape: bf16[1152,128], index: 1, kind: input, shape index: {}]   ;;  %s8373_s2 = inlined_call_operand.vmem [shape: f32[2,16,16,128], index: 2, kind: output, shape index: {0}]   ;;  %s8374_s3 = inlined_call_operand.vmem [shape: f32[2,1,128], index: 3, kind: output, shape index: {1}]   ;;  %s8375_s4 = inlined_call_operand.vmem [shape: f32[2,1,128], index: 4, kind: output, shape index: {2}]  }
   0x1 LB: > { %s5769_s16 = sadd.s32 4294967295, %s6845_s15   ;;  %p5773_p0 = scmp.ge.s32.totalorder %s6845_s15, 1  ;;  %s6845_s15 = sphi %s6873_s15, %s15_s15  }
   0x2   : > { %p167_p1 = scmp.lt.s32.totalorder %s6845_s15, 3 }
   0x4   : > { %p168_p2 = pnand %p5773_p0, %p167_p1 }
   0x6   : > { %171 = sbr.rel (%p168_p2) target bundleno = 691 (0x2b3), region = 28 }
   0xd   : > { %v6719_v0 = vld [vmem:[%s8372_s1 + $0x40] sm:$0xff]   ;;  %v6847_v2 = vmov 0   ;;  %v6721_v3 = vld [vmem:[%s8372_s1 + $0x48] sm:$0xff]   ;;  %p199_p3 = scmp.lt.s32.totalorder %s5769_s16, 1  ;;  %v6723_v5 = vld [vmem:[%s8372_s1 + $0x50] sm:$0xff]   ;;  %vm220_vm3 = vcmask 1040384  }
   0xe   : > { %v6720_v1 = vld [vmem:[%s8372_s1] sm:$0xff]   ;;  %218 = vst [vmem:[#allocation2 + $0x8] sm:$0xf] %v6847_v2  ;;  %219 = vst [vmem:[#allocation2 + $0xc] sm:$0xf] %v6847_v2  ;;  %6174 = vmatprep.subr.bf16.mxu0 %v6719_v0  ;;  %6694 = vmatprep.subr.bf16.mxu1 %v6719_v0  ;;  %v6722_v4 = vld [vmem:[%s8372_s1 + $0x8] sm:$0xff]  }
   0xf   : > { %217 = vst [vmem:[#allocation2 + $0x4] sm:$0xf] %v6847_v2  ;;  %227 = vst [vmem:[#allocation2 + $0x18] sm:$0xf] %v6847_v2  ;;  %6175 = vmatpush3.bf16.msra.mxu0 %v6720_v1  ;;  %6702 = vmatpush3.bf16.msra.mxu1 %v6720_v1  ;;  %v6724_v6 = vld [vmem:[%s8372_s1 + $0x10] sm:$0xff]   ;;  %s8492_s16 = smov (!%p199_p3, %s5769_s16), 1 }
  0x10   : > { %228 = vst [vmem:[#allocation2 + $0x1c] sm:$0xf] %v6847_v2  ;;  %229 = vst [vmem:[#allocation2 + $0x20] sm:$0xf] %v6847_v2  ;;  %6176 = vmatprep.subr.bf16.mxu0 %v6721_v3  ;;  %6695 = vmatprep.subr.bf16.mxu1 %v6721_v3  ;;  %v6725_v7 = vld [vmem:[%s8372_s1 + $0x58] sm:$0xff]   ;;  %s6092_s7 = sshll.u32 %s8492_s16, 8  ;;  %s211_s9 = scalar_lea.vmem %s8374_s3, %s8492_s16 }
  0x11   : > { %234 = vst [vmem:[#allocation2 + $0x2c] sm:$0xf] %v6847_v2  ;;  %235 = vst [vmem:[#allocation2 + $0x30] sm:$0xf] %v6847_v2  ;;  %v6726_v8 = vld [vmem:[%s8372_s1 + $0x18] sm:$0xff]   ;;  %v6727_v9 = vld [vmem:[%s8372_s1 + $0x60] sm:$0xff]   ;;  %s6923_s14 = scalar_lea.vmem %s8371_s0, %s6092_s7  ;;  %s8259_s6 = scalar_lea.vmem %s8373_s2, %s6092_s7 }
  0x12   : > { %236 = vst [vmem:[#allocation2 + $0x34] sm:$0xf] %v6847_v2  ;;  %241 = vst [vmem:[#allocation2 + $0x40] sm:$0xf] %v6847_v2  ;;  %v6728_v10 = vld [vmem:[%s8372_s1 + $0x20] sm:$0xff]   ;;  %v6729_v11 = vld [vmem:[%s8372_s1 + $0x68] sm:$0xff]   ;;  %s214_s12 = scalar_lea.vmem %s8375_s4, %s8492_s16 }
  0x13   : > { %242 = vst [vmem:[#allocation2 + $0x44] sm:$0xf] %v6847_v2  ;;  %243 = vst [vmem:[#allocation2 + $0x48] sm:$0xf] %v6847_v2  ;;  %6177 = vmatpush3.bf16.msra.mxu0 %v6722_v4  ;;  %6703 = vmatpush3.bf16.msra.mxu1 %v6722_v4  ;;  %v367_v13 = vld [vmem:[%s6923_s14 + $0xb0] sm:$0xff]  ;;  %v368_v14 = vld [vmem:[%s6923_s14 + $0xb8] sm:$0xff] }
  0x14   : > { %248 = vst [vmem:[#allocation2 + $0x54] sm:$0xf] %v6847_v2  ;;  %249 = vst [vmem:[#allocation2 + $0x58] sm:$0xf] %v6847_v2  ;;  %6178 = vmatprep.subr.bf16.mxu0 %v6723_v5  ;;  %6696 = vmatprep.subr.bf16.mxu1 %v6723_v5  ;;  %vm221_vm0 = vsmask.f32 256  ;;  %v6154_v16 = vpack.c.bf16 %v368_v14, %v367_v13 }
  0x15   : > { %250 = vst [vmem:[#allocation2 + $0x5c] sm:$0xf] %v6847_v2  ;;  %255 = vst [vmem:[#allocation2 + $0x68] sm:$0xf] %v6847_v2  ;;  %v6735_v12 = vld [vmem:[#allocation2 + $0x8] sm:$0xff]   ;;  %v6731_v24 = vld [vmem:[%s8372_s1 + $0x70] sm:$0xff]  }
  0x16   : > { %256 = vst [vmem:[#allocation2 + $0x6c] sm:$0xf] %v6847_v2  ;;  %257 = vst [vmem:[#allocation2 + $0x70] sm:$0xf] %v6847_v2  ;;  %v538_v15 = vld [vmem:[#allocation2 + $0x4] sm:$0x8]  ;;  %4704 = vmatprep.mubr.bf16.mxu0 %v6735_v12 }
  0x17   : > { %262 = vst [vmem:[#allocation2 + $0x7c] sm:$0xf] %v6847_v2  ;;  %263 = vst [vmem:[#allocation2 + $0x80] sm:$0xf] %v6847_v2  ;;  %6179 = vmatpush3.bf16.msra.mxu0 %v6724_v6  ;;  %6704 = vmatpush3.bf16.msra.mxu1 %v6724_v6  ;;  %v539_v17 = vld [vmem:[#allocation2 + $0x8] sm:$0xf] }
  0x18   : > { %264 = vst [vmem:[#allocation2 + $0x84] sm:$0xf] %v6847_v2  ;;  %269 = vst [vmem:[#allocation2 + $0x90] sm:$0xf] %v6847_v2  ;;  %6180 = vmatprep.subr.bf16.mxu0 %v6725_v7  ;;  %6697 = vmatprep.subr.bf16.mxu1 %v6725_v7  ;;  %v540_v18 = vld [vmem:[#allocation2 + $0xc] sm:$0xf] }
  0x19   : > { %270 = vst [vmem:[#allocation2 + $0x94] sm:$0xf] %v6847_v2  ;;  %271 = vst [vmem:[#allocation2 + $0x98] sm:$0xf] %v6847_v2  ;;  %vm586_vm1 = vsmask.f32 4368 }
  0x1a   : > { %276 = vst [vmem:[#allocation2 + $0xa4] sm:$0xf] %v6847_v2  ;;  %277 = vst [vmem:[#allocation2 + $0xa8] sm:$0xf] %v6847_v2  ;;  %v6730_v19 = vld [vmem:[%s8372_s1 + $0x28] sm:$0xff]   ;;  %v589_v20 = vshrl.u32 %v538_v15, 16 }
  0x1b   : > { %278 = vst [vmem:[#allocation2 + $0xac] sm:$0xf] %v6847_v2  ;;  %283 = vst [vmem:[#allocation2 + $0xb8] sm:$0xf] %v6847_v2  ;;  %6181 = vmatpush3.bf16.msra.mxu0 %v6726_v8  ;;  %6705 = vmatpush3.bf16.msra.mxu1 %v6726_v8  ;;  %v594_v21 = vshrl.u32 %v539_v17, 16  ;;  %v597_v22 = vshll.u32 %v539_v17, 16 }
  0x1c   : > { %284 = vst [vmem:[#allocation2 + $0xbc] sm:$0xf] %v6847_v2  ;;  %285 = vst [vmem:[#allocation2 + $0xc0] sm:$0xf] %v6847_v2  ;;  %6182 = vmatprep.subr.bf16.mxu0 %v6727_v9  ;;  %6698 = vmatprep.subr.bf16.mxu1 %v6727_v9  ;;  %v603_v23 = vshrl.u32 %v540_v18, 16  ;;  %v606_v25 = vshll.u32 %v540_v18, 16 }
  0x1d   : > { %290 = vst [vmem:[#allocation2 + $0xcc] sm:$0xf] %v6847_v2  ;;  %291 = vst [vmem:[#allocation2 + $0xd0] sm:$0xf] %v6847_v2  ;;  %v6732_v26 = vld [vmem:[%s8372_s1 + $0x30] sm:$0xff]   ;;  %v596_v27 = vrot.slane %v594_v21, 7 }
  0x1e   : > { %292 = vst [vmem:[#allocation2 + $0xd4] sm:$0xf] %v6847_v2  ;;  %297 = vst [vmem:[#allocation2 + $0xe0] sm:$0xf] %v6847_v2  ;;  %v605_v28 = vrot.slane %v603_v23, 7  ;;  %v6733_v29 = vld [vmem:[%s8372_s1 + $0x78] sm:$0xff]  }
  0x1f   : > { %298 = vst [vmem:[#allocation2 + $0xe4] sm:$0xf] %v6847_v2  ;;  %299 = vst [vmem:[#allocation2 + $0xe8] sm:$0xf] %v6847_v2  ;;  %6183 = vmatpush3.bf16.msra.mxu0 %v6728_v10  ;;  %6706 = vmatpush3.bf16.msra.mxu1 %v6728_v10  ;;  %v5810_v31 = vrot.slane %v589_v20, 11  ;;  %v599_v32 = vor.u32 %v597_v22, %v596_v27  ;;  %v601_v33 = vrot.slane %v596_v27, 4 }
  0x20   : > { %304 = vst [vmem:[#allocation2 + $0xf4] sm:$0xf] %v6847_v2  ;;  %305 = vst [vmem:[#allocation2 + $0xf8] sm:$0xf] %v6847_v2  ;;  %6184 = vmatprep.subr.bf16.mxu0 %v6729_v11  ;;  %6699 = vmatprep.subr.bf16.mxu1 %v6729_v11  ;;  %v608_v34 = vor.u32 %v606_v25, %v605_v28  ;;  %v6734_v36 = vld [vmem:[%s8372_s1 + $0x38] sm:$0xff]   ;;  %v6737_v37 = vld [vmem:[%s8372_s1 + $0xc0] sm:$0xff]  }
  0x21   : > { %306 = vst [vmem:[#allocation2 + $0xfc] sm:$0xf] %v6847_v2  ;;  %311 = vst [vmem:[#allocation2 + $0x108] sm:$0xf] %v6847_v2  ;;  %v6738_v38 = vld [vmem:[%s8372_s1 + $0x140] sm:$0xff]   ;;  %v346_v47 = vld [vmem:[%s6923_s14 + $0x8] sm:$0xff] }
  0x22   : > { %312 = vst [vmem:[#allocation2 + $0x10c] sm:$0xf] %v6847_v2  ;;  %313 = vst [vmem:[#allocation2 + $0x110] sm:$0xf] %v6847_v2  ;;  %v345_v39 = vld [vmem:[%s6923_s14] sm:$0xff]  ;;  %v370_v53 = vld [vmem:[%s6923_s14 + $0xc8] sm:$0xff]  ;;  %v6095_v55 = vpack.c.bf16 %v346_v47, %v346_v47 }
  0x23   : > { %318 = vst [vmem:[#allocation2 + $0x11c] sm:$0xf] %v6847_v2  ;;  %319 = vst [vmem:[#allocation2 + $0x120] sm:$0xf] %v6847_v2  ;;  %6185 = vmatpush3.bf16.msra.mxu0 %v6730_v19  ;;  %6707 = vmatpush3.bf16.msra.mxu1 %v6730_v19  ;;  %v6094_v44 = vpack.c.bf16 %v345_v39, %v345_v39  ;;  %v369_v52 = vld [vmem:[%s6923_s14 + $0xc0] sm:$0xff]  ;;  %v6119_v57 = vpack.c.bf16 %v370_v53, %v370_v53  ;;  %v6748_v4 = vld [vmem:[%s8372_s1 + $0x148] sm:$0xff]  }
  0x24   : > { %320 = vst [vmem:[#allocation2 + $0x124] sm:$0xf] %v6847_v2  ;;  %325 = vst [vmem:[#allocation2 + $0x130] sm:$0xf] %v6847_v2  ;;  %6186 = vmatprep.subr.bf16.mxu0 %v6731_v24  ;;  %6700 = vmatprep.subr.bf16.mxu1 %v6731_v24  ;;  %v6118_v56 = vpack.c.bf16 %v369_v52, %v369_v52  ;;  %v6740_v61 = vld [vmem:[%s8372_s1 + $0x100] sm:$0xff]   ;;  %v6741_v8 = vld [vmem:[%s8372_s1 + $0xc8] sm:$0xff]  }
  0x25   : > { %326 = vst [vmem:[#allocation2 + $0x134] sm:$0xf] %v6847_v2  ;;  %327 = vst [vmem:[#allocation2 + $0x138] sm:$0xf] %v6847_v2  ;;  %v541_v62 = vld [vmem:[#allocation2 + $0x18] sm:$0x8] }
  0x26   : > { %332 = vst [vmem:[#allocation2 + $0x144] sm:$0xf] %v6847_v2  ;;  %333 = vst [vmem:[#allocation2 + $0x148] sm:$0xf] %v6847_v2  ;;  %v611_v10 = vshrl.u32 %v541_v62, 16  ;;  %v6742_v11 = vld [vmem:[%s8372_s1 + $0x88] sm:$0xff]  }
  0x27   : > { %334 = vst [vmem:[#allocation2 + $0x14c] sm:$0xf] %v6847_v2  ;;  %339 = vst [vmem:[#allocation2 + $0x158] sm:$0xf] %v6847_v2  ;;  %v574_v35 = vld [vmem:[#allocation2 + $0xf4] sm:$0x8]  ;;  %6187 = vmatpush3.bf16.msra.mxu0 %v6732_v26  ;;  %6708 = vmatpush3.bf16.msra.mxu1 %v6732_v26 }
  0x28   : > { %340 = vst [vmem:[#allocation2 + $0x15c] sm:$0xf] %v6847_v2  ;;  %341 = vst [vmem:[#allocation2 + $0x160] sm:$0xf] %v6847_v2  ;;  %v853_v43 = vshrl.u32 %v574_v35, 16  ;;  %6188 = vmatprep.subr.bf16.mxu0 %v6733_v29  ;;  %6701 = vmatprep.subr.bf16.mxu1 %v6733_v29  ;;  %v6739_v2 = vld [vmem:[%s8372_s1 + $0x80] sm:$0xff]  }
  0x29   : > { %6171 = vst [vmem:[#allocation2 + $0xf8] sm:$0xff] %v6154_v16   ;;  %vm6944_vm2 = vmor %vm221_vm0, %vm586_vm1  ;;  %v577_v3 = vld [vmem:[#allocation2 + $0x108] sm:$0x8]  ;;  %v6745_v15 = vld [vmem:[%s8372_s1 + $0xd0] sm:$0xff]   ;;  %v5811_v24 = vrot.slane %v611_v10, 11 }
  0x2a   : > { %v600_v41 = vsel %vm6944_vm2, %v5810_v31, %v599_v32  ;;  %v609_v42 = vsel %vm6944_vm2, %v601_v33, %v608_v34  ;;  %506 = vst [vmem:[#allocation2 + $0x1c] sm:$0xf] %v6094_v44  ;;  %v5822_v58 = vrot.slane %v853_v43, 11  ;;  %507 = vst [vmem:[#allocation2 + $0x20] sm:$0xf] %v6095_v55  ;;  %v875_v14 = vshrl.u32 %v577_v3, 16 }
  0x2b   : > { %v5826_v54 = vcombine.low %v600_v41, %v609_v42  ;;  %6189 = vmatpush3.bf16.msra.mxu0 %v6734_v36  ;;  %6709 = vmatpush3.bf16.msra.mxu1 %v6734_v36  ;;  %530 = vst [vmem:[#allocation2 + $0x10c] sm:$0xf] %v6118_v56  ;;  %531 = vst [vmem:[#allocation2 + $0x110] sm:$0xf] %v6119_v57  ;;  %v6750_v16 = vld [vmem:[%s8372_s1 + $0x108] sm:$0xff]   ;;  %v347_v17 = vld [vmem:[%s6923_s14 + $0x10] sm:$0xff] }
  0x2c   : > { %6286 = vmatprep.subr.bf16.mxu1 %v6737_v37  ;;  %6398 = vmatprep.subr.bf16.mxu0 %v6738_v38  ;;  %v348_v18 = vld [vmem:[%s6923_s14 + $0x18] sm:$0xff]  ;;  %v6746_v29 = vld [vmem:[%s8372_s1 + $0x90] sm:$0xff]   ;;  %v544_v41 = vld [vmem:[#allocation2 + $0x2c] sm:$0x8]  ;;  %v5823_v42 = vrot.slane %v875_v14, 11 }
  0x2d   : > { %v6129_v21 = vpack.c.bf16 %v348_v18, %v347_v17  ;;  %v371_v31 = vld [vmem:[%s6923_s14 + $0xd0] sm:$0xff]  ;;  %v6747_v35 = vld [vmem:[%s8372_s1 + $0xd8] sm:$0xff]   ;;  %v6753_v55 = vld [vmem:[%s8372_s1 + $0xe0] sm:$0xff]   ;;  %vm1212_vm4 = vsmask.f32 3328 }
  0x2e   : > { %4705 = vmatmul.mubr.bf16.vlgmr.msra.gmra.mrb[0].mxu0 %v5826_v54  ;;  %v372_v36 = vld [vmem:[%s6923_s14 + $0xd8] sm:$0xff]  ;;  %v633_v54 = vshrl.u32 %v544_v41, 16  ;;  %v583_v18 = vld [vmem:[#allocation2 + $0x130] sm:$0x8]  ;;  %vm1213_vm5 = vsmask.f32 7440  ;;  %vm7064_vm6 = vmand %vm220_vm3, %vm221_vm0 }
  0x2f   : > { %6399 = vmatpush3.bf16.msra.mxu0 %v6740_v61  ;;  %6166 = vst [vmem:[#allocation2 + $0x30] sm:$0xff] %v6129_v21   ;;  %v6159_v44 = vpack.c.bf16 %v372_v36, %v371_v31  ;;  %v6759_v36 = vld [vmem:[%s8372_s1 + $0xf0] sm:$0xff]   ;;  %vm7087_vm7 = vmor %vm1212_vm4, %vm1213_vm5 }
  0x30   : > { %v6736_v40 = vld [vmem:[#allocation2 + $0xf8] sm:$0xff]   ;;  %6400 = vmatprep.subr.bf16.mxu0 %v6748_v4  ;;  %v6755_v4 = vld [vmem:[%s8372_s1 + $0xe8] sm:$0xff]   ;;  %v6761_v41 = vld [vmem:[%s8372_s1 + $0xb0] sm:$0xff]  }
  0x31   : > { %v575_v45 = vld [vmem:[#allocation2 + $0xf8] sm:$0xf]  ;;  %v576_v46 = vld [vmem:[#allocation2 + $0xfc] sm:$0xf]  ;;  %4800 = vmatprep.mubr.bf16.mxu1 %v6736_v40  ;;  %v543_v23 = vld [vmem:[#allocation2 + $0x20] sm:$0xf] }
  0x32   : > { %v858_v48 = vshrl.u32 %v575_v45, 16  ;;  %v861_v49 = vshll.u32 %v575_v45, 16  ;;  %v867_v50 = vshrl.u32 %v576_v46, 16  ;;  %v870_v51 = vshll.u32 %v576_v46, 16  ;;  %v542_v9 = vld [vmem:[#allocation2 + $0x1c] sm:$0xf] }
  0x33   : > { %v616_v12 = vshrl.u32 %v542_v9, 16  ;;  %v619_v13 = vshll.u32 %v542_v9, 16  ;;  %v6743_v19 = vld [vmem:[#allocation2 + $0x1c] sm:$0xff]   ;;  %v6744_v22 = vld [vmem:[#allocation2 + $0x10c] sm:$0xff]   ;;  %6401 = vmatpush3.bf16.msra.mxu0 %v6750_v16  ;;  %v625_v26 = vshrl.u32 %v543_v23, 16  ;;  %v628_v27 = vshll.u32 %v543_v23, 16 }
  0x34   : > { %v860_v59 = vrot.slane %v858_v48, 7  ;;  %v869_v60 = vrot.slane %v867_v50, 7  ;;  %4712 = vmatprep.mubr.bf16.mxu0 %v6743_v19  ;;  %v578_v28 = vld [vmem:[#allocation2 + $0x10c] sm:$0xf]  ;;  %v579_v32 = vld [vmem:[#allocation2 + $0x110] sm:$0xf] }
  0x35   : > { %v618_v20 = vrot.slane %v616_v12, 7  ;;  %v880_v33 = vshrl.u32 %v578_v28, 16  ;;  %v883_v34 = vshll.u32 %v578_v28, 16  ;;  %v627_v38 = vrot.slane %v625_v26, 7  ;;  %v580_v45 = vld [vmem:[#allocation2 + $0x11c] sm:$0x8] }
  0x36   : > { %v863_v63 = vor.u32 %v861_v49, %v860_v59  ;;  %v865_v0 = vrot.slane %v860_v59, 4  ;;  %v872_v1 = vor.u32 %v870_v51, %v869_v60  ;;  %v889_v39 = vshrl.u32 %v579_v32, 16  ;;  %v6749_v51 = vld [vmem:[%s8372_s1 + $0x98] sm:$0xff]   ;;  %6172 = vst [vmem:[#allocation2 + $0x120] sm:$0xff] %v6159_v44   ;;  %v545_v61 = vld [vmem:[#allocation2 + $0x30] sm:$0xf] }
  0x37   : > { %v621_v25 = vor.u32 %v619_v13, %v618_v20  ;;  %v623_v37 = vrot.slane %v618_v20, 4  ;;  %v892_v40 = vshll.u32 %v579_v32, 16  ;;  %v882_v43 = vrot.slane %v880_v33, 7  ;;  %v546_v62 = vld [vmem:[#allocation2 + $0x34] sm:$0xf]  ;;  %v374_v12 = vld [vmem:[%s6923_s14 + $0xe8] sm:$0xff] }
  0x38   : > { %v864_v5 = vsel %vm6944_vm2, %v5822_v58, %v863_v63  ;;  %v873_v6 = vsel %vm6944_vm2, %v865_v0, %v872_v1  ;;  %v630_v47 = vor.u32 %v628_v27, %v627_v38  ;;  %v891_v48 = vrot.slane %v889_v39, 7  ;;  %v6751_v58 = vld [vmem:[#allocation2 + $0x30] sm:$0xff]   ;;  %v6754_v63 = vld [vmem:[%s8372_s1 + $0xa0] sm:$0xff]   ;;  %v6756_v26 = vld [vmem:[%s8372_s1 + $0xa8] sm:$0xff]  }
  0x39   : > { %v5838_v7 = vcombine.low %v864_v5, %v873_v6  ;;  %v622_v46 = vsel %vm6944_vm2, %v5811_v24, %v621_v25  ;;  %v885_v49 = vor.u32 %v883_v34, %v882_v43  ;;  %v887_v50 = vrot.slane %v882_v43, 4  ;;  %v349_v5 = vld [vmem:[%s6923_s14 + $0x20] sm:$0xff]  ;;  %v350_v6 = vld [vmem:[%s6923_s14 + $0x28] sm:$0xff] }
  0x3a   : > { %v631_v52 = vsel %vm6944_vm2, %v623_v37, %v630_v47  ;;  %v894_v53 = vor.u32 %v892_v40, %v891_v48  ;;  %v897_v59 = vshrl.u32 %v580_v45, 16  ;;  %v638_v1 = vshrl.u32 %v545_v61, 16  ;;  %v547_v13 = vld [vmem:[#allocation2 + $0x40] sm:$0x8]  ;;  %v6760_v37 = vld [vmem:[%s8372_s1 + $0x150] sm:$0xff]  }
  0x3b   : > { %4801 = vmatmul.mubr.bf16.vlgmr.msra.gmra.mrb[0].mxu1 %v5838_v7  ;;  %v5827_v56 = vcombine.low %v622_v46, %v631_v52  ;;  %v886_v57 = vsel %vm6944_vm2, %v5823_v42, %v885_v49  ;;  %v647_v3 = vshrl.u32 %v546_v62, 16  ;;  %v5812_v7 = vrot.slane %v633_v54, 11  ;;  %6402 = vmatprep.subr.bf16.mxu0 %v6760_v37  ;;  %v6762_v45 = vld [vmem:[%s8372_s1 + $0x110] sm:$0xff]  }
  0x3c   : > { %6287 = vmatpush3.bf16.msra.mxu1 %v6739_v2  ;;  %4808 = vmatprep.mubr.bf16.mxu1 %v6744_v22  ;;  %v895_v60 = vsel %vm6944_vm2, %v887_v50, %v894_v53  ;;  %v641_v2 = vshll.u32 %v545_v61, 16  ;;  %v6098_v9 = vpack.c.bf16 %v349_v5, %v349_v5  ;;  %v6099_v10 = vpack.c.bf16 %v350_v6, %v350_v6 }
  0x3d   : > { %6288 = vmatprep.subr.bf16.mxu1 %v6741_v8  ;;  %4713 = vmatmul.mubr.bf16.gmra.mrb[4].mxu0 %v5827_v56  ;;  %v5839_v0 = vcombine.low %v886_v57, %v895_v60  ;;  %v650_v8 = vshll.u32 %v546_v62, 16  ;;  %v640_v14 = vrot.slane %v638_v1, 7  ;;  %v6123_v17 = vpack.c.bf16 %v374_v12, %v374_v12  ;;  %v6752_v19 = vld [vmem:[#allocation2 + $0x120] sm:$0xff]  }
  0x3e   : > { %4720 = vmatprep.mubr.bf16.mxu0 %v6751_v58  ;;  %v5824_v20 = vrot.slane %v897_v59, 11  ;;  %510 = vst [vmem:[#allocation2 + $0x44] sm:$0xf] %v6098_v9  ;;  %511 = vst [vmem:[#allocation2 + $0x48] sm:$0xf] %v6099_v10  ;;  %v655_v34 = vshrl.u32 %v547_v13, 16  ;;  %6403 = vmatpush3.bf16.msra.mxu0 %v6762_v45 }
  0x3f   : > { %v643_v21 = vor.u32 %v641_v2, %v640_v14  ;;  %v645_v22 = vrot.slane %v640_v14, 4  ;;  %v581_v24 = vld [vmem:[#allocation2 + $0x120] sm:$0xf]  ;;  %v582_v25 = vld [vmem:[#allocation2 + $0x124] sm:$0xf] }
  0x40   : > { %6289 = vmatpush3.bf16.msra.mxu1 %v6742_v11  ;;  %v373_v11 = vld [vmem:[%s6923_s14 + $0xe0] sm:$0xff]  ;;  %535 = vst [vmem:[#allocation2 + $0x138] sm:$0xf] %v6123_v17  ;;  %v902_v27 = vshrl.u32 %v581_v24, 16  ;;  %v905_v28 = vshll.u32 %v581_v24, 16  ;;  %v914_v31 = vshll.u32 %v582_v25, 16 }
  0x41   : > { %6290 = vmatprep.subr.bf16.mxu1 %v6745_v15  ;;  %v649_v15 = vrot.slane %v647_v3, 7  ;;  %v6122_v16 = vpack.c.bf16 %v373_v11, %v373_v11  ;;  %v644_v32 = vsel %vm6944_vm2, %v5812_v7, %v643_v21  ;;  %v5813_v47 = vrot.slane %v655_v34, 11  ;;  %v6763_v3 = vld [vmem:[%s8372_s1 + $0xf8] sm:$0xff]   ;;  %v351_v7 = vld [vmem:[%s6923_s14 + $0x30] sm:$0xff]  ;;  %v1165_v34 = vld [vmem:[#allocation2 + $0xc] sm:$0xf] }
  0x42   : > { %v904_v39 = vrot.slane %v902_v27, 7  ;;  %v1679_v13 = vld [vmem:[#allocation2 + $0x18] sm:$0x8]  ;;  %v1680_v14 = vld [vmem:[#allocation2 + $0x1c] sm:$0xf] }
  0x43   : > { %4809 = vmatmul.mubr.bf16.gmra.mrb[4].mxu1 %v5839_v0  ;;  %v652_v23 = vor.u32 %v650_v8, %v649_v15  ;;  %534 = vst [vmem:[#allocation2 + $0x134] sm:$0xf] %v6122_v16  ;;  %v352_v8 = vld [vmem:[%s6923_s14 + $0x38] sm:$0xff]  ;;  %v6766_v15 = vld [vmem:[%s8372_s1 + $0x1c0] sm:$0xff]   ;;  %v550_v21 = vld [vmem:[#allocation2 + $0x54] sm:$0x8] }
  0x44   : > { %6291 = vmatpush3.bf16.msra.mxu1 %v6746_v29  ;;  %4816 = vmatprep.mubr.bf16.mxu1 %v6752_v19  ;;  %v911_v29 = vshrl.u32 %v582_v25, 16  ;;  %v907_v42 = vor.u32 %v905_v28, %v904_v39  ;;  %v909_v43 = vrot.slane %v904_v39, 4  ;;  %v6134_v12 = vpack.c.bf16 %v352_v8, %v351_v7  ;;  %v1681_v19 = vld [vmem:[#allocation2 + $0x20] sm:$0xf]  ;;  %v223_v27 = vld [vmem:[#allocation2 + $0x10] sm:$0x1] }
  0x45   : > { %6292 = vmatprep.subr.bf16.mxu1 %v6747_v35  ;;  %v653_v33 = vsel %vm6944_vm2, %v645_v22, %v652_v23  ;;  %v919_v35 = vshrl.u32 %v583_v18, 16  ;;  %v6757_v46 = vld [vmem:[#allocation2 + $0x44] sm:$0xff]   ;;  %v1733_v24 = vshrl.u32 %v1680_v14, 16  ;;  %v1736_v25 = vshll.u32 %v1680_v14, 16  ;;  %v6768_v39 = vld [vmem:[%s8372_s1 + $0x158] sm:$0xff]  }
  0x46   : > { %v5828_v38 = vcombine.low %v644_v32, %v653_v33  ;;  %v913_v40 = vrot.slane %v911_v29, 7  ;;  %v908_v48 = vsel %vm6944_vm2, %v5824_v20, %v907_v42  ;;  %v548_v53 = vld [vmem:[#allocation2 + $0x44] sm:$0xf]  ;;  %v549_v54 = vld [vmem:[#allocation2 + $0x48] sm:$0xf]  ;;  %v1728_v20 = vshrl.u32 %v1679_v13, 16  ;;  %6404 = vmatprep.subr.bf16.mxu0 %v6768_v39 }
  0x47   : > { %v660_v56 = vshrl.u32 %v548_v53, 16  ;;  %v663_v57 = vshll.u32 %v548_v53, 16  ;;  %v669_v58 = vshrl.u32 %v549_v54, 16  ;;  %v672_v59 = vshll.u32 %v549_v54, 16  ;;  %v585_v60 = vld [vmem:[#allocation2 + $0x138] sm:$0xf] }
  0x48   : > { %6293 = vmatpush3.bf16.msra.mxu1 %v6749_v51  ;;  %4721 = vmatmul.mubr.bf16.gmra.mrb[8].mxu0 %v5828_v38  ;;  %v916_v44 = vor.u32 %v914_v31, %v913_v40  ;;  %v5825_v51 = vrot.slane %v919_v35, 11  ;;  %v936_v0 = vshll.u32 %v585_v60, 16  ;;  %6167 = vst [vmem:[#allocation2 + $0x58] sm:$0xff] %v6134_v12   ;;  %v1164_v28 = vld [vmem:[#allocation2 + $0x8] sm:$0xf]  ;;  %v5874_v33 = vrot.slane %v1728_v20, 11 }
  0x49   : > { %6294 = vmatprep.subr.bf16.mxu1 %v6753_v55  ;;  %4728 = vmatprep.mubr.bf16.mxu0 %v6757_v46  ;;  %v662_v1 = vrot.slane %v660_v56, 7  ;;  %v671_v2 = vrot.slane %v669_v58, 7  ;;  %v1742_v37 = vshrl.u32 %v1681_v19, 16  ;;  %v1745_v38 = vshll.u32 %v1681_v19, 16  ;;  %v353_v56 = vld [vmem:[%s6923_s14 + $0x40] sm:$0xff] }
  0x4a   : > { %v917_v49 = vsel %vm6944_vm2, %v909_v43, %v916_v44  ;;  %v6758_v50 = vld [vmem:[#allocation2 + $0x134] sm:$0xff]   ;;  %v677_v40 = vshrl.u32 %v550_v21, 16  ;;  %v1216_v42 = vshrl.u32 %v1164_v28, 16  ;;  %v1219_v43 = vshll.u32 %v1164_v28, 16  ;;  %v230_v28 = vld [vmem:[#allocation2 + $0x24] sm:$0x1] }
  0x4b   : > { %v5840_v52 = vcombine.low %v908_v48, %v917_v49  ;;  %v584_v55 = vld [vmem:[#allocation2 + $0x134] sm:$0xf]  ;;  %v665_v9 = vor.u32 %v663_v57, %v662_v1  ;;  %v667_v10 = vrot.slane %v662_v1, 4  ;;  %v674_v11 = vor.u32 %v672_v59, %v671_v2  ;;  %v6769_v48 = vld [vmem:[%s8372_s1 + $0x118] sm:$0xff]  }
  0x4c   : > { %6295 = vmatpush3.bf16.msra.mxu1 %v6754_v63  ;;  %v924_v61 = vshrl.u32 %v584_v55, 16  ;;  %v927_v62 = vshll.u32 %v584_v55, 16  ;;  %v933_v63 = vshrl.u32 %v585_v60, 16  ;;  %v1744_v46 = vrot.slane %v1742_v37, 7  ;;  %6405 = vmatpush3.bf16.msra.mxu0 %v6769_v48  ;;  %v1684_v12 = vld [vmem:[#allocation2 + $0x34] sm:$0xf] }
  0x4d   : > { %6296 = vmatprep.subr.bf16.mxu1 %v6755_v4  ;;  %4817 = vmatmul.mubr.bf16.gmra.mrb[8].mxu1 %v5840_v52  ;;  %v6764_v4 = vld [vmem:[%s8372_s1 + $0xb8] sm:$0xff]   ;;  %v666_v22 = vsel %vm6944_vm2, %v5813_v47, %v665_v9  ;;  %v675_v23 = vsel %vm6944_vm2, %v667_v10, %v674_v11  ;;  %v1225_v47 = vshll.u32 %v1165_v34, 16  ;;  %v5814_v49 = vrot.slane %v677_v40, 11  ;;  %v1683_v11 = vld [vmem:[#allocation2 + $0x30] sm:$0xf] }
  0x4e   : > { %4824 = vmatprep.mubr.bf16.mxu1 %v6758_v50  ;;  %v926_v5 = vrot.slane %v924_v61, 7  ;;  %v935_v6 = vrot.slane %v933_v63, 7  ;;  %v5829_v29 = vcombine.low %v666_v22, %v675_v23  ;;  %v1218_v50 = vrot.slane %v1216_v42, 4  ;;  %v553_v22 = vld [vmem:[#allocation2 + $0x68] sm:$0x8]  ;;  %v355_v40 = vld [vmem:[%s6923_s14 + $0x50] sm:$0xff] }
  0x4f   : > { %v1229_v52 = vshrl.u32 %v1165_v34, 16  ;;  %v1747_v54 = vor.u32 %v1745_v38, %v1744_v46  ;;  %v1227_v55 = vrot.slane %v1225_v47, 5  ;;  %v6765_v57 = vld [vmem:[#allocation2 + $0x58] sm:$0xff]   ;;  %v6102_v60 = vpack.c.bf16 %v353_v56, %v353_v56  ;;  %v1168_v46 = vld [vmem:[#allocation2 + $0x20] sm:$0xf] }
  0x50   : > { %6297 = vmatpush3.bf16.msra.mxu1 %v6756_v26  ;;  %v929_v16 = vor.u32 %v927_v62, %v926_v5  ;;  %v931_v17 = vrot.slane %v926_v5, 4  ;;  %v938_v18 = vor.u32 %v936_v0, %v935_v6  ;;  %v8379_v26 = vmov 0  ;;  %4729 = vmatmul.mubr.bf16.gmra.mrb[12].mxu0 %v5829_v29  ;;  %v551_v62 = vld [vmem:[#allocation2 + $0x58] sm:$0xf]  ;;  %v552_v63 = vld [vmem:[#allocation2 + $0x5c] sm:$0xf] }
  0x51   : > { %6298 = vmatprep.subr.bf16.mxu1 %v6759_v36  ;;  %v8380_v26 = vsel %vm7064_vm6, 4294967295, %v8379_v26  ;;  %v1735_v36 = vrot.slane %v1733_v24, 7  ;;  %v1231_v59 = vrot.slane %v1229_v52, 4  ;;  %4736 = vmatprep.mubr.bf16.mxu0 %v6765_v57  ;;  %v682_v1 = vshrl.u32 %v551_v62, 16  ;;  %v354_v5 = vld [vmem:[%s6923_s14 + $0x48] sm:$0xff]  ;;  %v356_v47 = vld [vmem:[%s6923_s14 + $0x58] sm:$0xff] }
  0x52   : > { %8381 = vst [vmem:[#allocation4_spill] sm:$0xff] %v8380_v26  ;;  %v930_v31 = vsel %vm6944_vm2, %v5825_v51, %v929_v16  ;;  %v939_v32 = vsel %vm6944_vm2, %v931_v17, %v938_v18  ;;  %v1221_v51 = vrot.slane %v1219_v43, 5  ;;  %v685_v2 = vshll.u32 %v551_v62, 16  ;;  %514 = vst [vmem:[#allocation2 + $0x6c] sm:$0xf] %v6102_v60  ;;  %v6773_v52 = vld [vmem:[%s8372_s1 + $0x1c8] sm:$0xff]  }
  0x53   : > { %v5841_v35 = vcombine.low %v930_v31, %v939_v32  ;;  %v1738_v44 = vor.u32 %v1736_v25, %v1735_v36  ;;  %v1740_v45 = vrot.slane %v1735_v36, 4  ;;  %v1682_v6 = vld [vmem:[#allocation2 + $0x2c] sm:$0x8]  ;;  %v694_v7 = vshll.u32 %v552_v63, 16  ;;  %v6767_v31 = vld [vmem:[%s8372_s1 + $0x180] sm:$0xff]  }
  0x54   : > { %6299 = vmatpush3.bf16.msra.mxu1 %v6761_v41  ;;  %v224_v41 = vsel %vm7064_vm6, 0, %v223_v27  ;;  %v1222_v58 = vor.u32 %v1221_v51, %v1218_v50  ;;  %v1232_v9 = vor.u32 %v1231_v59, %v1227_v55  ;;  %v6103_v10 = vpack.c.bf16 %v354_v5, %v354_v5  ;;  %v1167_v39 = vld [vmem:[#allocation2 + $0x1c] sm:$0xf]  ;;  %v1686_v59 = vld [vmem:[#allocation2 + $0x44] sm:$0xf] }
  0x55   : > { %6300 = vmatprep.subr.bf16.mxu1 %v6763_v3  ;;  %4825 = vmatmul.mubr.bf16.gmra.mrb[12].mxu1 %v5841_v35  ;;  %225 = vst [vmem:[#allocation2 + $0x10] sm:$0x1] %v224_v41  ;;  %v1739_v53 = vsel %vm6944_vm2, %v5874_v33, %v1738_v44  ;;  %v1748_v61 = vsel %vm6944_vm2, %v1740_v45, %v1747_v54  ;;  %v691_v3 = vshrl.u32 %v552_v63, 16  ;;  %v684_v13 = vrot.slane %v682_v1, 7  ;;  %v6772_v41 = vld [vmem:[%s8372_s1 + $0x160] sm:$0xff]  }
  0x56   : > { %v5890_v0 = vcombine.low %v1739_v53, %v1748_v61  ;;  %v1223_v8 = vrot.slane %v1222_v58, 4  ;;  %v1750_v16 = vshrl.u32 %v1682_v6, 16  ;;  %v1755_v17 = vshrl.u32 %v1683_v11, 16  ;;  %515 = vst [vmem:[#allocation2 + $0x70] sm:$0xf] %v6103_v10  ;;  %6406 = vmatprep.subr.bf16.mxu0 %v6772_v41  ;;  %v6774_v53 = vld [vmem:[%s8372_s1 + $0x120] sm:$0xff]  }
  0x57   : > { %v693_v14 = vrot.slane %v691_v3, 7  ;;  %v1233_v19 = vrot.slane %v1232_v9, 4  ;;  %v1758_v21 = vshll.u32 %v1683_v11, 16  ;;  %v687_v23 = vor.u32 %v685_v2, %v684_v13  ;;  %v1685_v58 = vld [vmem:[#allocation2 + $0x40] sm:$0x8]  ;;  %6407 = vmatpush3.bf16.msra.mxu0 %v6774_v53 }
  0x58   : > { %6301 = vmatpush3.bf16.msra.mxu1 %v6764_v4  ;;  %4865 = vmatprep.mubr.bf16.mxu1 %v5890_v0  ;;  %v1228_v18 = vsel %vm7087_vm7, %v1223_v8, %v1227_v55  ;;  %v689_v24 = vrot.slane %v684_v13, 4  ;;  %v5875_v27 = vrot.slane %v1750_v16, 11  ;;  %v1757_v32 = vrot.slane %v1755_v17, 7  ;;  %v1687_v16 = vld [vmem:[#allocation2 + $0x48] sm:$0xf] }
  0x59   : > { %6510 = vmatprep.subr.bf16.mxu1 %v6766_v15  ;;  %v696_v25 = vor.u32 %v694_v7, %v693_v14  ;;  %v1764_v33 = vshrl.u32 %v1684_v12, 16  ;;  %v1767_v34 = vshll.u32 %v1684_v12, 16  ;;  %v688_v35 = vsel %vm6944_vm2, %v5814_v49, %v687_v23  ;;  %v554_v45 = vld [vmem:[#allocation2 + $0x6c] sm:$0xf] }
  0x5a   : > { %v699_v37 = vshrl.u32 %v553_v22, 16  ;;  %v231_v38 = vsel %vm7064_vm6, 0, %v230_v28  ;;  %v1760_v44 = vor.u32 %v1758_v21, %v1757_v32  ;;  %v1762_v49 = vrot.slane %v1757_v32, 4  ;;  %v6775_v7 = vld [vmem:[%s8372_s1 + $0x188] sm:$0xff]   ;;  %v357_v22 = vld [vmem:[%s6923_s14 + $0x60] sm:$0xff] }
  0x5b   : > { %v697_v36 = vsel %vm6944_vm2, %v689_v24, %v696_v25  ;;  %232 = vst [vmem:[#allocation2 + $0x24] sm:$0x1] %v231_v38  ;;  %v1766_v50 = vrot.slane %v1764_v33, 7  ;;  %v704_v51 = vshrl.u32 %v554_v45, 16  ;;  %v707_v55 = vshll.u32 %v554_v45, 16  ;;  %v6777_v38 = vld [vmem:[%s8372_s1 + $0x168] sm:$0xff]  }
  0x5c   : > { %v1166_v15 = vld [vmem:[#allocation2 + $0x10] sm:$0x1]  ;;  %v5830_v42 = vcombine.low %v688_v35, %v697_v36  ;;  %v5815_v54 = vrot.slane %v699_v37, 11  ;;  %v1240_v56 = vshrl.u32 %v1167_v39, 16  ;;  %v1243_v57 = vshll.u32 %v1167_v39, 16  ;;  %6408 = vmatprep.subr.bf16.mxu0 %v6777_v38 }
  0x5d   : > { %v1235_v20 = vshll.u32 %v1166_v15, 16  ;;  %v6770_v60 = vld [vmem:[#allocation2 + $0x6c] sm:$0xff]   ;;  %v1761_v61 = vsel %vm6944_vm2, %v5875_v27, %v1760_v44  ;;  %v1769_v62 = vor.u32 %v1767_v34, %v1766_v50  ;;  %v706_v0 = vrot.slane %v704_v51, 7  ;;  %v556_v28 = vld [vmem:[#allocation2 + $0x7c] sm:$0x8] }
  0x5e   : > { %4737 = vmatmul.mubr.bf16.gmra.mrb[16].mxu0 %v5830_v42  ;;  %v555_v63 = vld [vmem:[#allocation2 + $0x70] sm:$0xf]  ;;  %v6139_v1 = vpack.c.bf16 %v356_v47, %v355_v40  ;;  %v1242_v5 = vrot.slane %v1240_v56, 4  ;;  %v1245_v6 = vrot.slane %v1243_v57, 5  ;;  %v1249_v11 = vshll.u32 %v1168_v46, 16 }
  0x5f   : > { %v1237_v29 = vrot.slane %v1235_v20, 5  ;;  %v713_v2 = vshrl.u32 %v555_v63, 16  ;;  %v716_v3 = vshll.u32 %v555_v63, 16  ;;  %4744 = vmatprep.mubr.bf16.mxu0 %v6770_v60  ;;  %v1770_v8 = vsel %vm6944_vm2, %v1762_v49, %v1769_v62  ;;  %v1170_v44 = vld [vmem:[#allocation2 + $0x30] sm:$0xf]  ;;  %v6778_v60 = vld [vmem:[%s8372_s1 + $0x128] sm:$0xff]  }
  0x60   : > { %v709_v9 = vor.u32 %v707_v55, %v706_v0  ;;  %v711_v10 = vrot.slane %v706_v0, 4  ;;  %6168 = vst [vmem:[#allocation2 + $0x80] sm:$0xff] %v6139_v1   ;;  %v5891_v12 = vcombine.low %v1761_v61, %v1770_v8  ;;  %v1246_v14 = vor.u32 %v1245_v6, %v1242_v5  ;;  %v1688_v6 = vld [vmem:[#allocation2 + $0x54] sm:$0x8]  ;;  %6409 = vmatpush3.bf16.msra.mxu0 %v6778_v60  ;;  %v244_v38 = vld [vmem:[#allocation2 + $0x4c] sm:$0x1] }
  0x61   : > { %v1238_v43 = vsel %vm7087_vm7, %v1233_v19, %v1237_v29  ;;  %v715_v13 = vrot.slane %v713_v2, 7  ;;  %v1253_v15 = vshrl.u32 %v1168_v46, 16  ;;  %v1251_v19 = vrot.slane %v1249_v11, 5  ;;  %v358_v29 = vld [vmem:[%s6923_s14 + $0x68] sm:$0xff]  ;;  %v1689_v11 = vld [vmem:[#allocation2 + $0x58] sm:$0xf] }
  0x62   : > { %v5858_v48 = vcombine.low %v1228_v18, %v1238_v43  ;;  %v710_v17 = vsel %vm6944_vm2, %v5815_v54, %v709_v9  ;;  %v1169_v18 = vld [vmem:[#allocation2 + $0x24] sm:$0x1]  ;;  %v1772_v20 = vshrl.u32 %v1685_v58, 16  ;;  %v1777_v21 = vshrl.u32 %v1686_v59, 16  ;;  %v237_v43 = vld [vmem:[#allocation2 + $0x38] sm:$0x1] }
  0x63   : > { %v718_v23 = vor.u32 %v716_v3, %v715_v13  ;;  %v1247_v24 = vrot.slane %v1246_v14, 4  ;;  %v1255_v25 = vrot.slane %v1253_v15, 4  ;;  %v1259_v27 = vshll.u32 %v1169_v18, 16  ;;  %v1174_v60 = vld [vmem:[#allocation2 + $0x48] sm:$0xf] }
  0x64   : > { %4866 = vmatmul.mubr.bf16.vlgmr.msra.gmra.mrb[16].mxu1 %v5858_v48  ;;  %v1779_v32 = vrot.slane %v1777_v21, 7  ;;  %v1780_v33 = vshll.u32 %v1686_v59, 16  ;;  %v1786_v34 = vshrl.u32 %v1687_v16, 16  ;;  %v1171_v48 = vld [vmem:[#allocation2 + $0x34] sm:$0xf]  ;;  %v6106_v49 = vpack.c.bf16 %v357_v22, %v357_v22 }
  0x65   : > { %6511 = vmatpush3.bf16.msra.mxu1 %v6767_v31  ;;  %4873 = vmatprep.mubr.bf16.mxu1 %v5891_v12  ;;  %v5876_v31 = vrot.slane %v1772_v20, 11  ;;  %v719_v35 = vsel %vm6944_vm2, %v711_v10, %v718_v23  ;;  %v1256_v36 = vor.u32 %v1255_v25, %v1251_v19  ;;  %v1261_v37 = vrot.slane %v1259_v27, 5  ;;  %v559_v21 = vld [vmem:[#allocation2 + $0x90] sm:$0x8] }
  0x66   : > { %6512 = vmatprep.subr.bf16.mxu1 %v6773_v52  ;;  %v5831_v39 = vcombine.low %v710_v17, %v719_v35  ;;  %v1782_v40 = vor.u32 %v1780_v33, %v1779_v32  ;;  %v1784_v41 = vrot.slane %v1779_v32, 4  ;;  %v1788_v42 = vrot.slane %v1786_v34, 7  ;;  %518 = vst [vmem:[#allocation2 + $0x94] sm:$0xf] %v6106_v49 }
  0x67   : > { %v1252_v45 = vsel %vm7087_vm7, %v1247_v24, %v1251_v19  ;;  %v1257_v46 = vrot.slane %v1256_v36, 4  ;;  %v6771_v47 = vld [vmem:[#allocation2 + $0x80] sm:$0xff]   ;;  %v6107_v50 = vpack.c.bf16 %v358_v29, %v358_v29  ;;  %v1789_v52 = vshll.u32 %v1687_v16, 16  ;;  %v1690_v16 = vld [vmem:[#allocation2 + $0x5c] sm:$0xf] }
  0x68   : > { %4745 = vmatmul.mubr.bf16.gmra.mrb[20].mxu0 %v5831_v39  ;;  %v1783_v51 = vsel %vm6944_vm2, %v5876_v31, %v1782_v40  ;;  %v557_v53 = vld [vmem:[#allocation2 + $0x80] sm:$0xf]  ;;  %v558_v54 = vld [vmem:[#allocation2 + $0x84] sm:$0xf]  ;;  %v721_v55 = vshrl.u32 %v556_v28, 16  ;;  %v238_v3 = vsel %vm7064_vm6, 0, %v237_v43 }
  0x69   : > { %6513 = vmatpush3.bf16.msra.mxu1 %v6775_v7  ;;  %v1262_v56 = vsel %vm7087_vm7, %v1257_v46, %v1261_v37  ;;  %4752 = vmatprep.mubr.bf16.mxu0 %v6771_v47  ;;  %v726_v57 = vshrl.u32 %v557_v53, 16  ;;  %v729_v58 = vshll.u32 %v557_v53, 16  ;;  %v735_v59 = vshrl.u32 %v558_v54, 16  ;;  %519 = vst [vmem:[#allocation2 + $0x98] sm:$0xf] %v6107_v50  ;;  %v6780_v50 = vld [vmem:[%s8372_s1 + $0x1d0] sm:$0xff]  }
  0x6a   : > { %v5859_v61 = vcombine.low %v1252_v45, %v1262_v56  ;;  %v1791_v62 = vor.u32 %v1789_v52, %v1788_v42  ;;  %v5816_v63 = vrot.slane %v721_v55, 11  ;;  %v738_v0 = vshll.u32 %v558_v54, 16  ;;  %239 = vst [vmem:[#allocation2 + $0x38] sm:$0x1] %v238_v3  ;;  %v6781_v55 = vld [vmem:[%s8372_s1 + $0x190] sm:$0xff]   ;;  %6514 = vmatprep.subr.bf16.mxu1 %v6780_v50 }
  0x6b   : > { %v728_v1 = vrot.slane %v726_v57, 7  ;;  %v737_v2 = vrot.slane %v735_v59, 7  ;;  %v1264_v5 = vshrl.u32 %v1170_v44, 16  ;;  %v1267_v8 = vshll.u32 %v1170_v44, 16  ;;  %v1173_v44 = vld [vmem:[#allocation2 + $0x44] sm:$0xf] }
  0x6c   : > { %4874 = vmatmul.mubr.bf16.gmra.mrb[20].mxu1 %v5859_v61  ;;  %v1792_v7 = vsel %vm6944_vm2, %v1784_v41, %v1791_v62  ;;  %v1273_v9 = vshll.u32 %v1171_v48, 16  ;;  %v1277_v10 = vshrl.u32 %v1171_v48, 16  ;;  %v1794_v24 = vshrl.u32 %v1688_v6, 16 }
  0x6d   : > { %v5892_v12 = vcombine.low %v1783_v51, %v1792_v7  ;;  %v731_v13 = vor.u32 %v729_v58, %v728_v1  ;;  %v733_v14 = vrot.slane %v728_v1, 4  ;;  %v740_v15 = vor.u32 %v738_v0, %v737_v2  ;;  %v560_v37 = vld [vmem:[#allocation2 + $0x94] sm:$0xf]  ;;  %v1691_v2 = vld [vmem:[#allocation2 + $0x68] sm:$0x8]  ;;  %6515 = vmatpush3.bf16.msra.mxu1 %v6781_v55 }
  0x6e   : > { %v1266_v17 = vrot.slane %v1264_v5, 4  ;;  %v1269_v18 = vrot.slane %v1267_v8, 5  ;;  %v7145_v19 = vrot.slane %v1273_v9, 5  ;;  %v1279_v20 = vrot.slane %v1277_v10, 4  ;;  %v359_v1 = vld [vmem:[%s6923_s14 + $0x70] sm:$0xff]  ;;  %v360_v8 = vld [vmem:[%s6923_s14 + $0x78] sm:$0xff] }
  0x6f   : > { %4881 = vmatprep.mubr.bf16.mxu1 %v5892_v12  ;;  %v732_v22 = vsel %vm6944_vm2, %v5816_v63, %v731_v13  ;;  %v741_v23 = vsel %vm6944_vm2, %v733_v14, %v740_v15  ;;  %v1799_v25 = vshrl.u32 %v1689_v11, 16  ;;  %v1802_v32 = vshll.u32 %v1689_v11, 16  ;;  %v1692_v9 = vld [vmem:[#allocation2 + $0x6c] sm:$0xf]  ;;  %v1693_v14 = vld [vmem:[#allocation2 + $0x70] sm:$0xf] }
  0x70   : > { %v5832_v27 = vcombine.low %v732_v22, %v741_v23  ;;  %v1270_v28 = vor.u32 %v1269_v18, %v1266_v17  ;;  %v1280_v29 = vor.u32 %v1279_v20, %v7145_v19  ;;  %v6776_v31 = vld [vmem:[#allocation2 + $0x94] sm:$0xff]   ;;  %v5877_v33 = vrot.slane %v1794_v24, 11  ;;  %v562_v15 = vld [vmem:[#allocation2 + $0xa4] sm:$0x8] }
  0x71   : > { %v1801_v34 = vrot.slane %v1799_v25, 7  ;;  %v1808_v35 = vshrl.u32 %v1690_v16, 16  ;;  %v1811_v36 = vshll.u32 %v1690_v16, 16  ;;  %v561_v41 = vld [vmem:[#allocation2 + $0x98] sm:$0xf]  ;;  %v743_v42 = vshrl.u32 %v559_v21, 16 }
  0x72   : > { %4753 = vmatmul.mubr.bf16.gmra.mrb[24].mxu0 %v5832_v27  ;;  %v1271_v39 = vrot.slane %v1270_v28, 4  ;;  %v1281_v40 = vrot.slane %v1280_v29, 4  ;;  %v748_v43 = vshrl.u32 %v560_v37, 16  ;;  %v1172_v45 = vld [vmem:[#allocation2 + $0x38] sm:$0x1]  ;;  %v751_v49 = vshll.u32 %v560_v37, 16 }
  0x73   : > { %4760 = vmatprep.mubr.bf16.mxu0 %v6776_v31  ;;  %v1804_v46 = vor.u32 %v1802_v32, %v1801_v34  ;;  %v1806_v47 = vrot.slane %v1801_v34, 4  ;;  %v1810_v48 = vrot.slane %v1808_v35, 7  ;;  %v1283_v52 = vshll.u32 %v1172_v45, 16  ;;  %v6783_v16 = vld [vmem:[%s8372_s1 + $0x170] sm:$0xff]   ;;  %v251_v21 = vld [vmem:[#allocation2 + $0x60] sm:$0x1] }
  0x74   : > { %v1276_v51 = vsel %vm7087_vm7, %v1271_v39, %v7145_v19  ;;  %v5817_v53 = vrot.slane %v743_v42, 11  ;;  %v750_v54 = vrot.slane %v748_v43, 7  ;;  %v757_v58 = vshrl.u32 %v561_v41, 16  ;;  %v1176_v22 = vld [vmem:[#allocation2 + $0x58] sm:$0xf]  ;;  %6410 = vmatprep.subr.bf16.mxu0 %v6783_v16  ;;  %v6784_v28 = vld [vmem:[%s8372_s1 + $0x130] sm:$0xff]  }
  0x75   : > { %v1805_v56 = vsel %vm6944_vm2, %v5877_v33, %v1804_v46  ;;  %v1813_v57 = vor.u32 %v1811_v36, %v1810_v48  ;;  %v760_v59 = vshll.u32 %v561_v41, 16  ;;  %v1285_v61 = vrot.slane %v1283_v52, 5  ;;  %6411 = vmatpush3.bf16.msra.mxu0 %v6784_v28  ;;  %v1177_v42 = vld [vmem:[#allocation2 + $0x5c] sm:$0xf]  ;;  %v361_v52 = vld [vmem:[%s6923_s14 + $0x80] sm:$0xff] }
  0x76   : > { %v753_v62 = vor.u32 %v751_v49, %v750_v54  ;;  %v755_v63 = vrot.slane %v750_v54, 4  ;;  %v245_v0 = vsel %vm7064_vm6, 0, %v244_v38  ;;  %v759_v5 = vrot.slane %v757_v58, 7  ;;  %v363_v58 = vld [vmem:[%s6923_s14 + $0x90] sm:$0xff] }
  0x77   : > { %v1814_v3 = vsel %vm6944_vm2, %v1806_v47, %v1813_v57  ;;  %246 = vst [vmem:[#allocation2 + $0x4c] sm:$0x1] %v245_v0  ;;  %v1288_v6 = vshrl.u32 %v1173_v44, 16  ;;  %v1291_v7 = vshll.u32 %v1173_v44, 16  ;;  %v1286_v10 = vsel %vm7087_vm7, %v1281_v40, %v1285_v61 }
  0x78   : > { %v5893_v11 = vcombine.low %v1805_v56, %v1814_v3  ;;  %v754_v12 = vsel %vm6944_vm2, %v5817_v53, %v753_v62  ;;  %v1297_v13 = vshll.u32 %v1174_v60, 16  ;;  %v5860_v17 = vcombine.low %v1276_v51, %v1286_v10  ;;  %v362_v53 = vld [vmem:[%s6923_s14 + $0x88] sm:$0xff] }
  0x79   : > { %v762_v18 = vor.u32 %v760_v59, %v759_v5  ;;  %v1290_v19 = vrot.slane %v1288_v6, 4  ;;  %v1293_v20 = vrot.slane %v1291_v7, 5  ;;  %v1301_v24 = vshrl.u32 %v1174_v60, 16  ;;  %v364_v59 = vld [vmem:[%s6923_s14 + $0x98] sm:$0xff] }
  0x7a   : > { %v7176_v23 = vrot.slane %v1297_v13, 5  ;;  %v6144_v25 = vpack.c.bf16 %v360_v8, %v359_v1  ;;  %v1816_v27 = vshrl.u32 %v1691_v2, 16  ;;  %4882 = vmatmul.mubr.bf16.gmra.mrb[24].mxu1 %v5860_v17  ;;  %v1821_v32 = vshrl.u32 %v1692_v9, 16  ;;  %v6786_v60 = vld [vmem:[%s8372_s1 + $0x1d8] sm:$0xff]   ;;  %v1695_v8 = vld [vmem:[#allocation2 + $0x80] sm:$0xf] }
  0x7b   : > { %v763_v29 = vsel %vm6944_vm2, %v755_v63, %v762_v18  ;;  %v1294_v31 = vor.u32 %v1293_v20, %v1290_v19  ;;  %v1824_v33 = vshll.u32 %v1692_v9, 16  ;;  %4889 = vmatprep.mubr.bf16.mxu1 %v5893_v11  ;;  %v1303_v35 = vrot.slane %v1301_v24, 4  ;;  %v6787_v1 = vld [vmem:[%s8372_s1 + $0x198] sm:$0xff]   ;;  %6516 = vmatprep.subr.bf16.mxu1 %v6786_v60  ;;  %v1696_v24 = vld [vmem:[#allocation2 + $0x84] sm:$0xf] }
  0x7c   : > { %v5833_v34 = vcombine.low %v754_v12, %v763_v29  ;;  %6169 = vst [vmem:[#allocation2 + $0xa8] sm:$0xff] %v6144_v25   ;;  %v5878_v36 = vrot.slane %v1816_v27, 11  ;;  %v1830_v37 = vshrl.u32 %v1693_v14, 16  ;;  %v1823_v39 = vrot.slane %v1821_v32, 7  ;;  %v1694_v7 = vld [vmem:[#allocation2 + $0x7c] sm:$0x8]  ;;  %6517 = vmatpush3.bf16.msra.mxu1 %v6787_v1 }
  0x7d   : > { %v1295_v38 = vrot.slane %v1294_v31, 4  ;;  %v1833_v40 = vshll.u32 %v1693_v14, 16  ;;  %v765_v41 = vshrl.u32 %v562_v15, 16  ;;  %v1304_v44 = vor.u32 %v1303_v35, %v7176_v23  ;;  %v6788_v9 = vld [vmem:[%s8372_s1 + $0x178] sm:$0xff]  }
  0x7e   : > { %4761 = vmatmul.mubr.bf16.gmra.mrb[28].mxu0 %v5833_v34  ;;  %v1175_v43 = vld [vmem:[#allocation2 + $0x4c] sm:$0x1]  ;;  %v1832_v45 = vrot.slane %v1830_v37, 7  ;;  %v252_v46 = vsel %vm7064_vm6, 0, %v251_v21  ;;  %v1312_v47 = vshrl.u32 %v1176_v22, 16  ;;  %v1826_v50 = vor.u32 %v1824_v33, %v1823_v39  ;;  %6412 = vmatprep.subr.bf16.mxu0 %v6788_v9 }
  0x7f   : > { %v1300_v48 = vsel %vm7087_vm7, %v1295_v38, %v7176_v23  ;;  %v1307_v49 = vshll.u32 %v1175_v43, 16  ;;  %v1828_v51 = vrot.slane %v1823_v39, 4  ;;  %253 = vst [vmem:[#allocation2 + $0x60] sm:$0x1] %v252_v46  ;;  %v1305_v54 = vrot.slane %v1304_v44, 4 }
  0x80   : > { %v1835_v55 = vor.u32 %v1833_v40, %v1832_v45  ;;  %v7191_v56 = vrot.slane %v765_v41, 11  ;;  %v1314_v57 = vrot.slane %v1312_v47, 4  ;;  %v1827_v62 = vsel %vm6944_vm2, %v5878_v36, %v1826_v50  ;;  %v565_v44 = vld [vmem:[#allocation2 + $0xb8] sm:$0x8]  ;;  %v1179_v50 = vld [vmem:[#allocation2 + $0x6c] sm:$0xf] }
  0x81   : > { %v1309_v61 = vrot.slane %v1307_v49, 5  ;;  %v1315_v63 = vshll.u32 %v1176_v22, 16  ;;  %v1321_v0 = vshll.u32 %v1177_v42, 16  ;;  %v1325_v3 = vshrl.u32 %v1177_v42, 16  ;;  %v258_v49 = vld [vmem:[#allocation2 + $0x74] sm:$0x1] }
  0x82   : > { %v1836_v2 = vsel %vm6944_vm2, %v1828_v51, %v1835_v55  ;;  %v6110_v5 = vpack.c.bf16 %v361_v52, %v361_v52  ;;  %v6111_v6 = vpack.c.bf16 %v362_v53, %v362_v53  ;;  %v6149_v14 = vpack.c.bf16 %v364_v59, %v363_v58 }
  0x83   : > { %v1310_v10 = vsel %vm7087_vm7, %v1305_v54, %v1309_v61  ;;  %v6779_v11 = vld [vmem:[#allocation2 + $0xa8] sm:$0xff]   ;;  %v5894_v12 = vcombine.low %v1827_v62, %v1836_v2  ;;  %v1317_v13 = vrot.slane %v1315_v63, 5  ;;  %v1323_v18 = vrot.slane %v1321_v0, 5 }
  0x84   : > { %v5861_v15 = vcombine.low %v1300_v48, %v1310_v10  ;;  %v563_v16 = vld [vmem:[#allocation2 + $0xa8] sm:$0xf]  ;;  %v564_v17 = vld [vmem:[#allocation2 + $0xac] sm:$0xf]  ;;  %v1327_v19 = vrot.slane %v1325_v3, 4  ;;  %4768 = vmatprep.mubr.bf16.mxu0 %v6779_v11  ;;  %6170 = vst [vmem:[#allocation2 + $0xd0] sm:$0xff] %v6149_v14  }
  0x85   : > { %522 = vst [vmem:[#allocation2 + $0xbc] sm:$0xf] %v6110_v5  ;;  %523 = vst [vmem:[#allocation2 + $0xc0] sm:$0xf] %v6111_v6  ;;  %v770_v20 = vshrl.u32 %v563_v16, 16  ;;  %v773_v21 = vshll.u32 %v563_v16, 16  ;;  %v1318_v27 = vor.u32 %v1317_v13, %v1314_v57 }
  0x86   : > { %v779_v22 = vshrl.u32 %v564_v17, 16  ;;  %v782_v23 = vshll.u32 %v564_v17, 16  ;;  %4890 = vmatmul.mubr.bf16.gmra.mrb[28].mxu1 %v5861_v15  ;;  %v1178_v25 = vld [vmem:[#allocation2 + $0x60] sm:$0x1]  ;;  %v1328_v28 = vor.u32 %v1327_v19, %v1323_v18  ;;  %v1838_v29 = vshrl.u32 %v1694_v7, 16 }
  0x87   : > { %v1843_v31 = vshrl.u32 %v1695_v8, 16  ;;  %4897 = vmatprep.mubr.bf16.mxu1 %v5894_v12  ;;  %v772_v32 = vrot.slane %v770_v20, 7  ;;  %v1331_v34 = vshll.u32 %v1178_v25, 16  ;;  %v1846_v35 = vshll.u32 %v1695_v8, 16  ;;  %v1180_v57 = vld [vmem:[#allocation2 + $0x70] sm:$0xf] }
  0x88   : > { %v781_v33 = vrot.slane %v779_v22, 7  ;;  %v1319_v36 = vrot.slane %v1318_v27, 4  ;;  %v1329_v37 = vrot.slane %v1328_v28, 4  ;;  %v5879_v38 = vrot.slane %v1838_v29, 11  ;;  %v6789_v8 = vld [vmem:[%s8372_s1 + $0x138] sm:$0xff]  }
  0x89   : > { %v1845_v39 = vrot.slane %v1843_v31, 7  ;;  %v775_v40 = vor.u32 %v773_v21, %v772_v32  ;;  %v777_v41 = vrot.slane %v772_v32, 4  ;;  %v1333_v43 = vrot.slane %v1331_v34, 5  ;;  %v1697_v13 = vld [vmem:[#allocation2 + $0x90] sm:$0x8]  ;;  %6413 = vmatpush3.bf16.msra.mxu0 %v6789_v8 }
  0x8a   : > { %v784_v42 = vor.u32 %v782_v23, %v781_v33  ;;  %v1324_v45 = vsel %vm7087_vm7, %v1319_v36, %v1323_v18  ;;  %v1852_v48 = vshrl.u32 %v1696_v24, 16  ;;  %v1855_v55 = vshll.u32 %v1696_v24, 16  ;;  %v1698_v18 = vld [vmem:[#allocation2 + $0x94] sm:$0xf]  ;;  %v1699_v24 = vld [vmem:[#allocation2 + $0x98] sm:$0xf] }
  0x8b   : > { %v1848_v46 = vor.u32 %v1846_v35, %v1845_v39  ;;  %v1850_v47 = vrot.slane %v1845_v39, 4  ;;  %v776_v51 = vsel %vm6944_vm2, %v7191_v56, %v775_v40  ;;  %v1334_v53 = vsel %vm7087_vm7, %v1329_v37, %v1333_v43  ;;  %v6785_v23 = vld [vmem:[#allocation2 + $0xd0] sm:$0xff]   ;;  %v568_v25 = vld [vmem:[#allocation2 + $0xcc] sm:$0x8]  ;;  %v1183_v8 = vld [vmem:[#allocation2 + $0x84] sm:$0xf] }
  0x8c   : > { %v785_v52 = vsel %vm6944_vm2, %v777_v41, %v784_v42  ;;  %v6782_v54 = vld [vmem:[#allocation2 + $0xbc] sm:$0xff]   ;;  %v5862_v59 = vcombine.low %v1324_v45, %v1334_v53  ;;  %v1854_v61 = vrot.slane %v1852_v48, 7  ;;  %v787_v0 = vshrl.u32 %v565_v44, 16  ;;  %v569_v32 = vld [vmem:[#allocation2 + $0xd0] sm:$0xf] }
  0x8d   : > { %v5834_v58 = vcombine.low %v776_v51, %v785_v52  ;;  %v1849_v60 = vsel %vm6944_vm2, %v5879_v38, %v1848_v46  ;;  %v566_v62 = vld [vmem:[#allocation2 + $0xbc] sm:$0xf]  ;;  %v567_v63 = vld [vmem:[#allocation2 + $0xc0] sm:$0xf]  ;;  %v259_v6 = vsel %vm7064_vm6, 0, %v258_v49  ;;  %v1336_v7 = vshrl.u32 %v1179_v50, 16 }
  0x8e   : > { %v792_v1 = vshrl.u32 %v566_v62, 16  ;;  %v795_v56 = vshll.u32 %v566_v62, 16  ;;  %v801_v2 = vshrl.u32 %v567_v63, 16  ;;  %4898 = vmatmul.mubr.bf16.gmra.mrb[32].mxu1 %v5862_v59  ;;  %v1857_v3 = vor.u32 %v1855_v55, %v1854_v61  ;;  %260 = vst [vmem:[#allocation2 + $0x74] sm:$0x1] %v259_v6 }
  0x8f   : > { %4769 = vmatmul.mubr.bf16.gmra.mrb[32].mxu0 %v5834_v58  ;;  %v804_v5 = vshll.u32 %v567_v63, 16  ;;  %v5819_v9 = vrot.slane %v787_v0, 11  ;;  %v1339_v12 = vshll.u32 %v1179_v50, 16  ;;  %v1338_v15 = vrot.slane %v1336_v7, 4  ;;  %v570_v37 = vld [vmem:[#allocation2 + $0xd4] sm:$0xf] }
  0x90   : > { %4776 = vmatprep.mubr.bf16.mxu0 %v6782_v54  ;;  %v794_v10 = vrot.slane %v792_v1, 7  ;;  %v803_v11 = vrot.slane %v801_v2, 7  ;;  %v1858_v14 = vsel %vm6944_vm2, %v1850_v47, %v1857_v3  ;;  %v1345_v16 = vshll.u32 %v1180_v57, 16  ;;  %v265_v46 = vld [vmem:[#allocation2 + $0x88] sm:$0x1]  ;;  %v6792_v58 = vld [vmem:[%s8372_s1 + $0x1e0] sm:$0xff]  }
  0x91   : > { %v1349_v17 = vshrl.u32 %v1180_v57, 16  ;;  %v5895_v19 = vcombine.low %v1849_v60, %v1858_v14  ;;  %v1341_v27 = vrot.slane %v1339_v12, 5  ;;  %v1860_v31 = vshrl.u32 %v1697_v13, 16  ;;  %v1182_v52 = vld [vmem:[#allocation2 + $0x80] sm:$0xf]  ;;  %6518 = vmatprep.subr.bf16.mxu1 %v6792_v58 }
  0x92   : > { %v797_v20 = vor.u32 %v795_v56, %v794_v10  ;;  %v799_v21 = vrot.slane %v794_v10, 4  ;;  %v806_v22 = vor.u32 %v804_v5, %v803_v11  ;;  %v1347_v28 = vrot.slane %v1345_v16, 5  ;;  %v7240_v63 = vld [vmem:[%s8372_s1 + $0x200] sm:$0xff]  }
  0x93   : > { %v1351_v29 = vrot.slane %v1349_v17, 4  ;;  %4905 = vmatprep.mubr.bf16.mxu1 %v5895_v19  ;;  %v1865_v35 = vshrl.u32 %v1698_v18, 16  ;;  %v1868_v36 = vshll.u32 %v1698_v18, 16  ;;  %v1342_v39 = vor.u32 %v1341_v27, %v1338_v15  ;;  %6646 = vmatprep.subr.bf16.mxu0 %v7240_v63  ;;  %v365_v14 = vld [vmem:[%s6923_s14 + $0xa0] sm:$0xff]  ;;  %v366_v15 = vld [vmem:[%s6923_s14 + $0xa8] sm:$0xff] }
  0x94   : > { %v798_v33 = vsel %vm6944_vm2, %v5819_v9, %v797_v20  ;;  %v807_v34 = vsel %vm6944_vm2, %v799_v21, %v806_v22  ;;  %v5880_v41 = vrot.slane %v1860_v31, 11  ;;  %v1874_v43 = vshrl.u32 %v1699_v24, 16  ;;  %v6794_v9 = vld [vmem:[%s8372_s1 + $0x1a0] sm:$0xff]   ;;  %v1701_v21 = vld [vmem:[#allocation2 + $0xa8] sm:$0xf] }
  0x95   : > { %v5835_v38 = vcombine.low %v798_v33, %v807_v34  ;;  %v1352_v40 = vor.u32 %v1351_v29, %v1347_v28  ;;  %v1867_v42 = vrot.slane %v1865_v35, 7  ;;  %v1877_v44 = vshll.u32 %v1699_v24, 16  ;;  %v1181_v47 = vld [vmem:[#allocation2 + $0x74] sm:$0x1]  ;;  %v1700_v16 = vld [vmem:[#allocation2 + $0xa4] sm:$0x8]  ;;  %6519 = vmatpush3.bf16.msra.mxu1 %v6794_v9 }
  0x96   : > { %v809_v45 = vshrl.u32 %v568_v25, 16  ;;  %v1343_v48 = vrot.slane %v1342_v39, 4  ;;  %v814_v50 = vshrl.u32 %v569_v32, 16  ;;  %v817_v51 = vshll.u32 %v569_v32, 16  ;;  %v1702_v27 = vld [vmem:[#allocation2 + $0xac] sm:$0xf] }
  0x97   : > { %4777 = vmatmul.mubr.bf16.gmra.mrb[36].mxu0 %v5835_v38  ;;  %v1353_v49 = vrot.slane %v1352_v40, 4  ;;  %v1355_v53 = vshll.u32 %v1181_v47, 16  ;;  %v1870_v54 = vor.u32 %v1868_v36, %v1867_v42  ;;  %v1872_v55 = vrot.slane %v1867_v42, 4  ;;  %v571_v33 = vld [vmem:[#allocation2 + $0xe0] sm:$0x8] }
  0x98   : > { %4784 = vmatprep.mubr.bf16.mxu0 %v6785_v23  ;;  %v1876_v57 = vrot.slane %v1874_v43, 7  ;;  %v1348_v59 = vsel %vm7087_vm7, %v1343_v48, %v1347_v28  ;;  %v5820_v60 = vrot.slane %v809_v45, 11  ;;  %v816_v61 = vrot.slane %v814_v50, 7  ;;  %v272_v38 = vld [vmem:[#allocation2 + $0x9c] sm:$0x1] }
  0x99   : > { %v823_v62 = vshrl.u32 %v570_v37, 16  ;;  %v1357_v0 = vrot.slane %v1355_v53, 5  ;;  %v1871_v1 = vsel %vm6944_vm2, %v5880_v41, %v1870_v54  ;;  %v826_v2 = vshll.u32 %v570_v37, 16  ;;  %v1185_v39 = vld [vmem:[#allocation2 + $0x94] sm:$0xf] }
  0x9a   : > { %v1879_v56 = vor.u32 %v1877_v44, %v1876_v57  ;;  %v819_v3 = vor.u32 %v817_v51, %v816_v61  ;;  %v821_v5 = vrot.slane %v816_v61, 4  ;;  %v266_v7 = vsel %vm7064_vm6, 0, %v265_v46  ;;  %v1186_v44 = vld [vmem:[#allocation2 + $0x98] sm:$0xf]  ;;  %v6797_v61 = vld [vmem:[%s8372_s1 + $0x1e8] sm:$0xff]  }
  0x9b   : > { %v825_v6 = vrot.slane %v823_v62, 7  ;;  %v1358_v10 = vsel %vm7087_vm7, %v1353_v49, %v1357_v0  ;;  %267 = vst [vmem:[#allocation2 + $0x88] sm:$0x1] %v266_v7  ;;  %v1360_v12 = vshrl.u32 %v1182_v52, 16  ;;  %v1363_v13 = vshll.u32 %v1182_v52, 16  ;;  %6520 = vmatprep.subr.bf16.mxu1 %v6797_v61 }
  0x9c   : > { %v1880_v11 = vsel %vm6944_vm2, %v1872_v55, %v1879_v56  ;;  %v5863_v17 = vcombine.low %v1348_v59, %v1358_v10  ;;  %v820_v19 = vsel %vm6944_vm2, %v5820_v60, %v819_v3  ;;  %v1369_v24 = vshll.u32 %v1183_v8, 16  ;;  %v1703_v49 = vld [vmem:[#allocation2 + $0xb8] sm:$0x8]  ;;  %v1704_v60 = vld [vmem:[#allocation2 + $0xbc] sm:$0xf] }
  0x9d   : > { %v5896_v18 = vcombine.low %v1871_v1, %v1880_v11  ;;  %v828_v20 = vor.u32 %v826_v2, %v825_v6  ;;  %v1362_v22 = vrot.slane %v1360_v12, 4  ;;  %v1365_v23 = vrot.slane %v1363_v13, 5 }
  0x9e   : > { %v1373_v25 = vshrl.u32 %v1183_v8, 16  ;;  %4906 = vmatmul.mubr.bf16.gmra.mrb[36].mxu1 %v5863_v17  ;;  %v6114_v29 = vpack.c.bf16 %v365_v14, %v365_v14  ;;  %v6115_v31 = vpack.c.bf16 %v366_v15, %v366_v15  ;;  %v1882_v32 = vshrl.u32 %v1700_v16, 16  ;;  %v1705_v15 = vld [vmem:[#allocation2 + $0xc0] sm:$0xf] }
  0x9f   : > { %v829_v28 = vsel %vm6944_vm2, %v821_v5, %v828_v20  ;;  %4913 = vmatprep.mubr.bf16.mxu1 %v5896_v18  ;;  %v1366_v35 = vor.u32 %v1365_v23, %v1362_v22  ;;  %v1371_v36 = vrot.slane %v1369_v24, 5  ;;  %v1887_v41 = vshrl.u32 %v1701_v21, 16 }
  0xa0   : > { %v5836_v34 = vcombine.low %v820_v19, %v829_v28  ;;  %v1375_v37 = vrot.slane %v1373_v25, 4  ;;  %526 = vst [vmem:[#allocation2 + $0xe4] sm:$0xf] %v6114_v29  ;;  %527 = vst [vmem:[#allocation2 + $0xe8] sm:$0xf] %v6115_v31  ;;  %v5881_v40 = vrot.slane %v1882_v32, 11 }
  0xa1   : > { %v1890_v42 = vshll.u32 %v1701_v21, 16  ;;  %v1896_v43 = vshrl.u32 %v1702_v27, 16  ;;  %v1367_v45 = vrot.slane %v1366_v35, 4  ;;  %v1899_v47 = vshll.u32 %v1702_v27, 16  ;;  %v2303_v32 = vld [vmem:[#allocation2 + $0x1c] sm:$0xf] }
  0xa2   : > { %4785 = vmatmul.mubr.bf16.gmra.mrb[40].mxu0 %v5836_v34  ;;  %v1376_v46 = vor.u32 %v1375_v37, %v1371_v36  ;;  %v831_v48 = vshrl.u32 %v571_v33, 16  ;;  %v1184_v50 = vld [vmem:[#allocation2 + $0x88] sm:$0x1]  ;;  %v1889_v51 = vrot.slane %v1887_v41, 7  ;;  %v273_v53 = vsel %vm7064_vm6, 0, %v272_v38 }
  0xa3   : > { %v1898_v52 = vrot.slane %v1896_v43, 7  ;;  %v1384_v54 = vshrl.u32 %v1185_v39, 16  ;;  %v1372_v55 = vsel %vm7087_vm7, %v1367_v45, %v1371_v36  ;;  %v1379_v58 = vshll.u32 %v1184_v50, 16  ;;  %274 = vst [vmem:[#allocation2 + $0x9c] sm:$0x1] %v273_v53 }
  0xa4   : > { %v1377_v57 = vrot.slane %v1376_v46, 4  ;;  %v7264_v59 = vrot.slane %v831_v48, 11  ;;  %v1892_v62 = vor.u32 %v1890_v42, %v1889_v51  ;;  %v1894_v0 = vrot.slane %v1889_v51, 4  ;;  %v2305_v50 = vld [vmem:[#allocation2 + $0x24] sm:$0x1] }
  0xa5   : > { %v1901_v1 = vor.u32 %v1899_v47, %v1898_v52  ;;  %v1386_v56 = vrot.slane %v1384_v54, 4  ;;  %v1381_v2 = vrot.slane %v1379_v58, 5  ;;  %v1387_v3 = vshll.u32 %v1185_v39, 16 }
  0xa6   : > { %v1393_v5 = vshll.u32 %v1186_v44, 16  ;;  %v1397_v6 = vshrl.u32 %v1186_v44, 16  ;;  %v1893_v7 = vsel %vm6944_vm2, %v5881_v40, %v1892_v62  ;;  %v1904_v9 = vshrl.u32 %v1703_v49, 16  ;;  %v2304_v49 = vld [vmem:[#allocation2 + $0x20] sm:$0xf] }
  0xa7   : > { %v1902_v8 = vsel %vm6944_vm2, %v1894_v0, %v1901_v1  ;;  %v1909_v10 = vshrl.u32 %v1704_v60, 16  ;;  %v1382_v11 = vsel %vm7087_vm7, %v1377_v57, %v1381_v2  ;;  %v6790_v12 = vld [vmem:[#allocation2 + $0xe4] sm:$0xff]   ;;  %v1389_v14 = vrot.slane %v1387_v3, 5  ;;  %v1189_v0 = vld [vmem:[#allocation2 + $0xac] sm:$0xf] }
  0xa8   : > { %v5897_v13 = vcombine.low %v1893_v7, %v1902_v8  ;;  %v5864_v16 = vcombine.low %v1372_v55, %v1382_v11  ;;  %v572_v17 = vld [vmem:[#allocation2 + $0xe4] sm:$0xf]  ;;  %v573_v18 = vld [vmem:[#allocation2 + $0xe8] sm:$0xf]  ;;  %v1395_v19 = vrot.slane %v1393_v5, 5  ;;  %v1399_v20 = vrot.slane %v1397_v6, 4  ;;  %4792 = vmatprep.mubr.bf16.mxu0 %v6790_v12 }
  0xa9   : > { %v836_v21 = vshrl.u32 %v572_v17, 16  ;;  %v839_v22 = vshll.u32 %v572_v17, 16  ;;  %v845_v23 = vshrl.u32 %v573_v18, 16  ;;  %v848_v24 = vshll.u32 %v573_v18, 16  ;;  %v279_v55 = vld [vmem:[#allocation2 + $0xb0] sm:$0x1] }
  0xaa   : > { %4914 = vmatmul.mubr.bf16.gmra.mrb[40].mxu1 %v5864_v16  ;;  %v1187_v25 = vld [vmem:[#allocation2 + $0x9c] sm:$0x1]  ;;  %v1390_v27 = vor.u32 %v1389_v14, %v1386_v56  ;;  %v1400_v28 = vor.u32 %v1399_v20, %v1395_v19  ;;  %v5882_v29 = vrot.slane %v1904_v9, 11  ;;  %v1911_v31 = vrot.slane %v1909_v10, 7  ;;  %v1188_v57 = vld [vmem:[#allocation2 + $0xa8] sm:$0xf] }
  0xab   : > { %4921 = vmatprep.mubr.bf16.mxu1 %v5897_v13  ;;  %v838_v33 = vrot.slane %v836_v21, 7  ;;  %v847_v34 = vrot.slane %v845_v23, 7  ;;  %v1403_v35 = vshll.u32 %v1187_v25, 16  ;;  %v1912_v36 = vshll.u32 %v1704_v60, 16  ;;  %v1706_v1 = vld [vmem:[#allocation2 + $0xcc] sm:$0x8] }
  0xac   : > { %v1391_v37 = vrot.slane %v1390_v27, 4  ;;  %v1401_v38 = vrot.slane %v1400_v28, 4  ;;  %v1916_v39 = vrot.slane %v1911_v31, 4  ;;  %v1918_v40 = vshrl.u32 %v1705_v15, 16  ;;  %v6799_v9 = vld [vmem:[%s8372_s1 + $0x1a8] sm:$0xff]  }
  0xad   : > { %v841_v41 = vor.u32 %v839_v22, %v838_v33  ;;  %v843_v42 = vrot.slane %v838_v33, 4  ;;  %v850_v43 = vor.u32 %v848_v24, %v847_v34  ;;  %v1405_v44 = vrot.slane %v1403_v35, 5  ;;  %v1707_v14 = vld [vmem:[#allocation2 + $0xd0] sm:$0xf]  ;;  %6521 = vmatpush3.bf16.msra.mxu1 %v6799_v9  ;;  %v1708_v22 = vld [vmem:[#allocation2 + $0xd4] sm:$0xf] }
  0xae   : > { %v1396_v45 = vsel %vm7087_vm7, %v1391_v37, %v1395_v19  ;;  %v1914_v46 = vor.u32 %v1912_v36, %v1911_v31  ;;  %v1920_v47 = vrot.slane %v1918_v40, 7  ;;  %v1921_v48 = vshll.u32 %v1705_v15, 16  ;;  %v2307_v35 = vld [vmem:[#allocation2 + $0x34] sm:$0xf]  ;;  %v6791_v37 = vld [vmem:[#allocation2 + $0x1c] sm:$0xff]  }
  0xaf   : > { %v842_v51 = vsel %vm6944_vm2, %v7264_v59, %v841_v41  ;;  %v851_v52 = vsel %vm6944_vm2, %v843_v42, %v850_v43  ;;  %v1406_v53 = vsel %vm7087_vm7, %v1401_v38, %v1405_v44  ;;  %v2352_v54 = vshrl.u32 %v2303_v32, 16  ;;  %v2308_v41 = vld [vmem:[#allocation2 + $0x38] sm:$0x1] }
  0xb0   : > { %v5837_v58 = vcombine.low %v842_v51, %v851_v52  ;;  %v5865_v60 = vcombine.low %v1396_v45, %v1406_v53  ;;  %v1915_v61 = vsel %vm6944_vm2, %v5882_v29, %v1914_v46  ;;  %v1923_v62 = vor.u32 %v1921_v48, %v1920_v47  ;;  %v2306_v29 = vld [vmem:[#allocation2 + $0x30] sm:$0xf]  ;;  %v286_v46 = vld [vmem:[#allocation2 + $0xc4] sm:$0x1]  ;;  %v1191_v47 = vld [vmem:[#allocation2 + $0xbc] sm:$0xf] }
  0xb1   : > { %v2354_v56 = vrot.slane %v2352_v54, 4  ;;  %v2355_v2 = vshll.u32 %v2303_v32, 16  ;;  %v2361_v59 = vshll.u32 %v2304_v49, 16  ;;  %v2365_v3 = vshrl.u32 %v2304_v49, 16  ;;  %v6798_v48 = vld [vmem:[%s8372_s1 + $0x208] sm:$0xff]   ;;  %v6802_v49 = vld [vmem:[%s8372_s1 + $0x1f0] sm:$0xff]  }
  0xb2   : > { %4793 = vmatmul.mubr.bf16.gmra.mrb[44].mxu0 %v5837_v58  ;;  %4922 = vmatmul.mubr.bf16.gmra.mrb[44].mxu1 %v5865_v60  ;;  %v1924_v5 = vsel %vm6944_vm2, %v1916_v39, %v1923_v62  ;;  %v2371_v6 = vshll.u32 %v2305_v50, 16  ;;  %v280_v7 = vsel %vm7064_vm6, 0, %v279_v55  ;;  %v1408_v8 = vshrl.u32 %v1188_v57, 16 }
  0xb3   : > { %v5898_v10 = vcombine.low %v1915_v61, %v1924_v5  ;;  %v2357_v11 = vrot.slane %v2355_v2, 5  ;;  %v2363_v12 = vrot.slane %v2361_v59, 5  ;;  %v2367_v13 = vrot.slane %v2365_v3, 4  ;;  %281 = vst [vmem:[#allocation2 + $0xb0] sm:$0x1] %v280_v7  ;;  %6522 = vmatprep.subr.bf16.mxu1 %v6802_v49 }
  0xb4   : > { %v2373_v15 = vrot.slane %v2371_v6, 5  ;;  %v1410_v16 = vrot.slane %v1408_v8, 4  ;;  %v1411_v17 = vshll.u32 %v1188_v57, 16  ;;  %v1417_v18 = vshll.u32 %v1189_v0, 16  ;;  %v1709_v6 = vld [vmem:[#allocation2 + $0xe0] sm:$0x8] }
  0xb5   : > { %4929 = vmatprep.mubr.bf16.mxu1 %v5898_v10  ;;  %v2358_v19 = vor.u32 %v2357_v11, %v2354_v56  ;;  %v2368_v20 = vor.u32 %v2367_v13, %v2363_v12  ;;  %v1421_v21 = vshrl.u32 %v1189_v0, 16  ;;  %v1926_v23 = vshrl.u32 %v1706_v1, 16  ;;  %v1192_v56 = vld [vmem:[#allocation2 + $0xc0] sm:$0xf]  ;;  %v1710_v7 = vld [vmem:[#allocation2 + $0xe4] sm:$0xf] }
  0xb6   : > { %v1413_v24 = vrot.slane %v1411_v17, 5  ;;  %v1419_v25 = vrot.slane %v1417_v18, 5  ;;  %v1931_v27 = vshrl.u32 %v1707_v14, 16  ;;  %v1934_v28 = vshll.u32 %v1707_v14, 16  ;;  %v6803_v8 = vld [vmem:[%s8372_s1 + $0x210] sm:$0xff]  }
  0xb7   : > { %v2359_v31 = vrot.slane %v2358_v19, 4  ;;  %v2369_v32 = vrot.slane %v2368_v20, 4  ;;  %v1423_v33 = vrot.slane %v1421_v21, 4  ;;  %v5883_v34 = vrot.slane %v1926_v23, 11  ;;  %v6804_v20 = vld [vmem:[%s8372_s1 + $0x1b0] sm:$0xff]  }
  0xb8   : > { %v1414_v36 = vor.u32 %v1413_v24, %v1410_v16  ;;  %v1933_v38 = vrot.slane %v1931_v27, 7  ;;  %v1940_v39 = vshrl.u32 %v1708_v22, 16  ;;  %v1943_v40 = vshll.u32 %v1708_v22, 16  ;;  %6523 = vmatpush3.bf16.msra.mxu1 %v6804_v20 }
  0xb9   : > { %v2364_v42 = vsel %vm7087_vm7, %v2359_v31, %v2363_v12  ;;  %v2374_v43 = vsel %vm7087_vm7, %v2369_v32, %v2373_v15  ;;  %v1424_v44 = vor.u32 %v1423_v33, %v1419_v25  ;;  %v2376_v45 = vshrl.u32 %v2306_v29, 16 }
  0xba   : > { %v5922_v50 = vcombine.low %v2364_v42, %v2374_v43  ;;  %v1190_v51 = vld [vmem:[#allocation2 + $0xb0] sm:$0x1]  ;;  %v1415_v52 = vrot.slane %v1414_v36, 4  ;;  %v1936_v53 = vor.u32 %v1934_v28, %v1933_v38  ;;  %v1938_v54 = vrot.slane %v1933_v38, 4 }
  0xbb   : > { %v1425_v55 = vrot.slane %v1424_v44, 4  ;;  %v1427_v57 = vshll.u32 %v1190_v51, 16  ;;  %v1942_v58 = vrot.slane %v1940_v39, 7  ;;  %v2378_v60 = vrot.slane %v2376_v45, 4  ;;  %v6795_v44 = vld [vmem:[#allocation2 + $0x30] sm:$0xff]  }
  0xbc   : > { %5026 = vmatprep.mubr.bf16.mxu0 %v5922_v50  ;;  %v1420_v61 = vsel %vm7087_vm7, %v1415_v52, %v1419_v25  ;;  %v1937_v62 = vsel %vm6944_vm2, %v5883_v34, %v1936_v53  ;;  %v2379_v0 = vshll.u32 %v2306_v29, 16  ;;  %v2385_v1 = vshll.u32 %v2307_v35, 16  ;;  %v1711_v25 = vld [vmem:[#allocation2 + $0xe8] sm:$0xf]  ;;  %v2311_v53 = vld [vmem:[#allocation2 + $0x4c] sm:$0x1] }
  0xbd   : > { %v1429_v2 = vrot.slane %v1427_v57, 5  ;;  %5027 = vmatmul.mubr.bf16.vlgmr.msra.gmra.mrb[48].mxu0 %v6791_v37  ;;  %v1945_v59 = vor.u32 %v1943_v40, %v1942_v58  ;;  %v2389_v3 = vshrl.u32 %v2307_v35, 16  ;;  %v2395_v5 = vshll.u32 %v2308_v41, 16  ;;  %v2309_v40 = vld [vmem:[#allocation2 + $0x44] sm:$0xf] }
  0xbe   : > { %6647 = vmatpush3.bf16.msra.mxu0 %v7240_v63  ;;  %v2381_v9 = vrot.slane %v2379_v0, 5  ;;  %v2387_v10 = vrot.slane %v2385_v1, 5  ;;  %v287_v11 = vsel %vm7064_vm6, 0, %v286_v46  ;;  %v1432_v12 = vshrl.u32 %v1191_v47, 16  ;;  %v2310_v46 = vld [vmem:[#allocation2 + $0x48] sm:$0xf] }
  0xbf   : > { %v1430_v13 = vsel %vm7087_vm7, %v1425_v55, %v1429_v2  ;;  %v1946_v14 = vsel %vm6944_vm2, %v1938_v54, %v1945_v59  ;;  %v2391_v15 = vrot.slane %v2389_v3, 4  ;;  %v2397_v16 = vrot.slane %v2395_v5, 5  ;;  %288 = vst [vmem:[#allocation2 + $0xc4] sm:$0x1] %v287_v11  ;;  %6648 = vmatprep.subr.bf16.mxu0 %v6798_v48  ;;  %v293_v1 = vld [vmem:[#allocation2 + $0xd8] sm:$0x1] }
  0xc0   : > { %v5866_v17 = vcombine.low %v1420_v61, %v1430_v13  ;;  %v5899_v18 = vcombine.low %v1937_v62, %v1946_v14  ;;  %v2382_v19 = vor.u32 %v2381_v9, %v2378_v60  ;;  %v1434_v63 = vrot.slane %v1432_v12, 4  ;;  %v1194_v5 = vld [vmem:[#allocation2 + $0xd0] sm:$0xf]  ;;  %v1195_v11 = vld [vmem:[#allocation2 + $0xd4] sm:$0xf]  ;;  %v6809_v12 = vld [vmem:[%s8372_s1 + $0x1b8] sm:$0xff]  }
  0xc1   : > { %v2392_v21 = vor.u32 %v2391_v15, %v2387_v10  ;;  %v1435_v22 = vshll.u32 %v1191_v47, 16  ;;  %v1441_v23 = vshll.u32 %v1192_v56, 16  ;;  %v1445_v24 = vshrl.u32 %v1192_v56, 16  ;;  %v6807_v47 = vld [vmem:[%s8372_s1 + $0x1f8] sm:$0xff]  }
  0xc2   : > { %4930 = vmatmul.mubr.bf16.gmra.mrb[48].mxu1 %v5866_v17  ;;  %v2383_v27 = vrot.slane %v2382_v19, 4  ;;  %v1948_v28 = vshrl.u32 %v1709_v6, 16  ;;  %v1953_v29 = vshrl.u32 %v1710_v7, 16  ;;  %v1956_v31 = vshll.u32 %v1710_v7, 16  ;;  %6649 = vmatpush3.bf16.msra.mxu0 %v6798_v48  ;;  %v6808_v6 = vld [vmem:[%s8372_s1 + $0x218] sm:$0xff]  }
  0xc3   : > { %4937 = vmatprep.mubr.bf16.mxu1 %v5899_v18  ;;  %v2393_v32 = vrot.slane %v2392_v21, 4  ;;  %v1437_v33 = vrot.slane %v1435_v22, 5  ;;  %v1443_v34 = vrot.slane %v1441_v23, 5  ;;  %v1447_v35 = vrot.slane %v1445_v24, 4  ;;  %6650 = vmatprep.subr.bf16.mxu0 %v6803_v8  ;;  %v1712_v17 = vld [vmem:[#allocation2 + $0xf4] sm:$0x8] }
  0xc4   : > { %v2388_v36 = vsel %vm7087_vm7, %v2383_v27, %v2387_v10  ;;  %v5884_v37 = vrot.slane %v1948_v28, 11  ;;  %v1955_v38 = vrot.slane %v1953_v29, 7  ;;  %v1962_v39 = vshrl.u32 %v1711_v25, 16  ;;  %6524 = vmatprep.subr.bf16.mxu1 %v6807_v47  ;;  %v1713_v18 = vld [vmem:[#allocation2 + $0xf8] sm:$0xf] }
  0xc5   : > { %v2398_v41 = vsel %vm7087_vm7, %v2393_v32, %v2397_v16  ;;  %v1438_v42 = vor.u32 %v1437_v33, %v1434_v63  ;;  %v1448_v43 = vor.u32 %v1447_v35, %v1443_v34  ;;  %v1965_v45 = vshll.u32 %v1711_v25, 16  ;;  %6525 = vmatpush3.bf16.msra.mxu1 %v6809_v12  ;;  %v1714_v27 = vld [vmem:[#allocation2 + $0xfc] sm:$0xf]  ;;  %v2312_v33 = vld [vmem:[#allocation2 + $0x58] sm:$0xf] }
  0xc6   : > { %v5923_v48 = vcombine.low %v2388_v36, %v2398_v41  ;;  %v1193_v49 = vld [vmem:[#allocation2 + $0xc4] sm:$0x1]  ;;  %v1958_v50 = vor.u32 %v1956_v31, %v1955_v38  ;;  %v1960_v51 = vrot.slane %v1955_v38, 4  ;;  %v1964_v52 = vrot.slane %v1962_v39, 7  ;;  %6651 = vmatpush3.bf16.msra.mxu0 %v6803_v8  ;;  %v2313_v38 = vld [vmem:[#allocation2 + $0x5c] sm:$0xf] }
  0xc7   : > { %v1439_v54 = vrot.slane %v1438_v42, 4  ;;  %v1449_v55 = vrot.slane %v1448_v43, 4  ;;  %v1451_v57 = vshll.u32 %v1193_v49, 16  ;;  %v2400_v58 = vshrl.u32 %v2309_v40, 16  ;;  %6652 = vmatprep.subr.bf16.mxu0 %v6808_v6 }
  0xc8   : > { %5034 = vmatprep.mubr.bf16.mxu0 %v5923_v48  ;;  %v1959_v60 = vsel %vm6944_vm2, %v5884_v37, %v1958_v50  ;;  %v1967_v61 = vor.u32 %v1965_v45, %v1964_v52  ;;  %v2403_v62 = vshll.u32 %v2309_v40, 16  ;;  %v2409_v0 = vshll.u32 %v2310_v46, 16  ;;  %v2314_v48 = vld [vmem:[#allocation2 + $0x60] sm:$0x1] }
  0xc9   : > { %v1444_v56 = vsel %vm7087_vm7, %v1439_v54, %v1443_v34  ;;  %v1453_v2 = vrot.slane %v1451_v57, 5  ;;  %5035 = vmatmul.mubr.bf16.gmra.mrb[52].mxu0 %v6795_v44  ;;  %v2402_v59 = vrot.slane %v2400_v58, 4  ;;  %v2413_v3 = vshrl.u32 %v2310_v46, 16  ;;  %v6796_v46 = vld [vmem:[#allocation2 + $0x44] sm:$0xff]  }
  0xca   : > { %v1968_v7 = vsel %vm6944_vm2, %v1960_v51, %v1967_v61  ;;  %v2405_v8 = vrot.slane %v2403_v62, 5  ;;  %v2411_v9 = vrot.slane %v2409_v0, 5  ;;  %v2419_v10 = vshll.u32 %v2311_v53, 16  ;;  %6653 = vmatpush3.bf16.msra.mxu0 %v6808_v6  ;;  %v300_v53 = vld [vmem:[#allocation2 + $0xec] sm:$0x1] }
  0xcb   : > { %v1454_v13 = vsel %vm7087_vm7, %v1449_v55, %v1453_v2  ;;  %v5900_v14 = vcombine.low %v1959_v60, %v1968_v7  ;;  %v2415_v15 = vrot.slane %v2413_v3, 4  ;;  %v294_v16 = vsel %vm7064_vm6, 0, %v293_v1  ;;  %v1197_v54 = vld [vmem:[#allocation2 + $0xe4] sm:$0xf] }
  0xcc   : > { %v5867_v19 = vcombine.low %v1444_v56, %v1454_v13  ;;  %v2406_v63 = vor.u32 %v2405_v8, %v2402_v59  ;;  %v2421_v20 = vrot.slane %v2419_v10, 5  ;;  %295 = vst [vmem:[#allocation2 + $0xd8] sm:$0x1] %v294_v16  ;;  %v1456_v21 = vshrl.u32 %v1194_v5, 16  ;;  %v1198_v10 = vld [vmem:[#allocation2 + $0xe8] sm:$0xf] }
  0xcd   : > { %v2416_v22 = vor.u32 %v2415_v15, %v2411_v9  ;;  %v1459_v23 = vshll.u32 %v1194_v5, 16  ;;  %v1465_v24 = vshll.u32 %v1195_v11, 16  ;;  %v1469_v25 = vshrl.u32 %v1195_v11, 16  ;;  %v1715_v15 = vld [vmem:[#allocation2 + $0x108] sm:$0x8] }
  0xce   : > { %4938 = vmatmul.mubr.bf16.gmra.mrb[52].mxu1 %v5867_v19  ;;  %v2407_v28 = vrot.slane %v2406_v63, 4  ;;  %v1458_v29 = vrot.slane %v1456_v21, 4  ;;  %v1970_v31 = vshrl.u32 %v1712_v17, 16  ;;  %v1975_v32 = vshrl.u32 %v1713_v18, 16  ;;  %v1716_v63 = vld [vmem:[#allocation2 + $0x10c] sm:$0xf] }
  0xcf   : > { %4945 = vmatprep.mubr.bf16.mxu1 %v5900_v14  ;;  %v2417_v34 = vrot.slane %v2416_v22, 4  ;;  %v1461_v35 = vrot.slane %v1459_v23, 5  ;;  %v1467_v36 = vrot.slane %v1465_v24, 5  ;;  %v1471_v37 = vrot.slane %v1469_v25, 4 }
  0xd0   : > { %v2412_v39 = vsel %vm7087_vm7, %v2407_v28, %v2411_v9  ;;  %v5885_v40 = vrot.slane %v1970_v31, 11  ;;  %v1977_v41 = vrot.slane %v1975_v32, 7  ;;  %v1978_v42 = vshll.u32 %v1713_v18, 16 }
  0xd1   : > { %v2422_v43 = vsel %vm7087_vm7, %v2417_v34, %v2421_v20  ;;  %v1462_v44 = vor.u32 %v1461_v35, %v1458_v29  ;;  %v1472_v45 = vor.u32 %v1471_v37, %v1467_v36  ;;  %v1984_v47 = vshrl.u32 %v1714_v27, 16  ;;  %v6813_v20 = vld [vmem:[%s8372_s1 + $0x220] sm:$0xff]   ;;  %v1717_v29 = vld [vmem:[#allocation2 + $0x110] sm:$0xf] }
  0xd2   : > { %v5924_v49 = vcombine.low %v2412_v39, %v2422_v43  ;;  %v1980_v50 = vor.u32 %v1978_v42, %v1977_v41  ;;  %v1982_v51 = vrot.slane %v1977_v41, 4  ;;  %v1987_v52 = vshll.u32 %v1714_v27, 16  ;;  %6654 = vmatprep.subr.bf16.mxu0 %v6813_v20 }
  0xd3   : > { %v1196_v55 = vld [vmem:[#allocation2 + $0xd8] sm:$0x1]  ;;  %v1463_v57 = vrot.slane %v1462_v44, 4  ;;  %v1473_v58 = vrot.slane %v1472_v45, 4  ;;  %v1986_v60 = vrot.slane %v1984_v47, 7  ;;  %v2424_v61 = vshrl.u32 %v2312_v33, 16  ;;  %6655 = vmatpush3.bf16.msra.mxu0 %v6813_v20 }
  0xd4   : > { %5042 = vmatprep.mubr.bf16.mxu0 %v5924_v49  ;;  %v1475_v62 = vshll.u32 %v1196_v55, 16  ;;  %v1981_v0 = vsel %vm6944_vm2, %v5885_v40, %v1980_v50  ;;  %v2427_v1 = vshll.u32 %v2312_v33, 16  ;;  %v2433_v56 = vshll.u32 %v2313_v38, 16  ;;  %v6800_v40 = vld [vmem:[#allocation2 + $0x58] sm:$0xff]   ;;  %v2317_v50 = vld [vmem:[#allocation2 + $0x74] sm:$0x1] }
  0xd5   : > { %v1468_v2 = vsel %vm7087_vm7, %v1463_v57, %v1467_v36  ;;  %5043 = vmatmul.mubr.bf16.gmra.mrb[56].mxu0 %v6796_v46  ;;  %v1989_v59 = vor.u32 %v1987_v52, %v1986_v60  ;;  %v2426_v3 = vrot.slane %v2424_v61, 4  ;;  %v2437_v5 = vshrl.u32 %v2313_v38, 16  ;;  %v2315_v36 = vld [vmem:[#allocation2 + $0x6c] sm:$0xf]  ;;  %v2316_v46 = vld [vmem:[#allocation2 + $0x70] sm:$0xf] }
  0xd6   : > { %v1477_v6 = vrot.slane %v1475_v62, 5  ;;  %v2429_v7 = vrot.slane %v2427_v1, 5  ;;  %v2435_v8 = vrot.slane %v2433_v56, 5  ;;  %v2443_v9 = vshll.u32 %v2314_v48, 16  ;;  %v307_v52 = vld [vmem:[#allocation2 + $0x100] sm:$0x1] }
  0xd7   : > { %v1990_v11 = vsel %vm6944_vm2, %v1982_v51, %v1989_v59  ;;  %v2439_v12 = vrot.slane %v2437_v5, 4  ;;  %v301_v13 = vsel %vm7064_vm6, 0, %v300_v53  ;;  %v1480_v14 = vshrl.u32 %v1197_v54, 16  ;;  %v1200_v1 = vld [vmem:[#allocation2 + $0xf8] sm:$0xf]  ;;  %v6818_v20 = vld [vmem:[%s8372_s1 + $0x228] sm:$0xff]  }
  0xd8   : > { %v1478_v16 = vsel %vm7087_vm7, %v1473_v58, %v1477_v6  ;;  %v5901_v17 = vcombine.low %v1981_v0, %v1990_v11  ;;  %v2430_v18 = vor.u32 %v2429_v7, %v2426_v3  ;;  %v2445_v19 = vrot.slane %v2443_v9, 5  ;;  %302 = vst [vmem:[#allocation2 + $0xec] sm:$0x1] %v301_v13  ;;  %v1201_v5 = vld [vmem:[#allocation2 + $0xfc] sm:$0xf]  ;;  %6656 = vmatprep.subr.bf16.mxu0 %v6818_v20 }
  0xd9   : > { %v5868_v21 = vcombine.low %v1468_v2, %v1478_v16  ;;  %v2440_v22 = vor.u32 %v2439_v12, %v2435_v8  ;;  %v1482_v23 = vrot.slane %v1480_v14, 4  ;;  %v1483_v24 = vshll.u32 %v1197_v54, 16  ;;  %6657 = vmatpush3.bf16.msra.mxu0 %v6818_v20 }
  0xda   : > { %v2431_v25 = vrot.slane %v2430_v18, 4  ;;  %v1489_v27 = vshll.u32 %v1198_v10, 16  ;;  %v1493_v28 = vshrl.u32 %v1198_v10, 16  ;;  %v1992_v31 = vshrl.u32 %v1715_v15, 16  ;;  %v1718_v10 = vld [vmem:[#allocation2 + $0x11c] sm:$0x8] }
  0xdb   : > { %4946 = vmatmul.mubr.bf16.gmra.mrb[56].mxu1 %v5868_v21  ;;  %v2441_v32 = vrot.slane %v2440_v22, 4  ;;  %v1485_v33 = vrot.slane %v1483_v24, 5  ;;  %v1997_v34 = vshrl.u32 %v1716_v63, 16  ;;  %v2000_v35 = vshll.u32 %v1716_v63, 16  ;;  %v1719_v15 = vld [vmem:[#allocation2 + $0x120] sm:$0xf] }
  0xdc   : > { %4953 = vmatprep.mubr.bf16.mxu1 %v5901_v17  ;;  %v2436_v37 = vsel %vm7087_vm7, %v2431_v25, %v2435_v8  ;;  %v1491_v38 = vrot.slane %v1489_v27, 5  ;;  %v1495_v39 = vrot.slane %v1493_v28, 4  ;;  %v5886_v41 = vrot.slane %v1992_v31, 11  ;;  %v1720_v63 = vld [vmem:[#allocation2 + $0x124] sm:$0xf] }
  0xdd   : > { %v2446_v42 = vsel %vm7087_vm7, %v2441_v32, %v2445_v19  ;;  %v1486_v43 = vor.u32 %v1485_v33, %v1482_v23  ;;  %v1999_v44 = vrot.slane %v1997_v34, 7  ;;  %v2006_v45 = vshrl.u32 %v1717_v29, 16  ;;  %v2318_v25 = vld [vmem:[#allocation2 + $0x80] sm:$0xf] }
  0xde   : > { %v5925_v47 = vcombine.low %v2436_v37, %v2446_v42  ;;  %v1496_v48 = vor.u32 %v1495_v39, %v1491_v38  ;;  %v2009_v49 = vshll.u32 %v1717_v29, 16  ;;  %v2448_v51 = vshrl.u32 %v2315_v36, 16  ;;  %v6801_v42 = vld [vmem:[#allocation2 + $0x6c] sm:$0xff]  }
  0xdf   : > { %v1199_v53 = vld [vmem:[#allocation2 + $0xec] sm:$0x1]  ;;  %v1487_v54 = vrot.slane %v1486_v43, 4  ;;  %v2002_v55 = vor.u32 %v2000_v35, %v1999_v44  ;;  %v2004_v57 = vrot.slane %v1999_v44, 4  ;;  %v2008_v58 = vrot.slane %v2006_v45, 7 }
  0xe0   : > { %5050 = vmatprep.mubr.bf16.mxu0 %v5925_v47  ;;  %v1497_v60 = vrot.slane %v1496_v48, 4  ;;  %v1499_v61 = vshll.u32 %v1199_v53, 16  ;;  %v2450_v62 = vrot.slane %v2448_v51, 4  ;;  %v2451_v0 = vshll.u32 %v2315_v36, 16 }
  0xe1   : > { %v1492_v56 = vsel %vm7087_vm7, %v1487_v54, %v1491_v38  ;;  %5051 = vmatmul.mubr.bf16.gmra.mrb[60].mxu0 %v6800_v40  ;;  %v2003_v2 = vsel %vm6944_vm2, %v5886_v41, %v2002_v55  ;;  %v2011_v59 = vor.u32 %v2009_v49, %v2008_v58  ;;  %v2457_v3 = vshll.u32 %v2316_v46, 16  ;;  %v2319_v40 = vld [vmem:[#allocation2 + $0x84] sm:$0xf] }
  0xe2   : > { %v1501_v6 = vrot.slane %v1499_v61, 5  ;;  %v2453_v7 = vrot.slane %v2451_v0, 5  ;;  %v2461_v8 = vshrl.u32 %v2316_v46, 16  ;;  %v2467_v9 = vshll.u32 %v2317_v50, 16  ;;  %v2320_v46 = vld [vmem:[#allocation2 + $0x88] sm:$0x1] }
  0xe3   : > { %v2012_v11 = vsel %vm6944_vm2, %v2004_v57, %v2011_v59  ;;  %v2459_v12 = vrot.slane %v2457_v3, 5  ;;  %v308_v13 = vsel %vm7064_vm6, 0, %v307_v52  ;;  %v1504_v14 = vshrl.u32 %v1200_v1, 16  ;;  %v314_v57 = vld [vmem:[#allocation2 + $0x114] sm:$0x1] }
  0xe4   : > { %v1502_v16 = vsel %vm7087_vm7, %v1497_v60, %v1501_v6  ;;  %v5902_v17 = vcombine.low %v2003_v2, %v2012_v11  ;;  %v2454_v18 = vor.u32 %v2453_v7, %v2450_v62  ;;  %v2463_v19 = vrot.slane %v2461_v8, 4  ;;  %309 = vst [vmem:[#allocation2 + $0x100] sm:$0x1] %v308_v13  ;;  %v1203_v0 = vld [vmem:[#allocation2 + $0x10c] sm:$0xf] }
  0xe5   : > { %v5869_v21 = vcombine.low %v1492_v56, %v1502_v16  ;;  %v2469_v22 = vrot.slane %v2467_v9, 5  ;;  %v1506_v23 = vrot.slane %v1504_v14, 4  ;;  %v1507_v24 = vshll.u32 %v1200_v1, 16  ;;  %v1204_v8 = vld [vmem:[#allocation2 + $0x110] sm:$0xf] }
  0xe6   : > { %v2455_v27 = vrot.slane %v2454_v18, 4  ;;  %v2464_v28 = vor.u32 %v2463_v19, %v2459_v12  ;;  %v1513_v29 = vshll.u32 %v1201_v5, 16  ;;  %v1517_v31 = vshrl.u32 %v1201_v5, 16  ;;  %v6823_v9 = vld [vmem:[%s8372_s1 + $0x230] sm:$0xff]  }
  0xe7   : > { %4954 = vmatmul.mubr.bf16.gmra.mrb[60].mxu1 %v5869_v21  ;;  %v1509_v32 = vrot.slane %v1507_v24, 5  ;;  %v2014_v33 = vshrl.u32 %v1718_v10, 16  ;;  %v2019_v34 = vshrl.u32 %v1719_v15, 16  ;;  %v2022_v35 = vshll.u32 %v1719_v15, 16  ;;  %v1721_v14 = vld [vmem:[#allocation2 + $0x130] sm:$0x8]  ;;  %6658 = vmatprep.subr.bf16.mxu0 %v6823_v9 }
  0xe8   : > { %4961 = vmatprep.mubr.bf16.mxu1 %v5902_v17  ;;  %v2460_v36 = vsel %vm7087_vm7, %v2455_v27, %v2459_v12  ;;  %v2465_v37 = vrot.slane %v2464_v28, 4  ;;  %v1515_v38 = vrot.slane %v1513_v29, 5  ;;  %v1519_v39 = vrot.slane %v1517_v31, 4  ;;  %v1722_v19 = vld [vmem:[#allocation2 + $0x134] sm:$0xf]  ;;  %6659 = vmatpush3.bf16.msra.mxu0 %v6823_v9  ;;  %v6828_v9 = vld [vmem:[%s8372_s1 + $0x238] sm:$0xff]  }
  0xe9   : > { %v1510_v41 = vor.u32 %v1509_v32, %v1506_v23  ;;  %v5887_v43 = vrot.slane %v2014_v33, 11  ;;  %v2021_v44 = vrot.slane %v2019_v34, 7  ;;  %v2028_v45 = vshrl.u32 %v1720_v63, 16  ;;  %v1723_v28 = vld [vmem:[#allocation2 + $0x138] sm:$0xf]  ;;  %6660 = vmatprep.subr.bf16.mxu0 %v6828_v9 }
  0xea   : > { %v2470_v47 = vsel %vm7087_vm7, %v2465_v37, %v2469_v22  ;;  %v1520_v48 = vor.u32 %v1519_v39, %v1515_v38  ;;  %v2031_v49 = vshll.u32 %v1720_v63, 16  ;;  %v2472_v50 = vshrl.u32 %v2318_v25, 16  ;;  %v2321_v34 = vld [vmem:[#allocation2 + $0x94] sm:$0xf]  ;;  %v2322_v39 = vld [vmem:[#allocation2 + $0x98] sm:$0xf] }
  0xeb   : > { %v5926_v51 = vcombine.low %v2460_v36, %v2470_v47  ;;  %v1202_v52 = vld [vmem:[#allocation2 + $0x100] sm:$0x1]  ;;  %v1511_v53 = vrot.slane %v1510_v41, 4  ;;  %v2024_v54 = vor.u32 %v2022_v35, %v2021_v44  ;;  %v2026_v55 = vrot.slane %v2021_v44, 4 }
  0xec   : > { %v1521_v58 = vrot.slane %v1520_v48, 4  ;;  %v1523_v60 = vshll.u32 %v1202_v52, 16  ;;  %v2030_v61 = vrot.slane %v2028_v45, 7  ;;  %v2474_v62 = vrot.slane %v2472_v50, 4  ;;  %v6805_v47 = vld [vmem:[#allocation2 + $0x80] sm:$0xff]   ;;  %6661 = vmatpush3.bf16.msra.mxu0 %v6828_v9 }
  0xed   : > { %5058 = vmatprep.mubr.bf16.mxu0 %v5926_v51  ;;  %v1516_v1 = vsel %vm7087_vm7, %v1511_v53, %v1515_v38  ;;  %v2025_v56 = vsel %vm6944_vm2, %v5887_v43, %v2024_v54  ;;  %v2475_v2 = vshll.u32 %v2318_v25, 16  ;;  %v2481_v59 = vshll.u32 %v2319_v40, 16  ;;  %v2323_v54 = vld [vmem:[#allocation2 + $0x9c] sm:$0x1] }
  0xee   : > { %v1525_v3 = vrot.slane %v1523_v60, 5  ;;  %5059 = vmatmul.mubr.bf16.gmra.mrb[64].mxu0 %v6801_v42  ;;  %v2033_v5 = vor.u32 %v2031_v49, %v2030_v61  ;;  %v2485_v6 = vshrl.u32 %v2319_v40, 16  ;;  %v2491_v7 = vshll.u32 %v2320_v46, 16  ;;  %v321_v61 = vld [vmem:[#allocation2 + $0x128] sm:$0x1] }
  0xef   : > { %v2477_v10 = vrot.slane %v2475_v2, 5  ;;  %v2483_v11 = vrot.slane %v2481_v59, 5  ;;  %v315_v12 = vsel %vm7064_vm6, 0, %v314_v57  ;;  %v1528_v13 = vshrl.u32 %v1203_v0, 16  ;;  %v1206_v2 = vld [vmem:[#allocation2 + $0x120] sm:$0xf] }
  0xf0   : > { %v1526_v15 = vsel %vm7087_vm7, %v1521_v58, %v1525_v3  ;;  %v2034_v16 = vsel %vm6944_vm2, %v2026_v55, %v2033_v5  ;;  %v2487_v17 = vrot.slane %v2485_v6, 4  ;;  %v2493_v18 = vrot.slane %v2491_v7, 5  ;;  %316 = vst [vmem:[#allocation2 + $0x114] sm:$0x1] %v315_v12  ;;  %v375_v7 = vld [vmem:[%s6923_s14 + $0xf0] sm:$0xff] }
  0xf1   : > { %v5870_v63 = vcombine.low %v1516_v1, %v1526_v15  ;;  %v5903_v20 = vcombine.low %v2025_v56, %v2034_v16  ;;  %v2478_v21 = vor.u32 %v2477_v10, %v2474_v62  ;;  %v1530_v22 = vrot.slane %v1528_v13, 4 }
  0xf2   : > { %v2488_v23 = vor.u32 %v2487_v17, %v2483_v11  ;;  %v1531_v24 = vshll.u32 %v1203_v0, 16  ;;  %v1537_v25 = vshll.u32 %v1204_v8, 16  ;;  %v1541_v27 = vshrl.u32 %v1204_v8, 16  ;;  %v376_v8 = vld [vmem:[%s6923_s14 + $0xf8] sm:$0xff] }
  0xf3   : > { %4962 = vmatmul.mubr.bf16.gmra.mrb[64].mxu1 %v5870_v63  ;;  %v2479_v29 = vrot.slane %v2478_v21, 4  ;;  %v2036_v31 = vshrl.u32 %v1721_v14, 16  ;;  %v2041_v32 = vshrl.u32 %v1722_v19, 16  ;;  %v2044_v33 = vshll.u32 %v1722_v19, 16  ;;  %v1207_v14 = vld [vmem:[#allocation2 + $0x124] sm:$0xf] }
  0xf4   : > { %4969 = vmatprep.mubr.bf16.mxu1 %v5903_v20  ;;  %v2489_v35 = vrot.slane %v2488_v23, 4  ;;  %v1533_v36 = vrot.slane %v1531_v24, 5  ;;  %v1539_v37 = vrot.slane %v1537_v25, 5  ;;  %v1543_v38 = vrot.slane %v1541_v27, 4  ;;  %v1724_v63 = vld [vmem:[#allocation2 + $0x144] sm:$0x8] }
  0xf5   : > { %v2484_v40 = vsel %vm7087_vm7, %v2479_v29, %v2483_v11  ;;  %v5888_v41 = vrot.slane %v2036_v31, 11  ;;  %v2043_v42 = vrot.slane %v2041_v32, 7  ;;  %v2050_v43 = vshrl.u32 %v1723_v28, 16  ;;  %v2324_v20 = vld [vmem:[#allocation2 + $0xa8] sm:$0xf] }
  0xf6   : > { %v2494_v44 = vsel %vm7087_vm7, %v2489_v35, %v2493_v18  ;;  %v1534_v45 = vor.u32 %v1533_v36, %v1530_v22  ;;  %v1544_v46 = vor.u32 %v1543_v38, %v1539_v37  ;;  %v2053_v48 = vshll.u32 %v1723_v28, 16  ;;  %v2325_v25 = vld [vmem:[#allocation2 + $0xac] sm:$0xf] }
  0xf7   : > { %v5927_v49 = vcombine.low %v2484_v40, %v2494_v44  ;;  %v1205_v50 = vld [vmem:[#allocation2 + $0x114] sm:$0x1]  ;;  %v2046_v51 = vor.u32 %v2044_v33, %v2043_v42  ;;  %v2048_v52 = vrot.slane %v2043_v42, 4  ;;  %v2052_v53 = vrot.slane %v2050_v43, 7 }
  0xf8   : > { %v1535_v55 = vrot.slane %v1534_v45, 4  ;;  %v1545_v57 = vrot.slane %v1544_v46, 4  ;;  %v1547_v58 = vshll.u32 %v1205_v50, 16  ;;  %v2496_v60 = vshrl.u32 %v2321_v34, 16  ;;  %v6806_v42 = vld [vmem:[#allocation2 + $0x94] sm:$0xff]  }
  0xf9   : > { %5066 = vmatprep.mubr.bf16.mxu0 %v5927_v49  ;;  %v2047_v62 = vsel %vm6944_vm2, %v5888_v41, %v2046_v51  ;;  %v2055_v0 = vor.u32 %v2053_v48, %v2052_v53  ;;  %v2499_v1 = vshll.u32 %v2321_v34, 16  ;;  %v2505_v56 = vshll.u32 %v2322_v39, 16  ;;  %v2326_v45 = vld [vmem:[#allocation2 + $0xb0] sm:$0x1]  ;;  %v328_v53 = vld [vmem:[#allocation2 + $0x13c] sm:$0x1] }
  0xfa   : > { %v1540_v59 = vsel %vm7087_vm7, %v1535_v55, %v1539_v37  ;;  %v1549_v3 = vrot.slane %v1547_v58, 5  ;;  %5067 = vmatmul.mubr.bf16.gmra.mrb[68].mxu0 %v6805_v47  ;;  %v2498_v5 = vrot.slane %v2496_v60, 4  ;;  %v2509_v6 = vshrl.u32 %v2322_v39, 16 }
  0xfb   : > { %v2056_v10 = vsel %vm6944_vm2, %v2048_v52, %v2055_v0  ;;  %v2501_v11 = vrot.slane %v2499_v1, 5  ;;  %v2507_v12 = vrot.slane %v2505_v56, 5  ;;  %v2515_v13 = vshll.u32 %v2323_v54, 16  ;;  %v1209_v54 = vld [vmem:[#allocation2 + $0x134] sm:$0xf] }
  0xfc   : > { %v1550_v16 = vsel %vm7087_vm7, %v1545_v57, %v1549_v3  ;;  %v5904_v17 = vcombine.low %v2047_v62, %v2056_v10  ;;  %v2511_v18 = vrot.slane %v2509_v6, 4  ;;  %v322_v19 = vsel %vm7064_vm6, 0, %v321_v61  ;;  %v1210_v62 = vld [vmem:[#allocation2 + $0x138] sm:$0xf] }
  0xfd   : > { %v5871_v21 = vcombine.low %v1540_v59, %v1550_v16  ;;  %v2502_v22 = vor.u32 %v2501_v11, %v2498_v5  ;;  %v2517_v23 = vrot.slane %v2515_v13, 5  ;;  %323 = vst [vmem:[#allocation2 + $0x128] sm:$0x1] %v322_v19  ;;  %v1552_v24 = vshrl.u32 %v1206_v2, 16 }
  0xfe   : > { %v2512_v27 = vor.u32 %v2511_v18, %v2507_v12  ;;  %v1555_v28 = vshll.u32 %v1206_v2, 16  ;;  %v1561_v29 = vshll.u32 %v1207_v14, 16  ;;  %v1565_v31 = vshrl.u32 %v1207_v14, 16 }
  0xff   : > { %4970 = vmatmul.mubr.bf16.gmra.mrb[68].mxu1 %v5871_v21  ;;  %v2503_v33 = vrot.slane %v2502_v22, 4  ;;  %v1554_v34 = vrot.slane %v1552_v24, 4  ;;  %v6164_v35 = vpack.c.bf16 %v376_v8, %v375_v7  ;;  %v2058_v36 = vshrl.u32 %v1724_v63, 16  ;;  %v2327_v63 = vld [vmem:[#allocation2 + $0xbc] sm:$0xf] }
 0x100   : > { %4977 = vmatprep.mubr.bf16.mxu1 %v5904_v17  ;;  %v2513_v38 = vrot.slane %v2512_v27, 4  ;;  %v1557_v39 = vrot.slane %v1555_v28, 5  ;;  %v1563_v40 = vrot.slane %v1561_v29, 5  ;;  %v1567_v41 = vrot.slane %v1565_v31, 4 }
 0x101   : > { %v7409_v15 = vpop.f32.mrb[0].mxu0  ;;  %v2508_v43 = vsel %vm7087_vm7, %v2503_v33, %v2507_v12  ;;  %6173 = vst [vmem:[#allocation2 + $0x148] sm:$0xff] %v6164_v35   ;;  %v7417_v44 = vrot.slane %v2058_v36, 11  ;;  %v2520_v46 = vshrl.u32 %v2324_v20, 16  ;;  %v2523_v47 = vshll.u32 %v2324_v20, 16 }
 0x102   : > { %v6191_v32 = vpop.f32.mrb[1].mxu0  ;;  %v2518_v49 = vsel %vm7087_vm7, %v2513_v38, %v2517_v23  ;;  %v1558_v50 = vor.u32 %v1557_v39, %v1554_v34  ;;  %v1568_v51 = vor.u32 %v1567_v41, %v1563_v40  ;;  %v2529_v52 = vshll.u32 %v2325_v25, 16  ;;  %v6810_v38 = vld [vmem:[#allocation2 + $0xa8] sm:$0xff]  }
 0x103   : > { %v7421_v55 = vpop.f32.mrb[2].mxu0  ;;  %v5928_v57 = vcombine.low %v2508_v43, %v2518_v49  ;;  %v2522_v58 = vrot.slane %v2520_v46, 4  ;;  %v2525_v60 = vrot.slane %v2523_v47, 5  ;;  %v2533_v61 = vshrl.u32 %v2325_v25, 16 }
 0x104   : > { %v1208_v1 = vld [vmem:[#allocation2 + $0x128] sm:$0x1]  ;;  %v1559_v56 = vrot.slane %v1558_v50, 4  ;;  %v1569_v2 = vrot.slane %v1568_v51, 4  ;;  %v2531_v59 = vrot.slane %v2529_v52, 5  ;;  %v2539_v3 = vshll.u32 %v2326_v45, 16 }
 0x105   : > { %5074 = vmatprep.mubr.bf16.mxu0 %v5928_v57  ;;  %v1571_v5 = vshll.u32 %v1208_v1, 16  ;;  %v2526_v6 = vor.u32 %v2525_v60, %v2522_v58  ;;  %v2535_v7 = vrot.slane %v2533_v61, 4  ;;  %v329_v8 = vsel %vm7064_vm6, 0, %v328_v53  ;;  %v7427_v9 = vpop.f32.mrb[3].mxu0  ;;  %v2329_v45 = vld [vmem:[#allocation2 + $0xc4] sm:$0x1] }
 0x106   : > { %v1564_v10 = vsel %vm7087_vm7, %v1559_v56, %v1563_v40  ;;  %5075 = vmatmul.mubr.bf16.gmra.mrb[72].mxu0 %v6806_v42  ;;  %v2541_v11 = vrot.slane %v2539_v3, 5  ;;  %330 = vst [vmem:[#allocation2 + $0x13c] sm:$0x1] %v329_v8  ;;  %v1576_v12 = vshrl.u32 %v1209_v54, 16  ;;  %v1579_v13 = vshll.u32 %v1209_v54, 16 }
 0x107   : > { %v1573_v16 = vrot.slane %v1571_v5, 5  ;;  %v2527_v17 = vrot.slane %v2526_v6, 4  ;;  %v2536_v18 = vor.u32 %v2535_v7, %v2531_v59  ;;  %v1585_v19 = vshll.u32 %v1210_v62, 16  ;;  %v2817_v3 = vld [vmem:[#allocation2 + $0x30] sm:$0xf] }
 0x108   : > { %v1725_v20 = vld [vmem:[#allocation2 + $0x148] sm:$0xf]  ;;  %v1726_v21 = vld [vmem:[#allocation2 + $0x14c] sm:$0xf]  ;;  %v1578_v22 = vrot.slane %v1576_v12, 4  ;;  %v1581_v23 = vrot.slane %v1579_v13, 5  ;;  %v7434_v24 = vadd.f32 %v6191_v32, %v7409_v15 }
 0x109   : > { %v1574_v27 = vsel %vm7087_vm7, %v1569_v2, %v1573_v16  ;;  %v2063_v28 = vshrl.u32 %v1725_v20, 16  ;;  %v2066_v29 = vshll.u32 %v1725_v20, 16  ;;  %v2072_v31 = vshrl.u32 %v1726_v21, 16  ;;  %v2328_v32 = vld [vmem:[#allocation2 + $0xc0] sm:$0xf] }
 0x10a   : > { %8384 = vst [vmem:[#allocation5_spill] sm:$0xff] %v7434_v24  ;;  %v5872_v33 = vcombine.low %v1564_v10, %v1574_v27  ;;  %v2075_v34 = vshll.u32 %v1726_v21, 16  ;;  %v2532_v35 = vsel %vm7087_vm7, %v2527_v17, %v2531_v59  ;;  %v2537_v36 = vrot.slane %v2536_v18, 4  ;;  %v2816_v59 = vld [vmem:[#allocation2 + $0x2c] sm:$0x8] }
 0x10b   : > { %v2065_v39 = vrot.slane %v2063_v28, 7  ;;  %v2074_v40 = vrot.slane %v2072_v31, 7  ;;  %v1582_v41 = vor.u32 %v1581_v23, %v1578_v22  ;;  %v1587_v15 = vrot.slane %v1585_v19, 5  ;;  %v2818_v10 = vld [vmem:[#allocation2 + $0x34] sm:$0xf] }
 0x10c   : > { %4978 = vmatmul.mubr.bf16.gmra.mrb[72].mxu1 %v5872_v33  ;;  %v2542_v42 = vsel %vm7087_vm7, %v2537_v36, %v2541_v11  ;;  %v1589_v43 = vshrl.u32 %v1210_v62, 16  ;;  %v2544_v46 = vshrl.u32 %v2327_v63, 16  ;;  %v2547_v47 = vshll.u32 %v2327_v63, 16  ;;  %v2330_v17 = vld [vmem:[#allocation2 + $0xd0] sm:$0xf] }
 0x10d   : > { %v2068_v49 = vor.u32 %v2066_v29, %v2065_v39  ;;  %v2070_v50 = vrot.slane %v2065_v39, 4  ;;  %v2077_v51 = vor.u32 %v2075_v34, %v2074_v40  ;;  %v5929_v52 = vcombine.low %v2532_v35, %v2542_v42  ;;  %v1211_v53 = vld [vmem:[#allocation2 + $0x13c] sm:$0x1]  ;;  %v6811_v63 = vld [vmem:[#allocation2 + $0x30] sm:$0xff]   ;;  %v2835_v24 = vld [vmem:[#allocation2 + $0xa8] sm:$0xf] }
 0x10e   : > { %v6262_v37 = vpop.f32.mrb[0].mxu1  ;;  %v1583_v57 = vrot.slane %v1582_v41, 4  ;;  %v1591_v58 = vrot.slane %v1589_v43, 4  ;;  %v1595_v60 = vshll.u32 %v1211_v53, 16  ;;  %v2546_v61 = vrot.slane %v2544_v46, 4  ;;  %v6812_v53 = vld [vmem:[#allocation2 + $0xbc] sm:$0xff]  }
 0x10f   : > { %v6263_v48 = vpop.f32.mrb[1].mxu1  ;;  %v2069_v62 = vsel %vm6944_vm2, %v7417_v44, %v2068_v49  ;;  %v2078_v1 = vsel %vm6944_vm2, %v2070_v50, %v2077_v51  ;;  %5082 = vmatprep.mubr.bf16.mxu0 %v5929_v52  ;;  %v2549_v56 = vrot.slane %v2547_v47, 5  ;;  %v2553_v2 = vshll.u32 %v2328_v32, 16  ;;  %v2331_v36 = vld [vmem:[#allocation2 + $0xd4] sm:$0xf] }
 0x110   : > { %v7423_v0 = vpop.f32.mrb[2].mxu1  ;;  %v7436_v25 = vadd.f32 %v6263_v48, %v6262_v37  ;;  %v7442_v37 = vpop.f32.mrb[4].mxu0  ;;  %v5905_v5 = vcombine.low %v2069_v62, %v2078_v1  ;;  %v1588_v6 = vsel %vm7087_vm7, %v1583_v57, %v1587_v15  ;;  %v1592_v7 = vor.u32 %v1591_v58, %v1587_v15  ;;  %5083 = vmatmul.mubr.bf16.gmra.mrb[76].mxu0 %v6810_v38  ;;  %v2819_v49 = vld [vmem:[#allocation2 + $0x40] sm:$0x8]  ;;  %v2820_v50 = vld [vmem:[#allocation2 + $0x44] sm:$0xf] }
 0x111   : > { %v7431_v14 = vpop.f32.mrb[3].mxu1  ;;  %v7446_v48 = vpop.f32.mrb[5].mxu0  ;;  %v1597_v8 = vrot.slane %v1595_v60, 5  ;;  %v2550_v12 = vor.u32 %v2549_v56, %v2546_v61  ;;  %v2555_v44 = vrot.slane %v2553_v2, 5  ;;  %v2557_v13 = vshrl.u32 %v2328_v32, 16 }
 0x112   : > { %8385 = vst [vmem:[#allocation6_spill] sm:$0xff] %v7436_v25  ;;  %v2563_v16 = vshll.u32 %v2329_v45, 16  ;;  %v7459_v18 = vpop.f32.mrb[6].mxu0  ;;  %4985 = vmatprep.mubr.bf16.mxu1 %v5905_v5  ;;  %v1593_v19 = vrot.slane %v1592_v7, 4  ;;  %v2865_v20 = vshrl.u32 %v2816_v59, 16  ;;  %v2870_v21 = vshrl.u32 %v2817_v3, 16 }
 0x113   : > { %v2873_v22 = vshll.u32 %v2817_v3, 16  ;;  %v2551_v23 = vrot.slane %v2550_v12, 4  ;;  %v2559_v27 = vrot.slane %v2557_v13, 4  ;;  %v2879_v29 = vshrl.u32 %v2818_v10, 16  ;;  %v2332_v32 = vld [vmem:[#allocation2 + $0xd8] sm:$0x1] }
 0x114   : > { %v2565_v28 = vrot.slane %v2563_v16, 5  ;;  %v1598_v31 = vsel %vm7087_vm7, %v1593_v19, %v1597_v8  ;;  %v5938_v33 = vrot.slane %v2865_v20, 11  ;;  %v2872_v34 = vrot.slane %v2870_v21, 7  ;;  %v7467_v42 = vpop.f32.mrb[7].mxu0  ;;  %v2821_v61 = vld [vmem:[#allocation2 + $0x48] sm:$0xf] }
 0x115   : > { %v2882_v35 = vshll.u32 %v2818_v10, 16  ;;  %v5873_v39 = vcombine.low %v1588_v6, %v1598_v31  ;;  %v2556_v40 = vsel %vm7087_vm7, %v2551_v23, %v2555_v44  ;;  %v2560_v41 = vor.u32 %v2559_v27, %v2555_v44  ;;  %v2333_v59 = vld [vmem:[#allocation2 + $0xe4] sm:$0xf]  ;;  %v2335_v31 = vld [vmem:[#allocation2 + $0xec] sm:$0x1] }
 0x116   : > { %v7448_v54 = vpop.f32.mrb[4].mxu1  ;;  %v2881_v15 = vrot.slane %v2879_v29, 7  ;;  %v2875_v43 = vor.u32 %v2873_v22, %v2872_v34  ;;  %v2877_v45 = vrot.slane %v2872_v34, 4  ;;  %v2568_v46 = vshrl.u32 %v2330_v17, 16  ;;  %v6814_v16 = vld [vmem:[#allocation2 + $0x44] sm:$0xff]  }
 0x117   : > { %v7457_v11 = vpop.f32.mrb[5].mxu1  ;;  %v2571_v47 = vshll.u32 %v2330_v17, 16  ;;  %4986 = vmatmul.mubr.bf16.gmra.mrb[76].mxu1 %v5873_v39  ;;  %v2561_v52 = vrot.slane %v2560_v41, 4  ;;  %v2577_v58 = vshll.u32 %v2331_v36, 16  ;;  %v2581_v60 = vshrl.u32 %v2331_v36, 16 }
 0x118   : > { %v7463_v38 = vpop.f32.mrb[6].mxu1  ;;  %v2884_v57 = vor.u32 %v2882_v35, %v2881_v15  ;;  %5187 = vmatprep.mubr.bf16.mxu1 %v6811_v63  ;;  %v2876_v62 = vsel %vm6944_vm2, %v5938_v33, %v2875_v43  ;;  %v2570_v1 = vrot.slane %v2568_v46, 4  ;;  %v2587_v2 = vshll.u32 %v2332_v32, 16  ;;  %v2334_v22 = vld [vmem:[#allocation2 + $0xe8] sm:$0xf] }
 0x119   : > { %v7469_v51 = vpop.f32.mrb[7].mxu1  ;;  %v2573_v56 = vrot.slane %v2571_v47, 5  ;;  %v2566_v5 = vsel %vm7087_vm7, %v2561_v52, %v2565_v28  ;;  %v2579_v7 = vrot.slane %v2577_v58, 5  ;;  %v2583_v8 = vrot.slane %v2581_v60, 4  ;;  %v2822_v34 = vld [vmem:[#allocation2 + $0x54] sm:$0x8] }
 0x11a   : > { %v2885_v6 = vsel %vm6944_vm2, %v2877_v45, %v2884_v57  ;;  %v5930_v10 = vcombine.low %v2556_v40, %v2566_v5  ;;  %v2589_v13 = vrot.slane %v2587_v2, 5  ;;  %v2887_v63 = vshrl.u32 %v2819_v49, 16  ;;  %v2823_v41 = vld [vmem:[#allocation2 + $0x58] sm:$0xf]  ;;  %v6815_v49 = vld [vmem:[#allocation2 + $0xd0] sm:$0xff]  }
 0x11b   : > { %v7473_v3 = vpop.f32.mrb[8].mxu0  ;;  %v5954_v12 = vcombine.low %v2876_v62, %v2885_v6  ;;  %v2574_v44 = vor.u32 %v2573_v56, %v2570_v1  ;;  %v2584_v19 = vor.u32 %v2583_v8, %v2579_v7  ;;  %v2892_v20 = vshrl.u32 %v2820_v50, 16  ;;  %v2824_v57 = vld [vmem:[#allocation2 + $0x5c] sm:$0xf]  ;;  %v2336_v1 = vld [vmem:[#allocation2 + $0xf8] sm:$0xf] }
 0x11c   : > { %v2895_v21 = vshll.u32 %v2820_v50, 16  ;;  %v7481_v23 = vpop.f32.mrb[9].mxu0  ;;  %5090 = vmatprep.mubr.bf16.mxu0 %v5930_v10  ;;  %v2901_v28 = vshrl.u32 %v2821_v61, 16  ;;  %v2904_v29 = vshll.u32 %v2821_v61, 16  ;;  %v2592_v33 = vshrl.u32 %v2333_v59, 16  ;;  %v6816_v10 = vld [vmem:[#allocation2 + $0x58] sm:$0xff]  }
 0x11d   : > { %v2575_v27 = vrot.slane %v2574_v44, 4  ;;  %5091 = vmatmul.mubr.bf16.gmra.mrb[80].mxu0 %v6812_v53  ;;  %v2585_v35 = vrot.slane %v2584_v19, 4  ;;  %v5939_v36 = vrot.slane %v2887_v63, 11  ;;  %v2894_v39 = vrot.slane %v2892_v20, 7  ;;  %v2337_v56 = vld [vmem:[#allocation2 + $0xfc] sm:$0xf] }
 0x11e   : > { %v2595_v40 = vshll.u32 %v2333_v59, 16  ;;  %v2903_v32 = vrot.slane %v2901_v28, 7  ;;  %v2594_v43 = vrot.slane %v2592_v33, 4  ;;  %v2601_v45 = vshll.u32 %v2334_v22, 16 }
 0x11f   : > { %v2580_v15 = vsel %vm7087_vm7, %v2575_v27, %v2579_v7  ;;  %5188 = vmatmul.mubr.bf16.vlgmr.msra.gmra.mrb[80].mxu1 %v5954_v12  ;;  %v2590_v47 = vsel %vm7087_vm7, %v2585_v35, %v2589_v13  ;;  %v2897_v50 = vor.u32 %v2895_v21, %v2894_v39  ;;  %v2899_v52 = vrot.slane %v2894_v39, 4  ;;  %v7493_v13 = vpop.f32.mrb[10].mxu0 }
 0x120   : > { %v7479_v17 = vpop.f32.mrb[8].mxu1  ;;  %v2597_v53 = vrot.slane %v2595_v40, 5  ;;  %v5931_v58 = vcombine.low %v2580_v15, %v2590_v47  ;;  %5195 = vmatprep.mubr.bf16.mxu1 %v6814_v16  ;;  %v2906_v60 = vor.u32 %v2904_v29, %v2903_v32  ;;  %v2603_v61 = vrot.slane %v2601_v45, 5  ;;  %v7497_v33 = vpop.f32.mrb[11].mxu0  ;;  %v2825_v40 = vld [vmem:[#allocation2 + $0x68] sm:$0x8] }
 0x121   : > { %v7485_v46 = vpop.f32.mrb[9].mxu1  ;;  %v2605_v62 = vshrl.u32 %v2334_v22, 16  ;;  %v2898_v2 = vsel %vm6944_vm2, %v5939_v36, %v2897_v50  ;;  %v2611_v5 = vshll.u32 %v2335_v31, 16  ;;  %v2909_v6 = vshrl.u32 %v2822_v34, 16  ;;  %v2338_v31 = vld [vmem:[#allocation2 + $0x100] sm:$0x1] }
 0x122   : > { %v2598_v59 = vor.u32 %v2597_v53, %v2594_v43  ;;  %5098 = vmatprep.mubr.bf16.mxu0 %v5931_v58  ;;  %v2907_v7 = vsel %vm6944_vm2, %v2899_v52, %v2906_v60  ;;  %v2914_v12 = vshrl.u32 %v2823_v41, 16  ;;  %v2917_v44 = vshll.u32 %v2823_v41, 16  ;;  %v7495_v21 = vpop.f32.mrb[10].mxu1  ;;  %v2826_v47 = vld [vmem:[#allocation2 + $0x6c] sm:$0xf]  ;;  %v6817_v50 = vld [vmem:[#allocation2 + $0xe4] sm:$0xff]  }
 0x123   : > { %v2607_v8 = vrot.slane %v2605_v62, 4  ;;  %v5955_v16 = vcombine.low %v2898_v2, %v2907_v7  ;;  %v2613_v63 = vrot.slane %v2611_v5, 5  ;;  %v5940_v20 = vrot.slane %v2909_v6, 11  ;;  %v7501_v41 = vpop.f32.mrb[11].mxu1  ;;  %v2827_v58 = vld [vmem:[#allocation2 + $0x70] sm:$0xf] }
 0x124   : > { %v2599_v19 = vrot.slane %v2598_v59, 4  ;;  %v2916_v27 = vrot.slane %v2914_v12, 7  ;;  %v2923_v28 = vshrl.u32 %v2824_v57, 16  ;;  %v2926_v29 = vshll.u32 %v2824_v57, 16  ;;  %v2339_v2 = vld [vmem:[#allocation2 + $0x10c] sm:$0xf] }
 0x125   : > { %v2608_v22 = vor.u32 %v2607_v8, %v2603_v61  ;;  %5099 = vmatmul.mubr.bf16.gmra.mrb[84].mxu0 %v6815_v49  ;;  %v2616_v35 = vshrl.u32 %v2336_v1, 16  ;;  %v2619_v36 = vshll.u32 %v2336_v1, 16  ;;  %v2625_v39 = vshll.u32 %v2337_v56, 16  ;;  %v2340_v59 = vld [vmem:[#allocation2 + $0x110] sm:$0xf]  ;;  %v7507_v5 = vpop.f32.mrb[12].mxu0 }
 0x126   : > { %v2604_v34 = vsel %vm7087_vm7, %v2599_v19, %v2603_v61  ;;  %v2919_v32 = vor.u32 %v2917_v44, %v2916_v27  ;;  %v2921_v43 = vrot.slane %v2916_v27, 4  ;;  %v2925_v45 = vrot.slane %v2923_v28, 7 }
 0x127   : > { %v2609_v15 = vrot.slane %v2608_v22, 4  ;;  %5196 = vmatmul.mubr.bf16.gmra.mrb[84].mxu1 %v5955_v16  ;;  %v2618_v52 = vrot.slane %v2616_v35, 4  ;;  %v2621_v53 = vrot.slane %v2619_v36, 5  ;;  %v2627_v57 = vrot.slane %v2625_v39, 5  ;;  %v6819_v16 = vld [vmem:[#allocation2 + $0x6c] sm:$0xff]  }
 0x128   : > { %v2629_v49 = vshrl.u32 %v2337_v56, 16  ;;  %5203 = vmatprep.mubr.bf16.mxu1 %v6816_v10  ;;  %v2920_v61 = vsel %vm6944_vm2, %v5940_v20, %v2919_v32  ;;  %v2928_v62 = vor.u32 %v2926_v29, %v2925_v45  ;;  %v2635_v1 = vshll.u32 %v2338_v31, 16  ;;  %v2341_v29 = vld [vmem:[#allocation2 + $0x114] sm:$0x1]  ;;  %v2828_v39 = vld [vmem:[#allocation2 + $0x7c] sm:$0x8] }
 0x129   : > { %v2614_v60 = vsel %vm7087_vm7, %v2609_v15, %v2613_v63  ;;  %v2622_v7 = vor.u32 %v2621_v53, %v2618_v52  ;;  %v2931_v12 = vshrl.u32 %v2825_v40, 16  ;;  %v2936_v19 = vshrl.u32 %v2826_v47, 16  ;;  %v7511_v63 = vpop.f32.mrb[12].mxu1  ;;  %v2829_v40 = vld [vmem:[#allocation2 + $0x80] sm:$0xf]  ;;  %v7515_v52 = vpop.f32.mrb[13].mxu0 }
 0x12a   : > { %v5932_v6 = vcombine.low %v2604_v34, %v2614_v60  ;;  %v2631_v8 = vrot.slane %v2629_v49, 4  ;;  %v2929_v56 = vsel %vm6944_vm2, %v2921_v43, %v2928_v62  ;;  %v2637_v44 = vrot.slane %v2635_v1, 5  ;;  %v7517_v62 = vpop.f32.mrb[13].mxu1 }
 0x12b   : > { %v2939_v10 = vshll.u32 %v2826_v47, 16  ;;  %v5956_v20 = vcombine.low %v2920_v61, %v2929_v56  ;;  %v2623_v22 = vrot.slane %v2622_v7, 4  ;;  %v5941_v28 = vrot.slane %v2931_v12, 11  ;;  %v2830_v47 = vld [vmem:[#allocation2 + $0x84] sm:$0xf]  ;;  %v6820_v7 = vld [vmem:[#allocation2 + $0xf8] sm:$0xff]  }
 0x12c   : > { %5106 = vmatprep.mubr.bf16.mxu0 %v5932_v6  ;;  %v2632_v27 = vor.u32 %v2631_v8, %v2627_v57  ;;  %v2938_v31 = vrot.slane %v2936_v19, 7  ;;  %v2945_v34 = vshrl.u32 %v2827_v58, 16  ;;  %v2948_v35 = vshll.u32 %v2827_v58, 16  ;;  %v2342_v19 = vld [vmem:[#allocation2 + $0x120] sm:$0xf] }
 0x12d   : > { %v2640_v36 = vshrl.u32 %v2339_v2, 16  ;;  %5107 = vmatmul.mubr.bf16.gmra.mrb[88].mxu0 %v6817_v50  ;;  %v2628_v15 = vsel %vm7087_vm7, %v2623_v22, %v2627_v57  ;;  %v2643_v43 = vshll.u32 %v2339_v2, 16  ;;  %v2649_v45 = vshll.u32 %v2340_v59, 16  ;;  %v7521_v57 = vpop.f32.mrb[14].mxu0 }
 0x12e   : > { %v2633_v32 = vrot.slane %v2632_v27, 4  ;;  %v2941_v53 = vor.u32 %v2939_v10, %v2938_v31  ;;  %v2943_v49 = vrot.slane %v2938_v31, 4  ;;  %v2947_v60 = vrot.slane %v2945_v34, 7  ;;  %v7525_v10 = vpop.f32.mrb[14].mxu1  ;;  %v2343_v31 = vld [vmem:[#allocation2 + $0x124] sm:$0xf] }
 0x12f   : > { %v2642_v61 = vrot.slane %v2640_v36, 4  ;;  %5204 = vmatmul.mubr.bf16.gmra.mrb[88].mxu1 %v5956_v20  ;;  %v2645_v50 = vrot.slane %v2643_v43, 5  ;;  %v2651_v1 = vrot.slane %v2649_v45, 5  ;;  %v2653_v6 = vshrl.u32 %v2340_v59, 16  ;;  %v7527_v34 = vpop.f32.mrb[15].mxu0  ;;  %v6821_v36 = vld [vmem:[#allocation2 + $0x80] sm:$0xff]  }
 0x130   : > { %v2638_v58 = vsel %vm7087_vm7, %v2633_v32, %v2637_v44  ;;  %5211 = vmatprep.mubr.bf16.mxu1 %v6819_v16  ;;  %v2942_v8 = vsel %vm6944_vm2, %v5941_v28, %v2941_v53  ;;  %v2950_v12 = vor.u32 %v2948_v35, %v2947_v60  ;;  %v2659_v56 = vshll.u32 %v2341_v29, 16  ;;  %v7531_v35 = vpop.f32.mrb[15].mxu1  ;;  %v2344_v53 = vld [vmem:[#allocation2 + $0x128] sm:$0x1] }
 0x131   : > { %v5933_v2 = vcombine.low %v2628_v15, %v2638_v58  ;;  %v2646_v20 = vor.u32 %v2645_v50, %v2642_v61  ;;  %v2655_v22 = vrot.slane %v2653_v6, 4  ;;  %v2953_v27 = vshrl.u32 %v2828_v39, 16 }
 0x132   : > { %v2958_v44 = vshrl.u32 %v2829_v40, 16  ;;  %v2951_v59 = vsel %vm6944_vm2, %v2943_v49, %v2950_v12  ;;  %v2661_v16 = vrot.slane %v2659_v56, 5  ;;  %v2961_v15 = vshll.u32 %v2829_v40, 16  ;;  %v2831_v40 = vld [vmem:[#allocation2 + $0x90] sm:$0x8] }
 0x133   : > { %5114 = vmatprep.mubr.bf16.mxu0 %v5933_v2  ;;  %v2967_v28 = vshrl.u32 %v2830_v47, 16  ;;  %v5957_v29 = vcombine.low %v2942_v8, %v2951_v59  ;;  %v2647_v32 = vrot.slane %v2646_v20, 4  ;;  %v2656_v43 = vor.u32 %v2655_v22, %v2651_v1  ;;  %v2832_v20 = vld [vmem:[#allocation2 + $0x94] sm:$0xf]  ;;  %v2833_v22 = vld [vmem:[#allocation2 + $0x98] sm:$0xf] }
 0x134   : > { %v5942_v45 = vrot.slane %v2953_v27, 11  ;;  %v2960_v39 = vrot.slane %v2958_v44, 7  ;;  %v2970_v61 = vshll.u32 %v2830_v47, 16  ;;  %v2664_v58 = vshrl.u32 %v2342_v19, 16  ;;  %v7537_v59 = vpop.f32.mrb[16].mxu0 }
 0x135   : > { %v2969_v60 = vrot.slane %v2967_v28, 7  ;;  %5115 = vmatmul.mubr.bf16.gmra.mrb[92].mxu0 %v6820_v7  ;;  %v2652_v50 = vsel %vm7087_vm7, %v2647_v32, %v2651_v1  ;;  %v2657_v49 = vrot.slane %v2656_v43, 4  ;;  %v2667_v6 = vshll.u32 %v2342_v19, 16 }
 0x136   : > { %v2673_v2 = vshll.u32 %v2343_v31, 16  ;;  %v2963_v12 = vor.u32 %v2961_v15, %v2960_v39  ;;  %v2965_v56 = vrot.slane %v2960_v39, 4  ;;  %v2666_v8 = vrot.slane %v2664_v58, 4 }
 0x137   : > { %v2972_v25 = vor.u32 %v2970_v61, %v2969_v60  ;;  %5212 = vmatmul.mubr.bf16.gmra.mrb[92].mxu1 %v5957_v29  ;;  %v2662_v27 = vsel %vm7087_vm7, %v2657_v49, %v2661_v16  ;;  %v2669_v47 = vrot.slane %v2667_v6, 5  ;;  %v2677_v7 = vshrl.u32 %v2343_v31, 16  ;;  %v7543_v32 = vpop.f32.mrb[16].mxu1  ;;  %v6822_v29 = vld [vmem:[#allocation2 + $0x10c] sm:$0xff]   ;;  %v2345_v61 = vld [vmem:[#allocation2 + $0x134] sm:$0xf] }
 0x138   : > { %v2675_v44 = vrot.slane %v2673_v2, 5  ;;  %v5934_v1 = vcombine.low %v2652_v50, %v2662_v27  ;;  %5219 = vmatprep.mubr.bf16.mxu1 %v6821_v36  ;;  %v2964_v19 = vsel %vm6944_vm2, %v5942_v45, %v2963_v12  ;;  %v2683_v28 = vshll.u32 %v2344_v53, 16  ;;  %8386 = vst [vmem:[#allocation7_spill] sm:$0xff] %v7543_v32  ;;  %v2346_v49 = vld [vmem:[#allocation2 + $0x138] sm:$0xf]  ;;  %v7545_v53 = vpop.f32.mrb[17].mxu0 }
 0x139   : > { %v2973_v15 = vsel %vm6944_vm2, %v2965_v56, %v2972_v25  ;;  %v2670_v39 = vor.u32 %v2669_v47, %v2666_v8  ;;  %v2679_v16 = vrot.slane %v2677_v7, 4  ;;  %v2975_v60 = vshrl.u32 %v2831_v40, 16  ;;  %v6824_v2 = vld [vmem:[#allocation2 + $0x94] sm:$0xff]  }
 0x13a   : > { %v5958_v43 = vcombine.low %v2964_v19, %v2973_v15  ;;  %5122 = vmatprep.mubr.bf16.mxu0 %v5934_v1  ;;  %v2685_v31 = vrot.slane %v2683_v28, 5  ;;  %v2980_v58 = vshrl.u32 %v2832_v20, 16  ;;  %v2983_v50 = vshll.u32 %v2832_v20, 16  ;;  %v2347_v19 = vld [vmem:[#allocation2 + $0x13c] sm:$0x1]  ;;  %v7549_v28 = vpop.f32.mrb[17].mxu1 }
 0x13b   : > { %v2989_v36 = vshrl.u32 %v2833_v22, 16  ;;  %v2671_v6 = vrot.slane %v2670_v39, 4  ;;  %v2680_v45 = vor.u32 %v2679_v16, %v2675_v44  ;;  %v5943_v12 = vrot.slane %v2975_v60, 11  ;;  %v2834_v15 = vld [vmem:[#allocation2 + $0xa4] sm:$0x8] }
 0x13c   : > { %v2992_v25 = vshll.u32 %v2833_v22, 16  ;;  %v2982_v56 = vrot.slane %v2980_v58, 7  ;;  %v2688_v8 = vshrl.u32 %v2345_v61, 16  ;;  %v2691_v47 = vshll.u32 %v2345_v61, 16  ;;  %v2836_v58 = vld [vmem:[#allocation2 + $0xac] sm:$0xf] }
 0x13d   : > { %v2991_v27 = vrot.slane %v2989_v36, 7  ;;  %5123 = vmatmul.mubr.bf16.gmra.mrb[96].mxu0 %v6822_v29  ;;  %v2676_v40 = vsel %vm7087_vm7, %v2671_v6, %v2675_v44  ;;  %v2681_v7 = vrot.slane %v2680_v45, 4  ;;  %v2697_v20 = vshll.u32 %v2346_v49, 16  ;;  %v7553_v44 = vpop.f32.mrb[18].mxu0 }
 0x13e   : > { %v2701_v1 = vshrl.u32 %v2346_v49, 16  ;;  %v2985_v39 = vor.u32 %v2983_v50, %v2982_v56  ;;  %v2987_v16 = vrot.slane %v2982_v56, 4  ;;  %v2690_v60 = vrot.slane %v2688_v8, 4  ;;  %8387 = vst [vmem:[#allocation8_spill] sm:$0xff] %v7553_v44 }
 0x13f   : > { %v2994_v22 = vor.u32 %v2992_v25, %v2991_v27  ;;  %5220 = vmatmul.mubr.bf16.gmra.mrb[96].mxu1 %v5958_v43  ;;  %v2686_v61 = vsel %vm7087_vm7, %v2681_v7, %v2685_v31  ;;  %v2693_v29 = vrot.slane %v2691_v47, 5  ;;  %v2699_v36 = vrot.slane %v2697_v20, 5  ;;  %v7559_v25 = vpop.f32.mrb[18].mxu1  ;;  %v6825_v43 = vld [vmem:[#allocation2 + $0x120] sm:$0xff]   ;;  %v335_v47 = vld [vmem:[#allocation2 + $0x150] sm:$0x1] }
 0x140   : > { %v2703_v32 = vrot.slane %v2701_v1, 4  ;;  %v5935_v6 = vcombine.low %v2676_v40, %v2686_v61  ;;  %5227 = vmatprep.mubr.bf16.mxu1 %v6824_v2  ;;  %v2986_v49 = vsel %vm6944_vm2, %v5943_v12, %v2985_v39  ;;  %v2707_v45 = vshll.u32 %v2347_v19, 16  ;;  %8388 = vst [vmem:[#allocation9_spill] sm:$0xff] %v7559_v25  ;;  %v7561_v7 = vpop.f32.mrb[19].mxu0  ;;  %v2348_v12 = vld [vmem:[#allocation2 + $0x148] sm:$0xf] }
 0x141   : > { %v2995_v50 = vsel %vm6944_vm2, %v2987_v16, %v2994_v22  ;;  %v2694_v27 = vor.u32 %v2693_v29, %v2690_v60  ;;  %v2997_v8 = vshrl.u32 %v2834_v15, 16  ;;  %v3002_v2 = vshrl.u32 %v2835_v24, 16  ;;  %v6826_v22 = vld [vmem:[#allocation2 + $0xa8] sm:$0xff]  }
 0x142   : > { %v5959_v56 = vcombine.low %v2986_v49, %v2995_v50  ;;  %v2704_v31 = vor.u32 %v2703_v32, %v2699_v36  ;;  %5130 = vmatprep.mubr.bf16.mxu0 %v5935_v6  ;;  %v2709_v40 = vrot.slane %v2707_v45, 5  ;;  %v3005_v20 = vshll.u32 %v2835_v24, 16  ;;  %v2349_v60 = vld [vmem:[#allocation2 + $0x14c] sm:$0xf]  ;;  %v2837_v49 = vld [vmem:[#allocation2 + $0xb8] sm:$0x8] }
 0x143   : > { %v3011_v1 = vshrl.u32 %v2836_v58, 16  ;;  %v2695_v39 = vrot.slane %v2694_v27, 4  ;;  %v5944_v16 = vrot.slane %v2997_v8, 11  ;;  %v3014_v19 = vshll.u32 %v2836_v58, 16  ;;  %v2838_v50 = vld [vmem:[#allocation2 + $0xbc] sm:$0xf] }
 0x144   : > { %v2705_v61 = vrot.slane %v2704_v31, 4  ;;  %v3004_v25 = vrot.slane %v3002_v2, 7  ;;  %v7565_v32 = vadd.f32 %v7427_v9, %v7421_v55  ;;  %v7569_v15 = vadd.f32 %v7431_v14, %v7423_v0  ;;  %v7577_v0 = vpop.f32.mrb[19].mxu1  ;;  %v2839_v8 = vld [vmem:[#allocation2 + $0xc0] sm:$0xf] }
 0x145   : > { %v3013_v44 = vrot.slane %v3011_v1, 7  ;;  %5131 = vmatmul.mubr.bf16.gmra.mrb[100].mxu0 %v6825_v43  ;;  %v2700_v24 = vsel %vm7087_vm7, %v2695_v39, %v2699_v36  ;;  %v336_v58 = vsel %vm7064_vm6, 0, %v335_v47  ;;  %v2712_v6 = vshrl.u32 %v2348_v12, 16 }
 0x146   : > { %8389 = vst [vmem:[#allocation10_spill] sm:$0xff] %v7569_v15  ;;  %v2710_v29 = vsel %vm7087_vm7, %v2705_v61, %v2709_v40  ;;  %v3007_v9 = vor.u32 %v3005_v20, %v3004_v25  ;;  %v3009_v45 = vrot.slane %v3004_v25, 4  ;;  %337 = vst [vmem:[#allocation2 + $0x150] sm:$0x1] %v336_v58  ;;  %v2715_v43 = vshll.u32 %v2348_v12, 16 }
 0x147   : > { %v5936_v55 = vcombine.low %v2700_v24, %v2710_v29  ;;  %v3016_v27 = vor.u32 %v3014_v19, %v3013_v44  ;;  %5228 = vmatmul.mubr.bf16.gmra.mrb[100].mxu1 %v5959_v56  ;;  %v2714_v14 = vrot.slane %v2712_v6, 4  ;;  %v2721_v36 = vshll.u32 %v2349_v60, 16  ;;  %v6827_v44 = vld [vmem:[#allocation2 + $0x134] sm:$0xff]   ;;  %v3440_v6 = vld [vmem:[#allocation2 + $0x30] sm:$0xf] }
 0x148   : > { %v2725_v31 = vshrl.u32 %v2349_v60, 16  ;;  %5235 = vmatprep.mubr.bf16.mxu1 %v6826_v22  ;;  %v3008_v47 = vsel %vm6944_vm2, %v5944_v16, %v3007_v9  ;;  %v3019_v2 = vshrl.u32 %v2837_v49, 16  ;;  %v3024_v25 = vshrl.u32 %v2838_v50, 16  ;;  %v6829_v22 = vld [vmem:[#allocation2 + $0xbc] sm:$0xff]   ;;  %v7587_v49 = vpop.f32.mrb[20].mxu0 }
 0x149   : > { %5138 = vmatprep.mubr.bf16.mxu0 %v5936_v55  ;;  %v3017_v40 = vsel %vm6944_vm2, %v3009_v45, %v3016_v27  ;;  %v2717_v1 = vrot.slane %v2715_v43, 5  ;;  %v2723_v39 = vrot.slane %v2721_v36, 5  ;;  %v3027_v19 = vshll.u32 %v2838_v50, 16  ;;  %v3441_v50 = vld [vmem:[#allocation2 + $0x34] sm:$0xf] }
 0x14a   : > { %v5960_v20 = vcombine.low %v3008_v47, %v3017_v40  ;;  %v2727_v56 = vrot.slane %v2725_v31, 4  ;;  %v5945_v61 = vrot.slane %v3019_v2, 11  ;;  %v3026_v12 = vrot.slane %v3024_v25, 7  ;;  %v3442_v43 = vld [vmem:[#allocation2 + $0x38] sm:$0x1] }
 0x14b   : > { %v3033_v60 = vshrl.u32 %v2839_v8, 16  ;;  %v2718_v24 = vor.u32 %v2717_v1, %v2714_v14  ;;  %v3036_v58 = vshll.u32 %v2839_v8, 16  ;;  %v7585_v16 = vadd.f32 %v7446_v48, %v7442_v37  ;;  %v2840_v40 = vld [vmem:[#allocation2 + $0xcc] sm:$0x8] }
 0x14c   : > { %v2728_v29 = vor.u32 %v2727_v56, %v2723_v39  ;;  %v3029_v55 = vor.u32 %v3027_v19, %v3026_v12  ;;  %v3031_v9 = vrot.slane %v3026_v12, 4  ;;  %v7591_v27 = vadd.f32 %v7457_v11, %v7448_v54  ;;  %v7609_v19 = vpop.f32.mrb[21].mxu0 }
 0x14d   : > { %v3035_v45 = vrot.slane %v3033_v60, 7  ;;  %5139 = vmatmul.mubr.bf16.gmra.mrb[104].mxu0 %v6827_v44  ;;  %v2350_v14 = vld [vmem:[#allocation2 + $0x150] sm:$0x1]  ;;  %v2719_v36 = vrot.slane %v2718_v24, 4  ;;  %v7595_v37 = vadd.f32 %v7467_v42, %v7459_v18  ;;  %v7599_v48 = vadd.f32 %v7469_v51, %v7463_v38  ;;  %v7605_v42 = vpop.f32.mrb[20].mxu1  ;;  %v6830_v38 = vld [vmem:[#allocation2 + $0x148] sm:$0xff]  }
 0x14e   : > { %8390 = vst [vmem:[#allocation11_spill] sm:$0xff] %v7591_v27  ;;  %v2729_v31 = vrot.slane %v2728_v29, 4  ;;  %v2731_v8 = vshll.u32 %v2350_v14, 16  ;;  %v3030_v47 = vsel %vm6944_vm2, %v5945_v61, %v3029_v55  ;;  %v3489_v11 = vshrl.u32 %v3440_v6, 16  ;;  %v2841_v18 = vld [vmem:[#allocation2 + $0xd0] sm:$0xf] }
 0x14f   : > { %8391 = vst [vmem:[#allocation12_spill] sm:$0xff] %v7599_v48  ;;  %v3038_v54 = vor.u32 %v3036_v58, %v3035_v45  ;;  %5236 = vmatmul.mubr.bf16.gmra.mrb[104].mxu1 %v5960_v20  ;;  %v2724_v2 = vsel %vm7087_vm7, %v2719_v36, %v2723_v39  ;;  %v3492_v25 = vshll.u32 %v3440_v6, 16  ;;  %v3498_v44 = vshll.u32 %v3441_v50, 16  ;;  %v2842_v29 = vld [vmem:[#allocation2 + $0xd4] sm:$0xf]  ;;  %v7611_v58 = vpop.f32.mrb[21].mxu1 }
 0x150   : > { %v3502_v1 = vshrl.u32 %v3441_v50, 16  ;;  %v2733_v56 = vrot.slane %v2731_v8, 5  ;;  %5243 = vmatprep.mubr.bf16.mxu1 %v6829_v22  ;;  %v3491_v61 = vrot.slane %v3489_v11, 4  ;;  %v3508_v12 = vshll.u32 %v3442_v43, 16  ;;  %v3443_v50 = vld [vmem:[#allocation2 + $0x44] sm:$0xf] }
 0x151   : > { %v3039_v51 = vsel %vm6944_vm2, %v3031_v9, %v3038_v54  ;;  %v3494_v60 = vrot.slane %v3492_v25, 5  ;;  %v3500_v24 = vrot.slane %v3498_v44, 5  ;;  %v3041_v22 = vshrl.u32 %v2840_v40, 16  ;;  %v7615_v14 = vpop.f32.mrb[22].mxu0  ;;  %v7617_v54 = vpop.f32.mrb[22].mxu1  ;;  %v6831_v11 = vld [vmem:[#allocation2 + $0xd0] sm:$0xff]  }
 0x152   : > { %v5961_v20 = vcombine.low %v3030_v47, %v3039_v51  ;;  %v3504_v39 = vrot.slane %v3502_v1, 4  ;;  %v2734_v6 = vsel %vm7087_vm7, %v2729_v31, %v2733_v56  ;;  %v3510_v55 = vrot.slane %v3508_v12, 5  ;;  %v3444_v47 = vld [vmem:[#allocation2 + $0x48] sm:$0xf]  ;;  %v3445_v40 = vld [vmem:[#allocation2 + $0x4c] sm:$0x1] }
 0x153   : > { %v3046_v45 = vshrl.u32 %v2841_v18, 16  ;;  %v5937_v9 = vcombine.low %v2724_v2, %v2734_v6  ;;  %v3495_v43 = vor.u32 %v3494_v60, %v3491_v61  ;;  %v3049_v8 = vshll.u32 %v2841_v18, 16  ;;  %v7619_v18 = vpop.f32.mrb[23].mxu0 }
 0x154   : > { %v3505_v36 = vor.u32 %v3504_v39, %v3500_v24  ;;  %v5946_v25 = vrot.slane %v3041_v22, 11  ;;  %v3055_v1 = vshrl.u32 %v2842_v29, 16  ;;  %v3058_v51 = vshll.u32 %v2842_v29, 16  ;;  %v7621_v39 = vpop.f32.mrb[23].mxu1 }
 0x155   : > { %v3048_v44 = vrot.slane %v3046_v45, 7  ;;  %5146 = vmatprep.mubr.bf16.mxu0 %v5937_v9  ;;  %v3496_v31 = vrot.slane %v3495_v43, 4  ;;  %v3513_v12 = vshrl.u32 %v3443_v50, 16  ;;  %v3516_v48 = vshll.u32 %v3443_v50, 16 }
 0x156   : > { %v3506_v56 = vrot.slane %v3505_v36, 4  ;;  %5147 = vmatmul.mubr.bf16.gmra.mrb[108].mxu0 %v6830_v38  ;;  %v3057_v61 = vrot.slane %v3055_v1, 7  ;;  %v3522_v60 = vshll.u32 %v3444_v47, 16  ;;  %v7629_v36 = vpop.f32.mrb[24].mxu0  ;;  %v3446_v1 = vld [vmem:[#allocation2 + $0x58] sm:$0xf] }
 0x157   : > { %v3051_v27 = vor.u32 %v3049_v8, %v3048_v44  ;;  %v3053_v2 = vrot.slane %v3048_v44, 4  ;;  %5244 = vmatmul.mubr.bf16.gmra.mrb[108].mxu1 %v5961_v20  ;;  %v3501_v6 = vsel %vm7087_vm7, %v3496_v31, %v3500_v24  ;;  %v3515_v22 = vrot.slane %v3513_v12, 4 }
 0x158   : > { %v3511_v29 = vsel %vm7087_vm7, %v3506_v56, %v3510_v55  ;;  %v3518_v45 = vrot.slane %v3516_v48, 5  ;;  %5251 = vmatprep.mubr.bf16.mxu1 %v6831_v11  ;;  %v3060_v9 = vor.u32 %v3058_v51, %v3057_v61  ;;  %v3524_v43 = vrot.slane %v3522_v60, 5  ;;  %v3447_v55 = vld [vmem:[#allocation2 + $0x5c] sm:$0xf]  ;;  %v2844_v51 = vld [vmem:[#allocation2 + $0xe4] sm:$0xf] }
 0x159   : > { %v5986_v50 = vcombine.low %v3501_v6, %v3511_v29  ;;  %v3052_v38 = vsel %vm6944_vm2, %v5946_v25, %v3051_v27  ;;  %v3526_v44 = vshrl.u32 %v3444_v47, 16  ;;  %v3532_v20 = vshll.u32 %v3445_v40, 16  ;;  %v2843_v25 = vld [vmem:[#allocation2 + $0xe0] sm:$0x8]  ;;  %v7649_v61 = vpop.f32.mrb[24].mxu1 }
 0x15a   : > { %v3519_v8 = vor.u32 %v3518_v45, %v3515_v22  ;;  %v7633_v24 = vadd.f32 %v7481_v23, %v7473_v3  ;;  %v3061_v48 = vsel %vm6944_vm2, %v3053_v2, %v3060_v9  ;;  %v7639_v27 = vadd.f32 %v7485_v46, %v7479_v17  ;;  %v6832_v3 = vld [vmem:[#allocation2 + $0xe4] sm:$0xff]   ;;  %v3448_v23 = vld [vmem:[#allocation2 + $0x60] sm:$0x1]  ;;  %v7653_v22 = vpop.f32.mrb[25].mxu0  ;;  %v7655_v45 = vpop.f32.mrb[25].mxu1 }
 0x15b   : > { %6662 = vmatprep.mubr.bf16.mxu0 %v5986_v50  ;;  %v7643_v11 = vadd.f32 %v7497_v33, %v7493_v13  ;;  %v7647_v47 = vadd.f32 %v7501_v41, %v7495_v21  ;;  %v5962_v31 = vcombine.low %v3052_v38, %v3061_v48  ;;  %v3528_v40 = vrot.slane %v3526_v44, 4  ;;  %v2845_v2 = vld [vmem:[#allocation2 + $0xe8] sm:$0xf]  ;;  %v3449_v33 = vld [vmem:[#allocation2 + $0x6c] sm:$0xf]  ;;  %v7657_v44 = vpop.f32.mrb[26].mxu0 }
 0x15c   : > { %8392 = vst [vmem:[#allocation13_spill] sm:$0xff] %v7633_v24  ;;  %8393 = vst [vmem:[#allocation14_spill] sm:$0xff] %v7639_v27  ;;  %v3520_v56 = vrot.slane %v3519_v8, 4  ;;  %v3534_v12 = vrot.slane %v3532_v20, 5  ;;  %v3537_v17 = vshrl.u32 %v3446_v1, 16  ;;  %v3540_v46 = vshll.u32 %v3446_v1, 16 }
 0x15d   : > { %8394 = vst [vmem:[#allocation15_spill] sm:$0xff] %v7643_v11  ;;  %8395 = vst [vmem:[#allocation16_spill] sm:$0xff] %v7647_v47  ;;  %v3546_v60 = vshll.u32 %v3447_v55, 16  ;;  %v3550_v13 = vshrl.u32 %v3447_v55, 16  ;;  %v3529_v41 = vor.u32 %v3528_v40, %v3524_v43  ;;  %v3556_v6 = vshll.u32 %v3448_v23, 16  ;;  %v7659_v20 = vpop.f32.mrb[26].mxu1 }
 0x15e   : > { %v3525_v21 = vsel %vm7087_vm7, %v3520_v56, %v3524_v43  ;;  %v3063_v29 = vshrl.u32 %v2843_v25, 16  ;;  %v3539_v50 = vrot.slane %v3537_v17, 4  ;;  %v3542_v38 = vrot.slane %v3540_v46, 5  ;;  %v7661_v43 = vpop.f32.mrb[27].mxu0  ;;  %v7663_v23 = vpop.f32.mrb[27].mxu1 }
 0x15f   : > { %v3548_v9 = vrot.slane %v3546_v60, 5  ;;  %v3552_v8 = vrot.slane %v3550_v13, 4  ;;  %5252 = vmatmul.mubr.bf16.gmra.mrb[112].mxu1 %v5962_v31  ;;  %v3530_v1 = vrot.slane %v3529_v41, 4  ;;  %v3558_v55 = vrot.slane %v3556_v6, 5  ;;  %v7665_v60 = vpop.f32.mrb[28].mxu0 }
 0x160   : > { %v5947_v48 = vrot.slane %v3063_v29, 11  ;;  %v3068_v56 = vshrl.u32 %v2844_v51, 16  ;;  %5259 = vmatprep.mubr.bf16.mxu1 %v6832_v3  ;;  %v3543_v25 = vor.u32 %v3542_v38, %v3539_v50  ;;  %v3071_v17 = vshll.u32 %v2844_v51, 16  ;;  %8396 = vst [vmem:[#allocation17_spill] sm:$0xff] %v7665_v60  ;;  %v3450_v41 = vld [vmem:[#allocation2 + $0x70] sm:$0xf] }
 0x161   : > { %v3553_v40 = vor.u32 %v3552_v8, %v3548_v9  ;;  %v3077_v46 = vshrl.u32 %v2845_v2, 16  ;;  %v3535_v13 = vsel %vm7087_vm7, %v3530_v1, %v3534_v12  ;;  %v3080_v31 = vshll.u32 %v2845_v2, 16  ;;  %v7669_v29 = vpop.f32.mrb[28].mxu1  ;;  %v7671_v3 = vpop.f32.mrb[29].mxu0  ;;  %v3451_v38 = vld [vmem:[#allocation2 + $0x74] sm:$0x1] }
 0x162   : > { %v3070_v47 = vrot.slane %v3068_v56, 7  ;;  %v3561_v6 = vshrl.u32 %v3449_v33, 16  ;;  %v5987_v27 = vcombine.low %v3525_v21, %v3535_v13  ;;  %v3544_v15 = vrot.slane %v3543_v25, 4  ;;  %v7673_v24 = vpop.f32.mrb[29].mxu1  ;;  %v6833_v56 = vld [vmem:[#allocation2 + $0xf8] sm:$0xff]   ;;  %v7679_v25 = vpop.f32.mrb[30].mxu0 }
 0x163   : > { %v3554_v26 = vrot.slane %v3553_v40, 4  ;;  %v3079_v11 = vrot.slane %v3077_v46, 7  ;;  %v3564_v60 = vshll.u32 %v3449_v33, 16  ;;  %v3570_v1 = vshll.u32 %v3450_v41, 16  ;;  %v3452_v46 = vld [vmem:[#allocation2 + $0x80] sm:$0xf] }
 0x164   : > { %v3073_v50 = vor.u32 %v3071_v17, %v3070_v47  ;;  %v3075_v51 = vrot.slane %v3070_v47, 4  ;;  %v3563_v8 = vrot.slane %v3561_v6, 4  ;;  %6663 = vmatmul.mubr.bf16.vlgmr.msra.gmra.mrb[112].mxu0 %v5987_v27  ;;  %v3549_v12 = vsel %vm7087_vm7, %v3544_v15, %v3548_v9  ;;  %v3453_v13 = vld [vmem:[#allocation2 + $0x84] sm:$0xf] }
 0x165   : > { %v3559_v2 = vsel %vm7087_vm7, %v3554_v26, %v3558_v55  ;;  %v3082_v21 = vor.u32 %v3080_v31, %v3079_v11  ;;  %v3566_v17 = vrot.slane %v3564_v60, 5  ;;  %v3574_v33 = vshrl.u32 %v3450_v41, 16  ;;  %v3454_v11 = vld [vmem:[#allocation2 + $0x88] sm:$0x1]  ;;  %v2846_v55 = vld [vmem:[#allocation2 + $0xf4] sm:$0x8] }
 0x166   : > { %v5988_v40 = vcombine.low %v3549_v12, %v3559_v2  ;;  %v3074_v47 = vsel %vm6944_vm2, %v5947_v48, %v3073_v50  ;;  %v3572_v15 = vrot.slane %v3570_v1, 5  ;;  %v3580_v9 = vshll.u32 %v3451_v38, 16  ;;  %v7693_v60 = vpop.f32.mrb[30].mxu1  ;;  %v7695_v41 = vpop.f32.mrb[31].mxu0  ;;  %v2847_v1 = vld [vmem:[#allocation2 + $0xf8] sm:$0xf] }
 0x167   : > { %v3083_v27 = vsel %vm6944_vm2, %v3075_v51, %v3082_v21  ;;  %v7687_v26 = vadd.f32 %v7515_v52, %v7507_v5  ;;  %v3567_v6 = vor.u32 %v3566_v17, %v3563_v8  ;;  %v3576_v12 = vrot.slane %v3574_v33, 4  ;;  %v7705_v38 = vpop.f32.mrb[31].mxu1  ;;  %v7707_v8 = vpop.f32.mrb[32].mxu0  ;;  %v2848_v17 = vld [vmem:[#allocation2 + $0xfc] sm:$0xf] }
 0x168   : > { %6666 = vmatprep.mubr.bf16.mxu0 %v5988_v40  ;;  %v5963_v31 = vcombine.low %v3074_v47, %v3083_v27  ;;  %v7691_v48 = vadd.f32 %v7517_v62, %v7511_v63  ;;  %v3582_v50 = vrot.slane %v3580_v9, 5  ;;  %v7699_v51 = vadd.f32 %v7527_v34, %v7521_v57  ;;  %8401 = vst [vmem:[#allocation22_spill] sm:$0xff] %v7705_v38  ;;  %v7709_v40 = vpop.f32.mrb[32].mxu1 }
 0x169   : > { %8397 = vst [vmem:[#allocation18_spill] sm:$0xff] %v7687_v26  ;;  %v7703_v5 = vadd.f32 %v7531_v35, %v7525_v10  ;;  %v3585_v52 = vshrl.u32 %v3452_v46, 16  ;;  %8402 = vst [vmem:[#allocation23_spill] sm:$0xff] %v7707_v8  ;;  %v3568_v63 = vrot.slane %v3567_v6, 4  ;;  %v3577_v62 = vor.u32 %v3576_v12, %v3572_v15  ;;  %v7717_v38 = vpop.f32.mrb[33].mxu1 }
 0x16a   : > { %8398 = vst [vmem:[#allocation19_spill] sm:$0xff] %v7691_v48  ;;  %8399 = vst [vmem:[#allocation20_spill] sm:$0xff] %v7699_v51  ;;  %5260 = vmatmul.mubr.bf16.gmra.mrb[116].mxu1 %v5963_v31  ;;  %v3588_v2 = vshll.u32 %v3452_v46, 16  ;;  %v3594_v21 = vshll.u32 %v3453_v13, 16  ;;  %v3598_v34 = vshrl.u32 %v3453_v13, 16  ;;  %v3604_v47 = vshll.u32 %v3454_v11, 16 }
 0x16b   : > { %8400 = vst [vmem:[#allocation21_spill] sm:$0xff] %v7703_v5  ;;  %8403 = vst [vmem:[#allocation24_spill] sm:$0xff] %v7709_v40  ;;  %5267 = vmatprep.mubr.bf16.mxu1 %v6833_v56  ;;  %v3587_v57 = vrot.slane %v3585_v52, 4  ;;  %v3085_v10 = vshrl.u32 %v2846_v55, 16  ;;  %v3573_v35 = vsel %vm7087_vm7, %v3568_v63, %v3572_v15  ;;  %v3578_v33 = vrot.slane %v3577_v62, 4  ;;  %v7713_v31 = vpop.f32.mrb[33].mxu0 }
 0x16c   : > { %v3590_v27 = vrot.slane %v3588_v2, 5  ;;  %v3596_v9 = vrot.slane %v3594_v21, 5  ;;  %8404 = vst [vmem:[#allocation25_spill] sm:$0xff] %v7713_v31  ;;  %v3600_v6 = vrot.slane %v3598_v34, 4  ;;  %v3606_v46 = vrot.slane %v3604_v47, 5 }
 0x16d   : > { %v5948_v12 = vrot.slane %v3085_v10, 11  ;;  %v3090_v5 = vshrl.u32 %v2847_v1, 16  ;;  %v3455_v48 = vld [vmem:[#allocation2 + $0x94] sm:$0xf]  ;;  %v3583_v56 = vsel %vm7087_vm7, %v3578_v33, %v3582_v50  ;;  %v3093_v11 = vshll.u32 %v2847_v1, 16  ;;  %v7719_v50 = vpop.f32.mrb[34].mxu0 }
 0x16e   : > { %v3591_v13 = vor.u32 %v3590_v27, %v3587_v57  ;;  %v3099_v52 = vshrl.u32 %v2848_v17, 16  ;;  %v3456_v55 = vld [vmem:[#allocation2 + $0x98] sm:$0xf]  ;;  %v5989_v40 = vcombine.low %v3573_v35, %v3583_v56  ;;  %v3601_v8 = vor.u32 %v3600_v6, %v3596_v9  ;;  %v3457_v21 = vld [vmem:[#allocation2 + $0x9c] sm:$0x1]  ;;  %v7723_v35 = vpop.f32.mrb[34].mxu1 }
 0x16f   : > { %v3092_v15 = vrot.slane %v3090_v5, 7  ;;  %v3102_v63 = vshll.u32 %v2848_v17, 16  ;;  %v3609_v31 = vshrl.u32 %v3455_v48, 16  ;;  %v3612_v34 = vshll.u32 %v3455_v48, 16  ;;  %v7725_v33 = vpop.f32.mrb[35].mxu0  ;;  %v7731_v6 = vpop.f32.mrb[35].mxu1 }
 0x170   : > { %v3592_v62 = vrot.slane %v3591_v13, 4  ;;  %v3101_v2 = vrot.slane %v3099_v52, 7  ;;  %6667 = vmatmul.mubr.bf16.gmra.mrb[116].mxu0 %v5989_v40  ;;  %v3602_v47 = vrot.slane %v3601_v8, 4  ;;  %v3618_v26 = vshll.u32 %v3456_v55, 16  ;;  %v7733_v56 = vpop.f32.mrb[36].mxu0  ;;  %v6834_v52 = vld [vmem:[#allocation2 + $0x10c] sm:$0xff]  }
 0x171   : > { %v3095_v10 = vor.u32 %v3093_v11, %v3092_v15  ;;  %v3097_v51 = vrot.slane %v3092_v15, 4  ;;  %v3611_v5 = vrot.slane %v3609_v31, 4  ;;  %v3614_v17 = vrot.slane %v3612_v34, 5  ;;  %v3458_v15 = vld [vmem:[#allocation2 + $0xa8] sm:$0xf]  ;;  %v7745_v34 = vpop.f32.mrb[37].mxu0 }
 0x172   : > { %v3597_v1 = vsel %vm7087_vm7, %v3592_v62, %v3596_v9  ;;  %v3104_v57 = vor.u32 %v3102_v63, %v3101_v2  ;;  %v3607_v48 = vsel %vm7087_vm7, %v3602_v47, %v3606_v46  ;;  %v3620_v40 = vrot.slane %v3618_v26, 5  ;;  %v7737_v63 = vpop.f32.mrb[36].mxu1  ;;  %v3459_v2 = vld [vmem:[#allocation2 + $0xac] sm:$0xf] }
 0x173   : > { %v3096_v8 = vsel %vm6944_vm2, %v5948_v12, %v3095_v10  ;;  %v3622_v27 = vshrl.u32 %v3456_v55, 16  ;;  %v5990_v9 = vcombine.low %v3597_v1, %v3607_v48  ;;  %v3615_v13 = vor.u32 %v3614_v17, %v3611_v5  ;;  %8405 = vst [vmem:[#allocation26_spill] sm:$0xff] %v7737_v63  ;;  %v8406_v12 = vld [vmem:[#allocation7_spill] sm:$0xff]  ;;  %v8408_v1 = vld [vmem:[#allocation9_spill] sm:$0xff] }
 0x174   : > { %v3105_v31 = vsel %vm6944_vm2, %v3097_v51, %v3104_v57  ;;  %v3628_v11 = vshll.u32 %v3457_v21, 16  ;;  %v7741_v26 = vadd.f32 %v7545_v53, %v7537_v59  ;;  %v6304_v55 = vadd.f32 %v7549_v28, %v8406_v12  ;;  %v8407_v21 = vld [vmem:[#allocation8_spill] sm:$0xff]  ;;  %v3460_v5 = vld [vmem:[#allocation2 + $0xb0] sm:$0x1] }
 0x175   : > { %v5964_v46 = vcombine.low %v3096_v8, %v3105_v31  ;;  %v3624_v62 = vrot.slane %v3622_v27, 4  ;;  %6670 = vmatprep.mubr.bf16.mxu0 %v5990_v9  ;;  %v3616_v51 = vrot.slane %v3615_v13, 4  ;;  %v7749_v10 = vadd.f32 %v7561_v7, %v8407_v21  ;;  %v8409_v53 = vld [vmem:[#allocation5_spill] sm:$0xff]  ;;  %v2849_v8 = vld [vmem:[#allocation2 + $0x108] sm:$0x8] }
 0x176   : > { %v3630_v47 = vrot.slane %v3628_v11, 5  ;;  %v6307_v57 = vadd.f32 %v7577_v0, %v8408_v1  ;;  %v7754_v17 = vadd.f32 %v6304_v55, %v8409_v53  ;;  %v3633_v28 = vshrl.u32 %v3458_v15, 16  ;;  %v2850_v27 = vld [vmem:[#allocation2 + $0x10c] sm:$0xf]  ;;  %v2851_v0 = vld [vmem:[#allocation2 + $0x110] sm:$0xf] }
 0x177   : > { %5268 = vmatmul.mubr.bf16.gmra.mrb[120].mxu1 %v5964_v46  ;;  %v3625_v59 = vor.u32 %v3624_v62, %v3620_v40  ;;  %v3636_v48 = vshll.u32 %v3458_v15, 16  ;;  %v3621_v9 = vsel %vm7087_vm7, %v3616_v51, %v3620_v40  ;;  %v3642_v7 = vshll.u32 %v3459_v2, 16  ;;  %v3461_v11 = vld [vmem:[#allocation2 + $0xbc] sm:$0xf]  ;;  %v7761_v46 = vpop.f32.mrb[37].mxu1  ;;  %v7763_v62 = vpop.f32.mrb[38].mxu0 }
 0x178   : > { %8410 = vst [vmem:[#allocation7_spill] sm:$0xff] %v7754_v17  ;;  %v7759_v31 = vadd.f32 %v6307_v57, %v7565_v32  ;;  %5275 = vmatprep.mubr.bf16.mxu1 %v6834_v52  ;;  %v3646_v13 = vshrl.u32 %v3459_v2, 16  ;;  %8412 = vst [vmem:[#allocation9_spill] sm:$0xff] %v7761_v46  ;;  %v3635_v55 = vrot.slane %v3633_v28, 4  ;;  %v3652_v21 = vshll.u32 %v3460_v5, 16  ;;  %v7765_v1 = vpop.f32.mrb[38].mxu1 }
 0x179   : > { %8413 = vst [vmem:[#allocation5_spill] sm:$0xff] %v7763_v62  ;;  %v3626_v12 = vrot.slane %v3625_v59, 4  ;;  %v3638_v15 = vrot.slane %v3636_v48, 5  ;;  %8414 = vst [vmem:[#allocation27_spill] sm:$0xff] %v7765_v1  ;;  %v7767_v53 = vpop.f32.mrb[39].mxu0  ;;  %v3644_v40 = vrot.slane %v3642_v7, 5 }
 0x17a   : > { %8411 = vst [vmem:[#allocation8_spill] sm:$0xff] %v7759_v31  ;;  %8415 = vst [vmem:[#allocation28_spill] sm:$0xff] %v7767_v53  ;;  %v3648_v32 = vrot.slane %v3646_v13, 4  ;;  %v3107_v51 = vshrl.u32 %v2849_v8, 16  ;;  %v3112_v52 = vshrl.u32 %v2850_v27, 16  ;;  %v7769_v57 = vpop.f32.mrb[39].mxu1 }
 0x17b   : > { %8416 = vst [vmem:[#allocation29_spill] sm:$0xff] %v7769_v57  ;;  %v7771_v2 = vpop.f32.mrb[40].mxu0  ;;  %v3631_v31 = vsel %vm7087_vm7, %v3626_v12, %v3630_v47  ;;  %v3639_v17 = vor.u32 %v3638_v15, %v3635_v55  ;;  %v3654_v59 = vrot.slane %v3652_v21, 5  ;;  %v3115_v28 = vshll.u32 %v2850_v27, 16  ;;  %v3462_v7 = vld [vmem:[#allocation2 + $0xc0] sm:$0xf] }
 0x17c   : > { %8417 = vst [vmem:[#allocation30_spill] sm:$0xff] %v7771_v2  ;;  %v7775_v48 = vpop.f32.mrb[41].mxu0  ;;  %v5991_v5 = vcombine.low %v3621_v9, %v3631_v31  ;;  %v3649_v1 = vor.u32 %v3648_v32, %v3644_v40  ;;  %v5949_v62 = vrot.slane %v3107_v51, 11  ;;  %v3114_v53 = vrot.slane %v3112_v52, 7  ;;  %v3463_v27 = vld [vmem:[#allocation2 + $0xc4] sm:$0x1] }
 0x17d   : > { %v7777_v13 = vpop.f32.mrb[42].mxu0  ;;  %v3640_v8 = vrot.slane %v3639_v17, 4  ;;  %v3121_v46 = vshrl.u32 %v2851_v0, 16  ;;  %v3124_v57 = vshll.u32 %v2851_v0, 16  ;;  %v3657_v63 = vshrl.u32 %v3461_v11, 16  ;;  %v7781_v21 = vpop.f32.mrb[40].mxu1 }
 0x17e   : > { %8418 = vst [vmem:[#allocation31_spill] sm:$0xff] %v7777_v13  ;;  %v7779_v2 = vpop.f32.mrb[43].mxu0  ;;  %6671 = vmatmul.mubr.bf16.gmra.mrb[120].mxu0 %v5991_v5  ;;  %v3650_v47 = vrot.slane %v3649_v1, 4  ;;  %v3117_v12 = vor.u32 %v3115_v28, %v3114_v53  ;;  %v3119_v55 = vrot.slane %v3114_v53, 4  ;;  %v3660_v15 = vshll.u32 %v3461_v11, 16  ;;  %v7785_v17 = vpop.f32.mrb[41].mxu1 }
 0x17f   : > { %8419 = vst [vmem:[#allocation32_spill] sm:$0xff] %v7779_v2  ;;  %v3645_v9 = vsel %vm7087_vm7, %v3640_v8, %v3644_v40  ;;  %v3123_v31 = vrot.slane %v3121_v46, 7  ;;  %v3659_v32 = vrot.slane %v3657_v63, 4  ;;  %v3666_v51 = vshll.u32 %v3462_v7, 16  ;;  %v7791_v28 = vpop.f32.mrb[42].mxu1 }
 0x180   : > { %v3655_v0 = vsel %vm7087_vm7, %v3650_v47, %v3654_v59  ;;  %v3118_v1 = vsel %vm6944_vm2, %v5949_v62, %v3117_v12  ;;  %v3662_v52 = vrot.slane %v3660_v15, 5  ;;  %v3670_v53 = vshrl.u32 %v3462_v7, 16  ;;  %v7793_v40 = vpop.f32.mrb[43].mxu1  ;;  %v3464_v62 = vld [vmem:[#allocation2 + $0xd0] sm:$0xf]  ;;  %v6835_v15 = vld [vmem:[#allocation2 + $0x120] sm:$0xff]  }
 0x181   : > { %v5992_v11 = vcombine.low %v3645_v9, %v3655_v0  ;;  %v3126_v5 = vor.u32 %v3124_v57, %v3123_v31  ;;  %v3668_v2 = vrot.slane %v3666_v51, 5  ;;  %v3676_v13 = vshll.u32 %v3463_v27, 16  ;;  %v3465_v47 = vld [vmem:[#allocation2 + $0xd4] sm:$0xf] }
 0x182   : > { %v3663_v63 = vor.u32 %v3662_v52, %v3659_v32  ;;  %v3672_v46 = vrot.slane %v3670_v53, 4  ;;  %v7797_v8 = vadd.f32 %v7609_v19, %v7587_v49  ;;  %v6310_v59 = vadd.f32 %v7611_v58, %v7605_v42  ;;  %v3466_v49 = vld [vmem:[#allocation2 + $0xd8] sm:$0x1]  ;;  %v2852_v58 = vld [vmem:[#allocation2 + $0x11c] sm:$0x8] }
 0x183   : > { %6674 = vmatprep.mubr.bf16.mxu0 %v5992_v11  ;;  %v3127_v7 = vsel %vm6944_vm2, %v3119_v55, %v3126_v5  ;;  %v3678_v57 = vrot.slane %v3676_v13, 5  ;;  %v7805_v12 = vadd.f32 %v7619_v18, %v7615_v14  ;;  %v6313_v27 = vadd.f32 %v7621_v39, %v7617_v54  ;;  %v2853_v32 = vld [vmem:[#allocation2 + $0x120] sm:$0xf]  ;;  %v2854_v18 = vld [vmem:[#allocation2 + $0x124] sm:$0xf] }
 0x184   : > { %v5965_v19 = vcombine.low %v3118_v1, %v3127_v7  ;;  %v3664_v9 = vrot.slane %v3663_v63, 4  ;;  %v3673_v31 = vor.u32 %v3672_v46, %v3668_v2  ;;  %v7810_v42 = vadd.f32 %v6310_v59, %v7585_v16  ;;  %v3467_v52 = vld [vmem:[#allocation2 + $0xe4] sm:$0xf]  ;;  %v3468_v53 = vld [vmem:[#allocation2 + $0xe8] sm:$0xf] }
 0x185   : > { %v7813_v55 = vadd.f32 %v6313_v27, %v7595_v37  ;;  %v3681_v13 = vshrl.u32 %v3464_v62, 16  ;;  %v3684_v51 = vshll.u32 %v3464_v62, 16  ;;  %v3690_v14 = vshll.u32 %v3465_v47, 16  ;;  %v7817_v16 = vpop.f32.mrb[44].mxu0  ;;  %v7819_v11 = vpop.f32.mrb[44].mxu1 }
 0x186   : > { %8420 = vst [vmem:[#allocation33_spill] sm:$0xff] %v7810_v42  ;;  %5276 = vmatmul.mubr.bf16.gmra.mrb[124].mxu1 %v5965_v19  ;;  %v3669_v54 = vsel %vm7087_vm7, %v3664_v9, %v3668_v2  ;;  %v3674_v39 = vrot.slane %v3673_v31, 4  ;;  %v3694_v0 = vshrl.u32 %v3465_v47, 16  ;;  %v3700_v1 = vshll.u32 %v3466_v49, 16  ;;  %8422 = vst [vmem:[#allocation35_spill] sm:$0xff] %v7819_v11  ;;  %v7821_v59 = vpop.f32.mrb[45].mxu0 }
 0x187   : > { %8421 = vst [vmem:[#allocation34_spill] sm:$0xff] %v7813_v55  ;;  %5283 = vmatprep.mubr.bf16.mxu1 %v6835_v15  ;;  %v3683_v37 = vrot.slane %v3681_v13, 4  ;;  %v3686_v5 = vrot.slane %v3684_v51, 5  ;;  %v3692_v63 = vrot.slane %v3690_v14, 5  ;;  %v3129_v46 = vshrl.u32 %v2852_v58, 16  ;;  %v7823_v62 = vpop.f32.mrb[45].mxu1 }
 0x188   : > { %8423 = vst [vmem:[#allocation36_spill] sm:$0xff] %v7823_v62  ;;  %v3679_v2 = vsel %vm7087_vm7, %v3674_v39, %v3678_v57  ;;  %v3696_v47 = vrot.slane %v3694_v0, 4  ;;  %v3702_v7 = vrot.slane %v3700_v1, 5  ;;  %v3134_v27 = vshrl.u32 %v2853_v32, 16  ;;  %v7827_v49 = vpop.f32.mrb[46].mxu0  ;;  %v7829_v19 = vpop.f32.mrb[46].mxu1 }
 0x189   : > { %8424 = vst [vmem:[#allocation37_spill] sm:$0xff] %v7827_v49  ;;  %8425 = vst [vmem:[#allocation38_spill] sm:$0xff] %v7829_v19  ;;  %v5993_v9 = vcombine.low %v3669_v54, %v3679_v2  ;;  %v3687_v15 = vor.u32 %v3686_v5, %v3683_v37  ;;  %v5950_v31 = vrot.slane %v3129_v46, 11  ;;  %v3137_v13 = vshll.u32 %v2853_v32, 16  ;;  %v7831_v51 = vpop.f32.mrb[47].mxu0  ;;  %v7833_v58 = vpop.f32.mrb[47].mxu1 }
 0x18a   : > { %v3697_v14 = vor.u32 %v3696_v47, %v3692_v63  ;;  %v3136_v55 = vrot.slane %v3134_v27, 7  ;;  %v3143_v42 = vshrl.u32 %v2854_v18, 16  ;;  %v3146_v62 = vshll.u32 %v2854_v18, 16  ;;  %v3469_v37 = vld [vmem:[#allocation2 + $0xec] sm:$0x1] }
 0x18b   : > { %6675 = vmatmul.mubr.bf16.gmra.mrb[124].mxu0 %v5993_v9  ;;  %v3688_v57 = vrot.slane %v3687_v15, 4  ;;  %v3705_v39 = vshrl.u32 %v3467_v52, 16  ;;  %v3708_v0 = vshll.u32 %v3467_v52, 16  ;;  %v3714_v1 = vshll.u32 %v3468_v53, 16 }
 0x18c   : > { %v3698_v49 = vrot.slane %v3697_v14, 4  ;;  %v3139_v11 = vor.u32 %v3137_v13, %v3136_v55  ;;  %v3141_v19 = vrot.slane %v3136_v55, 4  ;;  %v3145_v54 = vrot.slane %v3143_v42, 7  ;;  %v3470_v55 = vld [vmem:[#allocation2 + $0xf8] sm:$0xf] }
 0x18d   : > { %v3693_v32 = vsel %vm7087_vm7, %v3688_v57, %v3692_v63  ;;  %v3707_v5 = vrot.slane %v3705_v39, 4  ;;  %v3710_v46 = vrot.slane %v3708_v0, 5  ;;  %v3716_v2 = vrot.slane %v3714_v1, 5  ;;  %v2855_v39 = vld [vmem:[#allocation2 + $0x130] sm:$0x8] }
 0x18e   : > { %v3703_v47 = vsel %vm7087_vm7, %v3698_v49, %v3702_v7  ;;  %v3140_v18 = vsel %vm6944_vm2, %v5950_v31, %v3139_v11  ;;  %v3148_v27 = vor.u32 %v3146_v62, %v3145_v54  ;;  %v3718_v52 = vshrl.u32 %v3468_v53, 16  ;;  %v6836_v53 = vld [vmem:[#allocation2 + $0x134] sm:$0xff]   ;;  %v3471_v62 = vld [vmem:[#allocation2 + $0xfc] sm:$0xf]  ;;  %v3472_v49 = vld [vmem:[#allocation2 + $0x100] sm:$0x1] }
 0x18f   : > { %v5994_v9 = vcombine.low %v3693_v32, %v3703_v47  ;;  %v3711_v15 = vor.u32 %v3710_v46, %v3707_v5  ;;  %v3724_v13 = vshll.u32 %v3469_v37, 16  ;;  %v7843_v42 = vadd.f32 %v7653_v22, %v7629_v36  ;;  %v8426_v1 = vld [vmem:[#allocation13_spill] sm:$0xff]  ;;  %v8428_v32 = vld [vmem:[#allocation15_spill] sm:$0xff]  ;;  %v2857_v46 = vld [vmem:[#allocation2 + $0x138] sm:$0xf] }
 0x190   : > { %v3149_v63 = vsel %vm6944_vm2, %v3141_v19, %v3148_v27  ;;  %v3720_v14 = vrot.slane %v3718_v52, 4  ;;  %v6316_v7 = vadd.f32 %v7655_v45, %v7649_v61  ;;  %v7851_v11 = vadd.f32 %v7661_v43, %v7657_v44  ;;  %v7855_v19 = vpop.f32.mrb[48].mxu0  ;;  %v2856_v43 = vld [vmem:[#allocation2 + $0x134] sm:$0xf] }
 0x191   : > { %6678 = vmatprep.mubr.bf16.mxu0 %v5994_v9  ;;  %v5966_v31 = vcombine.low %v3140_v18, %v3149_v63  ;;  %v3712_v57 = vrot.slane %v3711_v15, 4  ;;  %v3726_v36 = vrot.slane %v3724_v13, 5  ;;  %v6319_v22 = vadd.f32 %v7663_v23, %v7659_v20  ;;  %v7860_v54 = vpop.f32.mrb[49].mxu0 }
 0x192   : > { %v3721_v0 = vor.u32 %v3720_v14, %v3716_v2  ;;  %v7858_v61 = vadd.f32 %v6316_v7, %v8426_v1  ;;  %v3729_v45 = vshrl.u32 %v3470_v55, 16  ;;  %v3732_v44 = vshll.u32 %v3470_v55, 16  ;;  %v7867_v47 = vpop.f32.mrb[50].mxu0 }
 0x193   : > { %5284 = vmatmul.mubr.bf16.gmra.mrb[128].mxu1 %v5966_v31  ;;  %v3717_v37 = vsel %vm7087_vm7, %v3712_v57, %v3716_v2  ;;  %v7865_v5 = vadd.f32 %v6319_v22, %v8428_v32  ;;  %v3738_v20 = vshll.u32 %v3471_v62, 16  ;;  %v3742_v23 = vshrl.u32 %v3471_v62, 16  ;;  %8430 = vst [vmem:[#allocation39_spill] sm:$0xff] %v7867_v47  ;;  %v7869_v15 = vpop.f32.mrb[51].mxu0  ;;  %v3473_v2 = vld [vmem:[#allocation2 + $0x10c] sm:$0xf] }
 0x194   : > { %8427 = vst [vmem:[#allocation13_spill] sm:$0xff] %v7858_v61  ;;  %v3722_v18 = vrot.slane %v3721_v0, 4  ;;  %5291 = vmatprep.mubr.bf16.mxu1 %v6836_v53  ;;  %v3731_v27 = vrot.slane %v3729_v45, 4  ;;  %v3734_v52 = vrot.slane %v3732_v44, 5  ;;  %v3748_v9 = vshll.u32 %v3472_v49, 16  ;;  %8431 = vst [vmem:[#allocation40_spill] sm:$0xff] %v7869_v15 }
 0x195   : > { %8429 = vst [vmem:[#allocation15_spill] sm:$0xff] %v7865_v5  ;;  %v3740_v13 = vrot.slane %v3738_v20, 5  ;;  %v3744_v55 = vrot.slane %v3742_v23, 4  ;;  %v3151_v63 = vshrl.u32 %v2855_v39, 16  ;;  %v3156_v14 = vshrl.u32 %v2856_v43, 16  ;;  %v7873_v22 = vpop.f32.mrb[48].mxu1 }
 0x196   : > { %v3727_v7 = vsel %vm7087_vm7, %v3722_v18, %v3726_v36  ;;  %v3735_v31 = vor.u32 %v3734_v52, %v3731_v27  ;;  %v3750_v62 = vrot.slane %v3748_v9, 5  ;;  %v3159_v57 = vshll.u32 %v2856_v43, 16  ;;  %v3474_v49 = vld [vmem:[#allocation2 + $0x110] sm:$0xf]  ;;  %v7875_v44 = vpop.f32.mrb[49].mxu1 }
 0x197   : > { %v5995_v0 = vcombine.low %v3717_v37, %v3727_v7  ;;  %v3745_v53 = vor.u32 %v3744_v55, %v3740_v13  ;;  %v5951_v1 = vrot.slane %v3151_v63, 11  ;;  %v3158_v45 = vrot.slane %v3156_v14, 7  ;;  %v7877_v5 = vpop.f32.mrb[50].mxu1  ;;  %v3475_v43 = vld [vmem:[#allocation2 + $0x114] sm:$0x1] }
 0x198   : > { %v3736_v32 = vrot.slane %v3735_v31, 4  ;;  %v3165_v20 = vshrl.u32 %v2857_v46, 16  ;;  %v3168_v39 = vshll.u32 %v2857_v46, 16  ;;  %v3753_v23 = vshrl.u32 %v3473_v2, 16  ;;  %v7879_v9 = vpop.f32.mrb[51].mxu1  ;;  %v8432_v47 = vld [vmem:[#allocation17_spill] sm:$0xff] }
 0x199   : > { %6679 = vmatmul.mubr.bf16.gmra.mrb[128].mxu0 %v5995_v0  ;;  %v3746_v36 = vrot.slane %v3745_v53, 4  ;;  %v3161_v18 = vor.u32 %v3159_v57, %v3158_v45  ;;  %v3163_v27 = vrot.slane %v3158_v45, 4  ;;  %v3756_v52 = vshll.u32 %v3473_v2, 16 }
 0x19a   : > { %v3741_v37 = vsel %vm7087_vm7, %v3736_v32, %v3740_v13  ;;  %v3167_v55 = vrot.slane %v3165_v20, 7  ;;  %v3755_v63 = vrot.slane %v3753_v23, 4  ;;  %v3762_v14 = vshll.u32 %v3474_v49, 16  ;;  %v3476_v20 = vld [vmem:[#allocation2 + $0x120] sm:$0xf] }
 0x19b   : > { %v3751_v46 = vsel %vm7087_vm7, %v3746_v36, %v3750_v62  ;;  %v3162_v7 = vsel %vm6944_vm2, %v5951_v1, %v3161_v18  ;;  %v3758_v31 = vrot.slane %v3756_v52, 5  ;;  %v3766_v0 = vshrl.u32 %v3474_v49, 16  ;;  %v3477_v62 = vld [vmem:[#allocation2 + $0x124] sm:$0xf]  ;;  %v8434_v36 = vld [vmem:[#allocation22_spill] sm:$0xff] }
 0x19c   : > { %v5996_v57 = vcombine.low %v3741_v37, %v3751_v46  ;;  %v3170_v53 = vor.u32 %v3168_v39, %v3167_v55  ;;  %v3764_v45 = vrot.slane %v3762_v14, 5  ;;  %v3772_v2 = vshll.u32 %v3475_v43, 16  ;;  %v7893_v23 = vpop.f32.mrb[52].mxu0  ;;  %v3478_v18 = vld [vmem:[#allocation2 + $0x128] sm:$0x1]  ;;  %v8436_v37 = vld [vmem:[#allocation18_spill] sm:$0xff] }
 0x19d   : > { %v3759_v61 = vor.u32 %v3758_v31, %v3755_v63  ;;  %v3768_v15 = vrot.slane %v3766_v0, 4  ;;  %v7889_v13 = vadd.f32 %v7671_v3, %v8432_v47  ;;  %v6322_v32 = vadd.f32 %v7673_v24, %v7669_v29  ;;  %8433 = vst [vmem:[#allocation17_spill] sm:$0xff] %v7893_v23  ;;  %v6837_v47 = vld [vmem:[#allocation2 + $0x148] sm:$0xff]   ;;  %v7903_v43 = vpop.f32.mrb[53].mxu0  ;;  %v2858_v63 = vld [vmem:[#allocation2 + $0x144] sm:$0x8] }
 0x19e   : > { %6682 = vmatprep.mubr.bf16.mxu0 %v5996_v57  ;;  %v3171_v1 = vsel %vm6944_vm2, %v3163_v27, %v3170_v53  ;;  %v3774_v49 = vrot.slane %v3772_v2, 5  ;;  %v7899_v39 = vadd.f32 %v7695_v41, %v7679_v25  ;;  %v6325_v3 = vadd.f32 %v8434_v36, %v7693_v60  ;;  %8435 = vst [vmem:[#allocation22_spill] sm:$0xff] %v7903_v43  ;;  %v2859_v27 = vld [vmem:[#allocation2 + $0x148] sm:$0xf]  ;;  %v7908_v14 = vpop.f32.mrb[54].mxu0 }
 0x19f   : > { %v5967_v24 = vcombine.low %v3162_v7, %v3171_v1  ;;  %v3760_v29 = vrot.slane %v3759_v61, 4  ;;  %v3769_v52 = vor.u32 %v3768_v15, %v3764_v45  ;;  %v7906_v55 = vadd.f32 %v6322_v32, %v8436_v37  ;;  %8438 = vst [vmem:[#allocation41_spill] sm:$0xff] %v7908_v14  ;;  %v8439_v46 = vld [vmem:[#allocation20_spill] sm:$0xff]  ;;  %v7913_v57 = vpop.f32.mrb[55].mxu0  ;;  %v3479_v2 = vld [vmem:[#allocation2 + $0x134] sm:$0xf] }
 0x1a0   : > { %v7911_v25 = vadd.f32 %v6325_v3, %v8439_v46  ;;  %v3777_v41 = vshrl.u32 %v3476_v20, 16  ;;  %v3780_v31 = vshll.u32 %v3476_v20, 16  ;;  %v3786_v60 = vshll.u32 %v3477_v62, 16  ;;  %v2860_v0 = vld [vmem:[#allocation2 + $0x14c] sm:$0xf]  ;;  %8441 = vst [vmem:[#allocation42_spill] sm:$0xff] %v7913_v57 }
 0x1a1   : > { %8437 = vst [vmem:[#allocation18_spill] sm:$0xff] %v7906_v55  ;;  %5292 = vmatmul.mubr.bf16.gmra.mrb[132].mxu1 %v5967_v24  ;;  %v3765_v61 = vsel %vm7087_vm7, %v3760_v29, %v3764_v45  ;;  %v3770_v15 = vrot.slane %v3769_v52, 4  ;;  %v3790_v7 = vshrl.u32 %v3477_v62, 16  ;;  %v3796_v53 = vshll.u32 %v3478_v18, 16  ;;  %v7917_v37 = vpop.f32.mrb[52].mxu1 }
 0x1a2   : > { %8440 = vst [vmem:[#allocation20_spill] sm:$0xff] %v7911_v25  ;;  %5299 = vmatprep.mubr.bf16.mxu1 %v6837_v47  ;;  %v3779_v32 = vrot.slane %v3777_v41, 4  ;;  %v3782_v1 = vrot.slane %v3780_v31, 5  ;;  %v3788_v36 = vrot.slane %v3786_v60, 5  ;;  %v3173_v3 = vshrl.u32 %v2858_v63, 16  ;;  %v7921_v57 = vpop.f32.mrb[53].mxu1 }
 0x1a3   : > { %v3775_v20 = vsel %vm7087_vm7, %v3770_v15, %v3774_v49  ;;  %v3792_v46 = vrot.slane %v3790_v7, 4  ;;  %v3798_v25 = vrot.slane %v3796_v53, 5  ;;  %v3178_v24 = vshrl.u32 %v2859_v27, 16  ;;  %v3480_v55 = vld [vmem:[#allocation2 + $0x138] sm:$0xf]  ;;  %v7923_v47 = vpop.f32.mrb[54].mxu1 }
 0x1a4   : > { %v5997_v45 = vcombine.low %v3765_v61, %v3775_v20  ;;  %v3783_v62 = vor.u32 %v3782_v1, %v3779_v32  ;;  %v5952_v18 = vrot.slane %v3173_v3, 11  ;;  %v3181_v29 = vshll.u32 %v2859_v27, 16  ;;  %v7925_v60 = vpop.f32.mrb[55].mxu1  ;;  %v3481_v32 = vld [vmem:[#allocation2 + $0x13c] sm:$0x1]  ;;  %v8468_v4 = vld [vmem:[#allocation17_spill] sm:$0xff] }
 0x1a5   : > { %v3793_v52 = vor.u32 %v3792_v46, %v3788_v36  ;;  %v3180_v41 = vrot.slane %v3178_v24, 7  ;;  %v3187_v63 = vshrl.u32 %v2860_v0, 16  ;;  %v3190_v31 = vshll.u32 %v2860_v0, 16  ;;  %8442 = vst [vmem:[#allocation43_spill] sm:$0xff] %v7925_v60 }
 0x1a6   : > { %6683 = vmatmul.mubr.bf16.gmra.mrb[132].mxu0 %v5997_v45  ;;  %v3784_v49 = vrot.slane %v3783_v62, 4  ;;  %v3801_v15 = vshrl.u32 %v3479_v2, 16  ;;  %v3804_v7 = vshll.u32 %v3479_v2, 16  ;;  %v3810_v53 = vshll.u32 %v3480_v55, 16 }
 0x1a7   : > { %v3794_v14 = vrot.slane %v3793_v52, 4  ;;  %v3183_v43 = vor.u32 %v3181_v29, %v3180_v41  ;;  %v3185_v23 = vrot.slane %v3180_v41, 4  ;;  %v3189_v61 = vrot.slane %v3187_v63, 7  ;;  %v8443_v41 = vld [vmem:[#allocation23_spill] sm:$0xff]  ;;  %v8444_v63 = vld [vmem:[#allocation25_spill] sm:$0xff] }
 0x1a8   : > { %v3789_v27 = vsel %vm7087_vm7, %v3784_v49, %v3788_v36  ;;  %v3803_v1 = vrot.slane %v3801_v15, 4  ;;  %v3806_v3 = vrot.slane %v3804_v7, 5  ;;  %v3812_v20 = vrot.slane %v3810_v53, 5  ;;  %v7933_v45 = vpop.f32.mrb[56].mxu0  ;;  %v3482_v36 = vld [vmem:[#allocation2 + $0x148] sm:$0xf] }
 0x1a9   : > { %v3799_v0 = vsel %vm7087_vm7, %v3794_v14, %v3798_v25  ;;  %v3184_v46 = vsel %vm6944_vm2, %v5952_v18, %v3183_v43  ;;  %v3192_v24 = vor.u32 %v3190_v31, %v3189_v61  ;;  %v3814_v2 = vshrl.u32 %v3480_v55, 16  ;;  %v7939_v49 = vpop.f32.mrb[57].mxu0  ;;  %v8445_v15 = vld [vmem:[#allocation24_spill] sm:$0xff]  ;;  %v6838_v18 = vld [vmem:[#allocation2 + $0x15c] sm:$0xff]  }
 0x1aa   : > { %v5998_v62 = vcombine.low %v3789_v27, %v3799_v0  ;;  %v3807_v29 = vor.u32 %v3806_v3, %v3803_v1  ;;  %v3820_v52 = vshll.u32 %v3481_v32, 16  ;;  %v7937_v60 = vadd.f32 %v8444_v63, %v8443_v41  ;;  %v3483_v31 = vld [vmem:[#allocation2 + $0x14c] sm:$0xf]  ;;  %v7949_v7 = vpop.f32.mrb[58].mxu0  ;;  %v2861_v0 = vld [vmem:[#allocation2 + $0x158] sm:$0x8] }
 0x1ab   : > { %v3193_v14 = vsel %vm6944_vm2, %v3185_v23, %v3192_v24  ;;  %v3816_v25 = vrot.slane %v3814_v2, 4  ;;  %v6328_v43 = vadd.f32 %v7717_v38, %v8445_v15  ;;  %v7947_v55 = vadd.f32 %v7725_v33, %v7719_v50  ;;  %8446 = vst [vmem:[#allocation23_spill] sm:$0xff] %v7949_v7  ;;  %v3484_v23 = vld [vmem:[#allocation2 + $0x150] sm:$0x1]  ;;  %v7953_v1 = vpop.f32.mrb[59].mxu0 }
 0x1ac   : > { %6686 = vmatprep.mubr.bf16.mxu0 %v5998_v62  ;;  %v5968_v53 = vcombine.low %v3184_v46, %v3193_v14  ;;  %v3808_v61 = vrot.slane %v3807_v29, 4  ;;  %v3822_v32 = vrot.slane %v3820_v52, 5  ;;  %v6331_v27 = vadd.f32 %v7731_v6, %v7723_v35  ;;  %8447 = vst [vmem:[#allocation25_spill] sm:$0xff] %v7953_v1  ;;  %v2862_v24 = vld [vmem:[#allocation2 + $0x15c] sm:$0xf] }
 0x1ad   : > { %v3817_v3 = vor.u32 %v3816_v25, %v3812_v20  ;;  %v7956_v38 = vadd.f32 %v6328_v43, %v7741_v26  ;;  %v3825_v50 = vshrl.u32 %v3482_v36, 16  ;;  %v3828_v33 = vshll.u32 %v3482_v36, 16  ;;  %v2863_v6 = vld [vmem:[#allocation2 + $0x160] sm:$0xf]  ;;  %v342_v29 = vld [vmem:[#allocation2 + $0x164] sm:$0x1] }
 0x1ae   : > { %5300 = vmatmul.mubr.bf16.gmra.mrb[136].mxu1 %v5968_v53  ;;  %v3813_v46 = vsel %vm7087_vm7, %v3808_v61, %v3812_v20  ;;  %v7961_v2 = vadd.f32 %v6331_v27, %v7749_v10  ;;  %v3834_v62 = vshll.u32 %v3483_v31, 16  ;;  %v3838_v35 = vshrl.u32 %v3483_v31, 16  ;;  %v7963_v14 = vpop.f32.mrb[56].mxu1  ;;  %v3485_v27 = vld [vmem:[#allocation2 + $0x15c] sm:$0xf] }
 0x1af   : > { %8448 = vst [vmem:[#allocation24_spill] sm:$0xff] %v7956_v38  ;;  %v3818_v52 = vrot.slane %v3817_v3, 4  ;;  %5307 = vmatprep.mubr.bf16.mxu1 %v6838_v18  ;;  %v3827_v41 = vrot.slane %v3825_v50, 4  ;;  %v3830_v26 = vrot.slane %v3828_v33, 5  ;;  %v3844_v63 = vshll.u32 %v3484_v23, 16  ;;  %v7965_v53 = vpop.f32.mrb[57].mxu1 }
 0x1b0   : > { %8449 = vst [vmem:[#allocation44_spill] sm:$0xff] %v7961_v2  ;;  %v3836_v36 = vrot.slane %v3834_v62, 5  ;;  %v3840_v25 = vrot.slane %v3838_v35, 4  ;;  %v3195_v15 = vshrl.u32 %v2861_v0, 16  ;;  %v3200_v43 = vshrl.u32 %v2862_v24, 16  ;;  %v7969_v3 = vpop.f32.mrb[58].mxu1 }
 0x1b1   : > { %v3823_v10 = vsel %vm7087_vm7, %v3818_v52, %v3822_v32  ;;  %v3831_v20 = vor.u32 %v3830_v26, %v3827_v41  ;;  %v3846_v31 = vrot.slane %v3844_v63, 5  ;;  %v3203_v61 = vshll.u32 %v2862_v24, 16  ;;  %v3486_v2 = vld [vmem:[#allocation2 + $0x160] sm:$0xf]  ;;  %v7971_v62 = vpop.f32.mrb[59].mxu1 }
 0x1b2   : > { %v5999_v18 = vcombine.low %v3813_v46, %v3823_v10  ;;  %v3841_v50 = vor.u32 %v3840_v25, %v3836_v36  ;;  %v5953_v23 = vrot.slane %v3195_v15, 11  ;;  %v3202_v33 = vrot.slane %v3200_v43, 7 }
 0x1b3   : > { %v3832_v0 = vrot.slane %v3831_v20, 4  ;;  %v3209_v35 = vshrl.u32 %v2863_v6, 16  ;;  %v3212_v38 = vshll.u32 %v2863_v6, 16  ;;  %v343_v7 = vsel %vm7064_vm6, 0, %v342_v29 }
 0x1b4   : > { %6687 = vmatmul.mubr.bf16.gmra.mrb[136].mxu0 %v5999_v18  ;;  %v3842_v32 = vrot.slane %v3841_v50, 4  ;;  %v3205_v52 = vor.u32 %v3203_v61, %v3202_v33  ;;  %v3207_v24 = vrot.slane %v3202_v33, 4  ;;  %344 = vst [vmem:[#allocation2 + $0x164] sm:$0x1] %v343_v7  ;;  %v3849_v41 = vshrl.u32 %v3485_v27, 16  ;;  %v7977_v15 = vpop.f32.mrb[60].mxu0 }
 0x1b5   : > { %v3837_v46 = vsel %vm7087_vm7, %v3832_v0, %v3836_v36  ;;  %v3211_v26 = vrot.slane %v3209_v35, 7  ;;  %v3852_v63 = vshll.u32 %v3485_v27, 16  ;;  %v3858_v25 = vshll.u32 %v3486_v2, 16  ;;  %v7983_v10 = vpop.f32.mrb[61].mxu0  ;;  %v8451_v33 = vld [vmem:[#allocation26_spill] sm:$0xff]  ;;  %v8452_v0 = vld [vmem:[#allocation9_spill] sm:$0xff] }
 0x1b6   : > { %v3847_v6 = vsel %vm7087_vm7, %v3842_v32, %v3846_v31  ;;  %v3206_v1 = vsel %vm6944_vm2, %v5953_v23, %v3205_v52  ;;  %v3851_v29 = vrot.slane %v3849_v41, 4  ;;  %v3862_v43 = vshrl.u32 %v3486_v2, 16  ;;  %v7985_v36 = vpop.f32.mrb[62].mxu0  ;;  %v8453_v35 = vld [vmem:[#allocation5_spill] sm:$0xff]  ;;  %v8454_v32 = vld [vmem:[#allocation28_spill] sm:$0xff]  ;;  %v8455_v41 = vld [vmem:[#allocation27_spill] sm:$0xff] }
 0x1b7   : > { %v6000_v7 = vcombine.low %v3837_v46, %v3847_v6  ;;  %v3214_v20 = vor.u32 %v3212_v38, %v3211_v26  ;;  %v3854_v61 = vrot.slane %v3852_v63, 5  ;;  %v3860_v18 = vrot.slane %v3858_v25, 5  ;;  %v7993_v52 = vpop.f32.mrb[63].mxu0  ;;  %v8456_v46 = vld [vmem:[#allocation29_spill] sm:$0xff]  ;;  %v8457_v63 = vld [vmem:[#allocation30_spill] sm:$0xff] }
 0x1b8   : > { %v3864_v27 = vrot.slane %v3862_v43, 4  ;;  %v6246_v50 = vadd.f32 %v7745_v34, %v7733_v56  ;;  %v6334_v31 = vadd.f32 %v8452_v0, %v8451_v33  ;;  %v6249_v23 = vadd.f32 %v8454_v32, %v8453_v35  ;;  %v8461_v35 = vld [vmem:[#allocation36_spill] sm:$0xff] }
 0x1b9   : > { %6690 = vmatprep.mubr.bf16.mxu0 %v6000_v7  ;;  %v3215_v38 = vsel %vm6944_vm2, %v3207_v24, %v3214_v20  ;;  %v3855_v2 = vor.u32 %v3854_v61, %v3851_v29  ;;  %v6337_v26 = vadd.f32 %v8456_v46, %v8455_v41  ;;  %v6252_v25 = vadd.f32 %v7775_v48, %v8457_v63  ;;  %v8458_v24 = vld [vmem:[#allocation31_spill] sm:$0xff]  ;;  %v8459_v29 = vld [vmem:[#allocation32_spill] sm:$0xff] }
 0x1ba   : > { %v5969_v56 = vcombine.low %v3206_v1, %v3215_v38  ;;  %v3865_v34 = vor.u32 %v3864_v27, %v3860_v18  ;;  %v8002_v6 = vadd.f32 %v6334_v31, %v7797_v8  ;;  %v6340_v43 = vadd.f32 %v7785_v17, %v7781_v21  ;;  %v6368_v48 = vpop.f32.mrb[60].mxu1  ;;  %v8460_v31 = vld [vmem:[#allocation35_spill] sm:$0xff] }
 0x1bb   : > { %v3487_v33 = vld [vmem:[#allocation2 + $0x164] sm:$0x1]  ;;  %v3856_v7 = vrot.slane %v3855_v2, 4  ;;  %v8007_v30 = vadd.f32 %v6337_v26, %v7805_v12  ;;  %v6255_v20 = vadd.f32 %v8459_v29, %v8458_v24  ;;  %v6343_v61 = vadd.f32 %v7793_v40, %v7791_v28  ;;  %v6369_v17 = vpop.f32.mrb[61].mxu1  ;;  %v8462_v40 = vld [vmem:[#allocation37_spill] sm:$0xff] }
 0x1bc   : > { %5308 = vmatmul.mubr.bf16.gmra.mrb[140].mxu1 %v5969_v56  ;;  %v3866_v1 = vrot.slane %v3865_v34, 4  ;;  %v3868_v27 = vshll.u32 %v3487_v33, 16  ;;  %v8014_v8 = vadd.f32 %v6340_v43, %v7843_v42  ;;  %v6258_v21 = vadd.f32 %v7821_v59, %v7817_v16  ;;  %v6371_v38 = vpop.f32.mrb[62].mxu1  ;;  %v8463_v42 = vld [vmem:[#allocation38_spill] sm:$0xff]  ;;  %v8464_v26 = vld [vmem:[#allocation39_spill] sm:$0xff] }
 0x1bd   : > { %v3861_v12 = vsel %vm7087_vm7, %v3856_v7, %v3860_v18  ;;  %v8021_v0 = vadd.f32 %v6343_v61, %v7851_v11  ;;  %v6346_v28 = vadd.f32 %v8461_v35, %v8460_v31  ;;  %v6261_v32 = vadd.f32 %v7831_v51, %v8462_v40  ;;  %v6372_v18 = vpop.f32.mrb[63].mxu1  ;;  %v8465_v51 = vld [vmem:[#allocation40_spill] sm:$0xff]  ;;  %v8472_v7 = vld [vmem:[#allocation42_spill] sm:$0xff] }
 0x1be   : > { %v3870_v2 = vrot.slane %v3868_v27, 5  ;;  %v6349_v41 = vadd.f32 %v7833_v58, %v8463_v42  ;;  %v6352_v16 = vadd.f32 %v7875_v44, %v7873_v22  ;;  %v6416_v59 = vadd.f32 %v7860_v54, %v7855_v19  ;;  %v8466_v54 = vld [vmem:[#allocation7_spill] sm:$0xff]  ;;  %v8474_v27 = vld [vmem:[#allocation25_spill] sm:$0xff] }
 0x1bf   : > { %v8034_v11 = vadd.f32 %v6346_v28, %v7889_v13  ;;  %v6355_v46 = vadd.f32 %v7879_v9, %v7877_v5  ;;  %v6419_v63 = vadd.f32 %v8465_v51, %v8464_v26  ;;  %v6358_v56 = vadd.f32 %v7921_v57, %v7917_v37  ;;  %v8467_v9 = vld [vmem:[#allocation8_spill] sm:$0xff]  ;;  %v8469_v37 = vld [vmem:[#allocation22_spill] sm:$0xff] }
 0x1c0   : > { %v3871_v58 = vsel %vm7087_vm7, %v3866_v1, %v3870_v2  ;;  %v8045_v22 = vadd.f32 %v6349_v41, %v7899_v39  ;;  %v8048_v19 = vadd.f32 %v6352_v16, %v7937_v60  ;;  %v8051_v44 = vadd.f32 %v6416_v59, %v8466_v54  ;;  %v8470_v39 = vld [vmem:[#allocation43_spill] sm:$0xff]  ;;  %v8471_v60 = vld [vmem:[#allocation41_spill] sm:$0xff]  ;;  %v8476_v2 = vld [vmem:[#allocation34_spill] sm:$0xff] }
 0x1c1   : > { %v6001_v13 = vcombine.low %v3861_v12, %v3871_v58  ;;  %v8054_v5 = vadd.f32 %v6355_v46, %v7947_v55  ;;  %v8057_v34 = vadd.f32 %v6419_v63, %v8467_v9  ;;  %v8059_v57 = vadd.f32 %v6358_v56, %v6246_v50  ;;  %v6438_v61 = vpop.f32.mrb[64].mxu0  ;;  %v8473_v1 = vld [vmem:[#allocation23_spill] sm:$0xff]  ;;  %v8479_v51 = vld [vmem:[#allocation18_spill] sm:$0xff]  ;;  %v8480_v56 = vld [vmem:[#allocation20_spill] sm:$0xff] }
 0x1c2   : > { %v6422_v43 = vadd.f32 %v8469_v37, %v8468_v4  ;;  %v6361_v33 = vadd.f32 %v8470_v39, %v7923_v47  ;;  %v6425_v24 = vadd.f32 %v8472_v7, %v8471_v60  ;;  %v6364_v29 = vadd.f32 %v7965_v53, %v7963_v14  ;;  %v6439_v35 = vpop.f32.mrb[65].mxu0  ;;  %v8475_v47 = vld [vmem:[#allocation33_spill] sm:$0xff]  ;;  %v8481_v54 = vld [vmem:[#allocation24_spill] sm:$0xff]  ;;  %v8484_v37 = vld [vmem:[#allocation10_spill] sm:$0xff] }
 0x1c3   : > { %6691 = vmatmul.mubr.bf16.gmra.mrb[140].mxu0 %v6001_v13  ;;  %v6428_v55 = vadd.f32 %v7939_v49, %v7933_v45  ;;  %v6367_v50 = vadd.f32 %v7971_v62, %v7969_v3  ;;  %v6431_v12 = vadd.f32 %v8474_v27, %v8473_v1  ;;  %v6370_v31 = vadd.f32 %v6369_v17, %v6368_v48  ;;  %v6441_v42 = vpop.f32.mrb[66].mxu0  ;;  %v8477_v45 = vld [vmem:[#allocation13_spill] sm:$0xff]  ;;  %v8478_v62 = vld [vmem:[#allocation15_spill] sm:$0xff] }
 0x1c4   : > { %v8076_v28 = vadd.f32 %v6422_v43, %v8475_v47  ;;  %v8078_v40 = vadd.f32 %v6361_v33, %v6249_v23  ;;  %v8081_v14 = vadd.f32 %v6425_v24, %v8476_v2  ;;  %v8083_v53 = vadd.f32 %v6364_v29, %v6252_v25  ;;  %v6442_v17 = vpop.f32.mrb[67].mxu0  ;;  %v8486_v2 = vld [vmem:[#allocation12_spill] sm:$0xff] }
 0x1c5   : > { %v8086_v49 = vadd.f32 %v6428_v55, %v8477_v45  ;;  %v8088_v3 = vadd.f32 %v6367_v50, %v6255_v20  ;;  %v8091_v41 = vadd.f32 %v6431_v12, %v8478_v62  ;;  %v8093_v48 = vadd.f32 %v6370_v31, %v6258_v21  ;;  %v8485_v31 = vld [vmem:[#allocation11_spill] sm:$0xff] }
 0x1c6   : > { %v6434_v23 = vadd.f32 %v7983_v10, %v7977_v15  ;;  %v6373_v16 = vadd.f32 %v6372_v18, %v6371_v38  ;;  %v6437_v25 = vadd.f32 %v7993_v52, %v7985_v36  ;;  %v6440_v59 = vadd.f32 %v6439_v35, %v6438_v61  ;;  %v6374_v46 = vpop.f32.mrb[64].mxu1  ;;  %v8482_v38 = vld [vmem:[#allocation44_spill] sm:$0xff]  ;;  %v8483_v52 = vld [vmem:[#allocation6_spill] sm:$0xff] }
 0x1c7   : > { %v6443_v26 = vadd.f32 %v6442_v17, %v6441_v42  ;;  %v6375_v21 = vpop.f32.mrb[65].mxu1 }
 0x1c8   : > { %v8100_v63 = vadd.f32 %v6434_v23, %v8479_v51  ;;  %v8102_v20 = vadd.f32 %v6373_v16, %v6261_v32  ;;  %v8105_v58 = vadd.f32 %v6437_v25, %v8480_v56  ;;  %v8108_v13 = vadd.f32 %v6440_v59, %v8481_v54  ;;  %v6377_v10 = vpop.f32.mrb[66].mxu1 }
 0x1c9   : > { %v6376_v15 = vadd.f32 %v6375_v21, %v6374_v46  ;;  %v8111_v18 = vadd.f32 %v6443_v26, %v8482_v38  ;;  %v6378_v36 = vpop.f32.mrb[67].mxu1  ;;  %v8487_v21 = vld [vmem:[#allocation14_spill] sm:$0xff] }
 0x1ca   : > { %v6379_v4 = vadd.f32 %v6378_v36, %v6377_v10  ;;  %v8488_v36 = vld [vmem:[#allocation16_spill] sm:$0xff] }
 0x1cb   : > { %v8114_v9 = vadd.f32 %v6376_v15, %v8483_v52 }
 0x1cc   : > { %v8117_v32 = vadd.f32 %v6379_v4, %v8484_v37 }
 0x1cd   : > { %v6444_v43 = vpop.f32.mrb[68].mxu0 }
 0x1ce   : > { %v6445_v39 = vpop.f32.mrb[69].mxu0 }
 0x1cf   : > { %v6446_v33 = vadd.f32 %v6445_v39, %v6444_v43  ;;  %v6447_v60 = vpop.f32.mrb[70].mxu0 }
 0x1d0   : > { %v6448_v7 = vpop.f32.mrb[71].mxu0 }
 0x1d1   : > { %v8120_v24 = vadd.f32 %v6446_v33, %v8002_v6  ;;  %v6449_v29 = vadd.f32 %v6448_v7, %v6447_v60 }
 0x1d2   : > { %v6380_v61 = vpop.f32.mrb[68].mxu1 }
 0x1d3   : > { %v6381_v55 = vpop.f32.mrb[69].mxu1  ;;  %v8123_v50 = vadd.f32 %v6449_v29, %v8007_v30 }
 0x1d4   : > { %v6382_v1 = vadd.f32 %v6381_v55, %v6380_v61  ;;  %v6383_v27 = vpop.f32.mrb[70].mxu1  ;;  %v8489_v55 = vld [vmem:[#allocation19_spill] sm:$0xff] }
 0x1d5   : > { %v6384_v12 = vpop.f32.mrb[71].mxu1 }
 0x1d6   : > { %v8126_v35 = vadd.f32 %v6382_v1, %v8485_v31  ;;  %v6385_v47 = vadd.f32 %v6384_v12, %v6383_v27  ;;  %v8490_v12 = vld [vmem:[#allocation21_spill] sm:$0xff] }
 0x1d8   : > { %v8129_v42 = vadd.f32 %v6385_v47, %v8486_v2 }
 0x1d9   : > { %v6450_v45 = vpop.f32.mrb[72].mxu0 }
 0x1da   : > { %v6451_v62 = vpop.f32.mrb[73].mxu0 }
 0x1db   : > { %v6452_v6 = vadd.f32 %v6451_v62, %v6450_v45  ;;  %v6453_v17 = vpop.f32.mrb[74].mxu0 }
 0x1dc   : > { %v6454_v23 = vpop.f32.mrb[75].mxu0 }
 0x1dd   : > { %v8132_v16 = vadd.f32 %v6452_v6, %v8014_v8  ;;  %v6455_v30 = vadd.f32 %v6454_v23, %v6453_v17 }
 0x1df   : > { %v6386_v25 = vpop.f32.mrb[72].mxu1  ;;  %v8135_v59 = vadd.f32 %v6455_v30, %v8021_v0 }
 0x1e0   : > { %v6387_v46 = vpop.f32.mrb[73].mxu1 }
 0x1e1   : > { %v6388_v26 = vadd.f32 %v6387_v46, %v6386_v25  ;;  %v6389_v51 = vpop.f32.mrb[74].mxu1 }
 0x1e2   : > { %v6390_v56 = vpop.f32.mrb[75].mxu1 }
 0x1e3   : > { %v8138_v54 = vadd.f32 %v6388_v26, %v8487_v21  ;;  %v6391_v15 = vadd.f32 %v6390_v56, %v6389_v51  ;;  %v6456_v10 = vpop.f32.mrb[76].mxu0 }
 0x1e4   : > { %v6457_v38 = vpop.f32.mrb[77].mxu0 }
 0x1e5   : > { %v8141_v52 = vadd.f32 %v6391_v15, %v8488_v36  ;;  %v6458_v8 = vadd.f32 %v6457_v38, %v6456_v10  ;;  %v6459_v4 = vpop.f32.mrb[78].mxu0 }
 0x1e6   : > { %v6460_v37 = vpop.f32.mrb[79].mxu0 }
 0x1e7   : > { %v8144_v43 = vadd.f32 %v6458_v8, %v8034_v11  ;;  %v6461_v0 = vadd.f32 %v6460_v37, %v6459_v4 }
 0x1e9   : > { %v8147_v39 = vadd.f32 %v6461_v0, %v8045_v22 }
 0x1ea   : > { %v6392_v33 = vpop.f32.mrb[76].mxu1 }
 0x1eb   : > { %v6393_v60 = vpop.f32.mrb[77].mxu1 }
 0x1ec   : > { %v6394_v7 = vadd.f32 %v6393_v60, %v6392_v33  ;;  %v6395_v29 = vpop.f32.mrb[78].mxu1 }
 0x1ed   : > { %v6396_v61 = vpop.f32.mrb[79].mxu1 }
 0x1ee   : > { %v8150_v1 = vadd.f32 %v6394_v7, %v8489_v55  ;;  %v6397_v27 = vadd.f32 %v6396_v61, %v6395_v29 }
 0x1f0   : > { %v8153_v31 = vadd.f32 %v6397_v27, %v8490_v12  ;;  %v6462_v47 = vpop.f32.mrb[80].mxu0 }
 0x1f1   : > { %v6463_v2 = vpop.f32.mrb[81].mxu0 }
 0x1f2   : > { %v6526_v11 = vpop.f32.mrb[80].mxu1  ;;  %v6464_v45 = vadd.f32 %v6463_v2, %v6462_v47  ;;  %v6465_v62 = vpop.f32.mrb[82].mxu0 }
 0x1f3   : > { %v6527_v6 = vpop.f32.mrb[81].mxu1  ;;  %v6466_v22 = vpop.f32.mrb[83].mxu0 }
 0x1f4   : > { %v8156_v17 = vadd.f32 %v6464_v45, %v8048_v19  ;;  %v6528_v23 = vadd.f32 %v6527_v6, %v6526_v11  ;;  %v6529_v30 = vpop.f32.mrb[82].mxu1  ;;  %v6467_v25 = vadd.f32 %v6466_v22, %v6465_v62 }
 0x1f5   : > { %v6530_v46 = vpop.f32.mrb[83].mxu1 }
 0x1f6   : > { %v8159_v26 = vadd.f32 %v6467_v25, %v8054_v5  ;;  %v6531_v51 = vadd.f32 %v6530_v46, %v6529_v30  ;;  %v8162_v56 = vadd.f32 %v6528_v23, %v8051_v44 }
 0x1f8   : > { %v6468_v21 = vpop.f32.mrb[84].mxu0  ;;  %v8165_v15 = vadd.f32 %v6531_v51, %v8057_v34 }
 0x1f9   : > { %v6469_v10 = vpop.f32.mrb[85].mxu0 }
 0x1fa   : > { %v6532_v38 = vpop.f32.mrb[84].mxu1  ;;  %v6470_v36 = vadd.f32 %v6469_v10, %v6468_v21  ;;  %v6471_v19 = vpop.f32.mrb[86].mxu0 }
 0x1fb   : > { %v6533_v8 = vpop.f32.mrb[85].mxu1  ;;  %v6472_v4 = vpop.f32.mrb[87].mxu0 }
 0x1fc   : > { %v8168_v37 = vadd.f32 %v6470_v36, %v8059_v57  ;;  %v6534_v0 = vadd.f32 %v6533_v8, %v6532_v38  ;;  %v6535_v5 = vpop.f32.mrb[86].mxu1  ;;  %v6473_v33 = vadd.f32 %v6472_v4, %v6471_v19 }
 0x1fd   : > { %v6536_v60 = vpop.f32.mrb[87].mxu1 }
 0x1fe   : > { %v8171_v44 = vadd.f32 %v6473_v33, %v8078_v40  ;;  %v6537_v7 = vadd.f32 %v6536_v60, %v6535_v5  ;;  %v8174_v34 = vadd.f32 %v6534_v0, %v8076_v28 }
 0x200   : > { %v6474_v29 = vpop.f32.mrb[88].mxu0  ;;  %v8177_v61 = vadd.f32 %v6537_v7, %v8081_v14 }
 0x201   : > { %v6475_v55 = vpop.f32.mrb[89].mxu0 }
 0x202   : > { %v6538_v27 = vpop.f32.mrb[88].mxu1  ;;  %v6476_v12 = vadd.f32 %v6475_v55, %v6474_v29  ;;  %v6477_v57 = vpop.f32.mrb[90].mxu0 }
 0x203   : > { %v6539_v47 = vpop.f32.mrb[89].mxu1  ;;  %v6478_v2 = vpop.f32.mrb[91].mxu0 }
 0x204   : > { %v8180_v11 = vadd.f32 %v6476_v12, %v8083_v53  ;;  %v6540_v45 = vadd.f32 %v6539_v47, %v6538_v27  ;;  %v6541_v40 = vpop.f32.mrb[90].mxu1  ;;  %v6479_v62 = vadd.f32 %v6478_v2, %v6477_v57 }
 0x205   : > { %v6542_v6 = vpop.f32.mrb[91].mxu1 }
 0x206   : > { %v8183_v28 = vadd.f32 %v6479_v62, %v8088_v3  ;;  %v6543_v22 = vadd.f32 %v6542_v6, %v6541_v40  ;;  %v8186_v14 = vadd.f32 %v6540_v45, %v8086_v49 }
 0x208   : > { %v6480_v23 = vpop.f32.mrb[92].mxu0  ;;  %v8189_v30 = vadd.f32 %v6543_v22, %v8091_v41 }
 0x209   : > { %v6481_v25 = vpop.f32.mrb[93].mxu0 }
 0x20a   : > { %v6544_v46 = vpop.f32.mrb[92].mxu1  ;;  %v6482_v51 = vadd.f32 %v6481_v25, %v6480_v23  ;;  %v6483_v53 = vpop.f32.mrb[94].mxu0 }
 0x20b   : > { %v6545_v21 = vpop.f32.mrb[93].mxu1  ;;  %v6484_v10 = vpop.f32.mrb[95].mxu0 }
 0x20c   : > { %v8192_v38 = vadd.f32 %v6482_v51, %v8093_v48  ;;  %v6546_v36 = vadd.f32 %v6545_v21, %v6544_v46  ;;  %v6547_v3 = vpop.f32.mrb[94].mxu1  ;;  %v6485_v19 = vadd.f32 %v6484_v10, %v6483_v53 }
 0x20d   : > { %v6548_v8 = vpop.f32.mrb[95].mxu1 }
 0x20e   : > { %v8195_v49 = vadd.f32 %v6485_v19, %v8102_v20  ;;  %v6549_v4 = vadd.f32 %v6548_v8, %v6547_v3  ;;  %v8198_v41 = vadd.f32 %v6546_v36, %v8100_v63 }
 0x210   : > { %v6486_v0 = vpop.f32.mrb[96].mxu0  ;;  %v8201_v5 = vadd.f32 %v6549_v4, %v8105_v58 }
 0x211   : > { %v6487_v33 = vpop.f32.mrb[97].mxu0 }
 0x212   : > { %v6550_v60 = vpop.f32.mrb[96].mxu1  ;;  %v6488_v7 = vadd.f32 %v6487_v33, %v6486_v0  ;;  %v6489_v48 = vpop.f32.mrb[98].mxu0 }
 0x213   : > { %v6551_v29 = vpop.f32.mrb[97].mxu1  ;;  %v6490_v55 = vpop.f32.mrb[99].mxu0 }
 0x214   : > { %v8204_v27 = vadd.f32 %v6488_v7, %v8114_v9  ;;  %v6552_v12 = vadd.f32 %v6551_v29, %v6550_v60  ;;  %v6553_v20 = vpop.f32.mrb[98].mxu1  ;;  %v6491_v57 = vadd.f32 %v6490_v55, %v6489_v48 }
 0x215   : > { %v6554_v47 = vpop.f32.mrb[99].mxu1 }
 0x216   : > { %v8207_v63 = vadd.f32 %v6491_v57, %v8117_v32  ;;  %v6555_v2 = vadd.f32 %v6554_v47, %v6553_v20  ;;  %v8210_v58 = vadd.f32 %v6552_v12, %v8108_v13 }
 0x218   : > { %v6492_v45 = vpop.f32.mrb[100].mxu0  ;;  %v8213_v40 = vadd.f32 %v6555_v2, %v8111_v18 }
 0x219   : > { %v6493_v62 = vpop.f32.mrb[101].mxu0 }
 0x21a   : > { %v6556_v6 = vpop.f32.mrb[100].mxu1  ;;  %v6494_v22 = vadd.f32 %v6493_v62, %v6492_v45  ;;  %v6495_v9 = vpop.f32.mrb[102].mxu0 }
 0x21b   : > { %v6557_v23 = vpop.f32.mrb[101].mxu1  ;;  %v6496_v25 = vpop.f32.mrb[103].mxu0 }
 0x21c   : > { %v8216_v46 = vadd.f32 %v6494_v22, %v8126_v35  ;;  %v6558_v51 = vadd.f32 %v6557_v23, %v6556_v6  ;;  %v6559_v32 = vpop.f32.mrb[102].mxu1  ;;  %v6497_v53 = vadd.f32 %v6496_v25, %v6495_v9 }
 0x21d   : > { %v6560_v21 = vpop.f32.mrb[103].mxu1 }
 0x21e   : > { %v8219_v13 = vadd.f32 %v6497_v53, %v8129_v42  ;;  %v6561_v10 = vadd.f32 %v6560_v21, %v6559_v32  ;;  %v8222_v18 = vadd.f32 %v6558_v51, %v8120_v24 }
 0x220   : > { %v6498_v36 = vpop.f32.mrb[104].mxu0  ;;  %v8225_v3 = vadd.f32 %v6561_v10, %v8123_v50 }
 0x221   : > { %v6499_v19 = vpop.f32.mrb[105].mxu0 }
 0x222   : > { %v6562_v8 = vpop.f32.mrb[104].mxu1  ;;  %v6500_v4 = vadd.f32 %v6499_v19, %v6498_v36  ;;  %v6501_v35 = vpop.f32.mrb[106].mxu0 }
 0x223   : > { %v6563_v0 = vpop.f32.mrb[105].mxu1  ;;  %v6502_v33 = vpop.f32.mrb[107].mxu0 }
 0x224   : > { %v8228_v60 = vadd.f32 %v6500_v4, %v8138_v54  ;;  %v6564_v7 = vadd.f32 %v6563_v0, %v6562_v8  ;;  %v6565_v42 = vpop.f32.mrb[106].mxu1  ;;  %v6503_v48 = vadd.f32 %v6502_v33, %v6501_v35 }
 0x225   : > { %v6566_v29 = vpop.f32.mrb[107].mxu1 }
 0x226   : > { %v8231_v24 = vadd.f32 %v6503_v48, %v8141_v52  ;;  %v6567_v55 = vadd.f32 %v6566_v29, %v6565_v42  ;;  %v8234_v50 = vadd.f32 %v6564_v7, %v8132_v16 }
 0x228   : > { %v8237_v12 = vadd.f32 %v6567_v55, %v8135_v59 }
 0x229   : > { %v6504_v20 = vpop.f32.mrb[108].mxu0 }
 0x22a   : > { %v6568_v57 = vpop.f32.mrb[108].mxu1  ;;  %v6505_v47 = vpop.f32.mrb[109].mxu0 }
 0x22b   : > { %v6506_v2 = vadd.f32 %v6505_v47, %v6504_v20  ;;  %v6569_v54 = vpop.f32.mrb[109].mxu1  ;;  %v6507_v45 = vpop.f32.mrb[110].mxu0 }
 0x22c   : > { %v6570_v62 = vadd.f32 %v6569_v54, %v6568_v57  ;;  %v6571_v6 = vpop.f32.mrb[110].mxu1  ;;  %v6508_v22 = vpop.f32.mrb[111].mxu0 }
 0x22d   : > { %v8240_v52 = vadd.f32 %v6506_v2, %v8150_v1  ;;  %v6509_v9 = vadd.f32 %v6508_v22, %v6507_v45  ;;  %v6572_v23 = vpop.f32.mrb[111].mxu1 }
 0x22e   : > { %v6573_v16 = vadd.f32 %v6572_v23, %v6571_v6  ;;  %v8243_v25 = vadd.f32 %v6570_v62, %v8144_v43 }
 0x22f   : > { %v8246_v59 = vadd.f32 %v6509_v9, %v8153_v31 }
 0x230   : > { %v8249_v51 = vadd.f32 %v6573_v16, %v8147_v39 }
 0x232   : > { %v6574_v32 = vpop.f32.mrb[112].mxu1 }
 0x233   : > { %v6575_v53 = vpop.f32.mrb[113].mxu1 }
 0x234   : > { %v6576_v21 = vadd.f32 %v6575_v53, %v6574_v32  ;;  %v6577_v10 = vpop.f32.mrb[114].mxu1 }
 0x235   : > { %v6578_v36 = vpop.f32.mrb[115].mxu1 }
 0x236   : > { %v6579_v19 = vadd.f32 %v6578_v36, %v6577_v10  ;;  %v8252_v1 = vadd.f32 %v6576_v21, %v8156_v17 }
 0x237   : > { %v6664_v43 = vpop.f32.mrb[112].mxu0 }
 0x238   : > { %v5359_v39 = vadd.f32 %v6664_v43, %v8174_v34  ;;  %v5350_v31 = vpop.f32.mrb[113].mxu0  ;;  %v8263_v8 = vadd.f32 %v6579_v19, %v8159_v26 }
 0x239   : > { %v5351_v17 = vadd.f32 %v5350_v31, %v8162_v56  ;;  %v6665_v4 = vpop.f32.mrb[114].mxu0 }
 0x23a   : > { %5479 = vst [vmem:[%s8259_s6 + $0x10] sm:$0xff] %v5359_v39  ;;  %v5362_v35 = vadd.f32 %v6665_v4, %v8177_v61  ;;  %v5353_v0 = vpop.f32.mrb[115].mxu0  ;;  %v5549_v20 = vmul.f32 %v5359_v39, %v5359_v39 }
 0x23b   : > { %5477 = vst [vmem:[%s8259_s6] sm:$0xff] %v5351_v17  ;;  %v5354_v33 = vadd.f32 %v5353_v0, %v8165_v15  ;;  %v5547_v42 = vmul.f32 %v5351_v17, %v5351_v17 }
 0x23c   : > { %5480 = vst [vmem:[%s8259_s6 + $0x18] sm:$0xff] %v5362_v35  ;;  %v5550_v15 = vmul.f32 %v5362_v35, %v5362_v35 }
 0x23d   : > { %v6580_v7 = vpop.f32.mrb[116].mxu1  ;;  %5478 = vst [vmem:[%s8259_s6 + $0x8] sm:$0xff] %v5354_v33  ;;  %v5525_v48 = vadd.f32 %v5354_v33, %v5351_v17  ;;  %v5548_v34 = vmul.f32 %v5354_v33, %v5354_v33 }
 0x23e   : > { %v6581_v29 = vpop.f32.mrb[117].mxu1 }
 0x23f   : > { %v6582_v55 = vadd.f32 %v6581_v29, %v6580_v7  ;;  %v6583_v26 = vpop.f32.mrb[118].mxu1  ;;  %v5526_v56 = vadd.f32 %v5525_v48, %v5359_v39  ;;  %v5563_v57 = vadd.f32 %v5548_v34, %v5547_v42 }
 0x240   : > { %v6584_v47 = vpop.f32.mrb[119].mxu1 }
 0x241   : > { %v6585_v61 = vadd.f32 %v6584_v47, %v6583_v26  ;;  %v8273_v2 = vadd.f32 %v6582_v55, %v8168_v37  ;;  %v5564_v54 = vadd.f32 %v5563_v57, %v5549_v20  ;;  %v5527_v45 = vadd.f32 %v5526_v56, %v5362_v35 }
 0x243   : > { %v8276_v62 = vadd.f32 %v6585_v61, %v8171_v44  ;;  %v6668_v6 = vpop.f32.mrb[116].mxu0  ;;  %v5565_v22 = vadd.f32 %v5564_v54, %v5550_v15 }
 0x244   : > { %v5375_v9 = vadd.f32 %v6668_v6, %v8198_v41  ;;  %v5366_v23 = vpop.f32.mrb[117].mxu0 }
 0x245   : > { %v5367_v16 = vadd.f32 %v5366_v23, %v8186_v14  ;;  %v6669_v32 = vpop.f32.mrb[118].mxu0 }
 0x246   : > { %5483 = vst [vmem:[%s8259_s6 + $0x30] sm:$0xff] %v5375_v9  ;;  %v5378_v37 = vadd.f32 %v6669_v32, %v8201_v5  ;;  %v5369_v53 = vpop.f32.mrb[119].mxu0  ;;  %v5553_v31 = vmul.f32 %v5375_v9, %v5375_v9 }
 0x247   : > { %5481 = vst [vmem:[%s8259_s6 + $0x20] sm:$0xff] %v5367_v16  ;;  %v5528_v21 = vadd.f32 %v5527_v45, %v5367_v16  ;;  %v5551_v10 = vmul.f32 %v5367_v16, %v5367_v16  ;;  %v5370_v36 = vadd.f32 %v5369_v53, %v8189_v30 }
 0x248   : > { %5484 = vst [vmem:[%s8259_s6 + $0x38] sm:$0xff] %v5378_v37  ;;  %v5554_v5 = vmul.f32 %v5378_v37, %v5378_v37 }
 0x249   : > { %v5566_v44 = vadd.f32 %v5565_v22, %v5551_v10  ;;  %5482 = vst [vmem:[%s8259_s6 + $0x28] sm:$0xff] %v5370_v36  ;;  %v5529_v19 = vadd.f32 %v5528_v21, %v5370_v36  ;;  %v5552_v43 = vmul.f32 %v5370_v36, %v5370_v36 }
 0x24a   : > { %v6586_v39 = vpop.f32.mrb[120].mxu1 }
 0x24b   : > { %v6587_v41 = vpop.f32.mrb[121].mxu1  ;;  %v5530_v17 = vadd.f32 %v5529_v19, %v5375_v9  ;;  %v5567_v14 = vadd.f32 %v5566_v44, %v5552_v43 }
 0x24c   : > { %v6588_v4 = vadd.f32 %v6587_v41, %v6586_v39  ;;  %v6589_v35 = vpop.f32.mrb[122].mxu1 }
 0x24d   : > { %v6590_v0 = vpop.f32.mrb[123].mxu1  ;;  %v5568_v33 = vadd.f32 %v5567_v14, %v5553_v31  ;;  %v5531_v7 = vadd.f32 %v5530_v17, %v5378_v37 }
 0x24e   : > { %v6591_v42 = vadd.f32 %v6590_v0, %v6589_v35  ;;  %v8287_v30 = vadd.f32 %v6588_v4, %v8180_v11 }
 0x24f   : > { %v5569_v48 = vadd.f32 %v5568_v33, %v5554_v5 }
 0x250   : > { %v8290_v34 = vadd.f32 %v6591_v42, %v8183_v28 }
 0x251   : > { %v6672_v29 = vpop.f32.mrb[120].mxu0 }
 0x252   : > { %v5391_v55 = vadd.f32 %v6672_v29, %v8222_v18  ;;  %v5382_v26 = vpop.f32.mrb[121].mxu0 }
 0x253   : > { %v5383_v20 = vadd.f32 %v5382_v26, %v8210_v58  ;;  %v6673_v56 = vpop.f32.mrb[122].mxu0 }
 0x254   : > { %5487 = vst [vmem:[%s8259_s6 + $0x50] sm:$0xff] %v5391_v55  ;;  %v5394_v57 = vadd.f32 %v6673_v56, %v8225_v3  ;;  %v5385_v47 = vpop.f32.mrb[123].mxu0  ;;  %v5557_v6 = vmul.f32 %v5391_v55, %v5391_v55 }
 0x255   : > { %5485 = vst [vmem:[%s8259_s6 + $0x40] sm:$0xff] %v5383_v20  ;;  %v5532_v61 = vadd.f32 %v5531_v7, %v5383_v20  ;;  %v5555_v11 = vmul.f32 %v5383_v20, %v5383_v20  ;;  %v5386_v15 = vadd.f32 %v5385_v47, %v8213_v40 }
 0x256   : > { %5488 = vst [vmem:[%s8259_s6 + $0x58] sm:$0xff] %v5394_v57  ;;  %v5558_v23 = vmul.f32 %v5394_v57, %v5394_v57 }
 0x257   : > { %v5570_v54 = vadd.f32 %v5569_v48, %v5555_v11  ;;  %5486 = vst [vmem:[%s8259_s6 + $0x48] sm:$0xff] %v5386_v15  ;;  %v5533_v28 = vadd.f32 %v5532_v61, %v5386_v15  ;;  %v5556_v45 = vmul.f32 %v5386_v15, %v5386_v15 }
 0x259   : > { %v5534_v18 = vadd.f32 %v5533_v28, %v5391_v55  ;;  %v5571_v22 = vadd.f32 %v5570_v54, %v5556_v45  ;;  %v6592_v9 = vpop.f32.mrb[124].mxu1 }
 0x25a   : > { %v6593_v58 = vpop.f32.mrb[125].mxu1 }
 0x25b   : > { %v5572_v16 = vadd.f32 %v5571_v22, %v5557_v6  ;;  %v6594_v3 = vadd.f32 %v6593_v58, %v6592_v9  ;;  %v5535_v32 = vadd.f32 %v5534_v18, %v5394_v57  ;;  %v6595_v37 = vpop.f32.mrb[126].mxu1 }
 0x25c   : > { %v6596_v53 = vpop.f32.mrb[127].mxu1 }
 0x25d   : > { %v5573_v21 = vadd.f32 %v5572_v16, %v5558_v23  ;;  %v6597_v40 = vadd.f32 %v6596_v53, %v6595_v37  ;;  %v8301_v10 = vadd.f32 %v6594_v3, %v8192_v38 }
 0x25e   : > { %v6676_v36 = vpop.f32.mrb[124].mxu0 }
 0x25f   : > { %v5407_v44 = vadd.f32 %v6676_v36, %v8243_v25  ;;  %v5398_v19 = vpop.f32.mrb[125].mxu0  ;;  %v8305_v43 = vadd.f32 %v6597_v40, %v8195_v49 }
 0x260   : > { %v5399_v39 = vadd.f32 %v5398_v19, %v8234_v50  ;;  %v6677_v41 = vpop.f32.mrb[126].mxu0 }
 0x261   : > { %5491 = vst [vmem:[%s8259_s6 + $0x70] sm:$0xff] %v5407_v44  ;;  %v5410_v31 = vadd.f32 %v6677_v41, %v8249_v51  ;;  %v5401_v17 = vpop.f32.mrb[127].mxu0  ;;  %v5561_v0 = vmul.f32 %v5407_v44, %v5407_v44 }
 0x262   : > { %5489 = vst [vmem:[%s8259_s6 + $0x60] sm:$0xff] %v5399_v39  ;;  %v5536_v14 = vadd.f32 %v5535_v32, %v5399_v39  ;;  %v5559_v4 = vmul.f32 %v5399_v39, %v5399_v39  ;;  %v5402_v38 = vadd.f32 %v5401_v17, %v8237_v12 }
 0x263   : > { %5492 = vst [vmem:[%s8259_s6 + $0x78] sm:$0xff] %v5410_v31  ;;  %v5562_v42 = vmul.f32 %v5410_v31, %v5410_v31 }
 0x264   : > { %v5574_v35 = vadd.f32 %v5573_v21, %v5559_v4  ;;  %5490 = vst [vmem:[%s8259_s6 + $0x68] sm:$0xff] %v5402_v38  ;;  %v5537_v25 = vadd.f32 %v5536_v14, %v5402_v38  ;;  %v5560_v5 = vmul.f32 %v5402_v38, %v5402_v38 }
 0x266   : > { %v5538_v49 = vadd.f32 %v5537_v25, %v5407_v44  ;;  %v5575_v33 = vadd.f32 %v5574_v35, %v5560_v5  ;;  %v6598_v7 = vpop.f32.mrb[128].mxu1 }
 0x267   : > { %v6599_v50 = vpop.f32.mrb[129].mxu1 }
 0x268   : > { %v8314_v48 = vadd.f32 %v5538_v49, %v5410_v31  ;;  %v5576_v51 = vadd.f32 %v5575_v33, %v5561_v0  ;;  %v6600_v29 = vadd.f32 %v6599_v50, %v6598_v7  ;;  %v6601_v55 = vpop.f32.mrb[130].mxu1 }
 0x269   : > { %v6602_v12 = vpop.f32.mrb[131].mxu1 }
 0x26a   : > { %v8316_v26 = vadd.f32 %v5576_v51, %v5562_v42  ;;  %v6603_v20 = vadd.f32 %v6602_v12, %v6601_v55  ;;  %v8319_v56 = vadd.f32 %v6600_v29, %v8204_v27 }
 0x26c   : > { %v6680_v57 = vpop.f32.mrb[128].mxu0  ;;  %v8322_v47 = vadd.f32 %v6603_v20, %v8207_v63 }
 0x26d   : > { %v5423_v61 = vadd.f32 %v6680_v57, %v8273_v2  ;;  %v5414_v11 = vpop.f32.mrb[129].mxu0 }
 0x26e   : > { %v5415_v15 = vadd.f32 %v5414_v11, %v8252_v1  ;;  %v6681_v54 = vpop.f32.mrb[130].mxu0 }
 0x26f   : > { %5495 = vst [vmem:[%s8259_s6 + $0x90] sm:$0xff] %v5423_v61  ;;  %v5426_v28 = vadd.f32 %v6681_v54, %v8276_v62  ;;  %v5417_v45 = vpop.f32.mrb[131].mxu0  ;;  %v5626_v63 = vmul.f32 %v5423_v61, %v5423_v61 }
 0x270   : > { %5493 = vst [vmem:[%s8259_s6 + $0x80] sm:$0xff] %v5415_v15  ;;  %v5418_v6 = vadd.f32 %v5417_v45, %v8263_v8  ;;  %v5624_v27 = vmul.f32 %v5415_v15, %v5415_v15 }
 0x271   : > { %5496 = vst [vmem:[%s8259_s6 + $0x98] sm:$0xff] %v5426_v28  ;;  %v5627_v1 = vmul.f32 %v5426_v28, %v5426_v28 }
 0x272   : > { %5494 = vst [vmem:[%s8259_s6 + $0x88] sm:$0xff] %v5418_v6  ;;  %v5602_v18 = vadd.f32 %v5418_v6, %v5415_v15  ;;  %v5625_v22 = vmul.f32 %v5418_v6, %v5418_v6 }
 0x274   : > { %v5603_v9 = vadd.f32 %v5602_v18, %v5423_v61  ;;  %v5640_v58 = vadd.f32 %v5625_v22, %v5624_v27  ;;  %v6604_v2 = vpop.f32.mrb[132].mxu1 }
 0x275   : > { %v6605_v23 = vpop.f32.mrb[133].mxu1 }
 0x276   : > { %v5641_v16 = vadd.f32 %v5640_v58, %v5626_v63  ;;  %v6606_v3 = vadd.f32 %v6605_v23, %v6604_v2  ;;  %v5604_v62 = vadd.f32 %v5603_v9, %v5426_v28  ;;  %v6607_v32 = vpop.f32.mrb[134].mxu1 }
 0x277   : > { %v6608_v37 = vpop.f32.mrb[135].mxu1 }
 0x278   : > { %v5642_v53 = vadd.f32 %v5641_v16, %v5627_v1  ;;  %v6609_v8 = vadd.f32 %v6608_v37, %v6607_v32  ;;  %v5294_v21 = vadd.f32 %v6606_v3, %v8216_v46 }
 0x279   : > { %v6684_v40 = vpop.f32.mrb[132].mxu0 }
 0x27a   : > { %v5439_v36 = vadd.f32 %v6684_v40, %v8301_v10  ;;  %v5430_v44 = vpop.f32.mrb[133].mxu0  ;;  %v5297_v19 = vadd.f32 %v6609_v8, %v8219_v13  ;;  %v5540_v8 = vrot.slane %v8314_v48, 4 }
 0x27b   : > { %v5431_v39 = vadd.f32 %v5430_v44, %v8287_v30  ;;  %v6685_v41 = vpop.f32.mrb[134].mxu0 }
 0x27c   : > { %5499 = vst [vmem:[%s8259_s6 + $0xb0] sm:$0xff] %v5439_v36  ;;  %v5442_v31 = vadd.f32 %v6685_v41, %v8305_v43  ;;  %v5433_v17 = vpop.f32.mrb[135].mxu0  ;;  %v5630_v25 = vmul.f32 %v5439_v36, %v5439_v36  ;;  %v5578_v41 = vrot.slane %v8316_v26, 4 }
 0x27d   : > { %5497 = vst [vmem:[%s8259_s6 + $0xa0] sm:$0xff] %v5431_v39  ;;  %v5605_v14 = vadd.f32 %v5604_v62, %v5431_v39  ;;  %v5628_v4 = vmul.f32 %v5431_v39, %v5431_v39  ;;  %v5434_v38 = vadd.f32 %v5433_v17, %v8290_v34 }
 0x27e   : > { %5500 = vst [vmem:[%s8259_s6 + $0xb8] sm:$0xff] %v5442_v31  ;;  %v5631_v49 = vmul.f32 %v5442_v31, %v5442_v31 }
 0x27f   : > { %v5643_v46 = vadd.f32 %v5642_v53, %v5628_v4  ;;  %5498 = vst [vmem:[%s8259_s6 + $0xa8] sm:$0xff] %v5434_v38  ;;  %v5606_v35 = vadd.f32 %v5605_v14, %v5434_v38  ;;  %v5629_v10 = vmul.f32 %v5434_v38, %v5434_v38 }
 0x281   : > { %v5607_v5 = vadd.f32 %v5606_v35, %v5439_v36  ;;  %v5644_v13 = vadd.f32 %v5643_v46, %v5629_v10  ;;  %v6610_v0 = vpop.f32.mrb[136].mxu1  ;;  %v5579_v35 = vadd.f32 %v5578_v41, %v8316_v26 }
 0x282   : > { %v6611_v30 = vpop.f32.mrb[137].mxu1 }
 0x283   : > { %v5645_v33 = vadd.f32 %v5644_v13, %v5630_v25  ;;  %v6612_v43 = vadd.f32 %v6611_v30, %v6610_v0  ;;  %v5608_v7 = vadd.f32 %v5607_v5, %v5442_v31  ;;  %v6613_v50 = vpop.f32.mrb[138].mxu1 }
 0x284   : > { %v6614_v42 = vpop.f32.mrb[139].mxu1 }
 0x285   : > { %v5646_v51 = vadd.f32 %v5645_v33, %v5631_v49  ;;  %v6615_v34 = vadd.f32 %v6614_v42, %v6613_v50  ;;  %v5302_v29 = vadd.f32 %v6612_v43, %v8228_v60  ;;  %v5580_v49 = vrot.slane %v5579_v35, 2 }
 0x287   : > { %v6688_v55 = vpop.f32.mrb[136].mxu0  ;;  %v5305_v12 = vadd.f32 %v6615_v34, %v8231_v24  ;;  %v5581_v42 = vadd.f32 %v5580_v49, %v5579_v35 }
 0x288   : > { %v5455_v20 = vadd.f32 %v6688_v55, %v5294_v21  ;;  %v5446_v57 = vpop.f32.mrb[137].mxu0 }
 0x289   : > { %v5447_v61 = vadd.f32 %v5446_v57, %v8319_v56  ;;  %v6689_v11 = vpop.f32.mrb[138].mxu0 }
 0x28a   : > { %5503 = vst [vmem:[%s8259_s6 + $0xd0] sm:$0xff] %v5455_v20  ;;  %v5458_v15 = vadd.f32 %v6689_v11, %v5297_v19  ;;  %v5449_v54 = vpop.f32.mrb[139].mxu0  ;;  %v5634_v22 = vmul.f32 %v5455_v20, %v5455_v20 }
 0x28b   : > { %5501 = vst [vmem:[%s8259_s6 + $0xc0] sm:$0xff] %v5447_v61  ;;  %v5609_v28 = vadd.f32 %v5608_v7, %v5447_v61  ;;  %v5632_v45 = vmul.f32 %v5447_v61, %v5447_v61  ;;  %v5450_v6 = vadd.f32 %v5449_v54, %v8322_v47 }
 0x28c   : > { %5504 = vst [vmem:[%s8259_s6 + $0xd8] sm:$0xff] %v5458_v15  ;;  %v5635_v56 = vmul.f32 %v5458_v15, %v5458_v15 }
 0x28d   : > { %v5647_v27 = vadd.f32 %v5646_v51, %v5632_v45  ;;  %5502 = vst [vmem:[%s8259_s6 + $0xc8] sm:$0xff] %v5450_v6  ;;  %v5610_v60 = vadd.f32 %v5609_v28, %v5450_v6  ;;  %v5633_v18 = vmul.f32 %v5450_v6, %v5450_v6 }
 0x28f   : > { %v5611_v24 = vadd.f32 %v5610_v60, %v5455_v20  ;;  %v5648_v63 = vadd.f32 %v5647_v27, %v5633_v18  ;;  %v6616_v9 = vpop.f32.mrb[140].mxu1 }
 0x290   : > { %v6617_v58 = vpop.f32.mrb[141].mxu1 }
 0x291   : > { %v5649_v2 = vadd.f32 %v5648_v63, %v5634_v22  ;;  %v6618_v23 = vadd.f32 %v6617_v58, %v6616_v9  ;;  %v5612_v1 = vadd.f32 %v5611_v24, %v5458_v15  ;;  %v6619_v16 = vpop.f32.mrb[142].mxu1 }
 0x292   : > { %v6620_v3 = vpop.f32.mrb[143].mxu1 }
 0x293   : > { %v5310_v47 = vadd.f32 %v6618_v23, %v8240_v52  ;;  %v5650_v62 = vadd.f32 %v5649_v2, %v5635_v56  ;;  %v6621_v32 = vadd.f32 %v6620_v3, %v6619_v16 }
 0x295   : > { %v5313_v37 = vadd.f32 %v6621_v32, %v8246_v59  ;;  %v5541_v59 = vadd.f32 %v5540_v8, %v8314_v48 }
 0x296   : > { %v6692_v53 = vpop.f32.mrb[140].mxu0 }
 0x297   : > { %v5471_v21 = vadd.f32 %v6692_v53, %v5310_v47  ;;  %v5462_v40 = vpop.f32.mrb[141].mxu0  ;;  %v5542_v13 = vrot.slane %v5541_v59, 2 }
 0x298   : > { %v5463_v36 = vadd.f32 %v5462_v40, %v5302_v29  ;;  %v6693_v44 = vpop.f32.mrb[142].mxu0 }
 0x299   : > { %5507 = vst [vmem:[%s8259_s6 + $0xf0] sm:$0xff] %v5471_v21  ;;  %v5474_v19 = vadd.f32 %v6693_v44, %v5313_v37  ;;  %v5465_v39 = vpop.f32.mrb[143].mxu0  ;;  %v5638_v46 = vmul.f32 %v5471_v21, %v5471_v21  ;;  %v5543_v7 = vadd.f32 %v5542_v13, %v5541_v59 }
 0x29a   : > { %5505 = vst [vmem:[%s8259_s6 + $0xe0] sm:$0xff] %v5463_v36  ;;  %v5613_v52 = vadd.f32 %v5612_v1, %v5463_v36  ;;  %v5636_v31 = vmul.f32 %v5463_v36, %v5463_v36  ;;  %v5466_v17 = vadd.f32 %v5465_v39, %v5305_v12  ;;  %v5582_v12 = vrot.slane %v5581_v42, 1 }
 0x29b   : > { %5508 = vst [vmem:[%s8259_s6 + $0xf8] sm:$0xff] %v5474_v19  ;;  %v5639_v10 = vmul.f32 %v5474_v19, %v5474_v19  ;;  %v5544_v29 = vrot.slane %v5543_v7, 1 }
 0x29c   : > { %v5651_v14 = vadd.f32 %v5650_v62, %v5636_v31  ;;  %5506 = vst [vmem:[%s8259_s6 + $0xe8] sm:$0xff] %v5466_v17  ;;  %v5614_v4 = vadd.f32 %v5613_v52, %v5466_v17  ;;  %v5637_v38 = vmul.f32 %v5466_v17, %v5466_v17  ;;  %v5583_v54 = vadd.f32 %v5582_v12, %v5581_v42 }
 0x29d   : > { %v5545_v61 = vadd.f32 %v5544_v29, %v5543_v7 }
 0x29e   : > { %v5615_v25 = vadd.f32 %v5614_v4, %v5471_v21  ;;  %v5652_v5 = vadd.f32 %v5651_v14, %v5637_v38 }
 0x2a0   : > { %v5616_v0 = vadd.f32 %v5615_v25, %v5474_v19  ;;  %v5653_v30 = vadd.f32 %v5652_v5, %v5638_v46 }
 0x2a2   : > { %v5617_v33 = vrot.slane %v5616_v0, 4  ;;  %v5654_v43 = vadd.f32 %v5653_v30, %v5639_v10 }
 0x2a4   : > { %v5618_v48 = vadd.f32 %v5617_v33, %v5616_v0  ;;  %v5655_v50 = vrot.slane %v5654_v43, 4 }
 0x2a6   : > { %v5619_v51 = vrot.slane %v5618_v48, 2  ;;  %v5656_v34 = vadd.f32 %v5655_v50, %v5654_v43 }
 0x2a8   : > { %v5620_v55 = vadd.f32 %v5619_v51, %v5618_v48  ;;  %v5657_v26 = vrot.slane %v5656_v34, 2 }
 0x2aa   : > { %v5621_v20 = vrot.slane %v5620_v55, 1  ;;  %v5658_v57 = vadd.f32 %v5657_v26, %v5656_v34 }
 0x2ac   : > { %v5622_v11 = vadd.f32 %v5621_v20, %v5620_v55  ;;  %v5659_v15 = vrot.slane %v5658_v57, 1 }
 0x2ae   : > { %v5623_v28 = vadd.f32 %v5622_v11, %v5545_v61  ;;  %v5660_v45 = vadd.f32 %v5659_v15, %v5658_v57 }
 0x2b0   : > { %v5661_v6 = vadd.f32 %v5660_v45, %v5583_v54  ;;  %5662 = vst [vmem:[%s211_s9] sm:$0x1] %v5623_v28 }
 0x2b2   : > { %5663 = vst [vmem:[%s214_s12] sm:$0x1] %v5661_v6 }
 0x2b3 PF: > { %s15_s15 = sadd.s32 1, %s6845_s15  }
 0x2b4   : > { %p12_p4 = scmp.ge.s32.totalorder %s15_s15, 4  }
 0x2b6   :  { %14 = sbr.rel (!%p12_p4) target bundleno = 1 (0x1), region = 85 }

// kernel: rezero_forward.4
= control target key start
LH: loop header
LB: loop body
LE: loop exit
PB: predicated region body
PF: predicated region fallthrough
CT: control target
= control target key end

     0   :  { %s7309_s21 = smov 0   ;;  %s9271_s0 = inlined_call_operand.vmem [shape: f32[2,16,16,128], index: 0, kind: input, shape index: {}]   ;;  %s9272_s1 = inlined_call_operand.vmem [shape: f32[1,128], index: 1, kind: input, shape index: {}]   ;;  %s9273_s2 = inlined_call_operand.vmem [shape: f32[1,128], index: 2, kind: input, shape index: {}]   ;;  %s9274_s3 = inlined_call_operand.vmem [shape: bf16[1152,128], index: 3, kind: input, shape index: {}]   ;;  %s9275_s4 = inlined_call_operand.vmem [shape: f32[2,16,16,128], index: 4, kind: output, shape index: {0}]   ;;  %s9276_s5 = inlined_call_operand.vmem [shape: f32[2,1,128], index: 5, kind: output, shape index: {1}]   ;;  %s9277_s6 = inlined_call_operand.vmem [shape: f32[2,1,128], index: 6, kind: output, shape index: {2}]  }
   0x1 LB: > { %s6093_s22 = sadd.s32 4294967295, %s7271_s21   ;;  %p6097_p0 = scmp.ge.s32.totalorder %s7271_s21, 1  ;;  %s7271_s21 = sphi %s7309_s21, %s17_s21  }
   0x2   : > { %p217_p1 = scmp.lt.s32.totalorder %s7271_s21, 3 }
   0x4   : > { %p218_p2 = pnand %p6097_p0, %p217_p1 }
   0x6   : > { %221 = sbr.rel (%p218_p2) target bundleno = 743 (0x2e7), region = 36 }
   0xd   : > { %v7077_v0 = vld [vmem:[%s9274_s3 + $0x40] sm:$0xff]   ;;  %v7273_v2 = vmov 0   ;;  %v7079_v3 = vld [vmem:[%s9274_s3 + $0x48] sm:$0xff]   ;;  %v7081_v5 = vld [vmem:[%s9274_s3 + $0x50] sm:$0xff]   ;;  %p253_p3 = scmp.lt.s32.totalorder %s6093_s22, 1 }
   0xe   : > { %v7078_v1 = vld [vmem:[%s9274_s3] sm:$0xff]   ;;  %272 = vst [vmem:[#allocation2 + $0x8] sm:$0xf] %v7273_v2  ;;  %273 = vst [vmem:[#allocation2 + $0xc] sm:$0xf] %v7273_v2  ;;  %6532 = vmatprep.subr.bf16.mxu0 %v7077_v0  ;;  %7052 = vmatprep.subr.bf16.mxu1 %v7077_v0  ;;  %v7080_v4 = vld [vmem:[%s9274_s3 + $0x8] sm:$0xff]  }
   0xf   : > { %271 = vst [vmem:[#allocation2 + $0x4] sm:$0xf] %v7273_v2  ;;  %281 = vst [vmem:[#allocation2 + $0x18] sm:$0xf] %v7273_v2  ;;  %6533 = vmatpush3.bf16.msra.mxu0 %v7078_v1  ;;  %7060 = vmatpush3.bf16.msra.mxu1 %v7078_v1  ;;  %v7082_v6 = vld [vmem:[%s9274_s3 + $0x10] sm:$0xff]   ;;  %v7083_v7 = vld [vmem:[%s9274_s3 + $0x58] sm:$0xff]  }
  0x10   : > { %282 = vst [vmem:[#allocation2 + $0x1c] sm:$0xf] %v7273_v2  ;;  %283 = vst [vmem:[#allocation2 + $0x20] sm:$0xf] %v7273_v2  ;;  %6534 = vmatprep.subr.bf16.mxu0 %v7079_v3  ;;  %7053 = vmatprep.subr.bf16.mxu1 %v7079_v3  ;;  %s9434_s22 = smov (!%p253_p3, %s6093_s22), 1  ;;  %v7084_v8 = vld [vmem:[%s9274_s3 + $0x18] sm:$0xff]  }
  0x11   : > { %288 = vst [vmem:[#allocation2 + $0x2c] sm:$0xf] %v7273_v2  ;;  %289 = vst [vmem:[#allocation2 + $0x30] sm:$0xf] %v7273_v2  ;;  %v7085_v9 = vld [vmem:[%s9274_s3 + $0x60] sm:$0xff]   ;;  %s6450_s17 = sshll.u32 %s9434_s22, 8  ;;  %s265_s23 = scalar_lea.vmem %s9276_s5, %s9434_s22 }
  0x12   : > { %290 = vst [vmem:[#allocation2 + $0x34] sm:$0xf] %v7273_v2  ;;  %295 = vst [vmem:[#allocation2 + $0x40] sm:$0xf] %v7273_v2  ;;  %v7086_v10 = vld [vmem:[%s9274_s3 + $0x20] sm:$0xff]   ;;  %v7087_v11 = vld [vmem:[%s9274_s3 + $0x68] sm:$0xff]   ;;  %s7362_s26 = scalar_lea.vmem %s9271_s0, %s6450_s17  ;;  %s9157_s19 = scalar_lea.vmem %s9275_s4, %s6450_s17 }
  0x13   : > { %296 = vst [vmem:[#allocation2 + $0x44] sm:$0xf] %v7273_v2  ;;  %297 = vst [vmem:[#allocation2 + $0x48] sm:$0xf] %v7273_v2  ;;  %6535 = vmatpush3.bf16.msra.mxu0 %v7080_v4  ;;  %7061 = vmatpush3.bf16.msra.mxu1 %v7080_v4  ;;  %vm275_vm0 = vsmask.f32 256 }
  0x14   : > { %302 = vst [vmem:[#allocation2 + $0x54] sm:$0xf] %v7273_v2  ;;  %303 = vst [vmem:[#allocation2 + $0x58] sm:$0xf] %v7273_v2  ;;  %6536 = vmatprep.subr.bf16.mxu0 %v7081_v5  ;;  %7054 = vmatprep.subr.bf16.mxu1 %v7081_v5  ;;  %vm910_vm1 = vsmask.f32 4368 }
  0x15   : > { %304 = vst [vmem:[#allocation2 + $0x5c] sm:$0xf] %v7273_v2  ;;  %309 = vst [vmem:[#allocation2 + $0x68] sm:$0xf] %v7273_v2  ;;  %v7093_v12 = vld [vmem:[#allocation2 + $0x8] sm:$0xff]   ;;  %v399_v22 = vld [vmem:[%s7362_s26] sm:$0xff] }
  0x16   : > { %310 = vst [vmem:[#allocation2 + $0x6c] sm:$0xf] %v7273_v2  ;;  %311 = vst [vmem:[#allocation2 + $0x70] sm:$0xf] %v7273_v2  ;;  %v862_v13 = vld [vmem:[#allocation2 + $0x4] sm:$0x8]  ;;  %5028 = vmatprep.mubr.bf16.mxu0 %v7093_v12 }
  0x17   : > { %316 = vst [vmem:[#allocation2 + $0x7c] sm:$0xf] %v7273_v2  ;;  %317 = vst [vmem:[#allocation2 + $0x80] sm:$0xf] %v7273_v2  ;;  %6537 = vmatpush3.bf16.msra.mxu0 %v7082_v6  ;;  %7062 = vmatpush3.bf16.msra.mxu1 %v7082_v6  ;;  %v863_v14 = vld [vmem:[#allocation2 + $0x8] sm:$0xf] }
  0x18   : > { %318 = vst [vmem:[#allocation2 + $0x84] sm:$0xf] %v7273_v2  ;;  %323 = vst [vmem:[#allocation2 + $0x90] sm:$0xf] %v7273_v2  ;;  %6538 = vmatprep.subr.bf16.mxu0 %v7083_v7  ;;  %7055 = vmatprep.subr.bf16.mxu1 %v7083_v7  ;;  %v864_v15 = vld [vmem:[#allocation2 + $0xc] sm:$0xf] }
  0x19   : > { %324 = vst [vmem:[#allocation2 + $0x94] sm:$0xf] %v7273_v2  ;;  %325 = vst [vmem:[#allocation2 + $0x98] sm:$0xf] %v7273_v2  ;;  %v913_v16 = vshrl.u32 %v862_v13, 16  ;;  %v918_v17 = vshrl.u32 %v863_v14, 16 }
  0x1a   : > { %330 = vst [vmem:[#allocation2 + $0xa4] sm:$0xf] %v7273_v2  ;;  %331 = vst [vmem:[#allocation2 + $0xa8] sm:$0xf] %v7273_v2  ;;  %v7088_v18 = vld [vmem:[%s9274_s3 + $0x28] sm:$0xff]   ;;  %v921_v19 = vshll.u32 %v863_v14, 16 }
  0x1b   : > { %332 = vst [vmem:[#allocation2 + $0xac] sm:$0xf] %v7273_v2  ;;  %337 = vst [vmem:[#allocation2 + $0xb8] sm:$0xf] %v7273_v2  ;;  %6539 = vmatpush3.bf16.msra.mxu0 %v7084_v8  ;;  %7063 = vmatpush3.bf16.msra.mxu1 %v7084_v8  ;;  %v927_v20 = vshrl.u32 %v864_v15, 16  ;;  %v930_v21 = vshll.u32 %v864_v15, 16 }
  0x1c   : > { %338 = vst [vmem:[#allocation2 + $0xbc] sm:$0xf] %v7273_v2  ;;  %339 = vst [vmem:[#allocation2 + $0xc0] sm:$0xf] %v7273_v2  ;;  %6540 = vmatprep.subr.bf16.mxu0 %v7085_v9  ;;  %7056 = vmatprep.subr.bf16.mxu1 %v7085_v9  ;;  %v400_v23 = vld [vmem:[%s7362_s26 + $0x8] sm:$0xff]  ;;  %v7089_v24 = vld [vmem:[%s9274_s3 + $0x70] sm:$0xff]  }
  0x1d   : > { %344 = vst [vmem:[#allocation2 + $0xcc] sm:$0xf] %v7273_v2  ;;  %345 = vst [vmem:[#allocation2 + $0xd0] sm:$0xf] %v7273_v2  ;;  %v920_v25 = vrot.slane %v918_v17, 7  ;;  %v929_v28 = vrot.slane %v927_v20, 7 }
  0x1e   : > { %346 = vst [vmem:[#allocation2 + $0xd4] sm:$0xf] %v7273_v2  ;;  %351 = vst [vmem:[#allocation2 + $0xe0] sm:$0xf] %v7273_v2  ;;  %v7375_v26 = vld [vmem:[%s9272_s1] ss:$0 sm:$0xff] }
  0x1f   : > { %352 = vst [vmem:[#allocation2 + $0xe4] sm:$0xf] %v7273_v2  ;;  %353 = vst [vmem:[#allocation2 + $0xe8] sm:$0xf] %v7273_v2  ;;  %6541 = vmatpush3.bf16.msra.mxu0 %v7086_v10  ;;  %7064 = vmatpush3.bf16.msra.mxu1 %v7086_v10  ;;  %v7380_v27 = vld [vmem:[%s9273_s2] ss:$0 sm:$0xff]  ;;  %v438_v29 = vmul.f32 %v7375_v26, %v399_v22  ;;  %v439_v30 = vmul.f32 %v7375_v26, %v400_v23 }
  0x20   : > { %358 = vst [vmem:[#allocation2 + $0xf4] sm:$0xf] %v7273_v2  ;;  %359 = vst [vmem:[#allocation2 + $0xf8] sm:$0xf] %v7273_v2  ;;  %6542 = vmatprep.subr.bf16.mxu0 %v7087_v11  ;;  %7057 = vmatprep.subr.bf16.mxu1 %v7087_v11  ;;  %v421_v31 = vld [vmem:[%s7362_s26 + $0xb0] sm:$0xff]  ;;  %v422_v32 = vld [vmem:[%s7362_s26 + $0xb8] sm:$0xff]  ;;  %v923_v34 = vor.u32 %v921_v19, %v920_v25  ;;  %v932_v40 = vor.u32 %v930_v21, %v929_v28 }
  0x21   : > { %360 = vst [vmem:[#allocation2 + $0xfc] sm:$0xf] %v7273_v2  ;;  %365 = vst [vmem:[#allocation2 + $0x108] sm:$0xf] %v7273_v2  ;;  %v6168_v33 = vrot.slane %v913_v16, 11  ;;  %v460_v35 = vmul.f32 %v7375_v26, %v421_v31  ;;  %v461_v36 = vmul.f32 %v7375_v26, %v422_v32  ;;  %v7090_v37 = vld [vmem:[%s9274_s3 + $0x30] sm:$0xff]   ;;  %v7398_v41 = vadd.f32 %v7380_v27, %v438_v29 }
  0x22   : > { %366 = vst [vmem:[#allocation2 + $0x10c] sm:$0xf] %v7273_v2  ;;  %367 = vst [vmem:[#allocation2 + $0x110] sm:$0xf] %v7273_v2  ;;  %v925_v39 = vrot.slane %v920_v25, 4  ;;  %v7401_v42 = vadd.f32 %v7380_v27, %v439_v30  ;;  %v7091_v43 = vld [vmem:[%s9274_s3 + $0x78] sm:$0xff]  }
  0x23   : > { %372 = vst [vmem:[#allocation2 + $0x11c] sm:$0xf] %v7273_v2  ;;  %373 = vst [vmem:[#allocation2 + $0x120] sm:$0xf] %v7273_v2  ;;  %6543 = vmatpush3.bf16.msra.mxu0 %v7088_v18  ;;  %7065 = vmatpush3.bf16.msra.mxu1 %v7088_v18  ;;  %v7407_v44 = vadd.f32 %v7380_v27, %v460_v35  ;;  %v7410_v45 = vadd.f32 %v7380_v27, %v461_v36  ;;  %v541_v46 = vmin.f32 %v7398_v41, 0.0  ;;  %v7092_v47 = vld [vmem:[%s9274_s3 + $0x38] sm:$0xff]  }
  0x24   : > { %374 = vst [vmem:[#allocation2 + $0x124] sm:$0xf] %v7273_v2  ;;  %379 = vst [vmem:[#allocation2 + $0x130] sm:$0xf] %v7273_v2  ;;  %6544 = vmatprep.subr.bf16.mxu0 %v7089_v24  ;;  %7058 = vmatprep.subr.bf16.mxu1 %v7089_v24  ;;  %v542_v49 = vmin.f32 %v7401_v42, 0.0  ;;  %v7096_v50 = vld [vmem:[%s9274_s3 + $0xc0] sm:$0xff]  }
  0x25   : > { %380 = vst [vmem:[#allocation2 + $0x134] sm:$0xf] %v7273_v2  ;;  %381 = vst [vmem:[#allocation2 + $0x138] sm:$0xf] %v7273_v2  ;;  %v573_v52 = vmul.f32 1.442695, %v541_v46 }
  0x26   : > { %386 = vst [vmem:[#allocation2 + $0x144] sm:$0xf] %v7273_v2  ;;  %387 = vst [vmem:[#allocation2 + $0x148] sm:$0xf] %v7273_v2  ;;  %v563_v53 = vmin.f32 %v7407_v44, 0.0  ;;  %v564_v54 = vmin.f32 %v7410_v45, 0.0 }
  0x27   : > { %388 = vst [vmem:[#allocation2 + $0x14c] sm:$0xf] %v7273_v2  ;;  %393 = vst [vmem:[#allocation2 + $0x158] sm:$0xf] %v7273_v2  ;;  %6545 = vmatpush3.bf16.msra.mxu0 %v7090_v37  ;;  %7066 = vmatpush3.bf16.msra.mxu1 %v7090_v37  ;;  %v865_v55 = vld [vmem:[#allocation2 + $0x18] sm:$0x8]  ;;  %7197 = vpow2.f32 %v573_v52 }
  0x28   : > { %394 = vst [vmem:[#allocation2 + $0x15c] sm:$0xf] %v7273_v2  ;;  %395 = vst [vmem:[#allocation2 + $0x160] sm:$0xf] %v7273_v2  ;;  %6546 = vmatprep.subr.bf16.mxu0 %v7091_v43  ;;  %7059 = vmatprep.subr.bf16.mxu1 %v7091_v43  ;;  %v575_v56 = vmul.f32 1.442695, %v542_v49 }
  0x29   : > { %vm7393_vm2 = vmor %vm275_vm0, %vm910_vm1  ;;  %v7097_v57 = vld [vmem:[%s9274_s3 + $0x140] sm:$0xff]   ;;  %v401_v58 = vld [vmem:[%s7362_s26 + $0x10] sm:$0xff]  ;;  %v617_v59 = vmul.f32 1.442695, %v563_v53  ;;  %v619_v60 = vmul.f32 1.442695, %v564_v54 }
  0x2a   : > { %v924_v48 = vsel %vm7393_vm2, %v6168_v33, %v923_v34  ;;  %v933_v51 = vsel %vm7393_vm2, %v925_v39, %v932_v40  ;;  %v7099_v61 = vld [vmem:[%s9274_s3 + $0x100] sm:$0xff]   ;;  %v440_v62 = vmul.f32 %v7375_v26, %v401_v58  ;;  %7199 = vpow2.f32 %v575_v56  ;;  %v402_v0 = vld [vmem:[%s7362_s26 + $0x18] sm:$0xff]  ;;  %v424_v5 = vld [vmem:[%s7362_s26 + $0xc8] sm:$0xff] }
  0x2b   : > { %v6184_v63 = vcombine.low %v924_v48, %v933_v51  ;;  %6547 = vmatpush3.bf16.msra.mxu0 %v7092_v47  ;;  %7067 = vmatpush3.bf16.msra.mxu1 %v7092_v47  ;;  %7201 = vpow2.f32 %v617_v59  ;;  %v935_v1 = vshrl.u32 %v865_v55, 16  ;;  %v441_v2 = vmul.f32 %v7375_v26, %v402_v0  ;;  %v423_v4 = vld [vmem:[%s7362_s26 + $0xc0] sm:$0xff]  ;;  %v898_v6 = vld [vmem:[#allocation2 + $0xf4] sm:$0x8]  ;;  %v868_v19 = vld [vmem:[#allocation2 + $0x2c] sm:$0x8] }
  0x2c   : > { %v7437_v3 = vadd.f32 %v7380_v27, %v440_v62  ;;  %7203 = vpow2.f32 %v619_v60  ;;  %6644 = vmatprep.subr.bf16.mxu1 %v7096_v50  ;;  %6756 = vmatprep.subr.bf16.mxu0 %v7097_v57  ;;  %v462_v7 = vmul.f32 %v7375_v26, %v423_v4  ;;  %v463_v8 = vmul.f32 %v7375_v26, %v424_v5  ;;  %v901_v21 = vld [vmem:[#allocation2 + $0x108] sm:$0x8]  ;;  %v403_v35 = vld [vmem:[%s7362_s26 + $0x20] sm:$0xff]  ;;  %v425_v47 = vld [vmem:[%s7362_s26 + $0xd0] sm:$0xff] }
  0x2d   : > { %vm509_vm3 = vcmp.gt.f32.partialorder %v7398_v41, 0.0  ;;  %vm510_vm4 = vcmp.gt.f32.partialorder %v7401_v42, 0.0  ;;  %v7446_v9 = vadd.f32 %v7380_v27, %v441_v2  ;;  %vm531_vm5 = vcmp.gt.f32.partialorder %v7407_v44, 0.0  ;;  %v7107_v28 = vld [vmem:[%s9274_s3 + $0x148] sm:$0xff]   ;;  %v426_v48 = vld [vmem:[%s7362_s26 + $0xd8] sm:$0xff] }
  0x2e   : > { %v543_v10 = vmin.f32 %v7437_v3, 0.0  ;;  %5029 = vmatmul.mubr.bf16.vlgmr.msra.gmra.mrb[0].mxu0 %v6184_v63  ;;  %vm532_vm6 = vcmp.gt.f32.partialorder %v7410_v45, 0.0  ;;  %v7452_v11 = vadd.f32 %v7380_v27, %v462_v7  ;;  %v7455_v12 = vadd.f32 %v7380_v27, %v463_v8  ;;  %v7109_v34 = vld [vmem:[%s9274_s3 + $0x108] sm:$0xff]   ;;  %v871_v56 = vld [vmem:[#allocation2 + $0x40] sm:$0x8] }
  0x2f   : > { %v7457_v13 = vrot.slane %v935_v1, 11  ;;  %v1177_v14 = vshrl.u32 %v898_v6, 16  ;;  %6757 = vmatpush3.bf16.msra.mxu0 %v7099_v61  ;;  %v544_v15 = vmin.f32 %v7446_v9, 0.0  ;;  %vm511_vm7 = vcmp.gt.f32.partialorder %v7437_v3, 0.0  ;;  %v404_v43 = vld [vmem:[%s7362_s26 + $0x28] sm:$0xff] }
  0x30   : > { %v577_v16 = vmul.f32 1.442695, %v543_v10  ;;  %v565_v17 = vmin.f32 %v7452_v11, 0.0  ;;  %v566_v18 = vmin.f32 %v7455_v12, 0.0  ;;  %v957_v33 = vshrl.u32 %v868_v19, 16  ;;  %6758 = vmatprep.subr.bf16.mxu0 %v7107_v28 }
  0x31   : > { %v579_v20 = vmul.f32 1.442695, %v544_v15  ;;  %v7198_v24 = vpop.eup %7197  ;;  %v7462_v25 = vrot.slane %v1177_v14, 11  ;;  %v1199_v40 = vshrl.u32 %v901_v21, 16  ;;  %v442_v46 = vmul.f32 %v7375_v26, %v403_v35  ;;  %v405_v14 = vld [vmem:[%s7362_s26 + $0x30] sm:$0xff] }
  0x32   : > { %7205 = vpow2.f32 %v577_v16  ;;  %v621_v22 = vmul.f32 1.442695, %v565_v17  ;;  %v623_v23 = vmul.f32 1.442695, %v566_v18  ;;  %v6104_v30 = vadd.f32 -1.0, %v7198_v24 }
  0x33   : > { %7207 = vpow2.f32 %v579_v20  ;;  %6759 = vmatpush3.bf16.msra.mxu0 %v7109_v34  ;;  %v443_v52 = vmul.f32 %v7375_v26, %v404_v43  ;;  %v7487_v54 = vadd.f32 %v7380_v27, %v442_v46  ;;  %v464_v55 = vmul.f32 %v7375_v26, %v425_v47 }
  0x34   : > { %v7200_v29 = vpop.eup %7199  ;;  %7209 = vpow2.f32 %v621_v22  ;;  %v669_v37 = vsel %vm509_vm3, %v7398_v41, %v6104_v30  ;;  %v465_v58 = vmul.f32 %v7375_v26, %v426_v48  ;;  %v979_v59 = vshrl.u32 %v871_v56, 16  ;;  %v406_v22 = vld [vmem:[%s7362_s26 + $0x38] sm:$0xff]  ;;  %v427_v30 = vld [vmem:[%s7362_s26 + $0xe0] sm:$0xff] }
  0x35   : > { %v7202_v31 = vpop.eup %7201  ;;  %v6105_v32 = vadd.f32 -1.0, %v7200_v29  ;;  %7211 = vpow2.f32 %v623_v23  ;;  %v6452_v50 = vpack.c.bf16 %v669_v37, %v669_v37  ;;  %v7494_v57 = vadd.f32 %v7380_v27, %v443_v52 }
  0x36   : > { %v7204_v36 = vpop.eup %7203  ;;  %v6126_v39 = vadd.f32 -1.0, %v7202_v31  ;;  %vm512_vm8 = vcmp.gt.f32.partialorder %v7446_v9, 0.0  ;;  %v7500_v61 = vadd.f32 %v7380_v27, %v464_v55  ;;  %vm533_vm9 = vcmp.gt.f32.partialorder %v7452_v11, 0.0 }
  0x37   : > { %v670_v49 = vsel %vm510_vm4, %v7401_v42, %v6105_v32  ;;  %v6127_v51 = vadd.f32 -1.0, %v7204_v36  ;;  %830 = vst [vmem:[#allocation2 + $0x1c] sm:$0xf] %v6452_v50  ;;  %vm534_vm10 = vcmp.gt.f32.partialorder %v7455_v12, 0.0  ;;  %v7506_v63 = vadd.f32 %v7380_v27, %v465_v58  ;;  %v7121_v58 = vld [vmem:[%s9274_s3 + $0x110] sm:$0xff]  }
  0x38   : > { %v6453_v53 = vpack.c.bf16 %v670_v49, %v670_v49  ;;  %v691_v41 = vsel %vm531_vm5, %v7407_v44, %v6126_v39  ;;  %v545_v44 = vmin.f32 %v7487_v54, 0.0  ;;  %v7508_v1 = vrot.slane %v957_v33, 11  ;;  %v7534_v39 = vld [vmem:[#allocation2 + $0x11c] sm:$0x8] }
  0x39   : > { %v692_v42 = vsel %vm532_vm6, %v7410_v45, %v6127_v51  ;;  %v546_v45 = vmin.f32 %v7494_v57, 0.0  ;;  %v567_v4 = vmin.f32 %v7500_v61, 0.0  ;;  %v7511_v6 = vrot.slane %v1199_v40, 11  ;;  %v7119_v40 = vld [vmem:[%s9274_s3 + $0x150] sm:$0xff]  }
  0x3a   : > { %831 = vst [vmem:[#allocation2 + $0x20] sm:$0xf] %v6453_v53  ;;  %v6512_v60 = vpack.c.bf16 %v692_v42, %v691_v41  ;;  %v581_v2 = vmul.f32 1.442695, %v545_v44  ;;  %v568_v8 = vmin.f32 %v7506_v63, 0.0  ;;  %v7514_v10 = vrot.slane %v979_v59, 11  ;;  %6760 = vmatprep.subr.bf16.mxu0 %v7119_v40 }
  0x3b   : > { %v583_v7 = vmul.f32 1.442695, %v546_v45  ;;  %v625_v18 = vmul.f32 1.442695, %v567_v4  ;;  %vm513_vm11 = vcmp.gt.f32.partialorder %v7487_v54, 0.0  ;;  %v444_v29 = vmul.f32 %v7375_v26, %v405_v14  ;;  %6761 = vmatpush3.bf16.msra.mxu0 %v7121_v58 }
  0x3c   : > { %v7206_v62 = vpop.eup %7205  ;;  %6529 = vst [vmem:[#allocation2 + $0xf8] sm:$0xff] %v6512_v60   ;;  %7213 = vpow2.f32 %v581_v2  ;;  %v627_v21 = vmul.f32 1.442695, %v568_v8  ;;  %vm514_vm12 = vcmp.gt.f32.partialorder %v7494_v57, 0.0  ;;  %v445_v48 = vmul.f32 %v7375_v26, %v406_v22 }
  0x3d   : > { %v6106_v0 = vadd.f32 -1.0, %v7206_v62  ;;  %v7208_v5 = vpop.eup %7207  ;;  %7215 = vpow2.f32 %v583_v7  ;;  %v7541_v52 = vadd.f32 %v7380_v27, %v444_v29  ;;  %v466_v53 = vmul.f32 %v7375_v26, %v427_v30  ;;  %v7098_v30 = vld [vmem:[%s9274_s3 + $0x80] sm:$0xff]  }
  0x3e   : > { %v7210_v15 = vpop.eup %7209  ;;  %v6107_v16 = vadd.f32 -1.0, %v7208_v5  ;;  %v866_v23 = vld [vmem:[#allocation2 + $0x1c] sm:$0xf]  ;;  %7217 = vpow2.f32 %v625_v18  ;;  %vm535_vm13 = vcmp.gt.f32.partialorder %v7500_v61, 0.0  ;;  %vm536_vm14 = vcmp.gt.f32.partialorder %v7506_v63, 0.0 }
  0x3f   : > { %v671_v17 = vsel %vm511_vm7, %v7437_v3, %v6106_v0  ;;  %v7212_v19 = vpop.eup %7211  ;;  %v6128_v20 = vadd.f32 -1.0, %v7210_v15  ;;  %v940_v32 = vshrl.u32 %v866_v23, 16  ;;  %7219 = vpow2.f32 %v627_v21 }
  0x40   : > { %v672_v24 = vsel %vm512_vm8, %v7446_v9, %v6107_v16  ;;  %v6129_v28 = vadd.f32 -1.0, %v7212_v19  ;;  %v943_v35 = vshll.u32 %v866_v23, 16  ;;  %v7551_v62 = vadd.f32 %v7380_v27, %v445_v48  ;;  %v7101_v48 = vld [vmem:[%s9274_s3 + $0x88] sm:$0xff]  }
  0x41   : > { %v7094_v3 = vld [vmem:[#allocation2 + $0x1c] sm:$0xff]   ;;  %v6487_v33 = vpack.c.bf16 %v672_v24, %v671_v17  ;;  %v693_v34 = vsel %vm533_vm9, %v7452_v11, %v6128_v20  ;;  %v942_v11 = vrot.slane %v940_v32, 7  ;;  %v1221_v2 = vshrl.u32 %v7534_v39, 16  ;;  %v907_v39 = vld [vmem:[#allocation2 + $0x130] sm:$0x8] }
  0x42   : > { %v867_v31 = vld [vmem:[#allocation2 + $0x20] sm:$0xf]  ;;  %v694_v37 = vsel %vm534_vm10, %v7455_v12, %v6129_v28  ;;  %5036 = vmatprep.mubr.bf16.mxu0 %v7094_v3  ;;  %v6476_v46 = vpack.c.bf16 %v693_v34, %v693_v34  ;;  %v428_v12 = vld [vmem:[%s7362_s26 + $0xe8] sm:$0xff]  ;;  %v547_v14 = vmin.f32 %v7541_v52, 0.0  ;;  %v548_v15 = vmin.f32 %v7551_v62, 0.0 }
  0x43   : > { %v949_v9 = vshrl.u32 %v867_v31, 16  ;;  %v952_v36 = vshll.u32 %v867_v31, 16  ;;  %v7095_v43 = vld [vmem:[#allocation2 + $0xf8] sm:$0xff]   ;;  %6524 = vst [vmem:[#allocation2 + $0x30] sm:$0xff] %v6487_v33   ;;  %v6477_v47 = vpack.c.bf16 %v694_v37, %v694_v37  ;;  %v945_v41 = vor.u32 %v943_v35, %v942_v11 }
  0x44   : > { %v899_v50 = vld [vmem:[#allocation2 + $0xf8] sm:$0xf]  ;;  %v900_v51 = vld [vmem:[#allocation2 + $0xfc] sm:$0xf]  ;;  %5124 = vmatprep.mubr.bf16.mxu1 %v7095_v43  ;;  %v947_v55 = vrot.slane %v942_v11, 4  ;;  %v467_v4 = vmul.f32 %v7375_v26, %v428_v12  ;;  %v7563_v24 = vadd.f32 %v7380_v27, %v466_v53  ;;  %vm515_vm15 = vcmp.gt.f32.partialorder %v7541_v52, 0.0 }
  0x45   : > { %v951_v49 = vrot.slane %v949_v9, 7  ;;  %v1182_v56 = vshrl.u32 %v899_v50, 16  ;;  %v1185_v42 = vshll.u32 %v899_v50, 16  ;;  %854 = vst [vmem:[#allocation2 + $0x10c] sm:$0xf] %v6476_v46  ;;  %v1191_v60 = vshrl.u32 %v900_v51, 16 }
  0x46   : > { %855 = vst [vmem:[#allocation2 + $0x110] sm:$0xf] %v6477_v47  ;;  %v1194_v44 = vshll.u32 %v900_v51, 16  ;;  %v946_v45 = vsel %vm7393_vm2, %v7457_v13, %v945_v41  ;;  %v7214_v5 = vpop.eup %7213  ;;  %v7575_v34 = vadd.f32 %v7380_v27, %v467_v4  ;;  %vm274_vm1 = vcmask 1040384  }
  0x47   : > { %v954_v59 = vor.u32 %v952_v36, %v951_v49  ;;  %v1184_v0 = vrot.slane %v1182_v56, 7  ;;  %v1193_v8 = vrot.slane %v1191_v60, 7  ;;  %v7216_v16 = vpop.eup %7215  ;;  %v6108_v13 = vadd.f32 -1.0, %v7214_v5  ;;  %vm7684_vm6 = vmand %vm274_vm1, %vm275_vm0 }
  0x48   : > { %v7218_v20 = vpop.eup %7217  ;;  %v6109_v23 = vadd.f32 -1.0, %v7216_v16  ;;  %v585_v5 = vmul.f32 1.442695, %v547_v14  ;;  %v874_v14 = vld [vmem:[#allocation2 + $0x54] sm:$0x8]  ;;  %vm516_vm3 = vcmp.gt.f32.partialorder %v7551_v62, 0.0 }
  0x49   : > { %v955_v7 = vsel %vm7393_vm2, %v947_v55, %v954_v59  ;;  %v1187_v18 = vor.u32 %v1185_v42, %v1184_v0  ;;  %v1189_v19 = vrot.slane %v1184_v0, 4  ;;  %v1196_v21 = vor.u32 %v1194_v44, %v1193_v8  ;;  %v7220_v28 = vpop.eup %7219  ;;  %v7104_v44 = vld [vmem:[%s9274_s3 + $0xd0] sm:$0xff]  }
  0x4a   : > { %v6185_v17 = vcombine.low %v946_v45, %v955_v7  ;;  %v7102_v22 = vld [vmem:[#allocation2 + $0x30] sm:$0xff]   ;;  %v673_v32 = vsel %vm513_vm11, %v7487_v54, %v6108_v13  ;;  %v6130_v33 = vadd.f32 -1.0, %v7218_v20  ;;  %v674_v36 = vsel %vm514_vm12, %v7494_v57, %v6109_v23  ;;  %v7100_v54 = vld [vmem:[%s9274_s3 + $0xc8] sm:$0xff]   ;;  %v407_v13 = vld [vmem:[%s7362_s26 + $0x40] sm:$0xff] }
  0x4b   : > { %v1188_v29 = vsel %vm7393_vm2, %v7462_v25, %v1187_v18  ;;  %v869_v3 = vld [vmem:[#allocation2 + $0x30] sm:$0xf]  ;;  %v870_v31 = vld [vmem:[#allocation2 + $0x34] sm:$0xf]  ;;  %v1197_v35 = vsel %vm7393_vm2, %v1189_v19, %v1196_v21  ;;  %v6456_v37 = vpack.c.bf16 %v673_v32, %v673_v32  ;;  %v6457_v53 = vpack.c.bf16 %v674_v36, %v674_v36  ;;  %v7106_v21 = vld [vmem:[%s9274_s3 + $0xd8] sm:$0xff]  }
  0x4c   : > { %5037 = vmatmul.mubr.bf16.gmra.mrb[4].mxu0 %v6185_v17  ;;  %v962_v25 = vshrl.u32 %v869_v3, 16  ;;  %v6196_v40 = vcombine.low %v1188_v29, %v1197_v35  ;;  %v965_v43 = vshll.u32 %v869_v3, 16  ;;  %v971_v11 = vshrl.u32 %v870_v31, 16  ;;  %v902_v47 = vld [vmem:[#allocation2 + $0x10c] sm:$0xf]  ;;  %v7105_v19 = vld [vmem:[%s9274_s3 + $0x90] sm:$0xff]  }
  0x4d   : > { %5044 = vmatprep.mubr.bf16.mxu0 %v7102_v22  ;;  %v7103_v9 = vld [vmem:[#allocation2 + $0x10c] sm:$0xff]   ;;  %v974_v46 = vshll.u32 %v870_v31, 16  ;;  %v1204_v51 = vshrl.u32 %v902_v47, 16  ;;  %v1207_v12 = vshll.u32 %v902_v47, 16  ;;  %834 = vst [vmem:[#allocation2 + $0x44] sm:$0xf] %v6456_v37  ;;  %v695_v60 = vsel %vm535_vm13, %v7500_v61, %v6130_v33 }
  0x4e   : > { %v964_v49 = vrot.slane %v962_v25, 7  ;;  %v903_v50 = vld [vmem:[#allocation2 + $0x110] sm:$0xf]  ;;  %5125 = vmatmul.mubr.bf16.vlgmr.msra.gmra.mrb[0].mxu1 %v6196_v40  ;;  %v973_v57 = vrot.slane %v971_v11, 7  ;;  %v6131_v56 = vadd.f32 -1.0, %v7220_v28  ;;  %7221 = vpow2.f32 %v585_v5  ;;  %v408_v23 = vld [vmem:[%s7362_s26 + $0x48] sm:$0xff] }
  0x4f   : > { %v1213_v41 = vshrl.u32 %v903_v50, 16  ;;  %v1216_v55 = vshll.u32 %v903_v50, 16  ;;  %6645 = vmatpush3.bf16.msra.mxu1 %v7098_v30  ;;  %5132 = vmatprep.mubr.bf16.mxu1 %v7103_v9  ;;  %v1206_v59 = vrot.slane %v1204_v51, 7  ;;  %835 = vst [vmem:[#allocation2 + $0x48] sm:$0xf] %v6457_v53  ;;  %v7616_v22 = vrot.slane %v1221_v2, 11 }
  0x50   : > { %v967_v42 = vor.u32 %v965_v43, %v964_v49  ;;  %v969_v58 = vrot.slane %v964_v49, 4  ;;  %6646 = vmatprep.subr.bf16.mxu1 %v7100_v54  ;;  %v976_v45 = vor.u32 %v974_v46, %v973_v57  ;;  %v696_v4 = vsel %vm536_vm14, %v7506_v63, %v6131_v56  ;;  %v7127_v2 = vld [vmem:[%s9274_s3 + $0x158] sm:$0xff]   ;;  %v7112_v49 = vld [vmem:[%s9274_s3 + $0xe0] sm:$0xff]  }
  0x51   : > { %v1215_v0 = vrot.slane %v1213_v41, 7  ;;  %v1209_v8 = vor.u32 %v1207_v12, %v1206_v59  ;;  %v1211_v61 = vrot.slane %v1206_v59, 4  ;;  %v6517_v16 = vpack.c.bf16 %v696_v4, %v695_v60  ;;  %6762 = vmatprep.subr.bf16.mxu0 %v7127_v2  ;;  %v7128_v43 = vld [vmem:[%s9274_s3 + $0x118] sm:$0xff]   ;;  %v7113_v57 = vld [vmem:[%s9274_s3 + $0xa0] sm:$0xff]  }
  0x52   : > { %v968_v7 = vsel %vm7393_vm2, %v7508_v1, %v967_v42  ;;  %v977_v17 = vsel %vm7393_vm2, %v969_v58, %v976_v45  ;;  %v587_v63 = vmul.f32 1.442695, %v548_v15  ;;  %v569_v29 = vmin.f32 %v7563_v24, 0.0  ;;  %v7108_v11 = vld [vmem:[%s9274_s3 + $0x98] sm:$0xff]   ;;  %6763 = vmatpush3.bf16.msra.mxu0 %v7128_v43  ;;  %v7114_v58 = vld [vmem:[%s9274_s3 + $0xe8] sm:$0xff]   ;;  %v7120_v43 = vld [vmem:[%s9274_s3 + $0xb0] sm:$0xff]  }
  0x53   : > { %v1218_v18 = vor.u32 %v1216_v55, %v1215_v0  ;;  %6647 = vmatpush3.bf16.msra.mxu1 %v7101_v48  ;;  %v6186_v1 = vcombine.low %v968_v7, %v977_v17  ;;  %v1210_v20 = vsel %vm7393_vm2, %v7511_v6, %v1209_v8  ;;  %6530 = vst [vmem:[#allocation2 + $0x120] sm:$0xff] %v6517_v16   ;;  %v570_v6 = vmin.f32 %v7575_v34, 0.0  ;;  %v2004_v7 = vld [vmem:[#allocation2 + $0x1c] sm:$0xf] }
  0x54   : > { %6648 = vmatprep.subr.bf16.mxu1 %v7104_v44  ;;  %v872_v28 = vld [vmem:[#allocation2 + $0x44] sm:$0xf]  ;;  %7223 = vpow2.f32 %v587_v63  ;;  %v1001_v35 = vshrl.u32 %v874_v14, 16  ;;  %v446_v9 = vmul.f32 %v7375_v26, %v407_v13  ;;  %v447_v25 = vmul.f32 %v7375_v26, %v408_v23  ;;  %v7658_v44 = vld [vmem:[#allocation2 + $0x18] sm:$0x8] }
  0x55   : > { %v1219_v15 = vsel %vm7393_vm2, %v1211_v61, %v1218_v18  ;;  %5045 = vmatmul.mubr.bf16.gmra.mrb[8].mxu0 %v6186_v1  ;;  %v984_v3 = vshrl.u32 %v872_v28, 16  ;;  %v987_v31 = vshll.u32 %v872_v28, 16  ;;  %v629_v54 = vmul.f32 1.442695, %v569_v29  ;;  %v7664_v18 = vld [vmem:[#allocation2 + $0x20] sm:$0xf] }
  0x56   : > { %v6197_v30 = vcombine.low %v1210_v20, %v1219_v15  ;;  %v7110_v32 = vld [vmem:[#allocation2 + $0x44] sm:$0xff]   ;;  %v631_v46 = vmul.f32 1.442695, %v570_v6  ;;  %v7637_v47 = vadd.f32 %v7380_v27, %v446_v9  ;;  %v7640_v48 = vadd.f32 %v7380_v27, %v447_v25  ;;  %v7118_v15 = vld [vmem:[%s9274_s3 + $0xf0] sm:$0xff]  }
  0x57   : > { %v873_v33 = vld [vmem:[#allocation2 + $0x48] sm:$0xf]  ;;  %v986_v36 = vrot.slane %v984_v3, 7  ;;  %6649 = vmatpush3.bf16.msra.mxu1 %v7105_v19  ;;  %5052 = vmatprep.mubr.bf16.mxu0 %v7110_v32  ;;  %7225 = vpow2.f32 %v629_v54  ;;  %v1243_v41 = vshrl.u32 %v907_v39, 16  ;;  %vm537_vm4 = vcmp.gt.f32.partialorder %v7563_v24, 0.0  ;;  %v409_v29 = vld [vmem:[%s7362_s26 + $0x50] sm:$0xff] }
  0x58   : > { %5133 = vmatmul.mubr.bf16.gmra.mrb[4].mxu1 %v6197_v30  ;;  %v993_v37 = vshrl.u32 %v873_v33, 16  ;;  %v996_v40 = vshll.u32 %v873_v33, 16  ;;  %6650 = vmatprep.subr.bf16.mxu1 %v7106_v21  ;;  %7227 = vpow2.f32 %v631_v46  ;;  %v7655_v59 = vrot.slane %v1001_v35, 11  ;;  %v7222_v45 = vpop.eup %7221  ;;  %v7115_v1 = vld [vmem:[%s9274_s3 + $0xa8] sm:$0xff]   ;;  %v277_v33 = vld [vmem:[#allocation2 + $0x10] sm:$0x1] }
  0x59   : > { %v989_v50 = vor.u32 %v987_v31, %v986_v36  ;;  %v991_v51 = vrot.slane %v986_v36, 4  ;;  %v549_v60 = vmin.f32 %v7637_v47, 0.0  ;;  %vm538_vm5 = vcmp.gt.f32.partialorder %v7575_v34, 0.0  ;;  %v1488_v35 = vld [vmem:[#allocation2 + $0x8] sm:$0xf] }
  0x5a   : > { %v995_v12 = vrot.slane %v993_v37, 7  ;;  %v7111_v53 = vld [vmem:[#allocation2 + $0x120] sm:$0xff]   ;;  %v6110_v61 = vadd.f32 -1.0, %v7222_v45  ;;  %v550_v16 = vmin.f32 %v7640_v48, 0.0  ;;  %v7669_v20 = vrot.slane %v1243_v41, 11 }
  0x5b   : > { %v990_v27 = vsel %vm7393_vm2, %v7514_v10, %v989_v50  ;;  %v905_v56 = vld [vmem:[#allocation2 + $0x120] sm:$0xf]  ;;  %v906_v42 = vld [vmem:[#allocation2 + $0x124] sm:$0xf]  ;;  %6651 = vmatpush3.bf16.msra.mxu1 %v7108_v11  ;;  %5140 = vmatprep.mubr.bf16.mxu1 %v7111_v53  ;;  %v589_v17 = vmul.f32 1.442695, %v549_v60 }
  0x5c   : > { %v998_v55 = vor.u32 %v996_v40, %v995_v12  ;;  %v1226_v0 = vshrl.u32 %v905_v56, 16  ;;  %v1229_v10 = vshll.u32 %v905_v56, 16  ;;  %v1235_v4 = vshrl.u32 %v906_v42, 16  ;;  %6652 = vmatprep.subr.bf16.mxu1 %v7112_v49  ;;  %v877_v37 = vld [vmem:[#allocation2 + $0x68] sm:$0x8]  ;;  %v7131_v49 = vld [vmem:[%s9274_s3 + $0x160] sm:$0xff]  }
  0x5d   : > { %v1238_v5 = vshll.u32 %v906_v42, 16  ;;  %v675_v23 = vsel %vm515_vm15, %v7541_v52, %v6110_v61  ;;  %7229 = vpow2.f32 %v589_v17  ;;  %v591_v28 = vmul.f32 1.442695, %v550_v16  ;;  %6764 = vmatprep.subr.bf16.mxu0 %v7131_v49  ;;  %v7125_v61 = vld [vmem:[%s9274_s3 + $0x1c0] sm:$0xff]   ;;  %v7724_v16 = vld [vmem:[#allocation2 + $0x2c] sm:$0x8] }
  0x5e   : > { %v999_v8 = vsel %vm7393_vm2, %v991_v51, %v998_v55  ;;  %v7224_v19 = vpop.eup %7223  ;;  %v1228_v14 = vrot.slane %v1226_v0, 7  ;;  %v1237_v13 = vrot.slane %v1235_v4, 7  ;;  %v2052_v31 = vshrl.u32 %v7658_v44, 16  ;;  %v7122_v55 = vld [vmem:[%s9274_s3 + $0xf8] sm:$0xff]   ;;  %v7133_v17 = vld [vmem:[%s9274_s3 + $0x120] sm:$0xff]  }
  0x5f   : > { %v6187_v63 = vcombine.low %v990_v27, %v999_v8  ;;  %v6111_v21 = vadd.f32 -1.0, %v7224_v19  ;;  %6653 = vmatpush3.bf16.msra.mxu1 %v7113_v57  ;;  %7231 = vpow2.f32 %v591_v28  ;;  %v2057_v52 = vshrl.u32 %v2004_v7, 16  ;;  %v1489_v57 = vld [vmem:[#allocation2 + $0xc] sm:$0xf]  ;;  %v7123_v44 = vld [vmem:[%s9274_s3 + $0xb8] sm:$0xff]   ;;  %6765 = vmatpush3.bf16.msra.mxu0 %v7133_v17  ;;  %v411_v28 = vld [vmem:[%s7362_s26 + $0x60] sm:$0xff] }
  0x60   : > { %v1231_v6 = vor.u32 %v1229_v10, %v1228_v14  ;;  %v1233_v30 = vrot.slane %v1228_v14, 4  ;;  %v1240_v3 = vor.u32 %v1238_v5, %v1237_v13  ;;  %6654 = vmatprep.subr.bf16.mxu1 %v7114_v58  ;;  %v2060_v2 = vshll.u32 %v2004_v7, 16  ;;  %v410_v4 = vld [vmem:[%s7362_s26 + $0x58] sm:$0xff]  ;;  %v7774_v49 = vld [vmem:[%s9272_s1] ss:$0 sm:$0xff] }
  0x61   : > { %5053 = vmatmul.mubr.bf16.gmra.mrb[12].mxu0 %v6187_v63  ;;  %v676_v39 = vsel %vm516_vm3, %v7551_v62, %v6111_v21  ;;  %v9281_v32 = vmov 0  ;;  %v2066_v62 = vshrl.u32 %v7664_v18, 16  ;;  %v7226_v40 = vpop.eup %7225  ;;  %v2059_v11 = vrot.slane %v2057_v52, 7  ;;  %v412_v52 = vld [vmem:[%s7362_s26 + $0x68] sm:$0xff] }
  0x62   : > { %v9282_v32 = vsel %vm7684_vm6, 4294967295, %v9281_v32  ;;  %v1232_v9 = vsel %vm7393_vm2, %v7616_v22, %v1231_v6  ;;  %v1241_v25 = vsel %vm7393_vm2, %v1233_v30, %v1240_v3  ;;  %v6492_v36 = vpack.c.bf16 %v676_v39, %v675_v23  ;;  %v7228_v50 = vpop.eup %7227 }
  0x63   : > { %9283 = vst [vmem:[#allocation4_spill] sm:$0xff] %v9282_v32  ;;  %v6198_v54 = vcombine.low %v1232_v9, %v1241_v25  ;;  %v2069_v46 = vshll.u32 %v7664_v18, 16  ;;  %vm1536_vm0 = vsmask.f32 3328  ;;  %vm1537_vm7 = vsmask.f32 7440  ;;  %6655 = vmatpush3.bf16.msra.mxu1 %v7115_v1 }
  0x64   : > { %v448_v22 = vmul.f32 %v7375_v26, %v409_v29  ;;  %6525 = vst [vmem:[#allocation2 + $0x58] sm:$0xff] %v6492_v36   ;;  %v6132_v51 = vadd.f32 -1.0, %v7226_v40  ;;  %v2068_v12 = vrot.slane %v2066_v62, 7  ;;  %v278_v53 = vsel %vm7684_vm6, 0, %v277_v33  ;;  %6656 = vmatprep.subr.bf16.mxu1 %v7118_v15  ;;  %vm7764_vm10 = vmor %vm1536_vm0, %vm1537_vm7 }
  0x65   : > { %v1540_v41 = vshrl.u32 %v1488_v35, 16  ;;  %5141 = vmatmul.mubr.bf16.gmra.mrb[8].mxu1 %v6198_v54  ;;  %v6133_v27 = vadd.f32 -1.0, %v7228_v50  ;;  %v7707_v56 = vrot.slane %v2052_v31, 11  ;;  %v7709_v42 = vor.u32 %v2060_v2, %v2059_v11  ;;  %279 = vst [vmem:[#allocation2 + $0x10] sm:$0x1] %v278_v53 }
  0x66   : > { %v1023_v58 = vshrl.u32 %v877_v37, 16  ;;  %v697_v60 = vsel %vm537_vm4, %v7563_v24, %v6132_v51  ;;  %v2064_v45 = vrot.slane %v2059_v11, 4  ;;  %v1543_v10 = vshll.u32 %v1488_v35, 16  ;;  %v7746_v31 = vld [vmem:[%s9273_s2] ss:$0 sm:$0xff] }
  0x67   : > { %v1542_v0 = vrot.slane %v1540_v41, 4  ;;  %v698_v5 = vsel %vm538_vm5, %v7575_v34, %v6133_v27  ;;  %v6480_v7 = vpack.c.bf16 %v697_v60, %v697_v60  ;;  %v2071_v8 = vor.u32 %v2069_v46, %v2068_v12  ;;  %6657 = vmatpush3.bf16.msra.mxu1 %v7120_v43  ;;  %v7230_v14 = vpop.eup %7229 }
  0x68   : > { %v1549_v24 = vshll.u32 %v1489_v57, 16  ;;  %v6481_v18 = vpack.c.bf16 %v698_v5, %v698_v5  ;;  %v1545_v19 = vrot.slane %v1543_v10, 5  ;;  %v1553_v63 = vshrl.u32 %v1489_v57, 16  ;;  %6658 = vmatprep.subr.bf16.mxu1 %v7122_v55  ;;  %v7136_v57 = vld [vmem:[%s9274_s3 + $0x168] sm:$0xff]  }
  0x69   : > { %858 = vst [vmem:[#allocation2 + $0x134] sm:$0xf] %v6480_v7  ;;  %vm517_vm8 = vcmp.gt.f32.partialorder %v7637_v47, 0.0  ;;  %vm518_vm9 = vcmp.gt.f32.partialorder %v7640_v48, 0.0  ;;  %v7731_v34 = vrot.slane %v1023_v58, 11  ;;  %v6112_v1 = vadd.f32 -1.0, %v7230_v14  ;;  %v7232_v29 = vpop.eup %7231  ;;  %6766 = vmatprep.subr.bf16.mxu0 %v7136_v57 }
  0x6a   : > { %v7733_v13 = vrot.slane %v1549_v24, 5  ;;  %859 = vst [vmem:[#allocation2 + $0x138] sm:$0xf] %v6481_v18  ;;  %v1546_v21 = vor.u32 %v1545_v19, %v1542_v0  ;;  %v1555_v23 = vrot.slane %v1553_v63, 4  ;;  %v449_v15 = vmul.f32 %v7375_v26, %v410_v4 }
  0x6b   : > { %v7116_v6 = vld [vmem:[#allocation2 + $0x58] sm:$0xff]   ;;  %v2063_v30 = vsel %vm7393_vm2, %v7707_v56, %v7709_v42  ;;  %v2072_v3 = vsel %vm7393_vm2, %v2064_v45, %v2071_v8  ;;  %v7749_v39 = vadd.f32 %v7746_v31, %v448_v22  ;;  %v2074_v26 = vshrl.u32 %v7724_v16, 16  ;;  %6659 = vmatpush3.bf16.msra.mxu1 %v7123_v44  ;;  %v2007_v42 = vld [vmem:[#allocation2 + $0x30] sm:$0xf] }
  0x6c   : > { %v875_v2 = vld [vmem:[#allocation2 + $0x58] sm:$0xf]  ;;  %v876_v33 = vld [vmem:[#allocation2 + $0x5c] sm:$0xf]  ;;  %v6113_v35 = vadd.f32 -1.0, %v7232_v29  ;;  %v677_v9 = vsel %vm517_vm8, %v7637_v47, %v6112_v1  ;;  %v7756_v25 = vrot.slane %v1546_v21, 4  ;;  %v1556_v36 = vor.u32 %v1555_v23, %v7733_v13  ;;  %5060 = vmatprep.mubr.bf16.mxu0 %v7116_v6  ;;  %6868 = vmatprep.subr.bf16.mxu1 %v7125_v61 }
  0x6d   : > { %v1006_v62 = vshrl.u32 %v875_v2, 16  ;;  %v1009_v37 = vshll.u32 %v875_v2, 16  ;;  %v1015_v40 = vshrl.u32 %v876_v33, 16  ;;  %v1018_v54 = vshll.u32 %v876_v33, 16  ;;  %v1490_v43 = vld [vmem:[#allocation2 + $0x10] sm:$0x1] }
  0x6e   : > { %v678_v11 = vsel %vm518_vm9, %v7640_v48, %v6113_v35  ;;  %v6460_v46 = vpack.c.bf16 %v677_v9, %v677_v9  ;;  %v7769_v22 = vadd.f32 %v7746_v31, %v449_v15  ;;  %v450_v50 = vmul.f32 %v7774_v49, %v411_v28  ;;  %v413_v23 = vld [vmem:[%s7362_s26 + $0x70] sm:$0xff]  ;;  %v880_v33 = vld [vmem:[#allocation2 + $0x7c] sm:$0x8]  ;;  %v284_v35 = vld [vmem:[#allocation2 + $0x24] sm:$0x1] }
  0x6f   : > { %v1008_v51 = vrot.slane %v1006_v62, 7  ;;  %v1017_v12 = vrot.slane %v1015_v40, 7  ;;  %v6461_v48 = vpack.c.bf16 %v678_v11, %v678_v11  ;;  %v7777_v53 = vrot.slane %v1556_v36, 4  ;;  %v2008_v29 = vld [vmem:[#allocation2 + $0x34] sm:$0xf]  ;;  %v7137_v9 = vld [vmem:[%s9274_s3 + $0x128] sm:$0xff]  }
  0x70   : > { %v908_v41 = vld [vmem:[#allocation2 + $0x134] sm:$0xf]  ;;  %838 = vst [vmem:[#allocation2 + $0x6c] sm:$0xf] %v6460_v46  ;;  %v7782_v27 = vcombine.low %v2063_v30, %v2072_v3  ;;  %v1559_v55 = vshll.u32 %v1490_v43, 16  ;;  %v551_v56 = vmin.f32 %v7749_v39, 0.0  ;;  %v451_v58 = vmul.f32 %v7774_v49, %v412_v52  ;;  %6767 = vmatpush3.bf16.msra.mxu0 %v7137_v9 }
  0x71   : > { %v7117_v60 = vld [vmem:[#allocation2 + $0x134] sm:$0xff]   ;;  %v1011_v44 = vor.u32 %v1009_v37, %v1008_v51  ;;  %v1013_v45 = vrot.slane %v1008_v51, 4  ;;  %v1020_v0 = vor.u32 %v1018_v54, %v1017_v12  ;;  %839 = vst [vmem:[#allocation2 + $0x70] sm:$0xf] %v6461_v48  ;;  %v1552_v4 = vsel %vm7764_vm10, %v7756_v25, %v7733_v13 }
  0x72   : > { %v909_v10 = vld [vmem:[#allocation2 + $0x138] sm:$0xf]  ;;  %v1248_v5 = vshrl.u32 %v908_v41, 16  ;;  %v1251_v7 = vshll.u32 %v908_v41, 16  ;;  %5148 = vmatprep.mubr.bf16.mxu1 %v7117_v60  ;;  %v552_v18 = vmin.f32 %v7769_v22, 0.0  ;;  %v7797_v19 = vadd.f32 %v7746_v31, %v450_v50 }
  0x73   : > { %v1257_v8 = vshrl.u32 %v909_v10, 16  ;;  %v1260_v61 = vshll.u32 %v909_v10, 16  ;;  %v1012_v24 = vsel %vm7393_vm2, %v7655_v59, %v1011_v44  ;;  %v1021_v17 = vsel %vm7393_vm2, %v1013_v45, %v1020_v0  ;;  %v1492_v44 = vld [vmem:[#allocation2 + $0x20] sm:$0xf] }
  0x74   : > { %v6188_v63 = vcombine.low %v1012_v24, %v1021_v17  ;;  %v1250_v14 = vrot.slane %v1248_v5, 7  ;;  %v593_v21 = vmul.f32 1.442695, %v551_v56  ;;  %v1561_v15 = vrot.slane %v1559_v55, 5  ;;  %v1491_v55 = vld [vmem:[#allocation2 + $0x1c] sm:$0xf] }
  0x75   : > { %v1259_v1 = vrot.slane %v1257_v8, 7  ;;  %v595_v28 = vmul.f32 1.442695, %v552_v18  ;;  %v2079_v6 = vshrl.u32 %v2007_v42, 16  ;;  %v7801_v30 = vadd.f32 %v7746_v31, %v451_v58 }
  0x76   : > { %5061 = vmatmul.mubr.bf16.gmra.mrb[16].mxu0 %v6188_v63  ;;  %v1253_v59 = vor.u32 %v1251_v7, %v1250_v14  ;;  %v1255_v3 = vrot.slane %v1250_v14, 4  ;;  %v6233_v2 = vrot.slane %v2074_v26, 11  ;;  %7233 = vpow2.f32 %v593_v21 }
  0x77   : > { %v1262_v52 = vor.u32 %v1260_v61, %v1259_v1  ;;  %v878_v36 = vld [vmem:[#allocation2 + $0x6c] sm:$0xf]  ;;  %v2081_v62 = vrot.slane %v2079_v6, 7  ;;  %v2082_v37 = vshll.u32 %v2007_v42, 16  ;;  %v7809_v40 = vmul.f32 %v7774_v49, %v413_v23  ;;  %v7126_v1 = vld [vmem:[%s9274_s3 + $0x180] sm:$0xff]  }
  0x78   : > { %v1254_v54 = vsel %vm7393_vm2, %v7669_v20, %v1253_v59  ;;  %v7124_v26 = vld [vmem:[#allocation2 + $0x6c] sm:$0xff]   ;;  %v1028_v11 = vshrl.u32 %v878_v36, 16  ;;  %7235 = vpow2.f32 %v595_v28  ;;  %v1031_v50 = vshll.u32 %v878_v36, 16 }
  0x79   : > { %v1263_v16 = vsel %vm7393_vm2, %v1255_v3, %v1262_v52  ;;  %v879_v43 = vld [vmem:[#allocation2 + $0x70] sm:$0xf]  ;;  %vm519_vm11 = vcmp.gt.f32.partialorder %v7749_v39, 0.0  ;;  %5068 = vmatprep.mubr.bf16.mxu0 %v7124_v26  ;;  %vm520_vm12 = vcmp.gt.f32.partialorder %v7769_v22, 0.0  ;;  %v2084_v57 = vor.u32 %v2082_v37, %v2081_v62  ;;  %v7132_v59 = vld [vmem:[%s9274_s3 + $0x1c8] sm:$0xff]   ;;  %v414_v3 = vld [vmem:[%s7362_s26 + $0x78] sm:$0xff] }
  0x7a   : > { %v6199_v46 = vcombine.low %v1254_v54, %v1263_v16  ;;  %v1037_v51 = vshrl.u32 %v879_v43, 16  ;;  %v1040_v12 = vshll.u32 %v879_v43, 16  ;;  %v1030_v48 = vrot.slane %v1028_v11, 7  ;;  %v2011_v37 = vld [vmem:[#allocation2 + $0x48] sm:$0xf] }
  0x7b   : > { %v2086_v20 = vrot.slane %v2081_v62, 4  ;;  %v2088_v41 = vshrl.u32 %v2008_v29, 16  ;;  %v2091_v42 = vshll.u32 %v2008_v29, 16  ;;  %v1045_v58 = vshrl.u32 %v880_v33, 16  ;;  %v2010_v33 = vld [vmem:[#allocation2 + $0x44] sm:$0xf] }
  0x7c   : > { %5149 = vmatmul.mubr.bf16.gmra.mrb[12].mxu1 %v6199_v46  ;;  %v1039_v56 = vrot.slane %v1037_v51, 7  ;;  %v285_v60 = vsel %vm7684_vm6, 0, %v284_v35  ;;  %v1033_v45 = vor.u32 %v1031_v50, %v1030_v48  ;;  %v1035_v0 = vrot.slane %v1030_v48, 4  ;;  %v7134_v16 = vld [vmem:[%s9274_s3 + $0x188] sm:$0xff]   ;;  %v291_v50 = vld [vmem:[#allocation2 + $0x38] sm:$0x1] }
  0x7d   : > { %5189 = vmatprep.mubr.bf16.mxu1 %v7782_v27  ;;  %v1562_v10 = vsel %vm7764_vm10, %v7777_v53, %v1561_v15  ;;  %v2090_v5 = vrot.slane %v2088_v41, 7  ;;  %286 = vst [vmem:[#allocation2 + $0x24] sm:$0x1] %v285_v60  ;;  %v2085_v8 = vsel %vm7393_vm2, %v6233_v2, %v2084_v57  ;;  %v1564_v61 = vshrl.u32 %v1491_v55, 16  ;;  %v2009_v15 = vld [vmem:[#allocation2 + $0x40] sm:$0x8] }
  0x7e   : > { %v1042_v7 = vor.u32 %v1040_v12, %v1039_v56  ;;  %v1567_v24 = vshll.u32 %v1491_v55, 16  ;;  %v1034_v17 = vsel %vm7393_vm2, %v7731_v34, %v1033_v45  ;;  %v1573_v18 = vshll.u32 %v1492_v44, 16  ;;  %v883_v41 = vld [vmem:[#allocation2 + $0x90] sm:$0x8] }
  0x7f   : > { %v2093_v27 = vor.u32 %v2091_v42, %v2090_v5  ;;  %v1577_v63 = vshrl.u32 %v1492_v44, 16  ;;  %v6216_v53 = vcombine.low %v1552_v4, %v1562_v10  ;;  %v1566_v21 = vrot.slane %v1564_v61, 4  ;;  %v1494_v55 = vld [vmem:[#allocation2 + $0x30] sm:$0xf] }
  0x80   : > { %v1043_v14 = vsel %vm7393_vm2, %v1035_v0, %v1042_v7  ;;  %v1569_v23 = vrot.slane %v1567_v24, 5  ;;  %v1575_v29 = vrot.slane %v1573_v18, 5  ;;  %v7234_v13 = vpop.eup %7233  ;;  %v7845_v4 = vrot.slane %v1045_v58, 11  ;;  %v1495_v58 = vld [vmem:[#allocation2 + $0x34] sm:$0xf] }
  0x81   : > { %v6189_v34 = vcombine.low %v1034_v17, %v1043_v14  ;;  %v2094_v28 = vsel %vm7393_vm2, %v2086_v20, %v2093_v27  ;;  %v1579_v6 = vrot.slane %v1577_v63, 4  ;;  %v553_v2 = vmin.f32 %v7797_v19, 0.0  ;;  %v7142_v27 = vld [vmem:[%s9274_s3 + $0x170] sm:$0xff]  }
  0x82   : > { %v6249_v25 = vcombine.low %v2085_v8, %v2094_v28  ;;  %v1570_v52 = vor.u32 %v1569_v23, %v1566_v21  ;;  %v7236_v35 = vpop.eup %7235  ;;  %v6114_v9 = vadd.f32 -1.0, %v7234_v13  ;;  %v554_v62 = vmin.f32 %v7801_v30, 0.0  ;;  %6768 = vmatprep.subr.bf16.mxu0 %v7142_v27 }
  0x83   : > { %5069 = vmatmul.mubr.bf16.gmra.mrb[20].mxu0 %v6189_v34  ;;  %v1580_v36 = vor.u32 %v1579_v6, %v1575_v29  ;;  %v2096_v54 = vshrl.u32 %v2009_v15, 16  ;;  %v6115_v26 = vadd.f32 -1.0, %v7236_v35  ;;  %v597_v46 = vmul.f32 1.442695, %v553_v2  ;;  %v415_v2 = vld [vmem:[%s7362_s26 + $0x80] sm:$0xff] }
  0x84   : > { %5190 = vmatmul.mubr.bf16.vlgmr.msra.gmra.mrb[16].mxu1 %v6216_v53  ;;  %v1493_v43 = vld [vmem:[#allocation2 + $0x24] sm:$0x1]  ;;  %v1571_v11 = vrot.slane %v1570_v52, 4  ;;  %v453_v51 = vmul.f32 %v7774_v49, %v414_v3  ;;  %v679_v12 = vsel %vm519_vm11, %v7749_v39, %v6114_v9  ;;  %v599_v20 = vmul.f32 1.442695, %v554_v62  ;;  %v7139_v39 = vld [vmem:[%s9274_s3 + $0x1d0] sm:$0xff]  }
  0x85   : > { %6869 = vmatpush3.bf16.msra.mxu1 %v7126_v1  ;;  %5197 = vmatprep.mubr.bf16.mxu1 %v6249_v25  ;;  %v1581_v48 = vrot.slane %v1580_v36, 4  ;;  %v1583_v57 = vshll.u32 %v1493_v43, 16  ;;  %v680_v56 = vsel %vm520_vm12, %v7769_v22, %v6115_v26  ;;  %7237 = vpow2.f32 %v597_v46  ;;  %v7140_v22 = vld [vmem:[%s9274_s3 + $0x190] sm:$0xff]   ;;  %v416_v62 = vld [vmem:[%s7362_s26 + $0x88] sm:$0xff] }
  0x86   : > { %v1576_v42 = vsel %vm7764_vm10, %v1571_v11, %v1575_v29  ;;  %6870 = vmatprep.subr.bf16.mxu1 %v7132_v59  ;;  %v7863_v60 = vadd.f32 %v7746_v31, %v7809_v40  ;;  %v6497_v44 = vpack.c.bf16 %v680_v56, %v679_v12  ;;  %7239 = vpow2.f32 %v599_v20  ;;  %v7143_v1 = vld [vmem:[%s9274_s3 + $0x130] sm:$0xff]  }
  0x87   : > { %v1585_v45 = vrot.slane %v1583_v57, 5  ;;  %v2101_v0 = vshrl.u32 %v2010_v33, 16  ;;  %vm521_vm13 = vcmp.gt.f32.partialorder %v7797_v19, 0.0  ;;  %v6234_v10 = vrot.slane %v2096_v54, 11  ;;  %v2012_v3 = vld [vmem:[#allocation2 + $0x54] sm:$0x8]  ;;  %6769 = vmatpush3.bf16.msra.mxu0 %v7143_v1 }
  0x88   : > { %v2104_v5 = vshll.u32 %v2010_v33, 16  ;;  %v2110_v7 = vshrl.u32 %v2011_v37, 16  ;;  %v2113_v8 = vshll.u32 %v2011_v37, 16  ;;  %6526 = vst [vmem:[#allocation2 + $0x80] sm:$0xff] %v6497_v44   ;;  %v292_v24 = vsel %vm7684_vm6, 0, %v291_v50 }
  0x89   : > { %v1586_v40 = vsel %vm7764_vm10, %v1581_v48, %v1585_v45  ;;  %v2103_v61 = vrot.slane %v2101_v0, 7  ;;  %v1588_v17 = vshrl.u32 %v1494_v55, 16  ;;  %6871 = vmatpush3.bf16.msra.mxu1 %v7134_v16  ;;  %v1067_v14 = vshrl.u32 %v883_v41, 16  ;;  %293 = vst [vmem:[#allocation2 + $0x38] sm:$0x1] %v292_v24 }
  0x8a   : > { %v6217_v18 = vcombine.low %v1576_v42, %v1586_v40  ;;  %v2112_v63 = vrot.slane %v2110_v7, 7  ;;  %v1591_v53 = vshll.u32 %v1494_v55, 16  ;;  %6872 = vmatprep.subr.bf16.mxu1 %v7139_v39  ;;  %v1597_v34 = vshll.u32 %v1495_v58, 16  ;;  %v2014_v7 = vld [vmem:[#allocation2 + $0x5c] sm:$0xf] }
  0x8b   : > { %v2106_v21 = vor.u32 %v2104_v5, %v2103_v61  ;;  %v2108_v23 = vrot.slane %v2103_v61, 4  ;;  %v1590_v15 = vrot.slane %v1588_v17, 4  ;;  %v1601_v6 = vshrl.u32 %v1495_v58, 16  ;;  %v7145_v17 = vld [vmem:[%s9274_s3 + $0x1d8] sm:$0xff]  }
  0x8c   : > { %5198 = vmatmul.mubr.bf16.gmra.mrb[20].mxu1 %v6217_v18  ;;  %v2115_v28 = vor.u32 %v2113_v8, %v2112_v63  ;;  %v1593_v29 = vrot.slane %v1591_v53, 5  ;;  %v7883_v59 = vadd.f32 %v7746_v31, %v453_v51  ;;  %vm522_vm14 = vcmp.gt.f32.partialorder %v7801_v30, 0.0  ;;  %v2013_v51 = vld [vmem:[#allocation2 + $0x58] sm:$0xf] }
  0x8d   : > { %v2107_v13 = vsel %vm7393_vm2, %v6234_v10, %v2106_v21  ;;  %v7888_v25 = vrot.slane %v1597_v34, 5  ;;  %v555_v52 = vmin.f32 %v7863_v60, 0.0  ;;  %6873 = vmatpush3.bf16.msra.mxu1 %v7140_v22  ;;  %v7894_v35 = vrot.slane %v1067_v14, 11  ;;  %v886_v14 = vld [vmem:[#allocation2 + $0xa4] sm:$0x8] }
  0x8e   : > { %v2116_v33 = vsel %vm7393_vm2, %v2108_v23, %v2115_v28  ;;  %v1594_v9 = vor.u32 %v1593_v29, %v1590_v15  ;;  %v1603_v36 = vrot.slane %v1601_v6, 4  ;;  %v556_v54 = vmin.f32 %v7883_v59, 0.0  ;;  %v298_v15 = vld [vmem:[#allocation2 + $0x4c] sm:$0x1]  ;;  %v1497_v34 = vld [vmem:[#allocation2 + $0x44] sm:$0xf]  ;;  %6874 = vmatprep.subr.bf16.mxu1 %v7145_v17 }
  0x8f   : > { %v6250_v37 = vcombine.low %v2107_v13, %v2116_v33  ;;  %v601_v16 = vmul.f32 1.442695, %v555_v52  ;;  %v2118_v26 = vshrl.u32 %v2012_v3, 16  ;;  %v7238_v43 = vpop.eup %7237  ;;  %v7129_v11 = vld [vmem:[#allocation2 + $0x80] sm:$0xff]   ;;  %v7902_v12 = vmul.f32 %v7774_v49, %v415_v2  ;;  %v7146_v28 = vld [vmem:[%s9274_s3 + $0x198] sm:$0xff]  }
  0x90   : > { %v7898_v46 = vrot.slane %v1594_v9, 4  ;;  %v1604_v50 = vor.u32 %v1603_v36, %v7888_v25  ;;  %v7240_v48 = vpop.eup %7239  ;;  %v881_v57 = vld [vmem:[#allocation2 + $0x80] sm:$0xf]  ;;  %v882_v20 = vld [vmem:[#allocation2 + $0x84] sm:$0xf]  ;;  %v6116_v41 = vadd.f32 -1.0, %v7238_v43  ;;  %v7907_v56 = vmul.f32 %v7774_v49, %v416_v62  ;;  %5076 = vmatprep.mubr.bf16.mxu0 %v7129_v11 }
  0x91   : > { %5205 = vmatprep.mubr.bf16.mxu1 %v6250_v37  ;;  %7241 = vpow2.f32 %v601_v16  ;;  %v7904_v55 = vrot.slane %v2118_v26, 11  ;;  %v1050_v42 = vshrl.u32 %v881_v57, 16  ;;  %v1053_v58 = vshll.u32 %v881_v57, 16  ;;  %v1496_v45 = vld [vmem:[#allocation2 + $0x38] sm:$0x1]  ;;  %6875 = vmatpush3.bf16.msra.mxu1 %v7146_v28  ;;  %v417_v11 = vld [vmem:[%s7362_s26 + $0x90] sm:$0xff] }
  0x92   : > { %v1059_v39 = vshrl.u32 %v882_v20, 16  ;;  %v1062_v44 = vshll.u32 %v882_v20, 16  ;;  %v6117_v0 = vadd.f32 -1.0, %v7240_v48  ;;  %v681_v22 = vsel %vm521_vm13, %v7797_v19, %v6116_v41  ;;  %v1498_v3 = vld [vmem:[#allocation2 + $0x48] sm:$0xf]  ;;  %v7147_v13 = vld [vmem:[%s9274_s3 + $0x178] sm:$0xff]  }
  0x93   : > { %v1600_v10 = vsel %vm7764_vm10, %v7898_v46, %v7888_v25  ;;  %v1605_v5 = vrot.slane %v1604_v50, 4  ;;  %v1052_v8 = vrot.slane %v1050_v42, 7  ;;  %v6464_v61 = vpack.c.bf16 %v681_v22, %v681_v22  ;;  %6770 = vmatprep.subr.bf16.mxu0 %v7147_v13  ;;  %v7150_v57 = vld [vmem:[%s9274_s3 + $0x1e0] sm:$0xff]  }
  0x94   : > { %v1061_v40 = vrot.slane %v1059_v39, 7  ;;  %v1607_v24 = vshll.u32 %v1496_v45, 16  ;;  %v682_v27 = vsel %vm522_vm14, %v7801_v30, %v6117_v0  ;;  %v603_v19 = vmul.f32 1.442695, %v556_v54  ;;  %v418_v39 = vld [vmem:[%s7362_s26 + $0x98] sm:$0xff]  ;;  %6876 = vmatprep.subr.bf16.mxu1 %v7150_v57 }
  0x95   : > { %v2123_v18 = vshrl.u32 %v2013_v51, 16  ;;  %v2126_v63 = vshll.u32 %v2013_v51, 16  ;;  %v1055_v53 = vor.u32 %v1053_v58, %v1052_v8  ;;  %v1057_v1 = vrot.slane %v1052_v8, 4  ;;  %842 = vst [vmem:[#allocation2 + $0x94] sm:$0xf] %v6464_v61 }
  0x96   : > { %v1064_v21 = vor.u32 %v1062_v44, %v1061_v40  ;;  %v6465_v23 = vpack.c.bf16 %v682_v27, %v682_v27  ;;  %vm523_vm15 = vcmp.gt.f32.partialorder %v7863_v60, 0.0  ;;  %v1609_v29 = vrot.slane %v1607_v24, 5 }
  0x97   : > { %7243 = vpow2.f32 %v603_v19  ;;  %v2125_v30 = vrot.slane %v2123_v18, 7  ;;  %v2132_v6 = vshrl.u32 %v2014_v7, 16  ;;  %v1056_v25 = vsel %vm7393_vm2, %v7845_v4, %v1055_v53  ;;  %v7148_v4 = vld [vmem:[%s9274_s3 + $0x138] sm:$0xff]  }
  0x98   : > { %v1065_v52 = vsel %vm7393_vm2, %v1057_v1, %v1064_v21  ;;  %843 = vst [vmem:[#allocation2 + $0x98] sm:$0xf] %v6465_v23  ;;  %v2135_v2 = vshll.u32 %v2014_v7, 16  ;;  %v1089_v33 = vshrl.u32 %v886_v14, 16  ;;  %v1610_v36 = vsel %vm7764_vm10, %v1605_v5, %v1609_v29  ;;  %6771 = vmatpush3.bf16.msra.mxu0 %v7148_v4  ;;  %v2015_v23 = vld [vmem:[#allocation2 + $0x68] sm:$0x8] }
  0x99   : > { %v6190_v9 = vcombine.low %v1056_v25, %v1065_v52  ;;  %vm524_vm1 = vcmp.gt.f32.partialorder %v7883_v59, 0.0  ;;  %v2128_v62 = vor.u32 %v2126_v63, %v2125_v30  ;;  %v2130_v37 = vrot.slane %v2125_v30, 4  ;;  %v889_v4 = vld [vmem:[#allocation2 + $0xb8] sm:$0x8] }
  0x9a   : > { %v6218_v54 = vcombine.low %v1600_v10, %v1610_v36  ;;  %v2134_v16 = vrot.slane %v2132_v6, 7  ;;  %v7940_v26 = vrot.slane %v1089_v33, 11  ;;  %v299_v43 = vsel %vm7684_vm6, 0, %v298_v15  ;;  %v2017_v33 = vld [vmem:[#allocation2 + $0x70] sm:$0xf] }
  0x9b   : > { %v7242_v46 = vpop.eup %7241  ;;  %5077 = vmatmul.mubr.bf16.gmra.mrb[24].mxu0 %v6190_v9  ;;  %300 = vst [vmem:[#allocation2 + $0x4c] sm:$0x1] %v299_v43  ;;  %v1612_v50 = vshrl.u32 %v1497_v34, 16  ;;  %v1615_v51 = vshll.u32 %v1497_v34, 16  ;;  %v1621_v48 = vshll.u32 %v1498_v3, 16  ;;  %v2129_v41 = vsel %vm7393_vm2, %v7904_v55, %v2128_v62 }
  0x9c   : > { %5206 = vmatmul.mubr.bf16.gmra.mrb[24].mxu1 %v6218_v54  ;;  %v6118_v20 = vadd.f32 -1.0, %v7242_v46  ;;  %v2137_v42 = vor.u32 %v2135_v2, %v2134_v16  ;;  %v1625_v58 = vshrl.u32 %v1498_v3, 16  ;;  %v884_v44 = vld [vmem:[#allocation2 + $0x94] sm:$0xf]  ;;  %v7954_v22 = vadd.f32 %v7746_v31, %v7902_v12  ;;  %v7976_v3 = vld [vmem:[%s9274_s3 + $0x200] sm:$0xff]  }
  0x9d   : > { %v1614_v45 = vrot.slane %v1612_v50, 4  ;;  %v1617_v0 = vrot.slane %v1615_v51, 5  ;;  %v456_v10 = vmul.f32 %v7774_v49, %v417_v11  ;;  %v1072_v5 = vshrl.u32 %v884_v44, 16  ;;  %v2016_v2 = vld [vmem:[#allocation2 + $0x6c] sm:$0xf]  ;;  %7004 = vmatprep.subr.bf16.mxu0 %v7976_v3 }
  0x9e   : > { %v1075_v7 = vshll.u32 %v884_v44, 16  ;;  %v2138_v8 = vsel %vm7393_vm2, %v2130_v37, %v2137_v42  ;;  %v7961_v55 = vadd.f32 %v7746_v31, %v7907_v56  ;;  %v1623_v27 = vrot.slane %v1621_v48, 5  ;;  %v1500_v48 = vld [vmem:[#allocation2 + $0x58] sm:$0xf] }
  0x9f   : > { %v7130_v40 = vld [vmem:[#allocation2 + $0x94] sm:$0xff]   ;;  %v6251_v24 = vcombine.low %v2129_v41, %v2138_v8  ;;  %v1618_v17 = vor.u32 %v1617_v0, %v1614_v45  ;;  %v7964_v12 = vmul.f32 %v7774_v49, %v418_v39  ;;  %v1074_v19 = vrot.slane %v1072_v5, 7  ;;  %v1501_v41 = vld [vmem:[#allocation2 + $0x5c] sm:$0xf]  ;;  %v7153_v45 = vld [vmem:[%s9274_s3 + $0x1a0] sm:$0xff]  }
  0xa0   : > { %v885_v61 = vld [vmem:[#allocation2 + $0x98] sm:$0xf]  ;;  %v1627_v14 = vrot.slane %v1625_v58, 4  ;;  %5084 = vmatprep.mubr.bf16.mxu0 %v7130_v40  ;;  %v683_v1 = vsel %vm523_vm15, %v7863_v60, %v6118_v20  ;;  %v557_v21 = vmin.f32 %v7954_v22, 0.0  ;;  %v7971_v15 = vadd.f32 %v7746_v31, %v456_v10  ;;  %6877 = vmatpush3.bf16.msra.mxu1 %v7153_v45 }
  0xa1   : > { %v1081_v18 = vshrl.u32 %v885_v61, 16  ;;  %v1084_v63 = vshll.u32 %v885_v61, 16  ;;  %v7244_v53 = vpop.eup %7243  ;;  %5213 = vmatprep.mubr.bf16.mxu1 %v6251_v24  ;;  %v1619_v56 = vrot.slane %v1618_v17, 4  ;;  %v1077_v34 = vor.u32 %v1075_v7, %v1074_v19 }
  0xa2   : > { %v1079_v28 = vrot.slane %v1074_v19, 4  ;;  %v6119_v30 = vadd.f32 -1.0, %v7244_v53  ;;  %v1499_v6 = vld [vmem:[#allocation2 + $0x4c] sm:$0x1]  ;;  %v1628_v13 = vor.u32 %v1627_v14, %v1623_v27  ;;  %v558_v52 = vmin.f32 %v7961_v55, 0.0 }
  0xa3   : > { %v1083_v29 = vrot.slane %v1081_v18, 7  ;;  %v1624_v60 = vsel %vm7764_vm10, %v1619_v56, %v1623_v27  ;;  %v1631_v25 = vshll.u32 %v1499_v6, 16  ;;  %v1078_v9 = vsel %vm7393_vm2, %v7894_v35, %v1077_v34  ;;  %v305_v35 = vld [vmem:[#allocation2 + $0x60] sm:$0x1] }
  0xa4   : > { %v684_v62 = vsel %vm524_vm1, %v7883_v59, %v6119_v30  ;;  %v605_v37 = vmul.f32 1.442695, %v557_v21  ;;  %v1629_v16 = vrot.slane %v1628_v13, 4  ;;  %v607_v11 = vmul.f32 1.442695, %v558_v52  ;;  %v419_v56 = vld [vmem:[%s7362_s26 + $0xa0] sm:$0xff] }
  0xa5   : > { %v1086_v36 = vor.u32 %v1084_v63, %v1083_v29  ;;  %v6502_v54 = vpack.c.bf16 %v684_v62, %v683_v1  ;;  %v1633_v43 = vrot.slane %v1631_v25, 5  ;;  %v2140_v50 = vshrl.u32 %v2015_v23, 16  ;;  %v8004_v1 = vld [vmem:[#allocation2 + $0x7c] sm:$0x8]  ;;  %v7155_v21 = vld [vmem:[%s9274_s3 + $0x1e8] sm:$0xff]  }
  0xa6   : > { %7245 = vpow2.f32 %v605_v37  ;;  %v2145_v51 = vshrl.u32 %v2016_v2, 16  ;;  %v2148_v20 = vshll.u32 %v2016_v2, 16  ;;  %v2154_v44 = vshrl.u32 %v2017_v33, 16  ;;  %6878 = vmatprep.subr.bf16.mxu1 %v7155_v21 }
  0xa7   : > { %v1087_v46 = vsel %vm7393_vm2, %v1079_v28, %v1086_v36  ;;  %6527 = vst [vmem:[#allocation2 + $0xa8] sm:$0xff] %v6502_v54   ;;  %v1634_v59 = vsel %vm7764_vm10, %v1629_v16, %v1633_v43  ;;  %7247 = vpow2.f32 %v607_v11  ;;  %v6236_v58 = vrot.slane %v2140_v50, 11 }
  0xa8   : > { %v6191_v57 = vcombine.low %v1078_v9, %v1087_v46  ;;  %v6219_v42 = vcombine.low %v1624_v60, %v1634_v59  ;;  %v2147_v39 = vrot.slane %v2145_v51, 7  ;;  %v2157_v0 = vshll.u32 %v2017_v33, 16 }
  0xa9   : > { %v1111_v10 = vshrl.u32 %v889_v4, 16  ;;  %v306_v5 = vsel %vm7684_vm6, 0, %v305_v35  ;;  %v1636_v7 = vshrl.u32 %v1500_v48, 16  ;;  %v2156_v61 = vrot.slane %v2154_v44, 7 }
  0xaa   : > { %5085 = vmatmul.mubr.bf16.gmra.mrb[28].mxu0 %v6191_v57  ;;  %5214 = vmatmul.mubr.bf16.gmra.mrb[28].mxu1 %v6219_v42  ;;  %v2150_v8 = vor.u32 %v2148_v20, %v2147_v39  ;;  %v2152_v40 = vrot.slane %v2147_v39, 4  ;;  %307 = vst [vmem:[#allocation2 + $0x60] sm:$0x1] %v306_v5  ;;  %v1639_v24 = vshll.u32 %v1500_v48, 16  ;;  %vm525_vm3 = vcmp.gt.f32.partialorder %v7954_v22, 0.0 }
  0xab   : > { %v1638_v17 = vrot.slane %v1636_v7, 4  ;;  %v1645_v27 = vshll.u32 %v1501_v41, 16  ;;  %v1649_v19 = vshrl.u32 %v1501_v41, 16  ;;  %v2159_v63 = vor.u32 %v2157_v0, %v2156_v61  ;;  %v2019_v42 = vld [vmem:[#allocation2 + $0x80] sm:$0xf] }
  0xac   : > { %v2151_v18 = vsel %vm7393_vm2, %v6236_v58, %v2150_v8  ;;  %v1641_v14 = vrot.slane %v1639_v24, 5  ;;  %v8002_v53 = vadd.f32 %v7746_v31, %v7964_v12  ;;  %vm526_vm4 = vcmp.gt.f32.partialorder %v7961_v55, 0.0  ;;  %v2020_v0 = vld [vmem:[#allocation2 + $0x84] sm:$0xf]  ;;  %v312_v61 = vld [vmem:[#allocation2 + $0x74] sm:$0x1] }
  0xad   : > { %v8011_v23 = vrot.slane %v1111_v10, 11  ;;  %v1647_v34 = vrot.slane %v1645_v27, 5  ;;  %v1651_v28 = vrot.slane %v1649_v19, 4  ;;  %v2160_v30 = vsel %vm7393_vm2, %v2152_v40, %v2159_v63  ;;  %v1503_v24 = vld [vmem:[#allocation2 + $0x6c] sm:$0xf] }
  0xae   : > { %v7135_v29 = vld [vmem:[#allocation2 + $0xa8] sm:$0xff]   ;;  %v1642_v6 = vor.u32 %v1641_v14, %v1638_v17  ;;  %v559_v31 = vmin.f32 %v7971_v15, 0.0  ;;  %v6252_v13 = vcombine.low %v2151_v18, %v2160_v30  ;;  %v560_v52 = vmin.f32 %v8002_v53, 0.0  ;;  %v1504_v63 = vld [vmem:[#allocation2 + $0x70] sm:$0xf] }
  0xaf   : > { %v887_v12 = vld [vmem:[#allocation2 + $0xa8] sm:$0xf]  ;;  %v888_v60 = vld [vmem:[#allocation2 + $0xac] sm:$0xf]  ;;  %v1652_v25 = vor.u32 %v1651_v28, %v1647_v34  ;;  %v8018_v2 = vmul.f32 %v7774_v49, %v419_v56  ;;  %5092 = vmatprep.mubr.bf16.mxu0 %v7135_v29  ;;  %v2162_v46 = vshrl.u32 %v8004_v1, 16  ;;  %v2167_v40 = vshrl.u32 %v2019_v42, 16 }
  0xb0   : > { %v7246_v33 = vpop.eup %7245  ;;  %v1094_v9 = vshrl.u32 %v887_v12, 16  ;;  %v1097_v36 = vshll.u32 %v887_v12, 16  ;;  %v1103_v62 = vshrl.u32 %v888_v60, 16  ;;  %v1106_v37 = vshll.u32 %v888_v60, 16  ;;  %5221 = vmatprep.mubr.bf16.mxu1 %v6252_v13  ;;  %v892_v18 = vld [vmem:[#allocation2 + $0xcc] sm:$0x8] }
  0xb1   : > { %v7248_v4 = vpop.eup %7247  ;;  %v6120_v54 = vadd.f32 -1.0, %v7246_v33  ;;  %v1502_v16 = vld [vmem:[#allocation2 + $0x60] sm:$0x1]  ;;  %v1643_v43 = vrot.slane %v1642_v6, 4  ;;  %v1653_v11 = vrot.slane %v1652_v25, 4  ;;  %v2170_v19 = vshll.u32 %v2019_v42, 16 }
  0xb2   : > { %v1096_v50 = vrot.slane %v1094_v9, 7  ;;  %v1105_v51 = vrot.slane %v1103_v62, 7  ;;  %v6121_v35 = vadd.f32 -1.0, %v7248_v4  ;;  %v1655_v48 = vshll.u32 %v1502_v16, 16  ;;  %v7160_v25 = vld [vmem:[%s9274_s3 + $0x1f0] sm:$0xff]  }
  0xb3   : > { %v685_v57 = vsel %vm525_vm3, %v7954_v22, %v6120_v54  ;;  %v1648_v59 = vsel %vm7764_vm10, %v1643_v43, %v1647_v34  ;;  %v609_v20 = vmul.f32 1.442695, %v559_v31  ;;  %v611_v41 = vmul.f32 1.442695, %v560_v52  ;;  %v420_v34 = vld [vmem:[%s7362_s26 + $0xa8] sm:$0xff] }
  0xb4   : > { %v1099_v58 = vor.u32 %v1097_v36, %v1096_v50  ;;  %v1101_v39 = vrot.slane %v1096_v50, 4  ;;  %v1108_v44 = vor.u32 %v1106_v37, %v1105_v51  ;;  %v686_v45 = vsel %vm526_vm4, %v7961_v55, %v6121_v35  ;;  %v7158_v55 = vld [vmem:[%s9274_s3 + $0x1a8] sm:$0xff]   ;;  %v8054_v54 = vld [vmem:[%s9273_s2] ss:$0 sm:$0xff]  ;;  %v2021_v43 = vld [vmem:[#allocation2 + $0x90] sm:$0x8] }
  0xb5   : > { %v6468_v10 = vpack.c.bf16 %v685_v57, %v685_v57  ;;  %v6469_v5 = vpack.c.bf16 %v686_v45, %v686_v45  ;;  %v1657_v7 = vrot.slane %v1655_v48, 5  ;;  %7249 = vpow2.f32 %v609_v20  ;;  %6879 = vmatpush3.bf16.msra.mxu1 %v7158_v55 }
  0xb6   : > { %v1100_v22 = vsel %vm7393_vm2, %v7940_v26, %v1099_v58  ;;  %v1109_v8 = vsel %vm7393_vm2, %v1101_v39, %v1108_v44  ;;  %7251 = vpow2.f32 %v611_v41  ;;  %v2176_v26 = vshrl.u32 %v2020_v0, 16  ;;  %6880 = vmatprep.subr.bf16.mxu1 %v7160_v25 }
  0xb7   : > { %v6192_v17 = vcombine.low %v1100_v22, %v1109_v8  ;;  %846 = vst [vmem:[#allocation2 + $0xbc] sm:$0xf] %v6468_v10  ;;  %847 = vst [vmem:[#allocation2 + $0xc0] sm:$0xf] %v6469_v5  ;;  %v1658_v27 = vsel %vm7764_vm10, %v1653_v11, %v1657_v7  ;;  %vm527_vm5 = vcmp.gt.f32.partialorder %v7971_v15, 0.0  ;;  %v6237_v1 = vrot.slane %v2162_v46, 11 }
  0xb8   : > { %v6220_v14 = vcombine.low %v1648_v59, %v1658_v27  ;;  %v2169_v56 = vrot.slane %v2167_v40, 7  ;;  %v2179_v21 = vshll.u32 %v2020_v0, 16  ;;  %v2178_v28 = vrot.slane %v2176_v26, 7  ;;  %v7163_v40 = vld [vmem:[%s9274_s3 + $0x1b0] sm:$0xff]  }
  0xb9   : > { %5093 = vmatmul.mubr.bf16.gmra.mrb[32].mxu0 %v6192_v17  ;;  %v313_v29 = vsel %vm7684_vm6, 0, %v312_v61  ;;  %v1660_v30 = vshrl.u32 %v1503_v24, 16  ;;  %v1663_v6 = vshll.u32 %v1503_v24, 16  ;;  %v1133_v60 = vshrl.u32 %v892_v18, 16  ;;  %6881 = vmatpush3.bf16.msra.mxu1 %v7163_v40 }
  0xba   : > { %5222 = vmatmul.mubr.bf16.gmra.mrb[32].mxu1 %v6220_v14  ;;  %v2172_v31 = vor.u32 %v2170_v19, %v2169_v56  ;;  %v2174_v12 = vrot.slane %v2169_v56, 4  ;;  %314 = vst [vmem:[#allocation2 + $0x74] sm:$0x1] %v313_v29  ;;  %v1669_v13 = vshll.u32 %v1504_v63, 16  ;;  %v2181_v52 = vor.u32 %v2179_v21, %v2178_v28  ;;  %v895_v14 = vld [vmem:[#allocation2 + $0xe0] sm:$0x8] }
  0xbb   : > { %v1662_v33 = vrot.slane %v1660_v30, 4  ;;  %v1665_v9 = vrot.slane %v1663_v6, 5  ;;  %v1673_v36 = vshrl.u32 %v1504_v63, 16  ;;  %v459_v4 = vmul.f32 %v7774_v49, %v420_v34  ;;  %v2022_v63 = vld [vmem:[#allocation2 + $0x94] sm:$0xf] }
  0xbc   : > { %v2173_v62 = vsel %vm7393_vm2, %v6237_v1, %v2172_v31  ;;  %v8048_v37 = vrot.slane %v1669_v13, 5  ;;  %v8058_v16 = vadd.f32 %v8054_v54, %v8018_v2  ;;  %vm528_vm0 = vcmp.gt.f32.partialorder %v8002_v53, 0.0  ;;  %v2023_v28 = vld [vmem:[#allocation2 + $0x98] sm:$0xf]  ;;  %v319_v29 = vld [vmem:[#allocation2 + $0x88] sm:$0x1] }
  0xbd   : > { %v2182_v11 = vsel %vm7393_vm2, %v2174_v12, %v2181_v52  ;;  %v1666_v46 = vor.u32 %v1665_v9, %v1662_v33  ;;  %v1675_v50 = vrot.slane %v1673_v36, 4  ;;  %v8063_v35 = vrot.slane %v1133_v60, 11  ;;  %v1506_v30 = vld [vmem:[#allocation2 + $0x80] sm:$0xf]  ;;  %v1507_v52 = vld [vmem:[#allocation2 + $0x84] sm:$0xf] }
  0xbe   : > { %v7138_v51 = vld [vmem:[#allocation2 + $0xbc] sm:$0xff]   ;;  %v6253_v49 = vcombine.low %v2173_v62, %v2182_v11  ;;  %v8067_v41 = vadd.f32 %v8054_v54, %v459_v4  ;;  %v561_v42 = vmin.f32 %v8058_v16, 0.0  ;;  %v2184_v8 = vshrl.u32 %v2021_v43, 16  ;;  %v2024_v62 = vld [vmem:[#allocation2 + $0xa4] sm:$0x8] }
  0xbf   : > { %v7250_v48 = vpop.eup %7249  ;;  %v890_v57 = vld [vmem:[#allocation2 + $0xbc] sm:$0xf]  ;;  %v891_v59 = vld [vmem:[#allocation2 + $0xc0] sm:$0xf]  ;;  %v1667_v20 = vrot.slane %v1666_v46, 4  ;;  %v1676_v2 = vor.u32 %v1675_v50, %v8048_v37  ;;  %5100 = vmatprep.mubr.bf16.mxu0 %v7138_v51  ;;  %v2189_v13 = vshrl.u32 %v2022_v63, 16 }
  0xc0   : > { %v7252_v58 = vpop.eup %7251  ;;  %v1116_v39 = vshrl.u32 %v890_v57, 16  ;;  %v1119_v44 = vshll.u32 %v890_v57, 16  ;;  %v1125_v45 = vshrl.u32 %v891_v59, 16  ;;  %v1128_v0 = vshll.u32 %v891_v59, 16  ;;  %5229 = vmatprep.mubr.bf16.mxu1 %v6253_v49  ;;  %v2025_v49 = vld [vmem:[#allocation2 + $0xa8] sm:$0xf] }
  0xc1   : > { %v6122_v10 = vadd.f32 -1.0, %v7250_v48  ;;  %v6123_v5 = vadd.f32 -1.0, %v7252_v58  ;;  %v1505_v7 = vld [vmem:[#allocation2 + $0x74] sm:$0x1]  ;;  %v1672_v22 = vsel %vm7764_vm10, %v1667_v20, %v8048_v37  ;;  %v1677_v55 = vrot.slane %v1676_v2, 4  ;;  %v7168_v2 = vld [vmem:[%s9274_s3 + $0x1b8] sm:$0xff]  }
  0xc2   : > { %v1118_v61 = vrot.slane %v1116_v39, 7  ;;  %v1127_v24 = vrot.slane %v1125_v45, 7  ;;  %v1679_v17 = vshll.u32 %v1505_v7, 16  ;;  %v562_v26 = vmin.f32 %v8067_v41, 0.0  ;;  %v429_v45 = vld [vmem:[%s7362_s26 + $0xf0] sm:$0xff] }
  0xc3   : > { %v687_v27 = vsel %vm527_vm5, %v7971_v15, %v6122_v10  ;;  %v688_v19 = vsel %vm528_vm0, %v8002_v53, %v6123_v5  ;;  %v613_v18 = vmul.f32 1.442695, %v561_v42  ;;  %v7165_v15 = vld [vmem:[%s9274_s3 + $0x1f8] sm:$0xff]   ;;  %v6238_v31 = vrot.slane %v2184_v8, 11  ;;  %v2026_v5 = vld [vmem:[#allocation2 + $0xac] sm:$0xf] }
  0xc4   : > { %v1121_v1 = vor.u32 %v1119_v44, %v1118_v61  ;;  %v1123_v56 = vrot.slane %v1118_v61, 4  ;;  %v1130_v21 = vor.u32 %v1128_v0, %v1127_v24  ;;  %v6507_v34 = vpack.c.bf16 %v688_v19, %v687_v27  ;;  %6882 = vmatprep.subr.bf16.mxu1 %v7165_v15  ;;  %v430_v8 = vld [vmem:[%s7362_s26 + $0xf8] sm:$0xff]  ;;  %s268_s26 = scalar_lea.vmem %s9277_s6, %s9434_s22 }
  0xc5   : > { %v1681_v6 = vrot.slane %v1679_v17, 5  ;;  %7253 = vpow2.f32 %v613_v18  ;;  %v615_v53 = vmul.f32 1.442695, %v562_v26  ;;  %v2192_v25 = vshll.u32 %v2022_v63, 16  ;;  %6883 = vmatpush3.bf16.msra.mxu1 %v7168_v2  ;;  %v7264_v17 = vld [vmem:[%s9272_s1] ss:$0 sm:$0xff] }
  0xc6   : > { %v1122_v12 = vsel %vm7393_vm2, %v8011_v23, %v1121_v1  ;;  %v1131_v60 = vsel %vm7393_vm2, %v1123_v56, %v1130_v21  ;;  %6528 = vst [vmem:[#allocation2 + $0xd0] sm:$0xff] %v6507_v34   ;;  %vm529_vm7 = vcmp.gt.f32.partialorder %v8058_v16, 0.0  ;;  %v2198_v36 = vshrl.u32 %v2023_v28, 16 }
  0xc7   : > { %v6193_v33 = vcombine.low %v1122_v12, %v1131_v60  ;;  %v1682_v9 = vsel %vm7764_vm10, %v1677_v55, %v1681_v6  ;;  %7255 = vpow2.f32 %v615_v53  ;;  %v2191_v4 = vrot.slane %v2189_v13, 7 }
  0xc8   : > { %v6221_v37 = vcombine.low %v1672_v22, %v1682_v9  ;;  %v2201_v23 = vshll.u32 %v2023_v28, 16  ;;  %v1155_v43 = vshrl.u32 %v895_v14, 16  ;;  %vm530_vm8 = vcmp.gt.f32.partialorder %v8067_v41, 0.0 }
  0xc9   : > { %5101 = vmatmul.mubr.bf16.gmra.mrb[36].mxu0 %v6193_v33  ;;  %v2200_v11 = vrot.slane %v2198_v36, 7  ;;  %v320_v46 = vsel %vm7684_vm6, 0, %v319_v29  ;;  %v1684_v50 = vshrl.u32 %v1506_v30, 16  ;;  %v1687_v51 = vshll.u32 %v1506_v30, 16 }
  0xca   : > { %5230 = vmatmul.mubr.bf16.gmra.mrb[36].mxu1 %v6221_v37  ;;  %v2194_v48 = vor.u32 %v2192_v25, %v2191_v4  ;;  %v2196_v57 = vrot.slane %v2191_v4, 4  ;;  %v8097_v59 = vrot.slane %v1155_v43, 11  ;;  %321 = vst [vmem:[#allocation2 + $0x88] sm:$0x1] %v320_v46  ;;  %v1693_v20 = vshll.u32 %v1507_v52, 16 }
  0xcb   : > { %v2203_v42 = vor.u32 %v2201_v23, %v2200_v11  ;;  %v1686_v58 = vrot.slane %v1684_v50, 4  ;;  %v1689_v39 = vrot.slane %v1687_v51, 5  ;;  %v1697_v44 = vshrl.u32 %v1507_v52, 16  ;;  %v2627_v11 = vld [vmem:[#allocation2 + $0x1c] sm:$0xf] }
  0xcc   : > { %v2195_v0 = vsel %vm7393_vm2, %v6238_v31, %v2194_v48  ;;  %v8105_v10 = vrot.slane %v1693_v20, 5  ;;  %v2206_v7 = vshrl.u32 %v2024_v62, 16  ;;  %v2211_v22 = vshrl.u32 %v2025_v49, 16  ;;  %v2628_v46 = vld [vmem:[#allocation2 + $0x20] sm:$0xf] }
  0xcd   : > { %v7141_v40 = vld [vmem:[#allocation2 + $0xd0] sm:$0xff]   ;;  %v2204_v61 = vsel %vm7393_vm2, %v2196_v57, %v2203_v42  ;;  %v1690_v24 = vor.u32 %v1689_v39, %v1686_v58  ;;  %v1699_v55 = vrot.slane %v1697_v44, 4  ;;  %v8113_v27 = vmul.f32 %v7264_v17, %v429_v45  ;;  %v2629_v57 = vld [vmem:[#allocation2 + $0x24] sm:$0x1]  ;;  %v326_v58 = vld [vmem:[#allocation2 + $0x9c] sm:$0x1] }
  0xce   : > { %v893_v19 = vld [vmem:[#allocation2 + $0xd0] sm:$0xf]  ;;  %v894_v26 = vld [vmem:[#allocation2 + $0xd4] sm:$0xf]  ;;  %v6254_v18 = vcombine.low %v2195_v0, %v2204_v61  ;;  %v8115_v63 = vrot.slane %v2206_v7, 11  ;;  %v2213_v14 = vrot.slane %v2211_v22, 7  ;;  %v8117_v1 = vmul.f32 %v7264_v17, %v430_v8  ;;  %5108 = vmatprep.mubr.bf16.mxu0 %v7141_v40 }
  0xcf   : > { %v7254_v56 = vpop.eup %7253  ;;  %v1138_v21 = vshrl.u32 %v893_v19, 16  ;;  %v1141_v34 = vshll.u32 %v893_v19, 16  ;;  %v1147_v28 = vshrl.u32 %v894_v26, 16  ;;  %v1150_v29 = vshll.u32 %v894_v26, 16 }
  0xd0   : > { %v6124_v30 = vadd.f32 -1.0, %v7254_v56  ;;  %5237 = vmatprep.mubr.bf16.mxu1 %v6254_v18  ;;  %v1691_v15 = vrot.slane %v1690_v24, 4  ;;  %v1700_v6 = vor.u32 %v1699_v55, %v8105_v10  ;;  %v2214_v53 = vshll.u32 %v2025_v49, 16  ;;  %v1510_v24 = vld [vmem:[#allocation2 + $0x98] sm:$0xf] }
  0xd1   : > { %v7256_v31 = vpop.eup %7255  ;;  %v1140_v12 = vrot.slane %v1138_v21, 7  ;;  %v1149_v60 = vrot.slane %v1147_v28, 7  ;;  %v1508_v13 = vld [vmem:[#allocation2 + $0x88] sm:$0x1]  ;;  %v2218_v25 = vrot.slane %v2213_v14, 4  ;;  %v2220_v52 = vshrl.u32 %v2026_v5, 16 }
  0xd2   : > { %v6125_v33 = vadd.f32 -1.0, %v7256_v31  ;;  %v689_v9 = vsel %vm529_vm7, %v8058_v16, %v6124_v30  ;;  %v1696_v36 = vsel %vm7764_vm10, %v1691_v15, %v8105_v10  ;;  %v1701_v62 = vrot.slane %v1700_v6, 4  ;;  %v2027_v18 = vld [vmem:[#allocation2 + $0xb8] sm:$0x8] }
  0xd3   : > { %v1143_v37 = vor.u32 %v1141_v34, %v1140_v12  ;;  %v1145_v4 = vrot.slane %v1140_v12, 4  ;;  %v1152_v23 = vor.u32 %v1150_v29, %v1149_v60  ;;  %v6472_v43 = vpack.c.bf16 %v689_v9, %v689_v9 }
  0xd4   : > { %v690_v50 = vsel %vm530_vm8, %v8067_v41, %v6125_v33  ;;  %v1703_v51 = vshll.u32 %v1508_v13, 16  ;;  %v2216_v49 = vor.u32 %v2214_v53, %v2213_v14  ;;  %v2222_v48 = vrot.slane %v2220_v52, 7 }
  0xd5   : > { %v1144_v16 = vsel %vm7393_vm2, %v8063_v35, %v1143_v37  ;;  %v1153_v20 = vsel %vm7393_vm2, %v1145_v4, %v1152_v23  ;;  %v6473_v2 = vpack.c.bf16 %v690_v50, %v690_v50  ;;  %850 = vst [vmem:[#allocation2 + $0xe4] sm:$0xf] %v6472_v43  ;;  %v2223_v42 = vshll.u32 %v2026_v5, 16  ;;  %v1509_v35 = vld [vmem:[#allocation2 + $0x94] sm:$0xf] }
  0xd6   : > { %v6194_v39 = vcombine.low %v1144_v16, %v1153_v20  ;;  %v1705_v44 = vrot.slane %v1703_v51, 5  ;;  %v2217_v41 = vsel %vm7393_vm2, %v8115_v63, %v2216_v49  ;;  %v2676_v45 = vshrl.u32 %v2627_v11, 16 }
  0xd7   : > { %851 = vst [vmem:[#allocation2 + $0xe8] sm:$0xf] %v6473_v2  ;;  %v2225_v0 = vor.u32 %v2223_v42, %v2222_v48  ;;  %v2679_v10 = vshll.u32 %v2627_v11, 16  ;;  %v2685_v7 = vshll.u32 %v2628_v46, 16  ;;  %v2689_v22 = vshrl.u32 %v2628_v46, 16 }
  0xd8   : > { %5109 = vmatmul.mubr.bf16.gmra.mrb[40].mxu0 %v6194_v39  ;;  %v1706_v8 = vsel %vm7764_vm10, %v1701_v62, %v1705_v44  ;;  %v2678_v40 = vrot.slane %v2676_v45, 4  ;;  %v2695_v5 = vshll.u32 %v2629_v57, 16  ;;  %v327_v61 = vsel %vm7684_vm6, 0, %v326_v58  ;;  %v2630_v39 = vld [vmem:[#allocation2 + $0x30] sm:$0xf] }
  0xd9   : > { %v6222_v55 = vcombine.low %v1696_v36, %v1706_v8  ;;  %v2226_v17 = vsel %vm7393_vm2, %v2218_v25, %v2225_v0  ;;  %v2681_v19 = vrot.slane %v2679_v10, 5  ;;  %v2687_v26 = vrot.slane %v2685_v7, 5  ;;  %328 = vst [vmem:[#allocation2 + $0x9c] sm:$0x1] %v327_v61  ;;  %v2631_v10 = vld [vmem:[#allocation2 + $0x34] sm:$0xf] }
  0xda   : > { %v6255_v63 = vcombine.low %v2217_v41, %v2226_v17  ;;  %v2691_v14 = vrot.slane %v2689_v22, 4  ;;  %v2697_v56 = vrot.slane %v2695_v5, 5  ;;  %v1708_v21 = vshrl.u32 %v1509_v35, 16  ;;  %v333_v5 = vld [vmem:[#allocation2 + $0xb0] sm:$0x1] }
  0xdb   : > { %5238 = vmatmul.mubr.bf16.gmra.mrb[40].mxu1 %v6222_v55  ;;  %v2682_v34 = vor.u32 %v2681_v19, %v2678_v40  ;;  %v1711_v28 = vshll.u32 %v1509_v35, 16  ;;  %v1717_v29 = vshll.u32 %v1510_v24, 16  ;;  %v1721_v30 = vshrl.u32 %v1510_v24, 16  ;;  %v2632_v40 = vld [vmem:[#allocation2 + $0x38] sm:$0x1] }
  0xdc   : > { %v896_v15 = vld [vmem:[#allocation2 + $0xe4] sm:$0xf]  ;;  %5245 = vmatprep.mubr.bf16.mxu1 %v6255_v63  ;;  %v2692_v6 = vor.u32 %v2691_v14, %v2687_v26  ;;  %v1710_v53 = vrot.slane %v1708_v21, 4  ;;  %v2228_v31 = vshrl.u32 %v2027_v18, 16  ;;  %v8145_v36 = vadd.f32 %v8054_v54, %v8113_v27  ;;  %v2028_v27 = vld [vmem:[#allocation2 + $0xbc] sm:$0xf] }
  0xdd   : > { %v1160_v12 = vshrl.u32 %v896_v15, 16  ;;  %v1163_v60 = vshll.u32 %v896_v15, 16  ;;  %v2683_v13 = vrot.slane %v2682_v34, 4  ;;  %v1713_v25 = vrot.slane %v1711_v28, 5  ;;  %v1512_v61 = vld [vmem:[#allocation2 + $0xa8] sm:$0xf] }
  0xde   : > { %v7144_v52 = vld [vmem:[#allocation2 + $0xe4] sm:$0xff]   ;;  %v2693_v9 = vrot.slane %v2692_v6, 4  ;;  %v8149_v62 = vadd.f32 %v8054_v54, %v8117_v1  ;;  %v1719_v51 = vrot.slane %v1717_v29, 5  ;;  %v1723_v49 = vrot.slane %v1721_v30, 4  ;;  %v2029_v1 = vld [vmem:[#allocation2 + $0xc0] sm:$0xf] }
  0xdf   : > { %v897_v33 = vld [vmem:[#allocation2 + $0xe8] sm:$0xf]  ;;  %v1162_v37 = vrot.slane %v1160_v12, 7  ;;  %v2688_v43 = vsel %vm7764_vm10, %v2683_v13, %v2687_v26  ;;  %5116 = vmatprep.mubr.bf16.mxu0 %v7144_v52  ;;  %v1714_v50 = vor.u32 %v1713_v25, %v1710_v53  ;;  %v6240_v58 = vrot.slane %v2228_v31, 11  ;;  %v1513_v12 = vld [vmem:[#allocation2 + $0xac] sm:$0xf] }
  0xe0   : > { %v1169_v4 = vshrl.u32 %v897_v33, 16  ;;  %v1172_v23 = vshll.u32 %v897_v33, 16  ;;  %v2698_v11 = vsel %vm7764_vm10, %v2693_v9, %v2697_v56  ;;  %v1511_v46 = vld [vmem:[#allocation2 + $0x9c] sm:$0x1]  ;;  %v1724_v2 = vor.u32 %v1723_v49, %v1719_v51  ;;  %v2030_v9 = vld [vmem:[#allocation2 + $0xcc] sm:$0x8] }
  0xe1   : > { %v1165_v48 = vor.u32 %v1163_v60, %v1162_v37  ;;  %v1167_v57 = vrot.slane %v1162_v37, 4  ;;  %v6280_v54 = vcombine.low %v2688_v43, %v2698_v11  ;;  %v1715_v20 = vrot.slane %v1714_v50, 4  ;;  %v2031_v37 = vld [vmem:[#allocation2 + $0xd0] sm:$0xf] }
  0xe2   : > { %v1171_v16 = vrot.slane %v1169_v4, 7  ;;  %v1727_v42 = vshll.u32 %v1511_v46, 16  ;;  %v2233_v45 = vshrl.u32 %v2028_v27, 16  ;;  %v2236_v0 = vshll.u32 %v2028_v27, 16  ;;  %v7149_v46 = vld [vmem:[#allocation2 + $0x1c] sm:$0xff]  }
  0xe3   : > { %v1166_v44 = vsel %vm7393_vm2, %v8097_v59, %v1165_v48  ;;  %v1720_v7 = vsel %vm7764_vm10, %v1715_v20, %v1719_v51  ;;  %v1725_v22 = vrot.slane %v1724_v2, 4  ;;  %v2242_v8 = vshrl.u32 %v2029_v1, 16  ;;  %v2032_v48 = vld [vmem:[#allocation2 + $0xd4] sm:$0xf]  ;;  %v2633_v20 = vld [vmem:[#allocation2 + $0x44] sm:$0xf] }
  0xe4   : > { %v1174_v41 = vor.u32 %v1172_v23, %v1171_v16  ;;  %v1729_v35 = vrot.slane %v1727_v42, 5  ;;  %v2235_v55 = vrot.slane %v2233_v45, 7  ;;  %v2245_v17 = vshll.u32 %v2029_v1, 16 }
  0xe5   : > { %v2700_v19 = vshrl.u32 %v2630_v39, 16  ;;  %v2244_v18 = vrot.slane %v2242_v8, 7  ;;  %v2703_v63 = vshll.u32 %v2630_v39, 16  ;;  %v2709_v30 = vshll.u32 %v2631_v10, 16 }
  0xe6   : > { %v1175_v24 = vsel %vm7393_vm2, %v1167_v57, %v1174_v41  ;;  %v1730_v26 = vsel %vm7764_vm10, %v1725_v22, %v1729_v35  ;;  %v2238_v56 = vor.u32 %v2236_v0, %v2235_v55  ;;  %v2240_v21 = vrot.slane %v2235_v55, 4  ;;  %v7156_v41 = vld [vmem:[%s9274_s3 + $0x208] sm:$0xff]  }
  0xe7   : > { %v6195_v59 = vcombine.low %v1166_v44, %v1175_v24  ;;  %v6223_v14 = vcombine.low %v1720_v7, %v1730_v26  ;;  %v2702_v34 = vrot.slane %v2700_v19, 4  ;;  %v2247_v28 = vor.u32 %v2245_v17, %v2244_v18  ;;  %v2634_v44 = vld [vmem:[#allocation2 + $0x48] sm:$0xf]  ;;  %v7161_v26 = vld [vmem:[%s9274_s3 + $0x210] sm:$0xff]  }
  0xe8   : > { %v2705_v29 = vrot.slane %v2703_v63, 5  ;;  %v2713_v15 = vshrl.u32 %v2631_v10, 16  ;;  %v2239_v6 = vsel %vm7393_vm2, %v6240_v58, %v2238_v56  ;;  %v2719_v53 = vshll.u32 %v2632_v40, 16  ;;  %v2635_v40 = vld [vmem:[#allocation2 + $0x4c] sm:$0x1] }
  0xe9   : > { %5117 = vmatmul.mubr.bf16.gmra.mrb[44].mxu0 %v6195_v59  ;;  %5246 = vmatmul.mubr.bf16.gmra.mrb[44].mxu1 %v6223_v14  ;;  %v334_v31 = vsel %vm7684_vm6, 0, %v333_v5  ;;  %v1732_v60 = vshrl.u32 %v1512_v61, 16  ;;  %v2248_v13 = vsel %vm7393_vm2, %v2240_v21, %v2247_v28  ;;  %v2711_v52 = vrot.slane %v2709_v30, 5  ;;  %v1515_v21 = vld [vmem:[#allocation2 + $0xbc] sm:$0xf]  ;;  %v7152_v28 = vld [vmem:[#allocation2 + $0x30] sm:$0xff]  }
  0xea   : > { %5350 = vmatprep.mubr.bf16.mxu0 %v6280_v54  ;;  %v2706_v25 = vor.u32 %v2705_v29, %v2702_v34  ;;  %v2715_v33 = vrot.slane %v2713_v15, 4  ;;  %335 = vst [vmem:[#allocation2 + $0xb0] sm:$0x1] %v334_v31  ;;  %v6256_v4 = vcombine.low %v2239_v6, %v2248_v13  ;;  %v2721_v23 = vrot.slane %v2719_v53, 5  ;;  %v1516_v15 = vld [vmem:[#allocation2 + $0xc0] sm:$0xf] }
  0xeb   : > { %v1734_v43 = vrot.slane %v1732_v60, 4  ;;  %v1735_v11 = vshll.u32 %v1512_v61, 16  ;;  %v1741_v49 = vshll.u32 %v1513_v12, 16  ;;  %v1745_v27 = vshrl.u32 %v1513_v12, 16  ;;  %v340_v61 = vld [vmem:[#allocation2 + $0xc4] sm:$0x1] }
  0xec   : > { %v2707_v50 = vrot.slane %v2706_v25, 4  ;;  %v2716_v51 = vor.u32 %v2715_v33, %v2711_v52  ;;  %5253 = vmatprep.mubr.bf16.mxu1 %v6256_v4  ;;  %v2250_v16 = vshrl.u32 %v2030_v9, 16  ;;  %v2255_v54 = vshrl.u32 %v2031_v37, 16  ;;  %v2033_v60 = vld [vmem:[#allocation2 + $0xe0] sm:$0x8]  ;;  %v7166_v25 = vld [vmem:[%s9274_s3 + $0x218] sm:$0xff]  }
  0xed   : > { %v1737_v57 = vrot.slane %v1735_v11, 5  ;;  %v2258_v1 = vshll.u32 %v2031_v37, 16  ;;  %v1743_v58 = vrot.slane %v1741_v49, 5  ;;  %v1747_v39 = vrot.slane %v1745_v27, 4  ;;  %v2034_v13 = vld [vmem:[#allocation2 + $0xe4] sm:$0xf] }
  0xee   : > { %v2712_v2 = vsel %vm7764_vm10, %v2707_v50, %v2711_v52  ;;  %v2717_v42 = vrot.slane %v2716_v51, 4  ;;  %v6241_v0 = vrot.slane %v2250_v16, 11  ;;  %v2257_v10 = vrot.slane %v2255_v54, 7  ;;  %v2035_v54 = vld [vmem:[#allocation2 + $0xe8] sm:$0xf] }
  0xef   : > { %v1738_v45 = vor.u32 %v1737_v57, %v1734_v43  ;;  %v2264_v7 = vshrl.u32 %v2032_v48, 16  ;;  %v1748_v35 = vor.u32 %v1747_v39, %v1743_v58  ;;  %v2267_v8 = vshll.u32 %v2032_v48, 16  ;;  %v2636_v39 = vld [vmem:[#allocation2 + $0x58] sm:$0xf] }
  0xf0   : > { %v2722_v22 = vsel %vm7764_vm10, %v2717_v42, %v2721_v23  ;;  %v2724_v5 = vshrl.u32 %v2633_v20, 16  ;;  %v2260_v19 = vor.u32 %v2258_v1, %v2257_v10  ;;  %v2262_v59 = vrot.slane %v2257_v10, 4  ;;  %v7171_v1 = vld [vmem:[%s9274_s3 + $0x220] sm:$0xff]  }
  0xf1   : > { %5351 = vmatmul.mubr.bf16.vlgmr.msra.gmra.mrb[48].mxu0 %v7149_v46  ;;  %v6281_v24 = vcombine.low %v2712_v2, %v2722_v22  ;;  %v1514_v55 = vld [vmem:[#allocation2 + $0xb0] sm:$0x1]  ;;  %v1739_v17 = vrot.slane %v1738_v45, 4  ;;  %v1749_v18 = vrot.slane %v1748_v35, 4  ;;  %v2266_v14 = vrot.slane %v2264_v7, 7 }
  0xf2   : > { %7005 = vmatpush3.bf16.msra.mxu0 %v7976_v3  ;;  %v1751_v63 = vshll.u32 %v1514_v55, 16  ;;  %v2726_v56 = vrot.slane %v2724_v5, 4  ;;  %v2261_v3 = vsel %vm7393_vm2, %v6241_v0, %v2260_v19  ;;  %v2727_v29 = vshll.u32 %v2633_v20, 16  ;;  %v2637_v55 = vld [vmem:[#allocation2 + $0x5c] sm:$0xf] }
  0xf3   : > { %7006 = vmatprep.subr.bf16.mxu0 %v7156_v41  ;;  %5358 = vmatprep.mubr.bf16.mxu0 %v6281_v24  ;;  %v1744_v34 = vsel %vm7764_vm10, %v1739_v17, %v1743_v58  ;;  %v2733_v30 = vshll.u32 %v2634_v44, 16  ;;  %v2269_v53 = vor.u32 %v2267_v8, %v2266_v14  ;;  %v2737_v31 = vshrl.u32 %v2634_v44, 16 }
  0xf4   : > { %v1753_v6 = vrot.slane %v1751_v63, 5  ;;  %v2743_v12 = vshll.u32 %v2635_v40, 16  ;;  %v2729_v52 = vrot.slane %v2727_v29, 5  ;;  %v341_v9 = vsel %vm7684_vm6, 0, %v340_v61  ;;  %v7154_v61 = vld [vmem:[#allocation2 + $0x44] sm:$0xff]  }
  0xf5   : > { %v2735_v33 = vrot.slane %v2733_v30, 5  ;;  %v1756_v37 = vshrl.u32 %v1515_v21, 16  ;;  %v2270_v23 = vsel %vm7393_vm2, %v2262_v59, %v2269_v53  ;;  %v2739_v43 = vrot.slane %v2737_v31, 4  ;;  %342 = vst [vmem:[#allocation2 + $0xc4] sm:$0x1] %v341_v9 }
  0xf6   : > { %7007 = vmatpush3.bf16.msra.mxu0 %v7156_v41  ;;  %v1754_v4 = vsel %vm7764_vm10, %v1749_v18, %v1753_v6  ;;  %v2745_v11 = vrot.slane %v2743_v12, 5  ;;  %v6257_v50 = vcombine.low %v2261_v3, %v2270_v23  ;;  %v2730_v51 = vor.u32 %v2729_v52, %v2726_v56  ;;  %v2638_v63 = vld [vmem:[#allocation2 + $0x60] sm:$0x1]  ;;  %v347_v6 = vld [vmem:[#allocation2 + $0xd8] sm:$0x1] }
  0xf7   : > { %7008 = vmatprep.subr.bf16.mxu0 %v7161_v26  ;;  %v6224_v46 = vcombine.low %v1744_v34, %v1754_v4  ;;  %v1758_v49 = vrot.slane %v1756_v37, 4  ;;  %v2740_v27 = vor.u32 %v2739_v43, %v2735_v33  ;;  %v1759_v48 = vshll.u32 %v1515_v21, 16  ;;  %v2037_v52 = vld [vmem:[#allocation2 + $0xf8] sm:$0xf]  ;;  %v1519_v23 = vld [vmem:[#allocation2 + $0xd4] sm:$0xf] }
  0xf8   : > { %v1765_v57 = vshll.u32 %v1516_v15, 16  ;;  %v1769_v16 = vshrl.u32 %v1516_v15, 16  ;;  %v2731_v20 = vrot.slane %v2730_v51, 4  ;;  %v2272_v2 = vshrl.u32 %v2033_v60, 16  ;;  %v7181_v43 = vld [vmem:[%s9274_s3 + $0x230] sm:$0xff]  }
  0xf9   : > { %5359 = vmatmul.mubr.bf16.gmra.mrb[52].mxu0 %v7152_v28  ;;  %5254 = vmatmul.mubr.bf16.gmra.mrb[48].mxu1 %v6224_v46  ;;  %v2277_v42 = vshrl.u32 %v2034_v13, 16  ;;  %v2280_v58 = vshll.u32 %v2034_v13, 16  ;;  %v2741_v44 = vrot.slane %v2740_v27, 4  ;;  %v1761_v41 = vrot.slane %v1759_v48, 5  ;;  %v7176_v28 = vld [vmem:[%s9274_s3 + $0x228] sm:$0xff]  }
  0xfa   : > { %7009 = vmatpush3.bf16.msra.mxu0 %v7161_v26  ;;  %5261 = vmatprep.mubr.bf16.mxu1 %v6257_v50  ;;  %v1767_v45 = vrot.slane %v1765_v57, 5  ;;  %v1771_v0 = vrot.slane %v1769_v16, 4  ;;  %v2736_v10 = vsel %vm7764_vm10, %v2731_v20, %v2735_v33  ;;  %v6242_v7 = vrot.slane %v2272_v2, 11  ;;  %v1518_v13 = vld [vmem:[#allocation2 + $0xd0] sm:$0xf] }
  0xfb   : > { %7010 = vmatprep.subr.bf16.mxu0 %v7166_v25  ;;  %v2279_v22 = vrot.slane %v2277_v42, 7  ;;  %v2286_v35 = vshrl.u32 %v2035_v54, 16  ;;  %v2746_v8 = vsel %vm7764_vm10, %v2741_v44, %v2745_v11  ;;  %v1762_v40 = vor.u32 %v1761_v41, %v1758_v49  ;;  %v2038_v16 = vld [vmem:[#allocation2 + $0xfc] sm:$0xf]  ;;  %v2639_v41 = vld [vmem:[#allocation2 + $0x6c] sm:$0xf] }
  0xfc   : > { %v1772_v5 = vor.u32 %v1771_v0, %v1767_v45  ;;  %v2289_v24 = vshll.u32 %v2035_v54, 16  ;;  %v6282_v17 = vcombine.low %v2736_v10, %v2746_v8  ;;  %v1517_v19 = vld [vmem:[#allocation2 + $0xc4] sm:$0x1]  ;;  %v2748_v34 = vshrl.u32 %v2636_v39, 16 }
  0xfd   : > { %v2282_v59 = vor.u32 %v2280_v58, %v2279_v22  ;;  %v2284_v26 = vrot.slane %v2279_v22, 4  ;;  %v2288_v18 = vrot.slane %v2286_v35, 7  ;;  %v1763_v14 = vrot.slane %v1762_v40, 4  ;;  %v2640_v22 = vld [vmem:[#allocation2 + $0x70] sm:$0xf] }
  0xfe   : > { %7011 = vmatpush3.bf16.msra.mxu0 %v7166_v25  ;;  %v1773_v56 = vrot.slane %v1772_v5, 4  ;;  %v1775_v21 = vshll.u32 %v1517_v19, 16  ;;  %5366 = vmatprep.mubr.bf16.mxu0 %v6282_v17  ;;  %v2751_v30 = vshll.u32 %v2636_v39, 16  ;;  %v2757_v15 = vshll.u32 %v2637_v55, 16  ;;  %v2036_v25 = vld [vmem:[#allocation2 + $0xf4] sm:$0x8] }
  0xff   : > { %7012 = vmatprep.subr.bf16.mxu0 %v7171_v1  ;;  %v2283_v3 = vsel %vm7393_vm2, %v6242_v7, %v2282_v59  ;;  %v2291_v29 = vor.u32 %v2289_v24, %v2288_v18  ;;  %v1768_v53 = vsel %vm7764_vm10, %v1763_v14, %v1767_v45  ;;  %v2750_v12 = vrot.slane %v2748_v34, 4  ;;  %v7157_v17 = vld [vmem:[#allocation2 + $0x58] sm:$0xff]   ;;  %v2641_v14 = vld [vmem:[#allocation2 + $0x74] sm:$0x1] }
 0x100   : > { %v1777_v31 = vrot.slane %v1775_v21, 5  ;;  %v2761_v60 = vshrl.u32 %v2637_v55, 16  ;;  %v2753_v9 = vrot.slane %v2751_v30, 5  ;;  %v2759_v37 = vrot.slane %v2757_v15, 5 }
 0x101   : > { %5367 = vmatmul.mubr.bf16.gmra.mrb[56].mxu0 %v7154_v61  ;;  %v2292_v33 = vsel %vm7393_vm2, %v2284_v26, %v2291_v29  ;;  %v2767_v4 = vshll.u32 %v2638_v63, 16  ;;  %v348_v51 = vsel %vm7684_vm6, 0, %v347_v6  ;;  %v1780_v57 = vshrl.u32 %v1518_v13, 16 }
 0x102   : > { %7013 = vmatpush3.bf16.msra.mxu0 %v7171_v1  ;;  %v1778_v11 = vsel %vm7764_vm10, %v1773_v56, %v1777_v31  ;;  %v6258_v46 = vcombine.low %v2283_v3, %v2292_v33  ;;  %v2763_v50 = vrot.slane %v2761_v60, 4  ;;  %v2754_v27 = vor.u32 %v2753_v9, %v2750_v12  ;;  %349 = vst [vmem:[#allocation2 + $0xd8] sm:$0x1] %v348_v51  ;;  %v354_v56 = vld [vmem:[#allocation2 + $0xec] sm:$0x1] }
 0x103   : > { %7014 = vmatprep.subr.bf16.mxu0 %v7176_v28  ;;  %v6225_v49 = vcombine.low %v1768_v53, %v1778_v11  ;;  %v2769_v48 = vrot.slane %v2767_v4, 5  ;;  %v1783_v1 = vshll.u32 %v1518_v13, 16  ;;  %v1789_v20 = vshll.u32 %v1519_v23, 16  ;;  %v1521_v31 = vld [vmem:[#allocation2 + $0xe4] sm:$0xf] }
 0x104   : > { %v2764_v54 = vor.u32 %v2763_v50, %v2759_v37  ;;  %v1793_v2 = vshrl.u32 %v1519_v23, 16  ;;  %v2755_v42 = vrot.slane %v2754_v27, 4  ;;  %v1782_v58 = vrot.slane %v1780_v57, 4  ;;  %v1522_v23 = vld [vmem:[#allocation2 + $0xe8] sm:$0xf] }
 0x105   : > { %5262 = vmatmul.mubr.bf16.gmra.mrb[52].mxu1 %v6225_v49  ;;  %v2294_v39 = vshrl.u32 %v2036_v25, 16  ;;  %v2299_v44 = vshrl.u32 %v2037_v52, 16  ;;  %v1785_v0 = vrot.slane %v1783_v1, 5  ;;  %v1791_v10 = vrot.slane %v1789_v20, 5 }
 0x106   : > { %7015 = vmatpush3.bf16.msra.mxu0 %v7176_v28  ;;  %5269 = vmatprep.mubr.bf16.mxu1 %v6258_v46  ;;  %v2765_v45 = vrot.slane %v2764_v54, 4  ;;  %v1795_v7 = vrot.slane %v1793_v2, 4  ;;  %v2760_v35 = vsel %vm7764_vm10, %v2755_v42, %v2759_v37  ;;  %v2302_v5 = vshll.u32 %v2037_v52, 16  ;;  %v2039_v52 = vld [vmem:[#allocation2 + $0x108] sm:$0x8] }
 0x107   : > { %7016 = vmatprep.subr.bf16.mxu0 %v7181_v43  ;;  %v6243_v8 = vrot.slane %v2294_v39, 11  ;;  %v2301_v40 = vrot.slane %v2299_v44, 7  ;;  %v1786_v24 = vor.u32 %v1785_v0, %v1782_v58  ;;  %v2308_v19 = vshrl.u32 %v2038_v16, 16  ;;  %v2041_v39 = vld [vmem:[#allocation2 + $0x110] sm:$0xf] }
 0x108   : > { %v2770_v61 = vsel %vm7764_vm10, %v2765_v45, %v2769_v48  ;;  %v1796_v55 = vor.u32 %v1795_v7, %v1791_v10  ;;  %v2311_v63 = vshll.u32 %v2038_v16, 16  ;;  %v2772_v29 = vshrl.u32 %v2639_v41, 16  ;;  %v7159_v0 = vld [vmem:[#allocation2 + $0x6c] sm:$0xff]  }
 0x109   : > { %v6283_v59 = vcombine.low %v2760_v35, %v2770_v61  ;;  %v2304_v26 = vor.u32 %v2302_v5, %v2301_v40  ;;  %v2306_v18 = vrot.slane %v2301_v40, 4  ;;  %v1520_v21 = vld [vmem:[#allocation2 + $0xd8] sm:$0x1]  ;;  %v1787_v34 = vrot.slane %v1786_v24, 4  ;;  %v2643_v61 = vld [vmem:[#allocation2 + $0x84] sm:$0xf] }
 0x10a   : > { %7017 = vmatpush3.bf16.msra.mxu0 %v7181_v43  ;;  %v1797_v28 = vrot.slane %v1796_v55, 4  ;;  %v2310_v3 = vrot.slane %v2308_v19, 7  ;;  %v1799_v30 = vshll.u32 %v1520_v21, 16  ;;  %v2775_v6 = vshll.u32 %v2639_v41, 16  ;;  %v2040_v43 = vld [vmem:[#allocation2 + $0x10c] sm:$0xf] }
 0x10b   : > { %5374 = vmatprep.mubr.bf16.mxu0 %v6283_v59  ;;  %v2305_v15 = vsel %vm7393_vm2, %v6243_v8, %v2304_v26  ;;  %v2781_v53 = vshll.u32 %v2640_v22, 16  ;;  %v1792_v12 = vsel %vm7764_vm10, %v1787_v34, %v1791_v10  ;;  %v2774_v13 = vrot.slane %v2772_v29, 4  ;;  %v7186_v24 = vld [vmem:[%s9274_s3 + $0x238] sm:$0xff]   ;;  %v2644_v26 = vld [vmem:[#allocation2 + $0x88] sm:$0x1] }
 0x10c   : > { %5375 = vmatmul.mubr.bf16.gmra.mrb[60].mxu0 %v7157_v17  ;;  %v2313_v60 = vor.u32 %v2311_v63, %v2310_v3  ;;  %v2785_v25 = vshrl.u32 %v2640_v22, 16  ;;  %v1801_v33 = vrot.slane %v1799_v30, 5  ;;  %v2777_v9 = vrot.slane %v2775_v6, 5  ;;  %v2642_v22 = vld [vmem:[#allocation2 + $0x80] sm:$0xf]  ;;  %7018 = vmatprep.subr.bf16.mxu0 %v7186_v24 }
 0x10d   : > { %v2783_v37 = vrot.slane %v2781_v53, 5  ;;  %v2791_v4 = vshll.u32 %v2641_v14, 16  ;;  %v355_v50 = vsel %vm7684_vm6, 0, %v354_v56  ;;  %v1804_v51 = vshrl.u32 %v1521_v31, 16  ;;  %v361_v21 = vld [vmem:[#allocation2 + $0x100] sm:$0x1] }
 0x10e   : > { %v2314_v11 = vsel %vm7393_vm2, %v2306_v18, %v2313_v60  ;;  %v2787_v46 = vrot.slane %v2785_v25, 4  ;;  %v1802_v49 = vsel %vm7764_vm10, %v1797_v28, %v1801_v33  ;;  %v2778_v48 = vor.u32 %v2777_v9, %v2774_v13  ;;  %356 = vst [vmem:[#allocation2 + $0xec] sm:$0x1] %v355_v50  ;;  %7019 = vmatpush3.bf16.msra.mxu0 %v7186_v24  ;;  %v1524_v60 = vld [vmem:[#allocation2 + $0xf8] sm:$0xf] }
 0x10f   : > { %v6259_v27 = vcombine.low %v2305_v15, %v2314_v11  ;;  %v2793_v57 = vrot.slane %v2791_v4, 5  ;;  %v6226_v16 = vcombine.low %v1792_v12, %v1802_v49  ;;  %v1806_v1 = vrot.slane %v1804_v51, 4  ;;  %v8238_v15 = vpop.f32.mrb[0].mxu0  ;;  %v1525_v51 = vld [vmem:[#allocation2 + $0xfc] sm:$0xf] }
 0x110   : > { %v2788_v54 = vor.u32 %v2787_v46, %v2783_v37  ;;  %v1807_v20 = vshll.u32 %v1521_v31, 16  ;;  %v2779_v2 = vrot.slane %v2778_v48, 4  ;;  %v1813_v42 = vshll.u32 %v1522_v23, 16  ;;  %v8244_v9 = vpop.f32.mrb[1].mxu0 }
 0x111   : > { %v1817_v58 = vshrl.u32 %v1522_v23, 16  ;;  %v2316_v44 = vshrl.u32 %v2039_v52, 16  ;;  %5270 = vmatmul.mubr.bf16.gmra.mrb[56].mxu1 %v6226_v16  ;;  %v2321_v10 = vshrl.u32 %v2040_v43, 16  ;;  %v2324_v7 = vshll.u32 %v2040_v43, 16 }
 0x112   : > { %v2789_v41 = vrot.slane %v2788_v54, 4  ;;  %v1809_v45 = vrot.slane %v1807_v20, 5  ;;  %5277 = vmatprep.mubr.bf16.mxu1 %v6259_v27  ;;  %v2784_v35 = vsel %vm7764_vm10, %v2779_v2, %v2783_v37  ;;  %v1815_v8 = vrot.slane %v1813_v42, 5  ;;  %v8250_v27 = vpop.f32.mrb[2].mxu0  ;;  %v2043_v20 = vld [vmem:[#allocation2 + $0x120] sm:$0xf] }
 0x113   : > { %v1819_v40 = vrot.slane %v1817_v58, 4  ;;  %v6244_v5 = vrot.slane %v2316_v44, 11  ;;  %v2323_v19 = vrot.slane %v2321_v10, 7  ;;  %v2330_v59 = vshrl.u32 %v2041_v39, 16  ;;  %v8254_v2 = vpop.f32.mrb[3].mxu0 }
 0x114   : > { %v2794_v55 = vsel %vm7764_vm10, %v2789_v41, %v2793_v57  ;;  %v1810_v17 = vor.u32 %v1809_v45, %v1806_v1  ;;  %v2333_v14 = vshll.u32 %v2041_v39, 16  ;;  %v2796_v56 = vshrl.u32 %v2642_v22, 16  ;;  %v2042_v1 = vld [vmem:[#allocation2 + $0x11c] sm:$0x8]  ;;  %v2044_v41 = vld [vmem:[#allocation2 + $0x124] sm:$0xf] }
 0x115   : > { %v6284_v18 = vcombine.low %v2784_v35, %v2794_v55  ;;  %v1820_v63 = vor.u32 %v1819_v40, %v1815_v8  ;;  %v1523_v34 = vld [vmem:[#allocation2 + $0xec] sm:$0x1]  ;;  %v2326_v3 = vor.u32 %v2324_v7, %v2323_v19  ;;  %v2328_v29 = vrot.slane %v2323_v19, 4  ;;  %v7162_v19 = vld [vmem:[#allocation2 + $0x80] sm:$0xff]  }
 0x116   : > { %v1811_v28 = vrot.slane %v1810_v17, 4  ;;  %v2332_v30 = vrot.slane %v2330_v59, 7  ;;  %v1823_v53 = vshll.u32 %v1523_v34, 16  ;;  %v2798_v31 = vrot.slane %v2796_v56, 4  ;;  %v2646_v59 = vld [vmem:[#allocation2 + $0x98] sm:$0xf] }
 0x117   : > { %5382 = vmatprep.mubr.bf16.mxu0 %v6284_v18  ;;  %v1821_v6 = vrot.slane %v1820_v63, 4  ;;  %v2799_v12 = vshll.u32 %v2642_v22, 16  ;;  %v2327_v25 = vsel %vm7393_vm2, %v6244_v5, %v2326_v3  ;;  %v2805_v33 = vshll.u32 %v2643_v61, 16  ;;  %v2645_v22 = vld [vmem:[#allocation2 + $0x94] sm:$0xf] }
 0x118   : > { %v1816_v13 = vsel %vm7764_vm10, %v1811_v28, %v1815_v8  ;;  %5383 = vmatmul.mubr.bf16.gmra.mrb[64].mxu0 %v7159_v0  ;;  %v2335_v52 = vor.u32 %v2333_v14, %v2332_v30  ;;  %v1825_v37 = vrot.slane %v1823_v53, 5  ;;  %v2809_v23 = vshrl.u32 %v2643_v61, 16 }
 0x119   : > { %v2801_v4 = vrot.slane %v2799_v12, 5  ;;  %v2815_v43 = vshll.u32 %v2644_v26, 16  ;;  %v2807_v46 = vrot.slane %v2805_v33, 5  ;;  %v362_v50 = vsel %vm7684_vm6, 0, %v361_v21 }
 0x11a   : > { %v2336_v11 = vsel %vm7393_vm2, %v2328_v29, %v2335_v52  ;;  %v1828_v49 = vshrl.u32 %v1524_v60, 16  ;;  %v1826_v48 = vsel %vm7764_vm10, %v1821_v6, %v1825_v37  ;;  %v2811_v54 = vrot.slane %v2809_v23, 4  ;;  %363 = vst [vmem:[#allocation2 + $0x100] sm:$0x1] %v362_v50  ;;  %v2647_v29 = vld [vmem:[#allocation2 + $0x9c] sm:$0x1] }
 0x11b   : > { %v6260_v57 = vcombine.low %v2327_v25, %v2336_v11  ;;  %v2802_v16 = vor.u32 %v2801_v4, %v2798_v31  ;;  %v6227_v42 = vcombine.low %v1816_v13, %v1826_v48  ;;  %v2817_v58 = vrot.slane %v2815_v43, 5  ;;  %v368_v13 = vld [vmem:[#allocation2 + $0x114] sm:$0x1]  ;;  %v1527_v4 = vld [vmem:[#allocation2 + $0x10c] sm:$0xf] }
 0x11c   : > { %v1830_v39 = vrot.slane %v1828_v49, 4  ;;  %v1831_v44 = vshll.u32 %v1524_v60, 16  ;;  %v2812_v0 = vor.u32 %v2811_v54, %v2807_v46  ;;  %v1837_v10 = vshll.u32 %v1525_v51, 16  ;;  %v1528_v50 = vld [vmem:[#allocation2 + $0x110] sm:$0xf] }
 0x11d   : > { %v2803_v45 = vrot.slane %v2802_v16, 4  ;;  %v1841_v7 = vshrl.u32 %v1525_v51, 16  ;;  %5278 = vmatmul.mubr.bf16.gmra.mrb[60].mxu1 %v6227_v42  ;;  %v2338_v8 = vshrl.u32 %v2042_v1, 16  ;;  %v2343_v40 = vshrl.u32 %v2043_v20, 16  ;;  %v2045_v16 = vld [vmem:[#allocation2 + $0x130] sm:$0x8] }
 0x11e   : > { %v1833_v35 = vrot.slane %v1831_v44, 5  ;;  %v2346_v5 = vshll.u32 %v2043_v20, 16  ;;  %5285 = vmatprep.mubr.bf16.mxu1 %v6260_v57  ;;  %v2813_v24 = vrot.slane %v2812_v0, 4  ;;  %v1839_v55 = vrot.slane %v1837_v10, 5  ;;  %v2046_v54 = vld [vmem:[#allocation2 + $0x134] sm:$0xf] }
 0x11f   : > { %v2808_v61 = vsel %vm7764_vm10, %v2803_v45, %v2807_v46  ;;  %v1843_v17 = vrot.slane %v1841_v7, 4  ;;  %v8258_v26 = vpop.f32.mrb[4].mxu0  ;;  %v6245_v63 = vrot.slane %v2338_v8, 11  ;;  %v2345_v14 = vrot.slane %v2343_v40, 7  ;;  %v2047_v10 = vld [vmem:[#allocation2 + $0x138] sm:$0xf] }
 0x120   : > { %v1834_v18 = vor.u32 %v1833_v35, %v1830_v39  ;;  %v2352_v56 = vshrl.u32 %v2044_v41, 16  ;;  %v8260_v21 = vpop.f32.mrb[5].mxu0  ;;  %v2818_v34 = vsel %vm7764_vm10, %v2813_v24, %v2817_v58  ;;  %v2355_v3 = vshll.u32 %v2044_v41, 16 }
 0x121   : > { %v1844_v28 = vor.u32 %v1843_v17, %v1839_v55  ;;  %v2820_v30 = vshrl.u32 %v2645_v22, 16  ;;  %v6285_v6 = vcombine.low %v2808_v61, %v2818_v34  ;;  %v1526_v53 = vld [vmem:[#allocation2 + $0x100] sm:$0x1]  ;;  %v2348_v12 = vor.u32 %v2346_v5, %v2345_v14  ;;  %v8268_v1 = vpop.f32.mrb[0].mxu1 }
 0x122   : > { %v1835_v31 = vrot.slane %v1834_v18, 4  ;;  %v2350_v60 = vrot.slane %v2345_v14, 4  ;;  %v1847_v52 = vshll.u32 %v1526_v53, 16  ;;  %v2354_v33 = vrot.slane %v2352_v56, 7  ;;  %v8276_v40 = vpop.f32.mrb[1].mxu1 }
 0x123   : > { %v1845_v25 = vrot.slane %v1844_v28, 4  ;;  %v2822_v37 = vrot.slane %v2820_v30, 4  ;;  %5390 = vmatprep.mubr.bf16.mxu0 %v6285_v6  ;;  %v2349_v43 = vsel %vm7393_vm2, %v6245_v63, %v2348_v12  ;;  %v2823_v11 = vshll.u32 %v2645_v22, 16  ;;  %v8278_v17 = vpop.f32.mrb[2].mxu1 }
 0x124   : > { %v1840_v23 = vsel %vm7764_vm10, %v1835_v31, %v1839_v55  ;;  %v2829_v46 = vshll.u32 %v2646_v59, 16  ;;  %v1849_v51 = vrot.slane %v1847_v52, 5  ;;  %5391 = vmatmul.mubr.bf16.gmra.mrb[68].mxu0 %v7162_v19  ;;  %v2357_v49 = vor.u32 %v2355_v3, %v2354_v33  ;;  %v7164_v3 = vld [vmem:[#allocation2 + $0x94] sm:$0xff]   ;;  %v2648_v31 = vld [vmem:[#allocation2 + $0xa8] sm:$0xf]  ;;  %v8282_v12 = vpop.f32.mrb[3].mxu1 }
 0x125   : > { %v2833_v48 = vshrl.u32 %v2646_v59, 16  ;;  %v2839_v57 = vshll.u32 %v2647_v29, 16  ;;  %v2825_v20 = vrot.slane %v2823_v11, 5  ;;  %v369_v58 = vsel %vm7684_vm6, 0, %v368_v13  ;;  %v2649_v33 = vld [vmem:[#allocation2 + $0xac] sm:$0xf] }
 0x126   : > { %v2831_v42 = vrot.slane %v2829_v46, 5  ;;  %v1852_v39 = vshrl.u32 %v1527_v4, 16  ;;  %v1850_v44 = vsel %vm7764_vm10, %v1845_v25, %v1849_v51  ;;  %v2358_v41 = vsel %vm7393_vm2, %v2350_v60, %v2357_v49  ;;  %370 = vst [vmem:[#allocation2 + $0x114] sm:$0x1] %v369_v58  ;;  %v375_v51 = vld [vmem:[#allocation2 + $0x128] sm:$0x1] }
 0x127   : > { %v2835_v45 = vrot.slane %v2833_v48, 4  ;;  %v2841_v0 = vrot.slane %v2839_v57, 5  ;;  %v6228_v7 = vcombine.low %v1840_v23, %v1850_v44  ;;  %v6261_v22 = vcombine.low %v2349_v43, %v2358_v41 }
 0x128   : > { %v2826_v35 = vor.u32 %v2825_v20, %v2822_v37  ;;  %v1854_v8 = vrot.slane %v1852_v39, 4  ;;  %v1855_v61 = vshll.u32 %v1527_v4, 16  ;;  %v1861_v24 = vshll.u32 %v1528_v50, 16  ;;  %v2650_v37 = vld [vmem:[#allocation2 + $0xb0] sm:$0x1]  ;;  %v8286_v4 = vpop.f32.mrb[6].mxu0 }
 0x129   : > { %v2836_v5 = vor.u32 %v2835_v45, %v2831_v42  ;;  %v1865_v55 = vshrl.u32 %v1528_v50, 16  ;;  %5286 = vmatmul.mubr.bf16.gmra.mrb[64].mxu1 %v6228_v7  ;;  %v2360_v59 = vshrl.u32 %v2045_v16, 16  ;;  %v2365_v18 = vshrl.u32 %v2046_v54, 16 }
 0x12a   : > { %v2827_v19 = vrot.slane %v2826_v35, 4  ;;  %v2368_v63 = vshll.u32 %v2046_v54, 16  ;;  %5293 = vmatprep.mubr.bf16.mxu1 %v6261_v22  ;;  %v1857_v56 = vrot.slane %v1855_v61, 5  ;;  %v1863_v34 = vrot.slane %v1861_v24, 5  ;;  %v1530_v54 = vld [vmem:[#allocation2 + $0x120] sm:$0xf] }
 0x12b   : > { %v2837_v14 = vrot.slane %v2836_v5, 4  ;;  %v1867_v28 = vrot.slane %v1865_v55, 4  ;;  %v6246_v30 = vrot.slane %v2360_v59, 11  ;;  %v2367_v6 = vrot.slane %v2365_v18, 7  ;;  %v1531_v5 = vld [vmem:[#allocation2 + $0x124] sm:$0xf] }
 0x12c   : > { %v2832_v29 = vsel %vm7764_vm10, %v2827_v19, %v2831_v42  ;;  %v2374_v53 = vshrl.u32 %v2047_v10, 16  ;;  %v1858_v13 = vor.u32 %v1857_v56, %v1854_v8  ;;  %v2377_v52 = vshll.u32 %v2047_v10, 16  ;;  %v8292_v10 = vpop.f32.mrb[7].mxu0  ;;  %v8296_v61 = vpop.f32.mrb[4].mxu1 }
 0x12d   : > { %v2842_v60 = vsel %vm7764_vm10, %v2837_v14, %v2841_v0  ;;  %v1868_v25 = vor.u32 %v1867_v28, %v1863_v34  ;;  %v1529_v43 = vld [vmem:[#allocation2 + $0x114] sm:$0x1]  ;;  %v2370_v11 = vor.u32 %v2368_v63, %v2367_v6  ;;  %v2372_v46 = vrot.slane %v2367_v6, 4  ;;  %v8302_v6 = vpop.f32.mrb[5].mxu1 }
 0x12e   : > { %v6286_v23 = vcombine.low %v2832_v29, %v2842_v60  ;;  %v2376_v50 = vrot.slane %v2374_v53, 7  ;;  %v1859_v49 = vrot.slane %v1858_v13, 4  ;;  %v1871_v57 = vshll.u32 %v1529_v43, 16  ;;  %v2651_v60 = vld [vmem:[#allocation2 + $0xbc] sm:$0xf] }
 0x12f   : > { %v1869_v48 = vrot.slane %v1868_v25, 4  ;;  %v2844_v16 = vshrl.u32 %v2648_v31, 16  ;;  %v2371_v20 = vsel %vm7393_vm2, %v6246_v30, %v2370_v11  ;;  %v2847_v58 = vshll.u32 %v2648_v31, 16 }
 0x130   : > { %5398 = vmatprep.mubr.bf16.mxu0 %v6286_v23  ;;  %v2379_v42 = vor.u32 %v2377_v52, %v2376_v50  ;;  %v2853_v39 = vshll.u32 %v2649_v33, 16  ;;  %v1864_v44 = vsel %vm7764_vm10, %v1859_v49, %v1863_v34  ;;  %v1873_v41 = vrot.slane %v1871_v57, 5  ;;  %v2048_v34 = vld [vmem:[#allocation2 + $0x144] sm:$0x8]  ;;  %v2652_v50 = vld [vmem:[#allocation2 + $0xc0] sm:$0xf] }
 0x131   : > { %5399 = vmatmul.mubr.bf16.gmra.mrb[72].mxu0 %v7164_v3  ;;  %v2846_v45 = vrot.slane %v2844_v16, 4  ;;  %v2857_v0 = vshrl.u32 %v2649_v33, 16  ;;  %v2849_v22 = vrot.slane %v2847_v58, 5  ;;  %v2863_v8 = vshll.u32 %v2650_v37, 16  ;;  %v7167_v37 = vld [vmem:[#allocation2 + $0xa8] sm:$0xff]  }
 0x132   : > { %v2380_v7 = vsel %vm7393_vm2, %v2372_v46, %v2379_v42  ;;  %v2855_v35 = vrot.slane %v2853_v39, 5  ;;  %v1874_v24 = vsel %vm7764_vm10, %v1869_v48, %v1873_v41  ;;  %v376_v59 = vsel %vm7684_vm6, 0, %v375_v51  ;;  %v8308_v51 = vpop.f32.mrb[6].mxu1  ;;  %v2653_v16 = vld [vmem:[#allocation2 + $0xc4] sm:$0x1] }
 0x133   : > { %v6262_v55 = vcombine.low %v2371_v20, %v2380_v7  ;;  %v2859_v19 = vrot.slane %v2857_v0, 4  ;;  %v6229_v18 = vcombine.low %v1864_v44, %v1874_v24  ;;  %v2850_v63 = vor.u32 %v2849_v22, %v2846_v45  ;;  %377 = vst [vmem:[#allocation2 + $0x128] sm:$0x1] %v376_v59  ;;  %v382_v20 = vld [vmem:[#allocation2 + $0x13c] sm:$0x1]  ;;  %v8312_v42 = vpop.f32.mrb[7].mxu1 }
 0x134   : > { %v2865_v14 = vrot.slane %v2863_v8, 5  ;;  %v1876_v56 = vshrl.u32 %v1530_v54, 16  ;;  %v1879_v3 = vshll.u32 %v1530_v54, 16  ;;  %v1885_v29 = vshll.u32 %v1531_v5, 16  ;;  %v1533_v45 = vld [vmem:[#allocation2 + $0x134] sm:$0xf] }
 0x135   : > { %v2860_v28 = vor.u32 %v2859_v19, %v2855_v35  ;;  %v1889_v30 = vshrl.u32 %v1531_v5, 16  ;;  %5294 = vmatmul.mubr.bf16.gmra.mrb[68].mxu1 %v6229_v18  ;;  %v2851_v53 = vrot.slane %v2850_v63, 4  ;;  %v571_v43 = vmin.f32 %v8145_v36, 0.0  ;;  %v1534_v19 = vld [vmem:[#allocation2 + $0x138] sm:$0xf]  ;;  %v8316_v59 = vpop.f32.mrb[8].mxu0 }
 0x136   : > { %v1878_v31 = vrot.slane %v1876_v56, 4  ;;  %5301 = vmatprep.mubr.bf16.mxu1 %v6262_v55  ;;  %v1881_v25 = vrot.slane %v1879_v3, 5  ;;  %v1887_v52 = vrot.slane %v1885_v29, 5  ;;  %v572_v11 = vmin.f32 %v8149_v62, 0.0 }
 0x137   : > { %v2861_v13 = vrot.slane %v2860_v28, 4  ;;  %v1891_v33 = vrot.slane %v1889_v30, 4  ;;  %v2856_v23 = vsel %vm7764_vm10, %v2851_v53, %v2855_v35  ;;  %v2382_v46 = vshrl.u32 %v2048_v34, 16 }
 0x138   : > { %v1882_v48 = vor.u32 %v1881_v25, %v1878_v31  ;;  %v2868_v54 = vshrl.u32 %v2651_v60, 16  ;;  %v633_v39 = vmul.f32 1.442695, %v571_v43  ;;  %v635_v44 = vmul.f32 1.442695, %v572_v11 }
 0x139   : > { %v2866_v49 = vsel %vm7764_vm10, %v2861_v13, %v2865_v14  ;;  %v1892_v57 = vor.u32 %v1891_v33, %v1887_v52  ;;  %v8314_v41 = vrot.slane %v2382_v46, 11  ;;  %v2871_v8 = vshll.u32 %v2651_v60, 16  ;;  %v2654_v60 = vld [vmem:[#allocation2 + $0xd0] sm:$0xf]  ;;  %v8324_v13 = vpop.f32.mrb[9].mxu0 }
 0x13a   : > { %v6287_v58 = vcombine.low %v2856_v23, %v2866_v49  ;;  %v1532_v0 = vld [vmem:[#allocation2 + $0x128] sm:$0x1]  ;;  %v1883_v7 = vrot.slane %v1882_v48, 4  ;;  %v2870_v35 = vrot.slane %v2868_v54, 4  ;;  %7257 = vpow2.f32 %v633_v39  ;;  %v2655_v23 = vld [vmem:[#allocation2 + $0xd4] sm:$0xf] }
 0x13b   : > { %v1893_v22 = vrot.slane %v1892_v57, 4  ;;  %v1895_v5 = vshll.u32 %v1532_v0, 16  ;;  %v2877_v24 = vshll.u32 %v2652_v50, 16  ;;  %v2881_v55 = vshrl.u32 %v2652_v50, 16  ;;  %v8328_v49 = vpop.f32.mrb[10].mxu0  ;;  %v7169_v54 = vld [vmem:[#allocation2 + $0xbc] sm:$0xff]  }
 0x13c   : > { %5406 = vmatprep.mubr.bf16.mxu0 %v6287_v58  ;;  %v1888_v18 = vsel %vm7764_vm10, %v1883_v7, %v1887_v52  ;;  %7259 = vpow2.f32 %v635_v44  ;;  %v2873_v63 = vrot.slane %v2871_v8, 5  ;;  %v2887_v14 = vshll.u32 %v2653_v16, 16  ;;  %v2656_v44 = vld [vmem:[#allocation2 + $0xd8] sm:$0x1]  ;;  %v3140_v7 = vld [vmem:[#allocation2 + $0x2c] sm:$0x8] }
 0x13d   : > { %5407 = vmatmul.mubr.bf16.gmra.mrb[76].mxu0 %v7167_v37  ;;  %v1897_v56 = vrot.slane %v1895_v5, 5  ;;  %vm539_vm9 = vcmp.gt.f32.partialorder %v8145_v36, 0.0  ;;  %v2879_v34 = vrot.slane %v2877_v24, 5  ;;  %v2883_v28 = vrot.slane %v2881_v55, 4  ;;  %v3141_v24 = vld [vmem:[#allocation2 + $0x30] sm:$0xf] }
 0x13e   : > { %v383_v3 = vsel %vm7684_vm6, 0, %v382_v20  ;;  %vm540_vm11 = vcmp.gt.f32.partialorder %v8149_v62, 0.0  ;;  %v2874_v29 = vor.u32 %v2873_v63, %v2870_v35  ;;  %v2889_v30 = vrot.slane %v2887_v14, 5  ;;  %v8334_v14 = vpop.f32.mrb[11].mxu0 }
 0x13f   : > { %384 = vst [vmem:[#allocation2 + $0x13c] sm:$0x1] %v383_v3  ;;  %v1900_v53 = vshrl.u32 %v1533_v45, 16  ;;  %v1903_v31 = vshll.u32 %v1533_v45, 16  ;;  %v1898_v25 = vsel %vm7764_vm10, %v1893_v22, %v1897_v56  ;;  %v2884_v52 = vor.u32 %v2883_v28, %v2879_v34 }
 0x140   : > { %v1909_v33 = vshll.u32 %v1534_v19, 16  ;;  %v1913_v37 = vshrl.u32 %v1534_v19, 16  ;;  %v6230_v43 = vcombine.low %v1888_v18, %v1898_v25  ;;  %v2875_v11 = vrot.slane %v2874_v29, 4 }
 0x141   : > { %v1902_v46 = vrot.slane %v1900_v53, 4  ;;  %v1905_v50 = vrot.slane %v1903_v31, 5  ;;  %v2885_v48 = vrot.slane %v2884_v52, 4  ;;  %v2892_v20 = vshrl.u32 %v2654_v60, 16 }
 0x142   : > { %v1911_v57 = vrot.slane %v1909_v33, 5  ;;  %v1915_v16 = vrot.slane %v1913_v37, 4  ;;  %5302 = vmatmul.mubr.bf16.gmra.mrb[72].mxu1 %v6230_v43  ;;  %v2880_v58 = vsel %vm7764_vm10, %v2875_v11, %v2879_v34  ;;  %v2895_v45 = vshll.u32 %v2654_v60, 16  ;;  %v3142_v33 = vld [vmem:[#allocation2 + $0x34] sm:$0xf] }
 0x143   : > { %v1906_v39 = vor.u32 %v1905_v50, %v1902_v46  ;;  %v2901_v0 = vshll.u32 %v2655_v23, 16  ;;  %v2890_v22 = vsel %vm7764_vm10, %v2885_v48, %v2889_v30  ;;  %v2894_v8 = vrot.slane %v2892_v20, 4  ;;  %v8338_v46 = vpop.f32.mrb[8].mxu1 }
 0x144   : > { %v1916_v35 = vor.u32 %v1915_v16, %v1911_v57  ;;  %v2905_v5 = vshrl.u32 %v2655_v23, 16  ;;  %v6288_v55 = vcombine.low %v2880_v58, %v2890_v22  ;;  %v2897_v18 = vrot.slane %v2895_v45, 5  ;;  %v7258_v56 = vpop.eup %7257  ;;  %v8343_v58 = vpop.f32.mrb[9].mxu1  ;;  %v2657_v45 = vld [vmem:[#allocation2 + $0xe4] sm:$0xf] }
 0x145   : > { %v1907_v19 = vrot.slane %v1906_v39, 4  ;;  %v2903_v63 = vrot.slane %v2901_v0, 5  ;;  %v2911_v29 = vshll.u32 %v2656_v44, 16  ;;  %v3189_v53 = vshrl.u32 %v3140_v7, 16  ;;  %v8348_v0 = vpop.f32.mrb[10].mxu1 }
 0x146   : > { %v1535_v34 = vld [vmem:[#allocation2 + $0x13c] sm:$0x1]  ;;  %v1917_v28 = vrot.slane %v1916_v35, 4  ;;  %v2907_v3 = vrot.slane %v2905_v5, 4  ;;  %v7260_v31 = vpop.eup %7259  ;;  %v6134_v60 = vadd.f32 -1.0, %v7258_v56  ;;  %5414 = vmatprep.mubr.bf16.mxu0 %v6288_v55  ;;  %v2898_v52 = vor.u32 %v2897_v18, %v2894_v8  ;;  %v7172_v35 = vld [vmem:[#allocation2 + $0xd0] sm:$0xff]  }
 0x147   : > { %v1912_v30 = vsel %vm7764_vm10, %v1907_v19, %v1911_v57  ;;  %v1919_v25 = vshll.u32 %v1535_v34, 16  ;;  %v6135_v37 = vadd.f32 -1.0, %v7260_v31  ;;  %5415 = vmatmul.mubr.bf16.gmra.mrb[80].mxu0 %v7169_v54  ;;  %v2913_v43 = vrot.slane %v2911_v29, 5  ;;  %v2658_v5 = vld [vmem:[#allocation2 + $0xe8] sm:$0xf]  ;;  %v8354_v55 = vpop.f32.mrb[11].mxu1 }
 0x148   : > { %v2908_v23 = vor.u32 %v2907_v3, %v2903_v63  ;;  %v6296_v11 = vrot.slane %v3189_v53, 11  ;;  %v699_v50 = vsel %vm539_vm9, %v8145_v36, %v6134_v60  ;;  %v2899_v16 = vrot.slane %v2898_v52, 4  ;;  %v2659_v56 = vld [vmem:[#allocation2 + $0xec] sm:$0x1]  ;;  %v3143_v34 = vld [vmem:[#allocation2 + $0x40] sm:$0x8] }
 0x149   : > { %v1921_v48 = vrot.slane %v1919_v25, 5  ;;  %v3194_v20 = vshrl.u32 %v3141_v24, 16  ;;  %v700_v57 = vsel %vm540_vm11, %v8149_v62, %v6135_v37  ;;  %v3197_v54 = vshll.u32 %v3141_v24, 16 }
 0x14a   : > { %v2909_v39 = vrot.slane %v2908_v23, 4  ;;  %v3203_v44 = vshrl.u32 %v3142_v33, 16  ;;  %v6522_v7 = vpack.c.bf16 %v700_v57, %v699_v50  ;;  %v2904_v36 = vsel %vm7764_vm10, %v2899_v16, %v2903_v63  ;;  %v3144_v63 = vld [vmem:[#allocation2 + $0x44] sm:$0xf]  ;;  %v8362_v50 = vpop.f32.mrb[12].mxu0 }
 0x14b   : > { %v1922_v22 = vsel %vm7764_vm10, %v1917_v28, %v1921_v48  ;;  %v3196_v8 = vrot.slane %v3194_v20, 7  ;;  %v3206_v18 = vshll.u32 %v3142_v33, 16  ;;  %v2916_v53 = vshrl.u32 %v2657_v45, 16 }
 0x14c   : > { %v8356_v19 = vcombine.low %v1912_v30, %v1922_v22  ;;  %v2914_v62 = vsel %vm7764_vm10, %v2909_v39, %v2913_v43  ;;  %v3205_v24 = vrot.slane %v3203_v44, 7  ;;  %6531 = vst [vmem:[#allocation2 + $0x148] sm:$0xff] %v6522_v7   ;;  %v2919_v60 = vshll.u32 %v2657_v45, 16  ;;  %v3145_v43 = vld [vmem:[#allocation2 + $0x48] sm:$0xf] }
 0x14d   : > { %v6289_v3 = vcombine.low %v2904_v36, %v2914_v62  ;;  %v3199_v28 = vor.u32 %v3197_v54, %v3196_v8  ;;  %v3201_v29 = vrot.slane %v3196_v8, 4  ;;  %v2925_v25 = vshll.u32 %v2658_v5, 16  ;;  %v2660_v39 = vld [vmem:[#allocation2 + $0xf8] sm:$0xf]  ;;  %v8366_v54 = vpop.f32.mrb[13].mxu0 }
 0x14e   : > { %v3208_v31 = vor.u32 %v3206_v18, %v3205_v24  ;;  %v2929_v52 = vshrl.u32 %v2658_v5, 16  ;;  %v2918_v37 = vrot.slane %v2916_v53, 4  ;;  %v2935_v23 = vshll.u32 %v2659_v56, 16  ;;  %v8370_v22 = vpop.f32.mrb[14].mxu0 }
 0x14f   : > { %5422 = vmatprep.mubr.bf16.mxu0 %v6289_v3  ;;  %v3200_v30 = vsel %vm7393_vm2, %v6296_v11, %v3199_v28  ;;  %v3211_v33 = vshrl.u32 %v3143_v34, 16  ;;  %v2921_v16 = vrot.slane %v2919_v60, 5  ;;  %v2927_v20 = vrot.slane %v2925_v25, 5 }
 0x150   : > { %5423 = vmatmul.mubr.bf16.gmra.mrb[84].mxu0 %v7172_v35  ;;  %v3209_v48 = vsel %vm7393_vm2, %v3201_v29, %v3208_v31  ;;  %v2931_v57 = vrot.slane %v2929_v52, 4  ;;  %v2937_v45 = vrot.slane %v2935_v23, 5  ;;  %v3216_v7 = vshrl.u32 %v3144_v63, 16 }
 0x151   : > { %v8368_v44 = vcombine.low %v3200_v30, %v3209_v48  ;;  %v6297_v11 = vrot.slane %v3211_v33, 11  ;;  %v2922_v36 = vor.u32 %v2921_v16, %v2918_v37  ;;  %v3219_v5 = vshll.u32 %v3144_v63, 16  ;;  %v2661_v30 = vld [vmem:[#allocation2 + $0xfc] sm:$0xf] }
 0x152   : > { %v2932_v8 = vor.u32 %v2931_v57, %v2927_v20  ;;  %v3225_v35 = vshrl.u32 %v3145_v43, 16  ;;  %v3218_v62 = vrot.slane %v3216_v7, 7  ;;  %v3228_v24 = vshll.u32 %v3145_v43, 16  ;;  %v7174_v43 = vld [vmem:[#allocation2 + $0xe4] sm:$0xff]  }
 0x153   : > { %v2940_v18 = vshrl.u32 %v2660_v39, 16  ;;  %v2943_v56 = vshll.u32 %v2660_v39, 16  ;;  %v2049_v34 = vld [vmem:[#allocation2 + $0x148] sm:$0xf]  ;;  %v2050_v3 = vld [vmem:[#allocation2 + $0x14c] sm:$0xf]  ;;  %v8374_v53 = vadd.f32 %v8244_v9, %v8238_v15  ;;  %v8378_v31 = vadd.f32 %v8254_v2, %v8250_v27 }
 0x154   : > { %v2923_v28 = vrot.slane %v2922_v36, 4  ;;  %v2933_v29 = vrot.slane %v2932_v8, 4  ;;  %v2387_v60 = vshrl.u32 %v2049_v34, 16  ;;  %v2390_v25 = vshll.u32 %v2049_v34, 16  ;;  %v2662_v15 = vld [vmem:[#allocation2 + $0x100] sm:$0x1] }
 0x155   : > { %9286 = vst [vmem:[#allocation5_spill] sm:$0xff] %v8374_v53  ;;  %9287 = vst [vmem:[#allocation6_spill] sm:$0xff] %v8378_v31  ;;  %v2396_v63 = vshrl.u32 %v2050_v3, 16  ;;  %v2399_v52 = vshll.u32 %v2050_v3, 16  ;;  %v3221_v33 = vor.u32 %v3219_v5, %v3218_v62  ;;  %v3223_v48 = vrot.slane %v3218_v62, 4  ;;  %v8384_v2 = vpop.f32.mrb[15].mxu0 }
 0x156   : > { %v2928_v37 = vsel %vm7764_vm10, %v2923_v28, %v2927_v20  ;;  %v2938_v23 = vsel %vm7764_vm10, %v2933_v29, %v2937_v45  ;;  %v2389_v9 = vrot.slane %v2387_v60, 7  ;;  %v3227_v27 = vrot.slane %v3225_v35, 7  ;;  %v3146_v20 = vld [vmem:[#allocation2 + $0x54] sm:$0x8]  ;;  %v8388_v34 = vpop.f32.mrb[12].mxu1 }
 0x157   : > { %v2398_v16 = vrot.slane %v2396_v63, 7  ;;  %v6290_v57 = vcombine.low %v2928_v37, %v2938_v23  ;;  %v3222_v39 = vsel %vm7393_vm2, %v6297_v11, %v3221_v33  ;;  %v2942_v7 = vrot.slane %v2940_v18, 4  ;;  %v3147_v28 = vld [vmem:[#allocation2 + $0x58] sm:$0xf]  ;;  %v3148_v29 = vld [vmem:[#allocation2 + $0x5c] sm:$0xf] }
 0x158   : > { %v2945_v36 = vrot.slane %v2943_v56, 5  ;;  %v2949_v8 = vshll.u32 %v2661_v30, 16  ;;  %v2392_v45 = vor.u32 %v2390_v25, %v2389_v9  ;;  %v2394_v3 = vrot.slane %v2389_v9, 4  ;;  %v8390_v60 = vpop.f32.mrb[13].mxu1 }
 0x159   : > { %v2401_v5 = vor.u32 %v2399_v52, %v2398_v16  ;;  %5430 = vmatprep.mubr.bf16.mxu0 %v6290_v57  ;;  %v3230_v62 = vor.u32 %v3228_v24, %v3227_v27  ;;  %v2953_v37 = vshrl.u32 %v2661_v30, 16  ;;  %v2959_v11 = vshll.u32 %v2662_v15, 16  ;;  %v8392_v18 = vpop.f32.mrb[14].mxu1  ;;  %v7170_v52 = vld [vmem:[#allocation2 + $0x30] sm:$0xff]   ;;  %v2663_v57 = vld [vmem:[#allocation2 + $0x10c] sm:$0xf] }
 0x15a   : > { %5431 = vmatmul.mubr.bf16.gmra.mrb[88].mxu0 %v7174_v43  ;;  %v2946_v35 = vor.u32 %v2945_v36, %v2942_v7  ;;  %v2951_v63 = vrot.slane %v2949_v8, 5  ;;  %v2393_v56 = vsel %vm7393_vm2, %v8314_v41, %v2392_v45  ;;  %v3233_v23 = vshrl.u32 %v3146_v20, 16  ;;  %v8401_v33 = vpop.f32.mrb[15].mxu1  ;;  %v8403_v43 = vpop.f32.mrb[16].mxu0  ;;  %v2664_v27 = vld [vmem:[#allocation2 + $0x110] sm:$0xf] }
 0x15b   : > { %v2402_v25 = vsel %vm7393_vm2, %v2394_v3, %v2401_v5  ;;  %v3231_v24 = vsel %vm7393_vm2, %v3223_v48, %v3230_v62  ;;  %9288 = vst [vmem:[#allocation7_spill] sm:$0xff] %v8403_v43  ;;  %v2955_v16 = vrot.slane %v2953_v37, 4  ;;  %v2961_v41 = vrot.slane %v2959_v11, 5  ;;  %v2665_v45 = vld [vmem:[#allocation2 + $0x114] sm:$0x1] }
 0x15c   : > { %v6263_v30 = vcombine.low %v2393_v56, %v2402_v25  ;;  %v8405_v15 = vcombine.low %v3222_v39, %v3231_v24  ;;  %v2947_v9 = vrot.slane %v2946_v35, 4  ;;  %v6298_v7 = vrot.slane %v3233_v23, 11  ;;  %v3149_v56 = vld [vmem:[#allocation2 + $0x68] sm:$0x8]  ;;  %v7177_v25 = vld [vmem:[#allocation2 + $0xf8] sm:$0xff]  }
 0x15d   : > { %v3238_v36 = vshrl.u32 %v3147_v28, 16  ;;  %v3241_v8 = vshll.u32 %v3147_v28, 16  ;;  %v2956_v20 = vor.u32 %v2955_v16, %v2951_v63  ;;  %v3247_v3 = vshrl.u32 %v3148_v29, 16  ;;  %v3151_v16 = vld [vmem:[#allocation2 + $0x70] sm:$0xf] }
 0x15e   : > { %5309 = vmatprep.mubr.bf16.mxu1 %v6263_v30  ;;  %v2952_v48 = vsel %vm7764_vm10, %v2947_v9, %v2951_v63  ;;  %v3250_v5 = vshll.u32 %v3148_v29, 16  ;;  %v2964_v62 = vshrl.u32 %v2663_v57, 16  ;;  %v2967_v35 = vshll.u32 %v2663_v57, 16  ;;  %v3150_v30 = vld [vmem:[#allocation2 + $0x6c] sm:$0xf]  ;;  %v8410_v29 = vpop.f32.mrb[17].mxu0 }
 0x15f   : > { %5310 = vmatmul.mubr.bf16.gmra.mrb[76].mxu1 %v8356_v19  ;;  %v3240_v39 = vrot.slane %v3238_v36, 7  ;;  %v2973_v37 = vshll.u32 %v2664_v27, 16  ;;  %v2957_v11 = vrot.slane %v2956_v20, 4  ;;  %v3249_v24 = vrot.slane %v3247_v3, 7  ;;  %9289 = vst [vmem:[#allocation8_spill] sm:$0xff] %v8410_v29  ;;  %v8414_v20 = vpop.f32.mrb[18].mxu0 }
 0x160   : > { %5511 = vmatprep.mubr.bf16.mxu1 %v7170_v52  ;;  %v2977_v28 = vshrl.u32 %v2664_v27, 16  ;;  %v2983_v23 = vshll.u32 %v2665_v45, 16  ;;  %v2966_v9 = vrot.slane %v2964_v62, 4  ;;  %v2969_v63 = vrot.slane %v2967_v35, 5  ;;  %v2666_v52 = vld [vmem:[#allocation2 + $0x120] sm:$0xf] }
 0x161   : > { %v3243_v31 = vor.u32 %v3241_v8, %v3240_v39  ;;  %v3245_v53 = vrot.slane %v3240_v39, 4  ;;  %v2962_v19 = vsel %vm7764_vm10, %v2957_v11, %v2961_v41  ;;  %v3252_v57 = vor.u32 %v3250_v5, %v3249_v24  ;;  %9290 = vst [vmem:[#allocation9_spill] sm:$0xff] %v8414_v20  ;;  %v8416_v3 = vpop.f32.mrb[16].mxu1  ;;  %v7173_v27 = vld [vmem:[#allocation2 + $0x44] sm:$0xff]   ;;  %v8420_v35 = vpop.f32.mrb[19].mxu0 }
 0x162   : > { %v2975_v36 = vrot.slane %v2973_v37, 5  ;;  %v2979_v43 = vrot.slane %v2977_v28, 4  ;;  %9291 = vst [vmem:[#allocation10_spill] sm:$0xff] %v8416_v3  ;;  %v6291_v45 = vcombine.low %v2952_v48, %v2962_v19  ;;  %v2970_v39 = vor.u32 %v2969_v63, %v2966_v9  ;;  %9292 = vst [vmem:[#allocation11_spill] sm:$0xff] %v8420_v35  ;;  %v8422_v29 = vpop.f32.mrb[17].mxu1  ;;  %v8428_v28 = vpop.f32.mrb[20].mxu0 }
 0x163   : > { %v3244_v8 = vsel %vm7393_vm2, %v6298_v7, %v3243_v31  ;;  %v2985_v62 = vrot.slane %v2983_v23, 5  ;;  %9293 = vst [vmem:[#allocation12_spill] sm:$0xff] %v8422_v29  ;;  %v3253_v41 = vsel %vm7393_vm2, %v3245_v53, %v3252_v57  ;;  %v3255_v37 = vshrl.u32 %v3149_v56, 16  ;;  %v8426_v24 = vpop.f32.mrb[18].mxu1  ;;  %9295 = vst [vmem:[#allocation14_spill] sm:$0xff] %v8428_v28 }
 0x164   : > { %v2980_v5 = vor.u32 %v2979_v43, %v2975_v36  ;;  %v3260_v11 = vshrl.u32 %v3150_v30, 16  ;;  %9294 = vst [vmem:[#allocation13_spill] sm:$0xff] %v8426_v24  ;;  %5438 = vmatprep.mubr.bf16.mxu0 %v6291_v45  ;;  %v8430_v48 = vcombine.low %v3244_v8, %v3253_v41  ;;  %v2971_v31 = vrot.slane %v2970_v39, 4  ;;  %v2667_v9 = vld [vmem:[#allocation2 + $0x124] sm:$0xf]  ;;  %v8432_v63 = vpop.f32.mrb[19].mxu1 }
 0x165   : > { %v3263_v7 = vshll.u32 %v3150_v30, 16  ;;  %v3269_v23 = vshrl.u32 %v3151_v16, 16  ;;  %9296 = vst [vmem:[#allocation15_spill] sm:$0xff] %v8432_v63  ;;  %5439 = vmatmul.mubr.bf16.gmra.mrb[92].mxu0 %v7177_v25  ;;  %v6299_v29 = vrot.slane %v3255_v37, 11  ;;  %v3272_v43 = vshll.u32 %v3151_v16, 16  ;;  %v8437_v39 = vpop.f32.mrb[21].mxu0 }
 0x166   : > { %v2981_v19 = vrot.slane %v2980_v5, 4  ;;  %v3262_v53 = vrot.slane %v3260_v11, 7  ;;  %v2976_v56 = vsel %vm7764_vm10, %v2971_v31, %v2975_v36  ;;  %v2668_v45 = vld [vmem:[#allocation2 + $0x128] sm:$0x1]  ;;  %v2988_v8 = vshrl.u32 %v2666_v52, 16  ;;  %9297 = vst [vmem:[#allocation16_spill] sm:$0xff] %v8437_v39 }
 0x167   : > { %5512 = vmatmul.mubr.bf16.vlgmr.msra.gmra.mrb[80].mxu1 %v8368_v44  ;;  %v3271_v57 = vrot.slane %v3269_v23, 7  ;;  %v2991_v41 = vshll.u32 %v2666_v52, 16  ;;  %v2997_v37 = vshll.u32 %v2667_v9, 16  ;;  %v3152_v11 = vld [vmem:[#allocation2 + $0x7c] sm:$0x8]  ;;  %v7179_v44 = vld [vmem:[#allocation2 + $0x10c] sm:$0xff]  }
 0x168   : > { %5519 = vmatprep.mubr.bf16.mxu1 %v7173_v27  ;;  %v2986_v30 = vsel %vm7764_vm10, %v2981_v19, %v2985_v62  ;;  %v3265_v25 = vor.u32 %v3263_v7, %v3262_v53  ;;  %v3267_v5 = vrot.slane %v3262_v53, 4  ;;  %v3153_v16 = vld [vmem:[#allocation2 + $0x80] sm:$0xf]  ;;  %v2990_v24 = vrot.slane %v2988_v8, 4  ;;  %v3154_v31 = vld [vmem:[#allocation2 + $0x84] sm:$0xf] }
 0x169   : > { %v6292_v28 = vcombine.low %v2976_v56, %v2986_v30  ;;  %v3274_v63 = vor.u32 %v3272_v43, %v3271_v57  ;;  %v2993_v36 = vrot.slane %v2991_v41, 5  ;;  %v7175_v23 = vld [vmem:[#allocation2 + $0x58] sm:$0xff]   ;;  %v2999_v39 = vrot.slane %v2997_v37, 5  ;;  %v2669_v35 = vld [vmem:[#allocation2 + $0x134] sm:$0xf]  ;;  %v8443_v62 = vpop.f32.mrb[22].mxu0 }
 0x16a   : > { %v3266_v52 = vsel %vm7393_vm2, %v6299_v29, %v3265_v25  ;;  %v3001_v27 = vshrl.u32 %v2667_v9, 16  ;;  %v3007_v3 = vshll.u32 %v2668_v45, 16  ;;  %9298 = vst [vmem:[#allocation17_spill] sm:$0xff] %v8443_v62  ;;  %v3277_v53 = vshrl.u32 %v3152_v11, 16  ;;  %v2670_v56 = vld [vmem:[#allocation2 + $0x138] sm:$0xf] }
 0x16b   : > { %5446 = vmatprep.mubr.bf16.mxu0 %v6292_v28  ;;  %v3275_v7 = vsel %vm7393_vm2, %v3267_v5, %v3274_v63  ;;  %v2994_v19 = vor.u32 %v2993_v36, %v2990_v24  ;;  %v3282_v43 = vshrl.u32 %v3153_v16, 16  ;;  %v8447_v57 = vpop.f32.mrb[23].mxu0  ;;  %v8449_v8 = vpop.f32.mrb[20].mxu1  ;;  %v3285_v45 = vshll.u32 %v3153_v16, 16  ;;  %v2671_v30 = vld [vmem:[#allocation2 + $0x13c] sm:$0x1] }
 0x16c   : > { %9299 = vst [vmem:[#allocation18_spill] sm:$0xff] %v8447_v57  ;;  %9300 = vst [vmem:[#allocation19_spill] sm:$0xff] %v8449_v8  ;;  %v8451_v41 = vcombine.low %v3266_v52, %v3275_v7  ;;  %v3003_v29 = vrot.slane %v3001_v27, 4  ;;  %v3009_v9 = vrot.slane %v3007_v3, 5  ;;  %v8453_v25 = vpop.f32.mrb[21].mxu1  ;;  %v6300_v37 = vrot.slane %v3277_v53, 11 }
 0x16d   : > { %9301 = vst [vmem:[#allocation20_spill] sm:$0xff] %v8453_v25  ;;  %v2995_v28 = vrot.slane %v2994_v19, 4  ;;  %v3284_v62 = vrot.slane %v3282_v43, 7  ;;  %v3291_v63 = vshrl.u32 %v3154_v31, 16  ;;  %v8455_v24 = vpop.f32.mrb[22].mxu1  ;;  %5447 = vmatmul.mubr.bf16.gmra.mrb[96].mxu0 %v7179_v44  ;;  %v3294_v11 = vshll.u32 %v3154_v31, 16 }
 0x16e   : > { %9302 = vst [vmem:[#allocation21_spill] sm:$0xff] %v8455_v24  ;;  %v3004_v5 = vor.u32 %v3003_v29, %v2999_v39  ;;  %v3012_v36 = vshrl.u32 %v2669_v35, 16  ;;  %v3015_v57 = vshll.u32 %v2669_v35, 16  ;;  %v8457_v8 = vpop.f32.mrb[23].mxu1  ;;  %v3155_v7 = vld [vmem:[#allocation2 + $0x90] sm:$0x8] }
 0x16f   : > { %9303 = vst [vmem:[#allocation22_spill] sm:$0xff] %v8457_v8  ;;  %5520 = vmatmul.mubr.bf16.gmra.mrb[84].mxu1 %v8405_v15  ;;  %v3000_v3 = vsel %vm7764_vm10, %v2995_v28, %v2999_v39  ;;  %v3287_v16 = vor.u32 %v3285_v45, %v3284_v62  ;;  %v3289_v52 = vrot.slane %v3284_v62, 4  ;;  %v3293_v27 = vrot.slane %v3291_v63, 7  ;;  %v3156_v24 = vld [vmem:[#allocation2 + $0x94] sm:$0xf]  ;;  %v8464_v15 = vpop.f32.mrb[24].mxu0 }
 0x170   : > { %5527 = vmatprep.mubr.bf16.mxu1 %v7175_v23  ;;  %v3005_v19 = vrot.slane %v3004_v5, 4  ;;  %v3014_v53 = vrot.slane %v3012_v36, 4  ;;  %v3017_v43 = vrot.slane %v3015_v57, 5  ;;  %v3021_v44 = vshll.u32 %v2670_v56, 16  ;;  %9304 = vst [vmem:[#allocation23_spill] sm:$0xff] %v8464_v15  ;;  %v8466_v25 = vpop.f32.mrb[24].mxu1 }
 0x171   : > { %v3288_v31 = vsel %vm7393_vm2, %v6300_v37, %v3287_v16  ;;  %v3296_v35 = vor.u32 %v3294_v11, %v3293_v27  ;;  %v3025_v29 = vshrl.u32 %v2670_v56, 16  ;;  %v3031_v8 = vshll.u32 %v2671_v30, 16  ;;  %9305 = vst [vmem:[#allocation24_spill] sm:$0xff] %v8466_v25  ;;  %v7178_v39 = vld [vmem:[#allocation2 + $0x6c] sm:$0xff]   ;;  %v7182_v23 = vld [vmem:[#allocation2 + $0x120] sm:$0xff]  }
 0x172   : > { %v3010_v62 = vsel %vm7764_vm10, %v3005_v19, %v3009_v9  ;;  %v3018_v45 = vor.u32 %v3017_v43, %v3014_v53  ;;  %v3023_v28 = vrot.slane %v3021_v44, 5  ;;  %v3157_v57 = vld [vmem:[#allocation2 + $0x98] sm:$0xf]  ;;  %v3299_v63 = vshrl.u32 %v3155_v7, 16  ;;  %v389_v11 = vld [vmem:[#allocation2 + $0x150] sm:$0x1] }
 0x173   : > { %v6293_v5 = vcombine.low %v3000_v3, %v3010_v62  ;;  %v3297_v37 = vsel %vm7393_vm2, %v3289_v52, %v3296_v35  ;;  %v3027_v56 = vrot.slane %v3025_v29, 4  ;;  %v3033_v30 = vrot.slane %v3031_v8, 5  ;;  %v2672_v36 = vld [vmem:[#allocation2 + $0x148] sm:$0xf]  ;;  %v2673_v20 = vld [vmem:[#allocation2 + $0x14c] sm:$0xf] }
 0x174   : > { %v8472_v16 = vcombine.low %v3288_v31, %v3297_v37  ;;  %v3019_v27 = vrot.slane %v3018_v45, 4  ;;  %v6301_v25 = vrot.slane %v3299_v63, 11  ;;  %v3304_v15 = vshrl.u32 %v3156_v24, 16  ;;  %v8474_v9 = vpop.f32.mrb[25].mxu0  ;;  %v3158_v43 = vld [vmem:[#allocation2 + $0xa4] sm:$0x8] }
 0x175   : > { %5454 = vmatprep.mubr.bf16.mxu0 %v6293_v5  ;;  %v3028_v19 = vor.u32 %v3027_v56, %v3023_v28  ;;  %v3307_v53 = vshll.u32 %v3156_v24, 16  ;;  %v3313_v7 = vshrl.u32 %v3157_v57, 16  ;;  %v3316_v3 = vshll.u32 %v3157_v57, 16  ;;  %v8476_v44 = vpop.f32.mrb[26].mxu0  ;;  %v8478_v52 = vpop.f32.mrb[25].mxu1 }
 0x176   : > { %9306 = vst [vmem:[#allocation25_spill] sm:$0xff] %v8478_v52  ;;  %5455 = vmatmul.mubr.bf16.gmra.mrb[100].mxu0 %v7182_v23  ;;  %v3024_v8 = vsel %vm7764_vm10, %v3019_v27, %v3023_v28  ;;  %v3306_v31 = vrot.slane %v3304_v15, 7  ;;  %v390_v35 = vsel %vm7684_vm6, 0, %v389_v11  ;;  %v3036_v29 = vshrl.u32 %v2672_v36, 16  ;;  %v3159_v62 = vld [vmem:[#allocation2 + $0xa8] sm:$0xf] }
 0x177   : > { %v8484_v45 = vpop.f32.mrb[27].mxu0  ;;  %v8486_v24 = vpop.f32.mrb[26].mxu1  ;;  %5528 = vmatmul.mubr.bf16.gmra.mrb[88].mxu1 %v8430_v48  ;;  %v3029_v57 = vrot.slane %v3028_v19, 4  ;;  %v3315_v63 = vrot.slane %v3313_v7, 7  ;;  %391 = vst [vmem:[#allocation2 + $0x150] sm:$0x1] %v390_v35 }
 0x178   : > { %9307 = vst [vmem:[#allocation26_spill] sm:$0xff] %v8486_v24  ;;  %v3039_v5 = vshll.u32 %v2672_v36, 16  ;;  %v3045_v23 = vshll.u32 %v2673_v20, 16  ;;  %v8489_v37 = vpop.f32.mrb[27].mxu1  ;;  %5535 = vmatprep.mubr.bf16.mxu1 %v7178_v39  ;;  %v3309_v15 = vor.u32 %v3307_v53, %v3306_v31  ;;  %v3311_v28 = vrot.slane %v3306_v31, 4  ;;  %v7184_v7 = vld [vmem:[#allocation2 + $0x134] sm:$0xff]  }
 0x179   : > { %9308 = vst [vmem:[#allocation27_spill] sm:$0xff] %v8489_v37  ;;  %v3038_v56 = vrot.slane %v3036_v29, 4  ;;  %v3049_v11 = vshrl.u32 %v2673_v20, 16  ;;  %v3034_v27 = vsel %vm7764_vm10, %v3029_v57, %v3033_v30  ;;  %v3318_v32 = vor.u32 %v3316_v3, %v3315_v63  ;;  %v3160_v48 = vld [vmem:[#allocation2 + $0xac] sm:$0xf]  ;;  %v7180_v30 = vld [vmem:[#allocation2 + $0x80] sm:$0xff]  }
 0x17a   : > { %v3041_v52 = vrot.slane %v3039_v5, 5  ;;  %v8493_v24 = vrot.slane %v3045_v23, 5  ;;  %v6294_v19 = vcombine.low %v3024_v8, %v3034_v27  ;;  %v3310_v36 = vsel %vm7393_vm2, %v6301_v25, %v3309_v15  ;;  %v3764_v29 = vld [vmem:[#allocation2 + $0x30] sm:$0xf]  ;;  %v3765_v5 = vld [vmem:[#allocation2 + $0x34] sm:$0xf] }
 0x17b   : > { %v3051_v35 = vrot.slane %v3049_v11, 4  ;;  %v3321_v37 = vshrl.u32 %v3158_v43, 16  ;;  %v3319_v39 = vsel %vm7393_vm2, %v3311_v28, %v3318_v32  ;;  %v3326_v20 = vshrl.u32 %v3159_v62, 16 }
 0x17c   : > { %v3042_v53 = vor.u32 %v3041_v52, %v3038_v56  ;;  %v3329_v31 = vshll.u32 %v3159_v62, 16  ;;  %5462 = vmatprep.mubr.bf16.mxu0 %v6294_v19  ;;  %v8499_v3 = vcombine.low %v3310_v36, %v3319_v39  ;;  %v3335_v63 = vshrl.u32 %v3160_v48, 16  ;;  %v3766_v52 = vld [vmem:[#allocation2 + $0x38] sm:$0x1] }
 0x17d   : > { %v3052_v57 = vor.u32 %v3051_v35, %v8493_v24  ;;  %v6302_v8 = vrot.slane %v3321_v37, 11  ;;  %v8502_v23 = vpop.f32.mrb[28].mxu0  ;;  %v3328_v43 = vrot.slane %v3326_v20, 7  ;;  %v3338_v15 = vshll.u32 %v3160_v48, 16  ;;  %v3162_v35 = vld [vmem:[#allocation2 + $0xbc] sm:$0xf] }
 0x17e   : > { %v3043_v25 = vrot.slane %v3042_v53, 4  ;;  %v8506_v32 = vadd.f32 %v8276_v40, %v8268_v1  ;;  %v8508_v62 = vpop.f32.mrb[29].mxu0  ;;  %5463 = vmatmul.mubr.bf16.gmra.mrb[104].mxu0 %v7184_v7  ;;  %v2674_v28 = vld [vmem:[#allocation2 + $0x150] sm:$0x1]  ;;  %v3337_v11 = vrot.slane %v3335_v63, 7  ;;  %v8512_v37 = vadd.f32 %v8282_v12, %v8278_v17  ;;  %v8522_v63 = vpop.f32.mrb[28].mxu1 }
 0x17f   : > { %v3053_v56 = vrot.slane %v3052_v57, 4  ;;  %v3813_v27 = vshrl.u32 %v3764_v29, 16  ;;  %v8514_v19 = vpop.f32.mrb[30].mxu0  ;;  %5536 = vmatmul.mubr.bf16.gmra.mrb[92].mxu1 %v8451_v41  ;;  %v3055_v40 = vshll.u32 %v2674_v28, 16  ;;  %v3331_v48 = vor.u32 %v3329_v31, %v3328_v43  ;;  %v3161_v7 = vld [vmem:[#allocation2 + $0xb8] sm:$0x8] }
 0x180   : > { %9309 = vst [vmem:[#allocation28_spill] sm:$0xff] %v8506_v32  ;;  %9310 = vst [vmem:[#allocation29_spill] sm:$0xff] %v8512_v37  ;;  %v3048_v1 = vsel %vm7764_vm10, %v3043_v25, %v8493_v24  ;;  %v3333_v36 = vrot.slane %v3328_v43, 4  ;;  %5543 = vmatprep.mubr.bf16.mxu1 %v7180_v30  ;;  %v3340_v39 = vor.u32 %v3338_v15, %v3337_v11  ;;  %v3816_v20 = vshll.u32 %v3764_v29, 16  ;;  %v3163_v12 = vld [vmem:[#allocation2 + $0xc0] sm:$0xf] }
 0x181   : > { %v3815_v53 = vrot.slane %v3813_v27, 4  ;;  %v3822_v17 = vshll.u32 %v3765_v5, 16  ;;  %v8520_v57 = vpop.f32.mrb[31].mxu0  ;;  %9312 = vst [vmem:[#allocation31_spill] sm:$0xff] %v8522_v63  ;;  %v3057_v41 = vrot.slane %v3055_v40, 5  ;;  %v3332_v37 = vsel %vm7393_vm2, %v6302_v8, %v3331_v48  ;;  %v8526_v31 = vpop.f32.mrb[29].mxu1 }
 0x182   : > { %9311 = vst [vmem:[#allocation30_spill] sm:$0xff] %v8520_v57  ;;  %v3826_v24 = vshrl.u32 %v3765_v5, 16  ;;  %v3832_v25 = vshll.u32 %v3766_v52, 16  ;;  %9313 = vst [vmem:[#allocation32_spill] sm:$0xff] %v8526_v31  ;;  %v3341_v30 = vsel %vm7393_vm2, %v3333_v36, %v3340_v39  ;;  %v3818_v43 = vrot.slane %v3816_v20, 5  ;;  %v8530_v28 = vpop.f32.mrb[30].mxu1 }
 0x183   : > { %v3824_v15 = vrot.slane %v3822_v17, 5  ;;  %v3343_v29 = vshrl.u32 %v3161_v7, 16  ;;  %9314 = vst [vmem:[#allocation33_spill] sm:$0xff] %v8530_v28  ;;  %v3058_v11 = vsel %vm7764_vm10, %v3053_v56, %v3057_v41  ;;  %v7187_v27 = vld [vmem:[#allocation2 + $0x148] sm:$0xff]   ;;  %v8534_v40 = vcombine.low %v3332_v37, %v3341_v30  ;;  %v3767_v5 = vld [vmem:[#allocation2 + $0x44] sm:$0xf] }
 0x184   : > { %v3828_v32 = vrot.slane %v3826_v24, 4  ;;  %v3834_v8 = vrot.slane %v3832_v25, 5  ;;  %v8536_v52 = vpop.f32.mrb[31].mxu1  ;;  %v7183_v48 = vld [vmem:[#allocation2 + $0x94] sm:$0xff]   ;;  %v6295_v31 = vcombine.low %v3048_v1, %v3058_v11  ;;  %v3819_v63 = vor.u32 %v3818_v43, %v3815_v53  ;;  %v3768_v20 = vld [vmem:[#allocation2 + $0x48] sm:$0xf] }
 0x185   : > { %9315 = vst [vmem:[#allocation34_spill] sm:$0xff] %v8536_v52  ;;  %v6303_v36 = vrot.slane %v3343_v29, 11  ;;  %v3348_v39 = vshrl.u32 %v3162_v35, 16  ;;  %v3351_v17 = vshll.u32 %v3162_v35, 16  ;;  %v3357_v28 = vshrl.u32 %v3163_v12, 16 }
 0x186   : > { %v3829_v7 = vor.u32 %v3828_v32, %v3824_v15  ;;  %v3360_v57 = vshll.u32 %v3163_v12, 16  ;;  %5470 = vmatprep.mubr.bf16.mxu0 %v6295_v31  ;;  %v3820_v56 = vrot.slane %v3819_v63, 4  ;;  %v3837_v37 = vshrl.u32 %v3767_v5, 16  ;;  %v3769_v52 = vld [vmem:[#allocation2 + $0x4c] sm:$0x1] }
 0x187   : > { %v3350_v41 = vrot.slane %v3348_v39, 7  ;;  %v3840_v30 = vshll.u32 %v3767_v5, 16  ;;  %5544 = vmatmul.mubr.bf16.gmra.mrb[96].mxu1 %v8472_v16  ;;  %5471 = vmatmul.mubr.bf16.gmra.mrb[108].mxu0 %v7187_v27  ;;  %v3359_v25 = vrot.slane %v3357_v28, 7  ;;  %v3846_v1 = vshll.u32 %v3768_v20, 16  ;;  %v3770_v39 = vld [vmem:[#allocation2 + $0x58] sm:$0xf] }
 0x188   : > { %v3830_v24 = vrot.slane %v3829_v7, 4  ;;  %v3850_v53 = vshrl.u32 %v3768_v20, 16  ;;  %5551 = vmatprep.mubr.bf16.mxu1 %v7183_v48  ;;  %v3825_v32 = vsel %vm7764_vm10, %v3820_v56, %v3824_v15  ;;  %v3839_v12 = vrot.slane %v3837_v37, 4  ;;  %v7185_v48 = vld [vmem:[#allocation2 + $0xa8] sm:$0xff]  }
 0x189   : > { %v3353_v35 = vor.u32 %v3351_v17, %v3350_v41  ;;  %v3355_v43 = vrot.slane %v3350_v41, 4  ;;  %v3362_v31 = vor.u32 %v3360_v57, %v3359_v25  ;;  %v3842_v29 = vrot.slane %v3840_v30, 5  ;;  %v3772_v17 = vld [vmem:[#allocation2 + $0x60] sm:$0x1]  ;;  %v3164_v37 = vld [vmem:[#allocation2 + $0xcc] sm:$0x8] }
 0x18a   : > { %v3835_v63 = vsel %vm7764_vm10, %v3830_v24, %v3834_v8  ;;  %v3848_v11 = vrot.slane %v3846_v1, 5  ;;  %v3852_v27 = vrot.slane %v3850_v53, 4  ;;  %v3856_v5 = vshll.u32 %v3769_v52, 16  ;;  %v3771_v8 = vld [vmem:[#allocation2 + $0x5c] sm:$0xf] }
 0x18b   : > { %v6344_v16 = vcombine.low %v3825_v32, %v3835_v63  ;;  %v3354_v28 = vsel %vm7393_vm2, %v6303_v36, %v3353_v35  ;;  %v3363_v15 = vsel %vm7393_vm2, %v3355_v43, %v3362_v31  ;;  %v3843_v20 = vor.u32 %v3842_v29, %v3839_v12  ;;  %v3165_v30 = vld [vmem:[#allocation2 + $0xd0] sm:$0xf]  ;;  %v3166_v25 = vld [vmem:[#allocation2 + $0xd4] sm:$0xf] }
 0x18c   : > { %v8549_v7 = vadd.f32 %v8260_v21, %v8258_v26  ;;  %v8553_v57 = vadd.f32 %v8292_v10, %v8286_v4  ;;  %v8555_v36 = vcombine.low %v3354_v28, %v3363_v15  ;;  %v3853_v52 = vor.u32 %v3852_v27, %v3848_v11  ;;  %v8561_v24 = vpop.f32.mrb[32].mxu0  ;;  %v3773_v15 = vld [vmem:[#allocation2 + $0x6c] sm:$0xf] }
 0x18d   : > { %7020 = vmatprep.mubr.bf16.mxu0 %v6344_v16  ;;  %v3858_v56 = vrot.slane %v3856_v5, 5  ;;  %v8559_v41 = vadd.f32 %v8302_v6, %v8296_v61  ;;  %v3844_v26 = vrot.slane %v3843_v20, 4  ;;  %v8565_v21 = vadd.f32 %v8312_v42, %v8308_v51  ;;  %v8567_v1 = vpop.f32.mrb[33].mxu0  ;;  %v8569_v53 = vpop.f32.mrb[32].mxu1 }
 0x18e   : > { %v3861_v4 = vshrl.u32 %v3770_v39, 16  ;;  %v3864_v10 = vshll.u32 %v3770_v39, 16  ;;  %v3854_v32 = vrot.slane %v3853_v52, 4  ;;  %v3870_v35 = vshll.u32 %v3771_v8, 16  ;;  %v8571_v43 = vpop.f32.mrb[34].mxu0  ;;  %v8573_v12 = vpop.f32.mrb[33].mxu1 }
 0x18f   : > { %9316 = vst [vmem:[#allocation35_spill] sm:$0xff] %v8559_v41  ;;  %9317 = vst [vmem:[#allocation36_spill] sm:$0xff] %v8565_v21  ;;  %v3874_v61 = vshrl.u32 %v3771_v8, 16  ;;  %v3880_v6 = vshll.u32 %v3772_v17, 16  ;;  %5552 = vmatmul.mubr.bf16.gmra.mrb[100].mxu1 %v8499_v3  ;;  %v3849_v51 = vsel %vm7764_vm10, %v3844_v26, %v3848_v11  ;;  %v3365_v31 = vshrl.u32 %v3164_v37, 16  ;;  %v8578_v29 = vpop.f32.mrb[35].mxu0 }
 0x190   : > { %v3863_v42 = vrot.slane %v3861_v4, 4  ;;  %v3866_v63 = vrot.slane %v3864_v10, 5  ;;  %v8580_v16 = vpop.f32.mrb[34].mxu1  ;;  %5559 = vmatprep.mubr.bf16.mxu1 %v7185_v48  ;;  %v3859_v28 = vsel %vm7764_vm10, %v3854_v32, %v3858_v56  ;;  %v3872_v27 = vrot.slane %v3870_v35, 5  ;;  %v3774_v52 = vld [vmem:[#allocation2 + $0x70] sm:$0xf] }
 0x191   : > { %9318 = vst [vmem:[#allocation37_spill] sm:$0xff] %v8580_v16  ;;  %v3876_v5 = vrot.slane %v3874_v61, 4  ;;  %v3882_v39 = vrot.slane %v3880_v6, 5  ;;  %v8584_v20 = vpop.f32.mrb[35].mxu1  ;;  %v6345_v3 = vcombine.low %v3849_v51, %v3859_v28  ;;  %v6304_v11 = vrot.slane %v3365_v31, 11  ;;  %v7188_v21 = vld [vmem:[#allocation2 + $0xbc] sm:$0xff]  }
 0x192   : > { %9319 = vst [vmem:[#allocation38_spill] sm:$0xff] %v8584_v20  ;;  %v3867_v8 = vor.u32 %v3866_v63, %v3863_v42  ;;  %v3370_v17 = vshrl.u32 %v3165_v30, 16  ;;  %v3373_v26 = vshll.u32 %v3165_v30, 16  ;;  %v3379_v4 = vshrl.u32 %v3166_v25, 16  ;;  %v3775_v6 = vld [vmem:[#allocation2 + $0x74] sm:$0x1] }
 0x193   : > { %v3877_v37 = vor.u32 %v3876_v5, %v3872_v27  ;;  %v3382_v10 = vshll.u32 %v3166_v25, 16  ;;  %7021 = vmatmul.mubr.bf16.vlgmr.msra.gmra.mrb[112].mxu0 %v6345_v3  ;;  %v3885_v56 = vshrl.u32 %v3773_v15, 16  ;;  %v3888_v32 = vshll.u32 %v3773_v15, 16 }
 0x194   : > { %v3868_v48 = vrot.slane %v3867_v8, 4  ;;  %v3372_v41 = vrot.slane %v3370_v17, 7  ;;  %v3381_v61 = vrot.slane %v3379_v4, 7  ;;  %v3894_v16 = vshll.u32 %v3774_v52, 16  ;;  %v3167_v4 = vld [vmem:[#allocation2 + $0xe0] sm:$0x8] }
 0x195   : > { %v3878_v35 = vrot.slane %v3877_v37, 4  ;;  %v3898_v20 = vshrl.u32 %v3774_v52, 16  ;;  %v3887_v31 = vrot.slane %v3885_v56, 4  ;;  %v3890_v28 = vrot.slane %v3888_v32, 5  ;;  %v3776_v52 = vld [vmem:[#allocation2 + $0x80] sm:$0xf] }
 0x196   : > { %v3873_v51 = vsel %vm7764_vm10, %v3868_v48, %v3872_v27  ;;  %v3375_v42 = vor.u32 %v3373_v26, %v3372_v41  ;;  %v3377_v63 = vrot.slane %v3372_v41, 4  ;;  %v3384_v25 = vor.u32 %v3382_v10, %v3381_v61  ;;  %v3778_v37 = vld [vmem:[#allocation2 + $0x88] sm:$0x1]  ;;  %v7189_v10 = vld [vmem:[#allocation2 + $0xd0] sm:$0xff]  }
 0x197   : > { %v3883_v30 = vsel %vm7764_vm10, %v3878_v35, %v3882_v39  ;;  %v3896_v5 = vrot.slane %v3894_v16, 5  ;;  %5560 = vmatmul.mubr.bf16.gmra.mrb[104].mxu1 %v8534_v40  ;;  %v3900_v8 = vrot.slane %v3898_v20, 4  ;;  %v3904_v17 = vshll.u32 %v3775_v6, 16  ;;  %v3777_v40 = vld [vmem:[#allocation2 + $0x84] sm:$0xf] }
 0x198   : > { %v6346_v15 = vcombine.low %v3873_v51, %v3883_v30  ;;  %v3376_v3 = vsel %vm7393_vm2, %v6304_v11, %v3375_v42  ;;  %5567 = vmatprep.mubr.bf16.mxu1 %v7188_v21  ;;  %v3385_v41 = vsel %vm7393_vm2, %v3377_v63, %v3384_v25  ;;  %v3891_v27 = vor.u32 %v3890_v28, %v3887_v31  ;;  %v3169_v6 = vld [vmem:[#allocation2 + $0xe8] sm:$0xf]  ;;  %v3779_v63 = vld [vmem:[#allocation2 + $0x94] sm:$0xf] }
 0x199   : > { %v8597_v39 = vadd.f32 %v8324_v13, %v8316_v59  ;;  %v8601_v16 = vadd.f32 %v8334_v14, %v8328_v49  ;;  %v8603_v11 = vcombine.low %v3376_v3, %v3385_v41  ;;  %v3901_v20 = vor.u32 %v3900_v8, %v3896_v5  ;;  %v3168_v14 = vld [vmem:[#allocation2 + $0xe4] sm:$0xf] }
 0x19a   : > { %7024 = vmatprep.mubr.bf16.mxu0 %v6346_v15  ;;  %v3906_v26 = vrot.slane %v3904_v17, 5  ;;  %v8607_v21 = vadd.f32 %v8343_v58, %v8338_v46  ;;  %v3892_v48 = vrot.slane %v3891_v27, 4  ;;  %v8611_v59 = vadd.f32 %v8354_v55, %v8348_v0 }
 0x19b   : > { %v3909_v13 = vshrl.u32 %v3776_v52, 16  ;;  %v3912_v49 = vshll.u32 %v3776_v52, 16  ;;  %v3902_v56 = vrot.slane %v3901_v20, 4  ;;  %v3918_v32 = vshll.u32 %v3777_v40, 16  ;;  %v3780_v52 = vld [vmem:[#allocation2 + $0x98] sm:$0xf] }
 0x19c   : > { %9320 = vst [vmem:[#allocation39_spill] sm:$0xff] %v8607_v21  ;;  %9321 = vst [vmem:[#allocation40_spill] sm:$0xff] %v8611_v59  ;;  %v3922_v35 = vshrl.u32 %v3777_v40, 16  ;;  %v3928_v61 = vshll.u32 %v3778_v37, 16  ;;  %v3897_v51 = vsel %vm7764_vm10, %v3892_v48, %v3896_v5  ;;  %v3387_v42 = vshrl.u32 %v3167_v4, 16  ;;  %v8615_v31 = vpop.f32.mrb[36].mxu0 }
 0x19d   : > { %v3911_v46 = vrot.slane %v3909_v13, 4  ;;  %v3914_v58 = vrot.slane %v3912_v49, 5  ;;  %v3907_v0 = vsel %vm7764_vm10, %v3902_v56, %v3906_v26  ;;  %v3920_v55 = vrot.slane %v3918_v32, 5  ;;  %v8619_v28 = vpop.f32.mrb[37].mxu0  ;;  %v8621_v15 = vpop.f32.mrb[36].mxu1 }
 0x19e   : > { %v3924_v30 = vrot.slane %v3922_v35, 4  ;;  %v3930_v25 = vrot.slane %v3928_v61, 5  ;;  %v6347_v3 = vcombine.low %v3897_v51, %v3907_v0  ;;  %v6305_v17 = vrot.slane %v3387_v42, 11  ;;  %v8623_v41 = vpop.f32.mrb[38].mxu0  ;;  %v8625_v27 = vpop.f32.mrb[37].mxu1 }
 0x19f   : > { %v3915_v8 = vor.u32 %v3914_v58, %v3911_v46  ;;  %v3392_v5 = vshrl.u32 %v3168_v14, 16  ;;  %5568 = vmatmul.mubr.bf16.gmra.mrb[108].mxu1 %v8555_v36  ;;  %v3395_v37 = vshll.u32 %v3168_v14, 16  ;;  %v3401_v20 = vshrl.u32 %v3169_v6, 16  ;;  %v8628_v4 = vpop.f32.mrb[39].mxu0  ;;  %v8630_v48 = vpop.f32.mrb[38].mxu1 }
 0x1a0   : > { %v3925_v40 = vor.u32 %v3924_v30, %v3920_v55  ;;  %v3404_v26 = vshll.u32 %v3169_v6, 16  ;;  %5575 = vmatprep.mubr.bf16.mxu1 %v7189_v10  ;;  %7025 = vmatmul.mubr.bf16.gmra.mrb[116].mxu0 %v6347_v3  ;;  %v3933_v56 = vshrl.u32 %v3779_v63, 16  ;;  %v3936_v32 = vshll.u32 %v3779_v63, 16  ;;  %v8632_v35 = vpop.f32.mrb[39].mxu1  ;;  %v3781_v46 = vld [vmem:[#allocation2 + $0x9c] sm:$0x1] }
 0x1a1   : > { %v3916_v13 = vrot.slane %v3915_v8, 4  ;;  %v3394_v49 = vrot.slane %v3392_v5, 7  ;;  %v3403_v51 = vrot.slane %v3401_v20, 7  ;;  %v3942_v36 = vshll.u32 %v3780_v52, 16  ;;  %v7190_v63 = vld [vmem:[#allocation2 + $0xe4] sm:$0xff]  }
 0x1a2   : > { %v3926_v61 = vrot.slane %v3925_v40, 4  ;;  %v3946_v58 = vshrl.u32 %v3780_v52, 16  ;;  %v3935_v0 = vrot.slane %v3933_v56, 4  ;;  %v3938_v3 = vrot.slane %v3936_v32, 5  ;;  %v3782_v52 = vld [vmem:[#allocation2 + $0xa8] sm:$0xf] }
 0x1a3   : > { %v3921_v14 = vsel %vm7764_vm10, %v3916_v13, %v3920_v55  ;;  %v3397_v6 = vor.u32 %v3395_v37, %v3394_v49  ;;  %v3399_v42 = vrot.slane %v3394_v49, 4  ;;  %v3406_v30 = vor.u32 %v3404_v26, %v3403_v51  ;;  %v3783_v26 = vld [vmem:[#allocation2 + $0xac] sm:$0xf]  ;;  %v3784_v49 = vld [vmem:[#allocation2 + $0xb0] sm:$0x1] }
 0x1a4   : > { %v3931_v10 = vsel %vm7764_vm10, %v3926_v61, %v3930_v25  ;;  %v3944_v8 = vrot.slane %v3942_v36, 5  ;;  %v3948_v20 = vrot.slane %v3946_v58, 4  ;;  %v3952_v59 = vshll.u32 %v3781_v46, 16  ;;  %v3170_v51 = vld [vmem:[#allocation2 + $0xf4] sm:$0x8] }
 0x1a5   : > { %v6348_v5 = vcombine.low %v3921_v14, %v3931_v10  ;;  %v3398_v40 = vsel %vm7393_vm2, %v6305_v17, %v3397_v6  ;;  %v3407_v55 = vsel %vm7393_vm2, %v3399_v42, %v3406_v30  ;;  %v3939_v37 = vor.u32 %v3938_v3, %v3935_v0  ;;  %v3172_v42 = vld [vmem:[#allocation2 + $0xfc] sm:$0xf]  ;;  %v3173_v21 = vld [vmem:[#allocation2 + $0x108] sm:$0x8] }
 0x1a6   : > { %v8644_v13 = vadd.f32 %v8366_v54, %v8362_v50  ;;  %v8648_v25 = vadd.f32 %v8384_v2, %v8370_v22  ;;  %v6321_v56 = vcombine.low %v3398_v40, %v3407_v55  ;;  %v3949_v17 = vor.u32 %v3948_v20, %v3944_v8  ;;  %v3785_v30 = vld [vmem:[#allocation2 + $0xbc] sm:$0xf] }
 0x1a7   : > { %7028 = vmatprep.mubr.bf16.mxu0 %v6348_v5  ;;  %v3954_v32 = vrot.slane %v3952_v59, 5  ;;  %v8652_v61 = vadd.f32 %v8390_v60, %v8388_v34  ;;  %5576 = vmatmul.mubr.bf16.gmra.mrb[112].mxu1 %v8603_v11  ;;  %v3940_v46 = vrot.slane %v3939_v37, 4  ;;  %v8657_v50 = vadd.f32 %v8401_v33, %v8392_v18  ;;  %v3171_v59 = vld [vmem:[#allocation2 + $0xf8] sm:$0xf] }
 0x1a8   : > { %v3957_v54 = vshrl.u32 %v3782_v52, 16  ;;  %v3960_v22 = vshll.u32 %v3782_v52, 16  ;;  %5583 = vmatprep.mubr.bf16.mxu1 %v7190_v63  ;;  %v3950_v2 = vrot.slane %v3949_v17, 4  ;;  %v3966_v36 = vshll.u32 %v3783_v26, 16  ;;  %v7191_v63 = vld [vmem:[#allocation2 + $0xf8] sm:$0xff]  }
 0x1a9   : > { %9322 = vst [vmem:[#allocation41_spill] sm:$0xff] %v8652_v61  ;;  %9323 = vst [vmem:[#allocation42_spill] sm:$0xff] %v8657_v50  ;;  %v3970_v58 = vshrl.u32 %v3783_v26, 16  ;;  %v3976_v14 = vshll.u32 %v3784_v49, 16  ;;  %v3945_v34 = vsel %vm7764_vm10, %v3940_v46, %v3944_v8  ;;  %v3409_v11 = vshrl.u32 %v3170_v51, 16 }
 0x1aa   : > { %v3959_v60 = vrot.slane %v3957_v54, 4  ;;  %v3962_v6 = vrot.slane %v3960_v22, 5  ;;  %v3955_v0 = vsel %vm7764_vm10, %v3950_v2, %v3954_v32  ;;  %v3968_v18 = vrot.slane %v3966_v36, 5  ;;  %v3786_v52 = vld [vmem:[#allocation2 + $0xc0] sm:$0xf] }
 0x1ab   : > { %v3972_v33 = vrot.slane %v3970_v58, 4  ;;  %v3978_v10 = vrot.slane %v3976_v14, 5  ;;  %v6349_v3 = vcombine.low %v3945_v34, %v3955_v0  ;;  %v6306_v40 = vrot.slane %v3409_v11, 11  ;;  %v8663_v55 = vpop.f32.mrb[40].mxu0  ;;  %v3787_v17 = vld [vmem:[#allocation2 + $0xc4] sm:$0x1] }
 0x1ac   : > { %v3963_v5 = vor.u32 %v3962_v6, %v3959_v60  ;;  %v3414_v20 = vshrl.u32 %v3171_v59, 16  ;;  %v3417_v37 = vshll.u32 %v3171_v59, 16  ;;  %v3423_v26 = vshrl.u32 %v3172_v42, 16  ;;  %v8665_v51 = vpop.f32.mrb[41].mxu0  ;;  %v3790_v50 = vld [vmem:[#allocation2 + $0xd8] sm:$0x1] }
 0x1ad   : > { %v3973_v8 = vor.u32 %v3972_v33, %v3968_v18  ;;  %v3426_v49 = vshll.u32 %v3172_v42, 16  ;;  %7029 = vmatmul.mubr.bf16.gmra.mrb[120].mxu0 %v6349_v3  ;;  %v3981_v54 = vshrl.u32 %v3785_v30, 16  ;;  %v3984_v22 = vshll.u32 %v3785_v30, 16  ;;  %v8667_v2 = vpop.f32.mrb[42].mxu0 }
 0x1ae   : > { %v3964_v32 = vrot.slane %v3963_v5, 4  ;;  %v3416_v46 = vrot.slane %v3414_v20, 7  ;;  %v3425_v58 = vrot.slane %v3423_v26, 7  ;;  %v3990_v14 = vshll.u32 %v3786_v52, 16  ;;  %v8669_v60 = vpop.f32.mrb[43].mxu0  ;;  %v8671_v6 = vpop.f32.mrb[40].mxu1 }
 0x1af   : > { %v3974_v36 = vrot.slane %v3973_v8, 4  ;;  %v3994_v34 = vshrl.u32 %v3786_v52, 16  ;;  %9324 = vst [vmem:[#allocation43_spill] sm:$0xff] %v8671_v6  ;;  %5584 = vmatmul.mubr.bf16.gmra.mrb[116].mxu1 %v6321_v56  ;;  %v3983_v0 = vrot.slane %v3981_v54, 4  ;;  %v8675_v33 = vpop.f32.mrb[41].mxu1  ;;  %v3986_v5 = vrot.slane %v3984_v22, 5 }
 0x1b0   : > { %v3969_v59 = vsel %vm7764_vm10, %v3964_v32, %v3968_v18  ;;  %v3419_v42 = vor.u32 %v3417_v37, %v3416_v46  ;;  %v3421_v11 = vrot.slane %v3416_v46, 4  ;;  %9325 = vst [vmem:[#allocation44_spill] sm:$0xff] %v8675_v33  ;;  %5591 = vmatprep.mubr.bf16.mxu1 %v7191_v63  ;;  %v3428_v3 = vor.u32 %v3426_v49, %v3425_v58  ;;  %v8679_v52 = vpop.f32.mrb[42].mxu1  ;;  %v3788_v37 = vld [vmem:[#allocation2 + $0xd0] sm:$0xf]  ;;  %v9328_v54 = vld [vmem:[#allocation7_spill] sm:$0xff] }
 0x1b1   : > { %v3979_v30 = vsel %vm7764_vm10, %v3974_v36, %v3978_v10  ;;  %v3992_v20 = vrot.slane %v3990_v14, 5  ;;  %9326 = vst [vmem:[#allocation45_spill] sm:$0xff] %v8679_v52  ;;  %v3996_v26 = vrot.slane %v3994_v34, 4  ;;  %v4000_v18 = vshll.u32 %v3787_v17, 16  ;;  %v8683_v32 = vpop.f32.mrb[43].mxu1  ;;  %v9329_v10 = vld [vmem:[#allocation8_spill] sm:$0xff] }
 0x1b2   : > { %v6350_v8 = vcombine.low %v3969_v59, %v3979_v30  ;;  %v3420_v56 = vsel %vm7393_vm2, %v6306_v40, %v3419_v42  ;;  %9327 = vst [vmem:[#allocation46_spill] sm:$0xff] %v8683_v32  ;;  %v3429_v63 = vsel %vm7393_vm2, %v3421_v11, %v3428_v3  ;;  %v3987_v46 = vor.u32 %v3986_v5, %v3983_v0  ;;  %v9330_v22 = vld [vmem:[#allocation9_spill] sm:$0xff]  ;;  %v9331_v36 = vld [vmem:[#allocation11_spill] sm:$0xff]  ;;  %v9332_v59 = vld [vmem:[#allocation10_spill] sm:$0xff] }
 0x1b3   : > { %v8689_v49 = vadd.f32 %v9329_v10, %v9328_v54  ;;  %v8693_v58 = vadd.f32 %v9331_v36, %v9330_v22  ;;  %v3789_v14 = vld [vmem:[#allocation2 + $0xd4] sm:$0xf]  ;;  %v6322_v40 = vcombine.low %v3420_v56, %v3429_v63  ;;  %v3997_v34 = vor.u32 %v3996_v26, %v3992_v20  ;;  %v9333_v42 = vld [vmem:[#allocation12_spill] sm:$0xff]  ;;  %v9335_v0 = vld [vmem:[#allocation15_spill] sm:$0xff] }
 0x1b4   : > { %7032 = vmatprep.mubr.bf16.mxu0 %v6350_v8  ;;  %v4002_v17 = vrot.slane %v4000_v18, 5  ;;  %v6662_v30 = vadd.f32 %v9333_v42, %v9332_v59  ;;  %v3988_v61 = vrot.slane %v3987_v46, 4  ;;  %v9334_v11 = vld [vmem:[#allocation13_spill] sm:$0xff]  ;;  %v4005_v54 = vshrl.u32 %v3788_v37, 16  ;;  %v3174_v26 = vld [vmem:[#allocation2 + $0x10c] sm:$0xf] }
 0x1b5   : > { %v6665_v3 = vadd.f32 %v9335_v0, %v9334_v11  ;;  %v7192_v5 = vld [vmem:[#allocation2 + $0x10c] sm:$0xff]   ;;  %v4008_v10 = vshll.u32 %v3788_v37, 16  ;;  %v3998_v32 = vrot.slane %v3997_v34, 4  ;;  %v4014_v8 = vshll.u32 %v3789_v14, 16  ;;  %v9338_v63 = vld [vmem:[#allocation6_spill] sm:$0xff] }
 0x1b6   : > { %v9336_v22 = vld [vmem:[#allocation5_spill] sm:$0xff]  ;;  %v4018_v56 = vshrl.u32 %v3789_v14, 16  ;;  %v3993_v18 = vsel %vm7764_vm10, %v3988_v61, %v3992_v20  ;;  %v4007_v46 = vrot.slane %v4005_v54, 4  ;;  %v3436_v52 = vshrl.u32 %v3174_v26, 16  ;;  %v3791_v33 = vld [vmem:[#allocation2 + $0xe4] sm:$0xf] }
 0x1b7   : > { %v8700_v36 = vadd.f32 %v6662_v30, %v9336_v22  ;;  %v8705_v59 = vadd.f32 %v6665_v3, %v9338_v63  ;;  %v4010_v42 = vrot.slane %v4008_v10, 5  ;;  %v3175_v11 = vld [vmem:[#allocation2 + $0x110] sm:$0xf]  ;;  %5592 = vmatmul.mubr.bf16.gmra.mrb[120].mxu1 %v6322_v40  ;;  %v4003_v37 = vsel %vm7764_vm10, %v3998_v32, %v4002_v17  ;;  %v3792_v54 = vld [vmem:[#allocation2 + $0xe8] sm:$0xf] }
 0x1b8   : > { %v4016_v34 = vrot.slane %v4014_v8, 5  ;;  %v4020_v0 = vrot.slane %v4018_v56, 4  ;;  %v4024_v30 = vshll.u32 %v3790_v50, 16  ;;  %v6351_v22 = vcombine.low %v3993_v18, %v4003_v37  ;;  %5599 = vmatprep.mubr.bf16.mxu1 %v7192_v5 }
 0x1b9   : > { %9337 = vst [vmem:[#allocation7_spill] sm:$0xff] %v8700_v36  ;;  %9339 = vst [vmem:[#allocation8_spill] sm:$0xff] %v8705_v59  ;;  %v4011_v14 = vor.u32 %v4010_v42, %v4007_v46  ;;  %v3431_v36 = vshrl.u32 %v3173_v21, 16  ;;  %v3439_v3 = vshll.u32 %v3174_v26, 16  ;;  %v3445_v63 = vshrl.u32 %v3175_v11, 16 }
 0x1ba   : > { %v4021_v61 = vor.u32 %v4020_v0, %v4016_v34  ;;  %v4026_v20 = vrot.slane %v4024_v30, 5  ;;  %7033 = vmatmul.mubr.bf16.gmra.mrb[124].mxu0 %v6351_v22  ;;  %v3438_v59 = vrot.slane %v3436_v52, 7  ;;  %v3448_v6 = vshll.u32 %v3175_v11, 16  ;;  %v3793_v46 = vld [vmem:[#allocation2 + $0xec] sm:$0x1] }
 0x1bb   : > { %v4012_v10 = vrot.slane %v4011_v14, 4  ;;  %v6307_v40 = vrot.slane %v3431_v36, 11  ;;  %v3447_v17 = vrot.slane %v3445_v63, 7  ;;  %v4029_v8 = vshrl.u32 %v3791_v33, 16 }
 0x1bc   : > { %v4022_v32 = vrot.slane %v4021_v61, 4  ;;  %v4032_v50 = vshll.u32 %v3791_v33, 16  ;;  %v8709_v56 = vpop.f32.mrb[44].mxu0  ;;  %v3441_v5 = vor.u32 %v3439_v3, %v3438_v59  ;;  %v3443_v18 = vrot.slane %v3438_v59, 4  ;;  %v8715_v37 = vpop.f32.mrb[44].mxu1 }
 0x1bd   : > { %9340 = vst [vmem:[#allocation9_spill] sm:$0xff] %v8709_v56  ;;  %v4017_v21 = vsel %vm7764_vm10, %v4012_v10, %v4016_v34  ;;  %v4038_v26 = vshll.u32 %v3792_v54, 16  ;;  %v8713_v42 = vpop.f32.mrb[45].mxu0  ;;  %9342 = vst [vmem:[#allocation10_spill] sm:$0xff] %v8715_v37  ;;  %v3450_v36 = vor.u32 %v3448_v6, %v3447_v17  ;;  %v4031_v11 = vrot.slane %v4029_v8, 4  ;;  %v8721_v30 = vpop.f32.mrb[45].mxu1 }
 0x1be   : > { %9341 = vst [vmem:[#allocation11_spill] sm:$0xff] %v8713_v42  ;;  %v4027_v52 = vsel %vm7764_vm10, %v4022_v32, %v4026_v20  ;;  %v4034_v0 = vrot.slane %v4032_v50, 5  ;;  %v8719_v33 = vpop.f32.mrb[46].mxu0  ;;  %9344 = vst [vmem:[#allocation13_spill] sm:$0xff] %v8721_v30  ;;  %v3442_v59 = vsel %vm7393_vm2, %v6307_v40, %v3441_v5  ;;  %v4042_v14 = vshrl.u32 %v3792_v54, 16  ;;  %v8727_v63 = vpop.f32.mrb[46].mxu1 }
 0x1bf   : > { %9343 = vst [vmem:[#allocation12_spill] sm:$0xff] %v8719_v33  ;;  %v6352_v22 = vcombine.low %v4017_v21, %v4027_v52  ;;  %v4040_v34 = vrot.slane %v4038_v26, 5  ;;  %v3794_v61 = vld [vmem:[#allocation2 + $0xf8] sm:$0xf]  ;;  %v8725_v3 = vpop.f32.mrb[47].mxu0  ;;  %9346 = vst [vmem:[#allocation5_spill] sm:$0xff] %v8727_v63  ;;  %v3451_v6 = vsel %vm7393_vm2, %v3443_v18, %v3450_v36 }
 0x1c0   : > { %9345 = vst [vmem:[#allocation15_spill] sm:$0xff] %v8725_v3  ;;  %v4035_v20 = vor.u32 %v4034_v0, %v4031_v11  ;;  %v4048_v10 = vshll.u32 %v3793_v46, 16  ;;  %v9347_v32 = vld [vmem:[#allocation14_spill] sm:$0xff]  ;;  %v9348_v17 = vld [vmem:[#allocation16_spill] sm:$0xff]  ;;  %v7193_v50 = vld [vmem:[#allocation2 + $0x120] sm:$0xff]   ;;  %v8735_v52 = vpop.f32.mrb[47].mxu1  ;;  %v6323_v54 = vcombine.low %v3442_v59, %v3451_v6 }
 0x1c1   : > { %v8733_v8 = vadd.f32 %v9348_v17, %v9347_v32  ;;  %v3795_v21 = vld [vmem:[#allocation2 + $0xfc] sm:$0xf]  ;;  %9349 = vst [vmem:[#allocation6_spill] sm:$0xff] %v8735_v52  ;;  %7036 = vmatprep.mubr.bf16.mxu0 %v6352_v22  ;;  %v4044_v40 = vrot.slane %v4042_v14, 4  ;;  %v9350_v5 = vld [vmem:[#allocation17_spill] sm:$0xff]  ;;  %v9353_v63 = vld [vmem:[#allocation19_spill] sm:$0xff] }
 0x1c2   : > { %v9351_v26 = vld [vmem:[#allocation18_spill] sm:$0xff]  ;;  %v9354_v37 = vld [vmem:[#allocation20_spill] sm:$0xff]  ;;  %v3796_v36 = vld [vmem:[#allocation2 + $0x100] sm:$0x1]  ;;  %v4036_v46 = vrot.slane %v4035_v20, 4  ;;  %v4050_v11 = vrot.slane %v4048_v10, 5  ;;  %5600 = vmatmul.mubr.bf16.gmra.mrb[124].mxu1 %v6323_v54 }
 0x1c3   : > { %v8739_v30 = vadd.f32 %v9351_v26, %v9350_v5  ;;  %v6668_v18 = vadd.f32 %v9354_v37, %v9353_v63  ;;  %v9355_v0 = vld [vmem:[#allocation21_spill] sm:$0xff]  ;;  %v9356_v32 = vld [vmem:[#allocation22_spill] sm:$0xff]  ;;  %v4053_v3 = vshrl.u32 %v3794_v61, 16  ;;  %v4045_v52 = vor.u32 %v4044_v40, %v4040_v34  ;;  %v3177_v6 = vld [vmem:[#allocation2 + $0x120] sm:$0xf]  ;;  %5607 = vmatprep.mubr.bf16.mxu1 %v7193_v50 }
 0x1c4   : > { %v6671_v17 = vadd.f32 %v9356_v32, %v9355_v0  ;;  %v3176_v33 = vld [vmem:[#allocation2 + $0x11c] sm:$0x8]  ;;  %v4056_v59 = vshll.u32 %v3794_v61, 16  ;;  %v4062_v14 = vshll.u32 %v3795_v21, 16  ;;  %v3178_v5 = vld [vmem:[#allocation2 + $0x124] sm:$0xf]  ;;  %v4041_v37 = vsel %vm7764_vm10, %v4036_v46, %v4040_v34 }
 0x1c5   : > { %9352 = vst [vmem:[#allocation14_spill] sm:$0xff] %v8739_v30  ;;  %v8746_v22 = vadd.f32 %v6668_v18, %v8549_v7  ;;  %v4055_v20 = vrot.slane %v4053_v3, 4  ;;  %v4066_v10 = vshrl.u32 %v3795_v21, 16  ;;  %v3797_v26 = vld [vmem:[#allocation2 + $0x10c] sm:$0xf]  ;;  %v8753_v0 = vpop.f32.mrb[48].mxu0 }
 0x1c6   : > { %v8751_v63 = vadd.f32 %v6671_v17, %v8553_v57  ;;  %9359 = vst [vmem:[#allocation18_spill] sm:$0xff] %v8753_v0  ;;  %v4046_v54 = vrot.slane %v4045_v52, 4  ;;  %v4058_v40 = vrot.slane %v4056_v59, 5  ;;  %v4064_v7 = vrot.slane %v4062_v14, 5  ;;  %v8755_v61 = vpop.f32.mrb[49].mxu0 }
 0x1c7   : > { %9357 = vst [vmem:[#allocation16_spill] sm:$0xff] %v8746_v22  ;;  %v4072_v18 = vshll.u32 %v3796_v36, 16  ;;  %9360 = vst [vmem:[#allocation19_spill] sm:$0xff] %v8755_v61  ;;  %v4068_v32 = vrot.slane %v4066_v10, 4  ;;  %v3453_v22 = vshrl.u32 %v3176_v33, 16  ;;  %v3458_v42 = vshrl.u32 %v3177_v6, 16 }
 0x1c8   : > { %9358 = vst [vmem:[#allocation17_spill] sm:$0xff] %v8751_v63  ;;  %v3461_v56 = vshll.u32 %v3177_v6, 16  ;;  %v8757_v34 = vpop.f32.mrb[50].mxu0  ;;  %v4051_v57 = vsel %vm7764_vm10, %v4046_v54, %v4050_v11  ;;  %v4059_v3 = vor.u32 %v4058_v40, %v4055_v20  ;;  %v3467_v21 = vshrl.u32 %v3178_v5, 16  ;;  %v3798_v14 = vld [vmem:[#allocation2 + $0x110] sm:$0xf] }
 0x1c9   : > { %9361 = vst [vmem:[#allocation20_spill] sm:$0xff] %v8757_v34  ;;  %v4074_v50 = vrot.slane %v4072_v18, 5  ;;  %v8761_v46 = vpop.f32.mrb[51].mxu0  ;;  %v6353_v52 = vcombine.low %v4041_v37, %v4051_v57  ;;  %v4069_v17 = vor.u32 %v4068_v32, %v4064_v7  ;;  %v6308_v59 = vrot.slane %v3453_v22, 11  ;;  %v3799_v30 = vld [vmem:[#allocation2 + $0x114] sm:$0x1] }
 0x1ca   : > { %v3460_v36 = vrot.slane %v3458_v42, 7  ;;  %v4060_v63 = vrot.slane %v4059_v3, 4  ;;  %v3469_v10 = vrot.slane %v3467_v21, 7  ;;  %v3470_v33 = vshll.u32 %v3178_v5, 16  ;;  %v7194_v32 = vld [vmem:[#allocation2 + $0x134] sm:$0xff]  }
 0x1cb   : > { %v4077_v61 = vshrl.u32 %v3797_v26, 16  ;;  %7037 = vmatmul.mubr.bf16.gmra.mrb[128].mxu0 %v6353_v52  ;;  %v4070_v6 = vrot.slane %v4069_v17, 4  ;;  %v4080_v11 = vshll.u32 %v3797_v26, 16  ;;  %v4086_v37 = vshll.u32 %v3798_v14, 16 }
 0x1cc   : > { %v3463_v34 = vor.u32 %v3461_v56, %v3460_v36  ;;  %v3465_v0 = vrot.slane %v3460_v36, 4  ;;  %v4065_v20 = vsel %vm7764_vm10, %v4060_v63, %v4064_v7  ;;  %v3472_v54 = vor.u32 %v3470_v33, %v3469_v10  ;;  %v8769_v57 = vpop.f32.mrb[52].mxu0  ;;  %v3800_v7 = vld [vmem:[#allocation2 + $0x120] sm:$0xf]  ;;  %v3801_v36 = vld [vmem:[#allocation2 + $0x124] sm:$0xf] }
 0x1cd   : > { %v4079_v40 = vrot.slane %v4077_v61, 4  ;;  %v4075_v42 = vsel %vm7764_vm10, %v4070_v6, %v4074_v50  ;;  %v4082_v5 = vrot.slane %v4080_v11, 5  ;;  %v4090_v18 = vshrl.u32 %v3798_v14, 16  ;;  %v8773_v61 = vpop.f32.mrb[48].mxu1  ;;  %v8775_v21 = vpop.f32.mrb[53].mxu0  ;;  %v9364_v33 = vld [vmem:[#allocation24_spill] sm:$0xff] }
 0x1ce   : > { %v3464_v22 = vsel %vm7393_vm2, %v6308_v59, %v3463_v34  ;;  %v6354_v56 = vcombine.low %v4065_v20, %v4075_v42  ;;  %v3473_v26 = vsel %vm7393_vm2, %v3465_v0, %v3472_v54  ;;  %v4088_v3 = vrot.slane %v4086_v37, 5  ;;  %v9362_v34 = vld [vmem:[#allocation23_spill] sm:$0xff]  ;;  %v8781_v14 = vpop.f32.mrb[49].mxu1  ;;  %v8783_v10 = vpop.f32.mrb[54].mxu0  ;;  %v9365_v6 = vld [vmem:[#allocation25_spill] sm:$0xff]  ;;  %v9366_v20 = vld [vmem:[#allocation26_spill] sm:$0xff] }
 0x1cf   : > { %v4096_v63 = vshll.u32 %v3799_v30, 16  ;;  %v6324_v50 = vcombine.low %v3464_v22, %v3473_v26  ;;  %v4083_v52 = vor.u32 %v4082_v5, %v4079_v40  ;;  %v4092_v17 = vrot.slane %v4090_v18, 4  ;;  %9363 = vst [vmem:[#allocation21_spill] sm:$0xff] %v8783_v10  ;;  %v9367_v54 = vld [vmem:[#allocation27_spill] sm:$0xff]  ;;  %v3802_v37 = vld [vmem:[#allocation2 + $0x128] sm:$0x1] }
 0x1d0   : > { %v8779_v59 = vadd.f32 %v8474_v9, %v9362_v34  ;;  %7040 = vmatprep.mubr.bf16.mxu0 %v6354_v56  ;;  %v8787_v30 = vadd.f32 %v8484_v45, %v8476_v44  ;;  %v6674_v11 = vadd.f32 %v9365_v6, %v9364_v33  ;;  %v6677_v40 = vadd.f32 %v9367_v54, %v9366_v20  ;;  %v8793_v9 = vpop.f32.mrb[50].mxu1  ;;  %v8795_v42 = vpop.f32.mrb[55].mxu0  ;;  %v3179_v26 = vld [vmem:[#allocation2 + $0x130] sm:$0x8]  ;;  %v3180_v6 = vld [vmem:[#allocation2 + $0x134] sm:$0xf] }
 0x1d1   : > { %v4098_v0 = vrot.slane %v4096_v63, 5  ;;  %9368 = vst [vmem:[#allocation22_spill] sm:$0xff] %v8795_v42  ;;  %5608 = vmatmul.mubr.bf16.gmra.mrb[128].mxu1 %v6324_v50  ;;  %v4084_v22 = vrot.slane %v4083_v52, 4  ;;  %v4093_v5 = vor.u32 %v4092_v17, %v4088_v3  ;;  %v4101_v18 = vshrl.u32 %v3800_v7, 16  ;;  %v8797_v63 = vpop.f32.mrb[51].mxu1 }
 0x1d2   : > { %v4104_v56 = vshll.u32 %v3800_v7, 16  ;;  %9369 = vst [vmem:[#allocation23_spill] sm:$0xff] %v8797_v63  ;;  %v8800_v44 = vadd.f32 %v6674_v11, %v8597_v39  ;;  %v8803_v45 = vadd.f32 %v6677_v40, %v8601_v16  ;;  %5615 = vmatprep.mubr.bf16.mxu1 %v7194_v32  ;;  %v4110_v34 = vshll.u32 %v3801_v36, 16  ;;  %v3181_v7 = vld [vmem:[#allocation2 + $0x138] sm:$0xf] }
 0x1d3   : > { %v4114_v33 = vshrl.u32 %v3801_v36, 16  ;;  %v4089_v50 = vsel %vm7764_vm10, %v4084_v22, %v4088_v3  ;;  %v4094_v52 = vrot.slane %v4093_v5, 4  ;;  %v4103_v17 = vrot.slane %v4101_v18, 4  ;;  %v3803_v39 = vld [vmem:[#allocation2 + $0x134] sm:$0xf] }
 0x1d4   : > { %9370 = vst [vmem:[#allocation24_spill] sm:$0xff] %v8800_v44  ;;  %9371 = vst [vmem:[#allocation25_spill] sm:$0xff] %v8803_v45  ;;  %v4106_v20 = vrot.slane %v4104_v56, 5  ;;  %v4112_v54 = vrot.slane %v4110_v34, 5  ;;  %v4120_v10 = vshll.u32 %v3802_v37, 16  ;;  %v3475_v63 = vshrl.u32 %v3179_v26, 16 }
 0x1d5   : > { %v4116_v42 = vrot.slane %v4114_v33, 4  ;;  %v4099_v16 = vsel %vm7764_vm10, %v4094_v52, %v4098_v0  ;;  %v3480_v32 = vshrl.u32 %v3180_v6, 16  ;;  %v3483_v40 = vshll.u32 %v3180_v6, 16  ;;  %v3804_v36 = vld [vmem:[#allocation2 + $0x138] sm:$0xf]  ;;  %v8809_v45 = vpop.f32.mrb[56].mxu0 }
 0x1d6   : > { %v4107_v11 = vor.u32 %v4106_v20, %v4103_v17  ;;  %9372 = vst [vmem:[#allocation26_spill] sm:$0xff] %v8809_v45  ;;  %v6355_v44 = vcombine.low %v4089_v50, %v4099_v16  ;;  %v4122_v22 = vrot.slane %v4120_v10, 5  ;;  %v6309_v5 = vrot.slane %v3475_v63, 11  ;;  %v8811_v18 = vpop.f32.mrb[57].mxu0  ;;  %v3805_v16 = vld [vmem:[#allocation2 + $0x13c] sm:$0x1] }
 0x1d7   : > { %v4117_v3 = vor.u32 %v4116_v42, %v4112_v54  ;;  %9373 = vst [vmem:[#allocation27_spill] sm:$0xff] %v8811_v18  ;;  %v3482_v34 = vrot.slane %v3480_v32, 7  ;;  %v3489_v37 = vshrl.u32 %v3181_v7, 16  ;;  %v3492_v26 = vshll.u32 %v3181_v7, 16  ;;  %v8813_v33 = vpop.f32.mrb[58].mxu0 }
 0x1d8   : > { %v4108_v56 = vrot.slane %v4107_v11, 4  ;;  %9374 = vst [vmem:[#allocation47_spill] sm:$0xff] %v8813_v33  ;;  %7041 = vmatmul.mubr.bf16.gmra.mrb[132].mxu0 %v6355_v44  ;;  %v4125_v52 = vshrl.u32 %v3803_v39, 16  ;;  %v4128_v17 = vshll.u32 %v3803_v39, 16  ;;  %v4134_v6 = vshll.u32 %v3804_v36, 16  ;;  %v8815_v20 = vpop.f32.mrb[59].mxu0 }
 0x1d9   : > { %v4118_v0 = vrot.slane %v4117_v3, 4  ;;  %9375 = vst [vmem:[#allocation48_spill] sm:$0xff] %v8815_v20  ;;  %v3485_v10 = vor.u32 %v3483_v40, %v3482_v34  ;;  %v3487_v63 = vrot.slane %v3482_v34, 4  ;;  %v3491_v50 = vrot.slane %v3489_v37, 7  ;;  %v8821_v44 = vpop.f32.mrb[52].mxu1 }
 0x1da   : > { %v4113_v42 = vsel %vm7764_vm10, %v4108_v56, %v4112_v54  ;;  %v4127_v7 = vrot.slane %v4125_v52, 4  ;;  %v4130_v32 = vrot.slane %v4128_v17, 5  ;;  %v4136_v33 = vrot.slane %v4134_v6, 5  ;;  %v3182_v45 = vld [vmem:[#allocation2 + $0x144] sm:$0x8]  ;;  %v8825_v54 = vpop.f32.mrb[53].mxu1 }
 0x1db   : > { %v4123_v11 = vsel %vm7764_vm10, %v4118_v0, %v4122_v22  ;;  %v3486_v39 = vsel %vm7393_vm2, %v6309_v5, %v3485_v10  ;;  %v3494_v20 = vor.u32 %v3492_v26, %v3491_v50  ;;  %v4138_v18 = vshrl.u32 %v3804_v36, 16  ;;  %v9376_v22 = vld [vmem:[#allocation30_spill] sm:$0xff]  ;;  %v3183_v0 = vld [vmem:[#allocation2 + $0x148] sm:$0xf]  ;;  %v8835_v52 = vpop.f32.mrb[54].mxu1  ;;  %v9377_v26 = vld [vmem:[#allocation31_spill] sm:$0xff] }
 0x1dc   : > { %v6356_v3 = vcombine.low %v4113_v42, %v4123_v11  ;;  %v4131_v40 = vor.u32 %v4130_v32, %v4127_v7  ;;  %v4144_v56 = vshll.u32 %v3805_v16, 16  ;;  %v8829_v34 = vadd.f32 %v8508_v62, %v8502_v23  ;;  %v9378_v17 = vld [vmem:[#allocation32_spill] sm:$0xff]  ;;  %v9379_v42 = vld [vmem:[#allocation33_spill] sm:$0xff]  ;;  %v9380_v10 = vld [vmem:[#allocation34_spill] sm:$0xff]  ;;  %v8843_v16 = vpop.f32.mrb[55].mxu1 }
 0x1dd   : > { %v8833_v37 = vadd.f32 %v9376_v22, %v8514_v19  ;;  %v3495_v36 = vsel %vm7393_vm2, %v3487_v63, %v3494_v20  ;;  %v4140_v5 = vrot.slane %v4138_v18, 4  ;;  %v6680_v6 = vadd.f32 %v9378_v17, %v9377_v26  ;;  %v7195_v23 = vld [vmem:[#allocation2 + $0x148] sm:$0xff]  }
 0x1de   : > { %7044 = vmatprep.mubr.bf16.mxu0 %v6356_v3  ;;  %v6683_v50 = vadd.f32 %v9380_v10, %v9379_v42  ;;  %v3184_v62 = vld [vmem:[#allocation2 + $0x14c] sm:$0xf]  ;;  %v6325_v19 = vcombine.low %v3486_v39, %v3495_v36  ;;  %v4132_v11 = vrot.slane %v4131_v40, 4  ;;  %v4146_v7 = vrot.slane %v4144_v56, 5  ;;  %v3806_v63 = vld [vmem:[#allocation2 + $0x148] sm:$0xf] }
 0x1df   : > { %v3497_v32 = vshrl.u32 %v3182_v45, 16  ;;  %v4141_v22 = vor.u32 %v4140_v5, %v4136_v33  ;;  %v8846_v3 = vadd.f32 %v6680_v6, %v8644_v13  ;;  %v3502_v20 = vshrl.u32 %v3183_v0, 16  ;;  %v3807_v39 = vld [vmem:[#allocation2 + $0x14c] sm:$0xf] }
 0x1e0   : > { %v8849_v18 = vadd.f32 %v6683_v50, %v8648_v25  ;;  %5616 = vmatmul.mubr.bf16.gmra.mrb[132].mxu1 %v6325_v19  ;;  %v4137_v26 = vsel %vm7764_vm10, %v4132_v11, %v4136_v33  ;;  %v3505_v42 = vshll.u32 %v3183_v0, 16  ;;  %v3511_v10 = vshrl.u32 %v3184_v62, 16  ;;  %v8857_v25 = vpop.f32.mrb[60].mxu0  ;;  %v3808_v33 = vld [vmem:[#allocation2 + $0x150] sm:$0x1] }
 0x1e1   : > { %9381 = vst [vmem:[#allocation30_spill] sm:$0xff] %v8846_v3  ;;  %v6310_v17 = vrot.slane %v3497_v32, 11  ;;  %v4142_v40 = vrot.slane %v4141_v22, 4  ;;  %5623 = vmatprep.mubr.bf16.mxu1 %v7195_v23  ;;  %v3504_v45 = vrot.slane %v3502_v20, 7  ;;  %v3514_v56 = vshll.u32 %v3184_v62, 16  ;;  %v8863_v50 = vpop.f32.mrb[61].mxu0 }
 0x1e2   : > { %9382 = vst [vmem:[#allocation31_spill] sm:$0xff] %v8849_v18  ;;  %v8855_v13 = vadd.f32 %v8567_v1, %v8561_v24  ;;  %v3513_v36 = vrot.slane %v3511_v10, 7  ;;  %v8861_v5 = vadd.f32 %v8578_v29, %v8571_v43  ;;  %v4149_v6 = vshrl.u32 %v3806_v63, 16  ;;  %9383 = vst [vmem:[#allocation32_spill] sm:$0xff] %v8863_v50  ;;  %v396_v24 = vld [vmem:[#allocation2 + $0x164] sm:$0x1] }
 0x1e3   : > { %v4152_v0 = vshll.u32 %v3806_v63, 16  ;;  %v4147_v23 = vsel %vm7764_vm10, %v4142_v40, %v4146_v7  ;;  %v3507_v62 = vor.u32 %v3505_v42, %v3504_v45  ;;  %v3509_v19 = vrot.slane %v3504_v45, 4  ;;  %v8867_v1 = vpop.f32.mrb[62].mxu0  ;;  %v3809_v43 = vld [vmem:[#allocation2 + $0x15c] sm:$0xf] }
 0x1e4   : > { %v4158_v11 = vshll.u32 %v3807_v39, 16  ;;  %v6357_v32 = vcombine.low %v4137_v26, %v4147_v23  ;;  %v3516_v22 = vor.u32 %v3514_v56, %v3513_v36  ;;  %v4151_v20 = vrot.slane %v4149_v6, 4  ;;  %v8869_v29 = vpop.f32.mrb[63].mxu0  ;;  %v3810_v7 = vld [vmem:[#allocation2 + $0x160] sm:$0xf] }
 0x1e5   : > { %v4154_v10 = vrot.slane %v4152_v0, 5  ;;  %9384 = vst [vmem:[#allocation33_spill] sm:$0xff] %v8869_v29  ;;  %v3508_v63 = vsel %vm7393_vm2, %v6310_v17, %v3507_v62  ;;  %v4162_v3 = vshrl.u32 %v3807_v39, 16  ;;  %v4168_v50 = vshll.u32 %v3808_v33, 16  ;;  %v7196_v36 = vld [vmem:[#allocation2 + $0x15c] sm:$0xff]   ;;  %v8879_v33 = vpop.f32.mrb[56].mxu1 }
 0x1e6   : > { %v4160_v18 = vrot.slane %v4158_v11, 5  ;;  %7045 = vmatmul.mubr.bf16.gmra.mrb[136].mxu0 %v6357_v32  ;;  %v3517_v42 = vsel %vm7393_vm2, %v3509_v19, %v3516_v22  ;;  %v6686_v26 = vadd.f32 %v8573_v12, %v8569_v53  ;;  %v397_v56 = vsel %vm7684_vm6, 0, %v396_v24  ;;  %v3185_v39 = vld [vmem:[#allocation2 + $0x158] sm:$0x8]  ;;  %v3186_v22 = vld [vmem:[#allocation2 + $0x15c] sm:$0xf] }
 0x1e7   : > { %v4155_v40 = vor.u32 %v4154_v10, %v4151_v20  ;;  %v6326_v6 = vcombine.low %v3508_v63, %v3517_v42  ;;  %v4164_v0 = vrot.slane %v4162_v3, 4  ;;  %v4170_v23 = vrot.slane %v4168_v50, 5  ;;  %398 = vst [vmem:[#allocation2 + $0x164] sm:$0x1] %v397_v56  ;;  %v8884_v53 = vpop.f32.mrb[57].mxu1  ;;  %v9387_v3 = vld [vmem:[#allocation37_spill] sm:$0xff] }
 0x1e8   : > { %v4173_v17 = vshrl.u32 %v3809_v43, 16  ;;  %v8882_v11 = vadd.f32 %v6686_v26, %v8689_v49  ;;  %v4176_v19 = vshll.u32 %v3809_v43, 16  ;;  %v4182_v32 = vshll.u32 %v3810_v7, 16  ;;  %v9388_v50 = vld [vmem:[#allocation38_spill] sm:$0xff]  ;;  %v3187_v63 = vld [vmem:[#allocation2 + $0x160] sm:$0xf] }
 0x1e9   : > { %v4156_v62 = vrot.slane %v4155_v40, 4  ;;  %5624 = vmatmul.mubr.bf16.gmra.mrb[136].mxu1 %v6326_v6  ;;  %v4165_v12 = vor.u32 %v4164_v0, %v4160_v18  ;;  %v4186_v20 = vshrl.u32 %v3810_v7, 16  ;;  %v6689_v10 = vadd.f32 %v9388_v50, %v9387_v3  ;;  %v8888_v42 = vpop.f32.mrb[58].mxu1 }
 0x1ea   : > { %9386 = vst [vmem:[#allocation34_spill] sm:$0xff] %v8882_v11  ;;  %v4175_v24 = vrot.slane %v4173_v17, 4  ;;  %v4178_v49 = vrot.slane %v4176_v19, 5  ;;  %v4184_v26 = vrot.slane %v4182_v32, 5  ;;  %5631 = vmatprep.mubr.bf16.mxu1 %v7196_v36  ;;  %v3519_v43 = vshrl.u32 %v3185_v39, 16  ;;  %v8892_v45 = vpop.f32.mrb[59].mxu1 }
 0x1eb   : > { %v4161_v40 = vsel %vm7764_vm10, %v4156_v62, %v4160_v18  ;;  %v4166_v56 = vrot.slane %v4165_v12, 4  ;;  %v4188_v6 = vrot.slane %v4186_v20, 4  ;;  %v8895_v0 = vadd.f32 %v6689_v10, %v8693_v58  ;;  %v8899_v36 = vpop.f32.mrb[64].mxu0 }
 0x1ec   : > { %v3524_v7 = vshrl.u32 %v3186_v22, 16  ;;  %v4179_v17 = vor.u32 %v4178_v49, %v4175_v24  ;;  %v6311_v3 = vrot.slane %v3519_v43, 11  ;;  %v3527_v50 = vshll.u32 %v3186_v22, 16  ;;  %v8903_v10 = vpop.f32.mrb[65].mxu0 }
 0x1ed   : > { %9389 = vst [vmem:[#allocation4_spill] sm:$0xff] %v8895_v0  ;;  %v3533_v11 = vshrl.u32 %v3187_v63, 16  ;;  %v4171_v29 = vsel %vm7764_vm10, %v4166_v56, %v4170_v23  ;;  %v4189_v18 = vor.u32 %v4188_v6, %v4184_v26  ;;  %v3536_v19 = vshll.u32 %v3187_v63, 16  ;;  %v8905_v0 = vpop.f32.mrb[66].mxu0 }
 0x1ee   : > { %v3526_v62 = vrot.slane %v3524_v7, 7  ;;  %v6358_v39 = vcombine.low %v4161_v40, %v4171_v29  ;;  %v3811_v32 = vld [vmem:[#allocation2 + $0x164] sm:$0x1]  ;;  %v4180_v12 = vrot.slane %v4179_v17, 4  ;;  %v6604_v58 = vadd.f32 %v8619_v28, %v8615_v31  ;;  %v8913_v31 = vpop.f32.mrb[67].mxu0 }
 0x1ef   : > { %v3535_v20 = vrot.slane %v3533_v11, 7  ;;  %v4190_v24 = vrot.slane %v4189_v18, 4  ;;  %v4192_v22 = vshll.u32 %v3811_v32, 16  ;;  %v6607_v29 = vadd.f32 %v8628_v4, %v8623_v41  ;;  %v9391_v4 = vld [vmem:[#allocation44_spill] sm:$0xff] }
 0x1f0   : > { %v3529_v49 = vor.u32 %v3527_v50, %v3526_v62  ;;  %v3531_v43 = vrot.slane %v3526_v62, 4  ;;  %7048 = vmatprep.mubr.bf16.mxu0 %v6358_v39  ;;  %v4185_v23 = vsel %vm7764_vm10, %v4180_v12, %v4184_v26  ;;  %v6692_v11 = vadd.f32 %v8625_v27, %v8621_v15  ;;  %v9390_v27 = vld [vmem:[#allocation43_spill] sm:$0xff]  ;;  %v9393_v50 = vld [vmem:[#allocation45_spill] sm:$0xff]  ;;  %v6726_v38 = vpop.f32.mrb[60].mxu1 }
 0x1f1   : > { %v3538_v63 = vor.u32 %v3536_v19, %v3535_v20  ;;  %v4194_v28 = vrot.slane %v4192_v22, 5  ;;  %v6695_v56 = vadd.f32 %v8632_v35, %v8630_v48  ;;  %v6610_v6 = vadd.f32 %v8665_v51, %v8663_v55  ;;  %v9392_v48 = vld [vmem:[#allocation14_spill] sm:$0xff]  ;;  %v9395_v62 = vld [vmem:[#allocation9_spill] sm:$0xff]  ;;  %v9396_v19 = vld [vmem:[#allocation11_spill] sm:$0xff]  ;;  %v6727_v12 = vpop.f32.mrb[61].mxu1 }
 0x1f2   : > { %v3530_v40 = vsel %vm7393_vm2, %v6311_v3, %v3529_v49  ;;  %v8924_v41 = vadd.f32 %v6692_v11, %v8733_v8  ;;  %v6613_v15 = vadd.f32 %v8669_v60, %v8667_v2  ;;  %v6698_v7 = vadd.f32 %v9391_v4, %v9390_v27  ;;  %v9394_v55 = vld [vmem:[#allocation46_spill] sm:$0xff]  ;;  %v9397_v60 = vld [vmem:[#allocation12_spill] sm:$0xff]  ;;  %v9398_v39 = vld [vmem:[#allocation15_spill] sm:$0xff] }
 0x1f3   : > { %v3539_v26 = vsel %vm7393_vm2, %v3531_v43, %v3538_v63  ;;  %v4195_v17 = vsel %vm7764_vm10, %v4190_v24, %v4194_v28  ;;  %v5235_v35 = vadd.f32 %v6695_v56, %v9392_v48  ;;  %v6701_v51 = vadd.f32 %v9394_v55, %v9393_v50  ;;  %v9399_v20 = vld [vmem:[#allocation10_spill] sm:$0xff]  ;;  %v9400_v24 = vld [vmem:[#allocation13_spill] sm:$0xff]  ;;  %v9402_v43 = vld [vmem:[#allocation19_spill] sm:$0xff]  ;;  %v6729_v28 = vpop.f32.mrb[62].mxu1 }
 0x1f4   : > { %v6327_v3 = vcombine.low %v3530_v40, %v3539_v26  ;;  %v6359_v18 = vcombine.low %v4185_v23, %v4195_v17  ;;  %v8936_v8 = vadd.f32 %v6698_v7, %v8779_v59  ;;  %v6616_v2 = vadd.f32 %v9396_v19, %v9395_v62  ;;  %v9401_v49 = vld [vmem:[#allocation18_spill] sm:$0xff]  ;;  %v9403_v63 = vld [vmem:[#allocation5_spill] sm:$0xff]  ;;  %v9405_v40 = vld [vmem:[#allocation20_spill] sm:$0xff]  ;;  %v6730_v7 = vpop.f32.mrb[63].mxu1 }
 0x1f5   : > { %v6619_v32 = vadd.f32 %v9398_v39, %v9397_v60  ;;  %v8943_v47 = vadd.f32 %v6701_v51, %v8787_v30  ;;  %v6704_v22 = vadd.f32 %v9400_v24, %v9399_v20  ;;  %v6774_v23 = vadd.f32 %v9402_v43, %v9401_v49  ;;  %v9404_v59 = vld [vmem:[#allocation6_spill] sm:$0xff]  ;;  %v9406_v27 = vld [vmem:[#allocation23_spill] sm:$0xff]  ;;  %v9416_v24 = vld [vmem:[#allocation48_spill] sm:$0xff] }
 0x1f6   : > { %5632 = vmatmul.mubr.bf16.gmra.mrb[140].mxu1 %v6327_v3  ;;  %v6707_v11 = vadd.f32 %v9404_v59, %v9403_v63  ;;  %7049 = vmatmul.mubr.bf16.gmra.mrb[140].mxu0 %v6359_v18  ;;  %v6777_v56 = vadd.f32 %v8761_v46, %v9405_v40  ;;  %v6710_v26 = vadd.f32 %v8781_v14, %v8773_v61  ;;  %v9407_v3 = vld [vmem:[#allocation7_spill] sm:$0xff]  ;;  %v9408_v46 = vld [vmem:[#allocation21_spill] sm:$0xff]  ;;  %v9409_v55 = vld [vmem:[#allocation22_spill] sm:$0xff] }
 0x1f7   : > { %v6780_v30 = vadd.f32 %v8775_v21, %v8769_v57  ;;  %v6713_v4 = vadd.f32 %v9406_v27, %v8793_v9  ;;  %v8960_v17 = vadd.f32 %v6704_v22, %v8829_v34  ;;  %v8963_v48 = vadd.f32 %v6774_v23, %v9407_v3  ;;  %v9410_v61 = vld [vmem:[#allocation8_spill] sm:$0xff]  ;;  %v9412_v18 = vld [vmem:[#allocation17_spill] sm:$0xff]  ;;  %v9413_v19 = vld [vmem:[#allocation26_spill] sm:$0xff]  ;;  %v6802_v63 = vpop.f32.mrb[68].mxu0 }
 0x1f8   : > { %v8966_v50 = vadd.f32 %v6707_v11, %v8833_v37  ;;  %v6783_v51 = vadd.f32 %v9409_v55, %v9408_v46  ;;  %v8971_v14 = vadd.f32 %v6777_v56, %v9410_v61  ;;  %v8974_v57 = vadd.f32 %v6710_v26, %v8855_v13  ;;  %v9411_v21 = vld [vmem:[#allocation16_spill] sm:$0xff]  ;;  %v9414_v60 = vld [vmem:[#allocation27_spill] sm:$0xff]  ;;  %v6803_v40 = vpop.f32.mrb[69].mxu0  ;;  %v9420_v56 = vld [vmem:[#allocation25_spill] sm:$0xff] }
 0x1f9   : > { %v8977_v9 = vadd.f32 %v6780_v30, %v9411_v21  ;;  %v8980_v34 = vadd.f32 %v6713_v4, %v8861_v5  ;;  %v6716_v37 = vadd.f32 %v8825_v54, %v8821_v44  ;;  %v6786_v39 = vadd.f32 %v9414_v60, %v9413_v19  ;;  %v9415_v13 = vld [vmem:[#allocation47_spill] sm:$0xff]  ;;  %v9417_v5 = vld [vmem:[#allocation32_spill] sm:$0xff]  ;;  %v9426_v19 = vld [vmem:[#allocation29_spill] sm:$0xff] }
 0x1fa   : > { %v8983_v62 = vadd.f32 %v6783_v51, %v9412_v18  ;;  %v6719_v20 = vadd.f32 %v8843_v16, %v8835_v52  ;;  %v6789_v22 = vadd.f32 %v9416_v24, %v9415_v13  ;;  %v6722_v49 = vadd.f32 %v8884_v53, %v8879_v33  ;;  %v9418_v54 = vld [vmem:[#allocation24_spill] sm:$0xff]  ;;  %v9419_v52 = vld [vmem:[#allocation33_spill] sm:$0xff]  ;;  %v9423_v51 = vld [vmem:[#allocation34_spill] sm:$0xff] }
 0x1fb   : > { %v6792_v43 = vadd.f32 %v9417_v5, %v8857_v25  ;;  %v6725_v23 = vadd.f32 %v8892_v45, %v8888_v42  ;;  %v8999_v44 = vadd.f32 %v6716_v37, %v6604_v58  ;;  %v9002_v59 = vadd.f32 %v6786_v39, %v9418_v54  ;;  %v9421_v25 = vld [vmem:[#allocation30_spill] sm:$0xff]  ;;  %v6805_v45 = vpop.f32.mrb[70].mxu0  ;;  %v9422_v58 = vld [vmem:[#allocation31_spill] sm:$0xff]  ;;  %v9424_v18 = vld [vmem:[#allocation4_spill] sm:$0xff] }
 0x1fc   : > { %v9004_v11 = vadd.f32 %v6719_v20, %v6607_v29  ;;  %v6795_v16 = vadd.f32 %v9419_v52, %v8867_v1  ;;  %v9009_v33 = vadd.f32 %v6789_v22, %v9420_v56  ;;  %v9011_v53 = vadd.f32 %v6722_v49, %v6610_v6  ;;  %v6806_v4 = vpop.f32.mrb[71].mxu0  ;;  %v6732_v21 = vpop.f32.mrb[64].mxu1  ;;  %v9427_v54 = vld [vmem:[#allocation35_spill] sm:$0xff] }
 0x1fd   : > { %v9014_v26 = vadd.f32 %v6792_v43, %v9421_v25  ;;  %v9016_v42 = vadd.f32 %v6725_v23, %v6613_v15  ;;  %v6728_v29 = vadd.f32 %v6727_v12, %v6726_v38  ;;  %v6798_v27 = vadd.f32 %v8903_v10, %v8899_v36  ;;  %v6733_v12 = vpop.f32.mrb[65].mxu1 }
 0x1fe   : > { %v9019_v30 = vadd.f32 %v6795_v16, %v9422_v58  ;;  %v6731_v1 = vadd.f32 %v6730_v7, %v6729_v28  ;;  %v6801_v3 = vadd.f32 %v8913_v31, %v8905_v0  ;;  %v6804_v6 = vadd.f32 %v6803_v40, %v6802_v63  ;;  %v6735_v31 = vpop.f32.mrb[66].mxu1  ;;  %v9428_v40 = vld [vmem:[#allocation36_spill] sm:$0xff] }
 0x1ff   : > { %v6807_v46 = vadd.f32 %v6806_v4, %v6805_v45  ;;  %v9025_v55 = vadd.f32 %v6728_v29, %v6616_v2  ;;  %v9028_v15 = vadd.f32 %v6798_v27, %v9423_v51  ;;  %v6734_v0 = vadd.f32 %v6733_v12, %v6732_v21  ;;  %v6736_v28 = vpop.f32.mrb[67].mxu1  ;;  %v9425_v2 = vld [vmem:[#allocation28_spill] sm:$0xff]  ;;  %v9429_v21 = vld [vmem:[#allocation39_spill] sm:$0xff] }
 0x200   : > { %v9030_v61 = vadd.f32 %v6731_v1, %v6619_v32  ;;  %v9033_v38 = vadd.f32 %v6801_v3, %v9424_v18  ;;  %v9036_v36 = vadd.f32 %v6804_v6, %v8924_v41  ;;  %v6737_v37 = vadd.f32 %v6736_v28, %v6735_v31  ;;  %v9430_v31 = vld [vmem:[#allocation40_spill] sm:$0xff] }
 0x201   : > { %v9038_v10 = vadd.f32 %v6807_v46, %v5235_v35  ;;  %v9041_v7 = vadd.f32 %v6734_v0, %v9425_v2 }
 0x202   : > { %v9044_v32 = vadd.f32 %v6737_v37, %v9426_v19 }
 0x204   : > { %v6808_v60 = vpop.f32.mrb[72].mxu0 }
 0x205   : > { %v6809_v39 = vpop.f32.mrb[73].mxu0 }
 0x206   : > { %v6810_v20 = vadd.f32 %v6809_v39, %v6808_v60  ;;  %v6811_v13 = vpop.f32.mrb[74].mxu0 }
 0x207   : > { %v6812_v24 = vpop.f32.mrb[75].mxu0 }
 0x208   : > { %v9047_v41 = vadd.f32 %v6810_v20, %v8936_v8  ;;  %v6813_v35 = vadd.f32 %v6812_v24, %v6811_v13  ;;  %v6738_v22 = vpop.f32.mrb[68].mxu1 }
 0x209   : > { %v6739_v49 = vpop.f32.mrb[69].mxu1 }
 0x20a   : > { %v9050_v5 = vadd.f32 %v6813_v35, %v8943_v47  ;;  %v6740_v43 = vadd.f32 %v6739_v49, %v6738_v22  ;;  %v6741_v23 = vpop.f32.mrb[70].mxu1 }
 0x20b   : > { %v6742_v63 = vpop.f32.mrb[71].mxu1 }
 0x20c   : > { %v9053_v52 = vadd.f32 %v6740_v43, %v9427_v54  ;;  %v6743_v16 = vadd.f32 %v6742_v63, %v6741_v23 }
 0x20e   : > { %v9056_v56 = vadd.f32 %v6743_v16, %v9428_v40 }
 0x210   : > { %v6814_v25 = vpop.f32.mrb[76].mxu0 }
 0x211   : > { %v6815_v45 = vpop.f32.mrb[77].mxu0 }
 0x212   : > { %v6816_v8 = vadd.f32 %v6815_v45, %v6814_v25  ;;  %v6817_v58 = vpop.f32.mrb[78].mxu0 }
 0x213   : > { %v6818_v29 = vpop.f32.mrb[79].mxu0 }
 0x214   : > { %v9059_v27 = vadd.f32 %v6816_v8, %v8960_v17  ;;  %v6819_v47 = vadd.f32 %v6818_v29, %v6817_v58 }
 0x215   : > { %v6744_v1 = vpop.f32.mrb[72].mxu1 }
 0x216   : > { %v9062_v4 = vadd.f32 %v6819_v47, %v8966_v50  ;;  %v6745_v3 = vpop.f32.mrb[73].mxu1 }
 0x217   : > { %v6746_v6 = vadd.f32 %v6745_v3, %v6744_v1  ;;  %v6747_v46 = vpop.f32.mrb[74].mxu1  ;;  %v9431_v1 = vld [vmem:[#allocation41_spill] sm:$0xff] }
 0x218   : > { %v6748_v51 = vpop.f32.mrb[75].mxu1 }
 0x219   : > { %v9065_v18 = vadd.f32 %v6746_v6, %v9429_v21  ;;  %v6749_v12 = vadd.f32 %v6748_v51, %v6747_v46  ;;  %v9432_v6 = vld [vmem:[#allocation42_spill] sm:$0xff] }
 0x21a   : > { %v6820_v0 = vpop.f32.mrb[80].mxu0 }
 0x21b   : > { %v9068_v28 = vadd.f32 %v6749_v12, %v9430_v31  ;;  %v6821_v2 = vpop.f32.mrb[81].mxu0 }
 0x21c   : > { %v6822_v17 = vadd.f32 %v6821_v2, %v6820_v0  ;;  %v6823_v37 = vpop.f32.mrb[82].mxu0 }
 0x21d   : > { %v6824_v19 = vpop.f32.mrb[83].mxu0 }
 0x21e   : > { %v9071_v60 = vadd.f32 %v6822_v17, %v8974_v57  ;;  %v6825_v50 = vadd.f32 %v6824_v19, %v6823_v37 }
 0x220   : > { %v9074_v39 = vadd.f32 %v6825_v50, %v8980_v34 }
 0x223   : > { %v6826_v20 = vpop.f32.mrb[84].mxu0 }
 0x224   : > { %v6827_v13 = vpop.f32.mrb[85].mxu0 }
 0x225   : > { %v6828_v24 = vadd.f32 %v6827_v13, %v6826_v20  ;;  %v6829_v35 = vpop.f32.mrb[86].mxu0 }
 0x226   : > { %v6830_v22 = vpop.f32.mrb[87].mxu0 }
 0x227   : > { %v9077_v49 = vadd.f32 %v6828_v24, %v8999_v44  ;;  %v6831_v43 = vadd.f32 %v6830_v22, %v6829_v35 }
 0x229   : > { %v9080_v23 = vadd.f32 %v6831_v43, %v9004_v11 }
 0x22d   : > { %v6832_v63 = vpop.f32.mrb[88].mxu0 }
 0x22e   : > { %v6833_v54 = vpop.f32.mrb[89].mxu0 }
 0x22f   : > { %v6834_v57 = vadd.f32 %v6833_v54, %v6832_v63  ;;  %v6835_v16 = vpop.f32.mrb[90].mxu0 }
 0x230   : > { %v6836_v40 = vpop.f32.mrb[91].mxu0 }
 0x231   : > { %v9083_v34 = vadd.f32 %v6834_v57, %v9011_v53  ;;  %v6837_v25 = vadd.f32 %v6836_v40, %v6835_v16 }
 0x232   : > { %v6750_v45 = vpop.f32.mrb[76].mxu1 }
 0x233   : > { %v6751_v8 = vpop.f32.mrb[77].mxu1  ;;  %v9086_v58 = vadd.f32 %v6837_v25, %v9016_v42 }
 0x234   : > { %v6752_v44 = vadd.f32 %v6751_v8, %v6750_v45  ;;  %v6753_v29 = vpop.f32.mrb[78].mxu1 }
 0x235   : > { %v6754_v47 = vpop.f32.mrb[79].mxu1 }
 0x236   : > { %v9089_v11 = vadd.f32 %v6752_v44, %v9431_v1  ;;  %v6755_v3 = vadd.f32 %v6754_v47, %v6753_v29 }
 0x238   : > { %v9092_v46 = vadd.f32 %v6755_v3, %v9432_v6  ;;  %v6838_v51 = vpop.f32.mrb[92].mxu0 }
 0x239   : > { %v6839_v53 = vpop.f32.mrb[93].mxu0 }
 0x23a   : > { %v6884_v21 = vpop.f32.mrb[80].mxu1  ;;  %v6840_v0 = vadd.f32 %v6839_v53, %v6838_v51  ;;  %v6841_v31 = vpop.f32.mrb[94].mxu0 }
 0x23b   : > { %v6885_v12 = vpop.f32.mrb[81].mxu1  ;;  %v6842_v42 = vpop.f32.mrb[95].mxu0 }
 0x23c   : > { %v6886_v2 = vadd.f32 %v6885_v12, %v6884_v21  ;;  %v6887_v17 = vpop.f32.mrb[82].mxu1  ;;  %v9095_v19 = vadd.f32 %v6840_v0, %v9025_v55  ;;  %v6843_v50 = vadd.f32 %v6842_v42, %v6841_v31 }
 0x23d   : > { %v6888_v37 = vpop.f32.mrb[83].mxu1 }
 0x23e   : > { %v6889_v20 = vadd.f32 %v6888_v37, %v6887_v17  ;;  %v9098_v13 = vadd.f32 %v6886_v2, %v8963_v48  ;;  %v9101_v24 = vadd.f32 %v6843_v50, %v9030_v61 }
 0x240   : > { %v9104_v35 = vadd.f32 %v6889_v20, %v8971_v14  ;;  %v6844_v22 = vpop.f32.mrb[96].mxu0 }
 0x241   : > { %v6845_v63 = vpop.f32.mrb[97].mxu0 }
 0x242   : > { %v6890_v43 = vpop.f32.mrb[84].mxu1  ;;  %v6846_v57 = vadd.f32 %v6845_v63, %v6844_v22  ;;  %v6847_v16 = vpop.f32.mrb[98].mxu0 }
 0x243   : > { %v6891_v54 = vpop.f32.mrb[85].mxu1  ;;  %v6848_v25 = vpop.f32.mrb[99].mxu0 }
 0x244   : > { %v6892_v40 = vadd.f32 %v6891_v54, %v6890_v43  ;;  %v6893_v55 = vpop.f32.mrb[86].mxu1  ;;  %v9107_v8 = vadd.f32 %v6846_v57, %v9041_v7  ;;  %v6849_v48 = vadd.f32 %v6848_v25, %v6847_v16 }
 0x245   : > { %v6894_v45 = vpop.f32.mrb[87].mxu1 }
 0x246   : > { %v6895_v44 = vadd.f32 %v6894_v45, %v6893_v55  ;;  %v5522_v61 = vadd.f32 %v6892_v40, %v8977_v9  ;;  %v9111_v14 = vadd.f32 %v6849_v48, %v9044_v32 }
 0x248   : > { %v9114_v29 = vadd.f32 %v6895_v44, %v8983_v62 }
 0x249   : > { %v6850_v47 = vpop.f32.mrb[100].mxu0 }
 0x24a   : > { %v6896_v1 = vpop.f32.mrb[88].mxu1  ;;  %v6851_v3 = vpop.f32.mrb[101].mxu0 }
 0x24b   : > { %v6897_v6 = vpop.f32.mrb[89].mxu1  ;;  %v6852_v51 = vadd.f32 %v6851_v3, %v6850_v47  ;;  %v6853_v21 = vpop.f32.mrb[102].mxu0 }
 0x24c   : > { %v6898_v53 = vadd.f32 %v6897_v6, %v6896_v1  ;;  %v6899_v12 = vpop.f32.mrb[90].mxu1  ;;  %v6854_v7 = vpop.f32.mrb[103].mxu0 }
 0x24d   : > { %v6900_v0 = vpop.f32.mrb[91].mxu1  ;;  %v9117_v31 = vadd.f32 %v6852_v51, %v9053_v52  ;;  %v6855_v9 = vadd.f32 %v6854_v7, %v6853_v21 }
 0x24e   : > { %v6901_v2 = vadd.f32 %v6900_v0, %v6899_v12  ;;  %v9120_v32 = vadd.f32 %v6898_v53, %v9002_v59 }
 0x24f   : > { %v9123_v62 = vadd.f32 %v6855_v9, %v9056_v56 }
 0x250   : > { %v9126_v17 = vadd.f32 %v6901_v2, %v9009_v33 }
 0x251   : > { %v6856_v42 = vpop.f32.mrb[104].mxu0 }
 0x252   : > { %v6902_v37 = vpop.f32.mrb[92].mxu1  ;;  %v6857_v50 = vpop.f32.mrb[105].mxu0 }
 0x253   : > { %v6903_v20 = vpop.f32.mrb[93].mxu1  ;;  %v6858_v22 = vadd.f32 %v6857_v50, %v6856_v42  ;;  %v6859_v43 = vpop.f32.mrb[106].mxu0 }
 0x254   : > { %v6904_v63 = vadd.f32 %v6903_v20, %v6902_v37  ;;  %v6905_v52 = vpop.f32.mrb[94].mxu1  ;;  %v6860_v54 = vpop.f32.mrb[107].mxu0 }
 0x255   : > { %v6906_v57 = vpop.f32.mrb[95].mxu1  ;;  %v9129_v16 = vadd.f32 %v6858_v22, %v9065_v18  ;;  %v6861_v59 = vadd.f32 %v6860_v54, %v6859_v43 }
 0x256   : > { %v6907_v40 = vadd.f32 %v6906_v57, %v6905_v52  ;;  %v9132_v56 = vadd.f32 %v6904_v63, %v9014_v26 }
 0x257   : > { %v9135_v33 = vadd.f32 %v6861_v59, %v9068_v28 }
 0x258   : > { %v9138_v55 = vadd.f32 %v6907_v40, %v9019_v30 }
 0x25a   : > { %v6908_v25 = vpop.f32.mrb[96].mxu1  ;;  %v6862_v45 = vpop.f32.mrb[108].mxu0 }
 0x25b   : > { %v6909_v48 = vpop.f32.mrb[97].mxu1  ;;  %v6863_v44 = vpop.f32.mrb[109].mxu0 }
 0x25c   : > { %v6910_v47 = vadd.f32 %v6909_v48, %v6908_v25  ;;  %v6911_v1 = vpop.f32.mrb[98].mxu1  ;;  %v6864_v18 = vadd.f32 %v6863_v44, %v6862_v45  ;;  %v6865_v3 = vpop.f32.mrb[110].mxu0 }
 0x25d   : > { %v6912_v6 = vpop.f32.mrb[99].mxu1  ;;  %v6866_v51 = vpop.f32.mrb[111].mxu0 }
 0x25e   : > { %v6913_v21 = vadd.f32 %v6912_v6, %v6911_v1  ;;  %v9141_v26 = vadd.f32 %v6864_v18, %v9089_v11  ;;  %v6867_v28 = vadd.f32 %v6866_v51, %v6865_v3  ;;  %v9144_v53 = vadd.f32 %v6910_v47, %v9028_v15 }
 0x260   : > { %v9147_v30 = vadd.f32 %v6867_v28, %v9092_v46  ;;  %v9150_v12 = vadd.f32 %v6913_v21, %v9033_v38 }
 0x262   : > { %v6914_v7 = vpop.f32.mrb[100].mxu1 }
 0x263   : > { %v6915_v0 = vpop.f32.mrb[101].mxu1 }
 0x264   : > { %v6916_v9 = vadd.f32 %v6915_v0, %v6914_v7  ;;  %v6917_v2 = vpop.f32.mrb[102].mxu1 }
 0x265   : > { %v6918_v42 = vpop.f32.mrb[103].mxu1 }
 0x266   : > { %v6919_v15 = vadd.f32 %v6918_v42, %v6917_v2  ;;  %v7022_v11 = vpop.f32.mrb[112].mxu0  ;;  %v9160_v46 = vadd.f32 %v6916_v9, %v9036_v36 }
 0x267   : > { %v5683_v38 = vadd.f32 %v7022_v11, %v5522_v61  ;;  %v5674_v37 = vpop.f32.mrb[113].mxu0 }
 0x268   : > { %v5675_v50 = vadd.f32 %v5674_v37, %v9098_v13  ;;  %v7023_v20 = vpop.f32.mrb[114].mxu0  ;;  %v9164_v22 = vadd.f32 %v6919_v15, %v9038_v10 }
 0x269   : > { %5803 = vst [vmem:[%s9157_s19 + $0x10] sm:$0xff] %v5683_v38  ;;  %v5686_v43 = vadd.f32 %v7023_v20, %v9114_v29  ;;  %v5677_v63 = vpop.f32.mrb[115].mxu0  ;;  %v5873_v45 = vmul.f32 %v5683_v38, %v5683_v38 }
 0x26a   : > { %v6920_v52 = vpop.f32.mrb[104].mxu1  ;;  %5801 = vst [vmem:[%s9157_s19] sm:$0xff] %v5675_v50  ;;  %v5678_v54 = vadd.f32 %v5677_v63, %v9104_v35  ;;  %v5871_v59 = vmul.f32 %v5675_v50, %v5675_v50 }
 0x26b   : > { %v6921_v57 = vpop.f32.mrb[105].mxu1  ;;  %5804 = vst [vmem:[%s9157_s19 + $0x18] sm:$0xff] %v5686_v43  ;;  %v5874_v47 = vmul.f32 %v5686_v43, %v5686_v43 }
 0x26c   : > { %v6922_v36 = vadd.f32 %v6921_v57, %v6920_v52  ;;  %v6923_v61 = vpop.f32.mrb[106].mxu1  ;;  %5802 = vst [vmem:[%s9157_s19 + $0x8] sm:$0xff] %v5678_v54  ;;  %v5849_v40 = vadd.f32 %v5678_v54, %v5675_v50  ;;  %v5872_v13 = vmul.f32 %v5678_v54, %v5678_v54 }
 0x26d   : > { %v6924_v25 = vpop.f32.mrb[107].mxu1 }
 0x26e   : > { %v6925_v10 = vadd.f32 %v6924_v25, %v6923_v61  ;;  %v5850_v48 = vadd.f32 %v5849_v40, %v5683_v38  ;;  %v5887_v44 = vadd.f32 %v5872_v13, %v5871_v59  ;;  %v9173_v29 = vadd.f32 %v6922_v36, %v9047_v41 }
 0x270   : > { %v5888_v1 = vadd.f32 %v5887_v44, %v5873_v45  ;;  %v5851_v35 = vadd.f32 %v5850_v48, %v5686_v43  ;;  %v9176_v18 = vadd.f32 %v6925_v10, %v9050_v5 }
 0x272   : > { %v6926_v3 = vpop.f32.mrb[108].mxu1  ;;  %v5889_v6 = vadd.f32 %v5888_v1, %v5874_v47 }
 0x273   : > { %v6927_v51 = vpop.f32.mrb[109].mxu1  ;;  %v7026_v21 = vpop.f32.mrb[116].mxu0 }
 0x274   : > { %v6928_v28 = vadd.f32 %v6927_v51, %v6926_v3  ;;  %v6929_v7 = vpop.f32.mrb[110].mxu1  ;;  %v5699_v0 = vadd.f32 %v7026_v21, %v9132_v56  ;;  %v5690_v9 = vpop.f32.mrb[117].mxu0 }
 0x275   : > { %v6930_v41 = vpop.f32.mrb[111].mxu1  ;;  %v5691_v2 = vadd.f32 %v5690_v9, %v9120_v32  ;;  %v7027_v42 = vpop.f32.mrb[118].mxu0 }
 0x276   : > { %v6931_v15 = vadd.f32 %v6930_v41, %v6929_v7  ;;  %5807 = vst [vmem:[%s9157_s19 + $0x30] sm:$0xff] %v5699_v0  ;;  %v5702_v5 = vadd.f32 %v7027_v42, %v9138_v55  ;;  %v5693_v11 = vpop.f32.mrb[119].mxu0  ;;  %v9183_v38 = vadd.f32 %v6928_v28, %v9059_v27  ;;  %v5877_v54 = vmul.f32 %v5699_v0, %v5699_v0 }
 0x277   : > { %5805 = vst [vmem:[%s9157_s19 + $0x20] sm:$0xff] %v5691_v2  ;;  %v5852_v37 = vadd.f32 %v5851_v35, %v5691_v2  ;;  %v5875_v50 = vmul.f32 %v5691_v2, %v5691_v2  ;;  %v5694_v20 = vadd.f32 %v5693_v11, %v9126_v17 }
 0x278   : > { %5808 = vst [vmem:[%s9157_s19 + $0x38] sm:$0xff] %v5702_v5  ;;  %v9189_v56 = vadd.f32 %v6931_v15, %v9062_v4  ;;  %v5878_v59 = vmul.f32 %v5702_v5, %v5702_v5 }
 0x279   : > { %v5890_v43 = vadd.f32 %v5889_v6, %v5875_v50  ;;  %5806 = vst [vmem:[%s9157_s19 + $0x28] sm:$0xff] %v5694_v20  ;;  %v5853_v32 = vadd.f32 %v5852_v37, %v5694_v20  ;;  %v5876_v63 = vmul.f32 %v5694_v20, %v5694_v20 }
 0x27a   : > { %v6932_v52 = vpop.f32.mrb[112].mxu1 }
 0x27b   : > { %v6933_v55 = vpop.f32.mrb[113].mxu1  ;;  %v5854_v57 = vadd.f32 %v5853_v32, %v5699_v0  ;;  %v5891_v36 = vadd.f32 %v5890_v43, %v5876_v63 }
 0x27c   : > { %v6934_v27 = vadd.f32 %v6933_v55, %v6932_v52  ;;  %v6935_v61 = vpop.f32.mrb[114].mxu1 }
 0x27d   : > { %v6936_v40 = vpop.f32.mrb[115].mxu1  ;;  %v5892_v13 = vadd.f32 %v5891_v36, %v5877_v54  ;;  %v5855_v17 = vadd.f32 %v5854_v57, %v5702_v5 }
 0x27e   : > { %v6937_v25 = vadd.f32 %v6936_v40, %v6935_v61  ;;  %v9193_v4 = vadd.f32 %v6934_v27, %v9071_v60 }
 0x27f   : > { %v5893_v45 = vadd.f32 %v5892_v13, %v5878_v59 }
 0x280   : > { %v7030_v10 = vpop.f32.mrb[120].mxu0  ;;  %v9196_v48 = vadd.f32 %v6937_v25, %v9074_v39 }
 0x281   : > { %v5715_v44 = vadd.f32 %v7030_v10, %v9160_v46  ;;  %v5706_v47 = vpop.f32.mrb[121].mxu0 }
 0x282   : > { %v6938_v1 = vpop.f32.mrb[116].mxu1  ;;  %v5707_v35 = vadd.f32 %v5706_v47, %v9144_v53  ;;  %v7031_v3 = vpop.f32.mrb[122].mxu0 }
 0x283   : > { %5811 = vst [vmem:[%s9157_s19 + $0x50] sm:$0xff] %v5715_v44  ;;  %v6939_v6 = vpop.f32.mrb[117].mxu1  ;;  %v5718_v51 = vadd.f32 %v7031_v3, %v9164_v22  ;;  %v5709_v60 = vpop.f32.mrb[123].mxu0  ;;  %v5881_v15 = vmul.f32 %v5715_v44, %v5715_v44 }
 0x284   : > { %v6940_v21 = vadd.f32 %v6939_v6, %v6938_v1  ;;  %5809 = vst [vmem:[%s9157_s19 + $0x40] sm:$0xff] %v5707_v35  ;;  %v5856_v28 = vadd.f32 %v5855_v17, %v5707_v35  ;;  %v5879_v7 = vmul.f32 %v5707_v35, %v5707_v35  ;;  %v6941_v39 = vpop.f32.mrb[118].mxu1  ;;  %v5710_v0 = vadd.f32 %v5709_v60, %v9150_v12 }
 0x285   : > { %5812 = vst [vmem:[%s9157_s19 + $0x58] sm:$0xff] %v5718_v51  ;;  %v6942_v46 = vpop.f32.mrb[119].mxu1  ;;  %v5882_v37 = vmul.f32 %v5718_v51, %v5718_v51 }
 0x286   : > { %v5894_v9 = vadd.f32 %v5893_v45, %v5879_v7  ;;  %v6943_v41 = vadd.f32 %v6942_v46, %v6941_v39  ;;  %5810 = vst [vmem:[%s9157_s19 + $0x48] sm:$0xff] %v5710_v0  ;;  %v5857_v53 = vadd.f32 %v5856_v28, %v5710_v0  ;;  %v5880_v2 = vmul.f32 %v5710_v0, %v5710_v0 }
 0x287   : > { %v5586_v42 = vadd.f32 %v6940_v21, %v9077_v49 }
 0x288   : > { %v5858_v5 = vadd.f32 %v5857_v53, %v5715_v44  ;;  %v5895_v22 = vadd.f32 %v5894_v9, %v5880_v2  ;;  %v5589_v11 = vadd.f32 %v6943_v41, %v9080_v23 }
 0x28a   : > { %v5896_v50 = vadd.f32 %v5895_v22, %v5881_v15  ;;  %v6944_v20 = vpop.f32.mrb[120].mxu1  ;;  %v5859_v43 = vadd.f32 %v5858_v5, %v5718_v51 }
 0x28b   : > { %v6945_v12 = vpop.f32.mrb[121].mxu1 }
 0x28c   : > { %v6946_v32 = vadd.f32 %v6945_v12, %v6944_v20  ;;  %v5897_v63 = vadd.f32 %v5896_v50, %v5882_v37  ;;  %v6947_v52 = vpop.f32.mrb[122].mxu1 }
 0x28d   : > { %v7034_v54 = vpop.f32.mrb[124].mxu0  ;;  %v6948_v55 = vpop.f32.mrb[123].mxu1 }
 0x28e   : > { %v5731_v49 = vadd.f32 %v7034_v54, %v9183_v38  ;;  %v5722_v57 = vpop.f32.mrb[125].mxu0  ;;  %v6949_v36 = vadd.f32 %v6948_v55, %v6947_v52  ;;  %v9210_v23 = vadd.f32 %v6946_v32, %v9083_v34 }
 0x28f   : > { %v5723_v27 = vadd.f32 %v5722_v57, %v9173_v29  ;;  %v7035_v61 = vpop.f32.mrb[126].mxu0 }
 0x290   : > { %5815 = vst [vmem:[%s9157_s19 + $0x70] sm:$0xff] %v5731_v49  ;;  %v5734_v59 = vadd.f32 %v7035_v61, %v9189_v56  ;;  %v5725_v40 = vpop.f32.mrb[127].mxu0  ;;  %v9216_v13 = vadd.f32 %v6949_v36, %v9086_v58  ;;  %v5885_v44 = vmul.f32 %v5731_v49, %v5731_v49 }
 0x291   : > { %5813 = vst [vmem:[%s9157_s19 + $0x60] sm:$0xff] %v5723_v27  ;;  %v5860_v17 = vadd.f32 %v5859_v43, %v5723_v27  ;;  %v5883_v25 = vmul.f32 %v5723_v27, %v5723_v27  ;;  %v5726_v38 = vadd.f32 %v5725_v40, %v9176_v18 }
 0x292   : > { %5816 = vst [vmem:[%s9157_s19 + $0x78] sm:$0xff] %v5734_v59  ;;  %v5886_v56 = vmul.f32 %v5734_v59, %v5734_v59 }
 0x293   : > { %v5898_v45 = vadd.f32 %v5897_v63, %v5883_v25  ;;  %5814 = vst [vmem:[%s9157_s19 + $0x68] sm:$0xff] %v5726_v38  ;;  %v5861_v34 = vadd.f32 %v5860_v17, %v5726_v38  ;;  %v5884_v10 = vmul.f32 %v5726_v38, %v5726_v38 }
 0x295   : > { %v5862_v29 = vadd.f32 %v5861_v34, %v5731_v49  ;;  %v5899_v47 = vadd.f32 %v5898_v45, %v5884_v10  ;;  %v6950_v1 = vpop.f32.mrb[124].mxu1 }
 0x296   : > { %v6951_v35 = vpop.f32.mrb[125].mxu1 }
 0x297   : > { %v9222_v3 = vadd.f32 %v5862_v29, %v5734_v59  ;;  %v5900_v58 = vadd.f32 %v5899_v47, %v5885_v44  ;;  %v6952_v6 = vadd.f32 %v6951_v35, %v6950_v1  ;;  %v6953_v51 = vpop.f32.mrb[126].mxu1 }
 0x298   : > { %v6954_v18 = vpop.f32.mrb[127].mxu1 }
 0x299   : > { %v9224_v60 = vadd.f32 %v5900_v58, %v5886_v56  ;;  %v6955_v21 = vadd.f32 %v6954_v18, %v6953_v51  ;;  %v5602_v28 = vadd.f32 %v6952_v6, %v9095_v19 }
 0x29b   : > { %v5605_v7 = vadd.f32 %v6955_v21, %v9101_v24 }
 0x29e   : > { %v7038_v39 = vpop.f32.mrb[128].mxu0 }
 0x29f   : > { %v5747_v0 = vadd.f32 %v7038_v39, %v5586_v42  ;;  %v5738_v46 = vpop.f32.mrb[129].mxu0 }
 0x2a0   : > { %v5739_v9 = vadd.f32 %v5738_v46, %v9193_v4  ;;  %v7039_v41 = vpop.f32.mrb[130].mxu0 }
 0x2a1   : > { %5819 = vst [vmem:[%s9157_s19 + $0x90] sm:$0xff] %v5747_v0  ;;  %v5750_v53 = vadd.f32 %v7039_v41, %v5589_v11  ;;  %v5741_v2 = vpop.f32.mrb[131].mxu0  ;;  %v5950_v24 = vmul.f32 %v5747_v0, %v5747_v0 }
 0x2a2   : > { %5817 = vst [vmem:[%s9157_s19 + $0x80] sm:$0xff] %v5739_v9  ;;  %v5742_v15 = vadd.f32 %v5741_v2, %v9196_v48  ;;  %v5948_v5 = vmul.f32 %v5739_v9, %v5739_v9 }
 0x2a3   : > { %5820 = vst [vmem:[%s9157_s19 + $0x98] sm:$0xff] %v5750_v53  ;;  %v5951_v12 = vmul.f32 %v5750_v53, %v5750_v53 }
 0x2a4   : > { %5818 = vst [vmem:[%s9157_s19 + $0x88] sm:$0xff] %v5742_v15  ;;  %v5926_v22 = vadd.f32 %v5742_v15, %v5739_v9  ;;  %v5949_v37 = vmul.f32 %v5742_v15, %v5742_v15  ;;  %v6956_v19 = vpop.f32.mrb[128].mxu1 }
 0x2a5   : > { %v6957_v50 = vpop.f32.mrb[129].mxu1 }
 0x2a6   : > { %v5927_v20 = vadd.f32 %v5926_v22, %v5747_v0  ;;  %v5964_v42 = vadd.f32 %v5949_v37, %v5948_v5  ;;  %v6958_v43 = vadd.f32 %v6957_v50, %v6956_v19  ;;  %v6959_v4 = vpop.f32.mrb[130].mxu1 }
 0x2a7   : > { %v6960_v11 = vpop.f32.mrb[131].mxu1 }
 0x2a8   : > { %v5965_v32 = vadd.f32 %v5964_v42, %v5950_v24  ;;  %v5928_v63 = vadd.f32 %v5927_v20, %v5750_v53  ;;  %v6961_v52 = vadd.f32 %v6960_v11, %v6959_v4  ;;  %v5610_v48 = vadd.f32 %v6958_v43, %v9107_v8 }
 0x2aa   : > { %v5966_v54 = vadd.f32 %v5965_v32, %v5951_v12  ;;  %v5613_v55 = vadd.f32 %v6961_v52, %v9111_v14 }
 0x2ab   : > { %v7042_v49 = vpop.f32.mrb[132].mxu0 }
 0x2ac   : > { %v5763_v57 = vadd.f32 %v7042_v49, %v5602_v28  ;;  %v5754_v36 = vpop.f32.mrb[133].mxu0 }
 0x2ad   : > { %v5755_v27 = vadd.f32 %v5754_v36, %v9210_v23  ;;  %v7043_v61 = vpop.f32.mrb[134].mxu0 }
 0x2ae   : > { %5823 = vst [vmem:[%s9157_s19 + $0xb0] sm:$0xff] %v5763_v57  ;;  %v5766_v59 = vadd.f32 %v7043_v61, %v5605_v7  ;;  %v5757_v40 = vpop.f32.mrb[135].mxu0  ;;  %v5954_v14 = vmul.f32 %v5763_v57, %v5763_v57  ;;  %v5864_v61 = vrot.slane %v9222_v3, 4 }
 0x2af   : > { %5821 = vst [vmem:[%s9157_s19 + $0xa0] sm:$0xff] %v5755_v27  ;;  %v5929_v17 = vadd.f32 %v5928_v63, %v5755_v27  ;;  %v5952_v25 = vmul.f32 %v5755_v27, %v5755_v27  ;;  %v5758_v38 = vadd.f32 %v5757_v40, %v9216_v13 }
 0x2b0   : > { %5824 = vst [vmem:[%s9157_s19 + $0xb8] sm:$0xff] %v5766_v59  ;;  %v5955_v23 = vmul.f32 %v5766_v59, %v5766_v59 }
 0x2b1   : > { %v5967_v8 = vadd.f32 %v5966_v54, %v5952_v25  ;;  %5822 = vst [vmem:[%s9157_s19 + $0xa8] sm:$0xff] %v5758_v38  ;;  %v5930_v45 = vadd.f32 %v5929_v17, %v5758_v38  ;;  %v5953_v34 = vmul.f32 %v5758_v38, %v5758_v38  ;;  %v5902_v38 = vrot.slane %v9224_v60, 4 }
 0x2b3   : > { %v5931_v10 = vadd.f32 %v5930_v45, %v5763_v57  ;;  %v5968_v44 = vadd.f32 %v5967_v8, %v5953_v34  ;;  %v6962_v29 = vpop.f32.mrb[132].mxu1 }
 0x2b4   : > { %v6963_v47 = vpop.f32.mrb[133].mxu1 }
 0x2b5   : > { %v5969_v1 = vadd.f32 %v5968_v44, %v5954_v14  ;;  %v6964_v35 = vadd.f32 %v6963_v47, %v6962_v29  ;;  %v5932_v56 = vadd.f32 %v5931_v10, %v5766_v59  ;;  %v6965_v58 = vpop.f32.mrb[134].mxu1  ;;  %v5865_v44 = vadd.f32 %v5864_v61, %v9222_v3 }
 0x2b6   : > { %v6966_v6 = vpop.f32.mrb[135].mxu1 }
 0x2b7   : > { %v5618_v13 = vadd.f32 %v6964_v35, %v9117_v31  ;;  %v5970_v51 = vadd.f32 %v5969_v1, %v5955_v23  ;;  %v6967_v18 = vadd.f32 %v6966_v6, %v6965_v58  ;;  %v5903_v35 = vadd.f32 %v5902_v38, %v9224_v60 }
 0x2b9   : > { %v7046_v21 = vpop.f32.mrb[136].mxu0  ;;  %v5621_v28 = vadd.f32 %v6967_v18, %v9123_v62 }
 0x2ba   : > { %v5779_v7 = vadd.f32 %v7046_v21, %v5618_v13  ;;  %v5770_v39 = vpop.f32.mrb[137].mxu0  ;;  %v5866_v13 = vrot.slane %v5865_v44, 2  ;;  %v5904_v21 = vrot.slane %v5903_v35, 2 }
 0x2bb   : > { %v5771_v0 = vadd.f32 %v5770_v39, %v5610_v48  ;;  %v7047_v46 = vpop.f32.mrb[138].mxu0 }
 0x2bc   : > { %5827 = vst [vmem:[%s9157_s19 + $0xd0] sm:$0xff] %v5779_v7  ;;  %v5782_v9 = vadd.f32 %v7047_v46, %v5621_v28  ;;  %v5773_v41 = vpop.f32.mrb[139].mxu0  ;;  %v6968_v53 = vpop.f32.mrb[136].mxu1  ;;  %v5958_v24 = vmul.f32 %v5779_v7, %v5779_v7  ;;  %v5867_v3 = vadd.f32 %v5866_v13, %v5865_v44 }
 0x2bd   : > { %5825 = vst [vmem:[%s9157_s19 + $0xc0] sm:$0xff] %v5771_v0  ;;  %v5933_v2 = vadd.f32 %v5932_v56, %v5771_v0  ;;  %v5956_v15 = vmul.f32 %v5771_v0, %v5771_v0  ;;  %v5774_v5 = vadd.f32 %v5773_v41, %v5613_v55  ;;  %v6969_v31 = vpop.f32.mrb[137].mxu1  ;;  %v5905_v0 = vadd.f32 %v5904_v21, %v5903_v35 }
 0x2be   : > { %5828 = vst [vmem:[%s9157_s19 + $0xd8] sm:$0xff] %v5782_v9  ;;  %v6970_v22 = vadd.f32 %v6969_v31, %v6968_v53  ;;  %v6971_v37 = vpop.f32.mrb[138].mxu1  ;;  %v5959_v11 = vmul.f32 %v5782_v9, %v5782_v9  ;;  %v5868_v41 = vrot.slane %v5867_v3, 1 }
 0x2bf   : > { %v5971_v19 = vadd.f32 %v5970_v51, %v5956_v15  ;;  %5826 = vst [vmem:[%s9157_s19 + $0xc8] sm:$0xff] %v5774_v5  ;;  %v5934_v62 = vadd.f32 %v5933_v2, %v5774_v5  ;;  %v5957_v50 = vmul.f32 %v5774_v5, %v5774_v5  ;;  %v6972_v20 = vpop.f32.mrb[139].mxu1  ;;  %v5906_v2 = vrot.slane %v5905_v0, 1 }
 0x2c0   : > { %v6973_v42 = vadd.f32 %v6972_v20, %v6971_v37  ;;  %v5626_v43 = vadd.f32 %v6970_v22, %v9129_v16  ;;  %v5869_v31 = vadd.f32 %v5868_v41, %v5867_v3 }
 0x2c1   : > { %v5935_v4 = vadd.f32 %v5934_v62, %v5779_v7  ;;  %v5972_v12 = vadd.f32 %v5971_v19, %v5957_v50  ;;  %v5907_v19 = vadd.f32 %v5906_v2, %v5905_v0 }
 0x2c2   : > { %v5629_v32 = vadd.f32 %v6973_v42, %v9135_v33 }
 0x2c3   : > { %v5973_v63 = vadd.f32 %v5972_v12, %v5958_v24  ;;  %v5936_v52 = vadd.f32 %v5935_v4, %v5782_v9 }
 0x2c5   : > { %v5974_v48 = vadd.f32 %v5973_v63, %v5959_v11 }
 0x2c9   : > { %v6974_v54 = vpop.f32.mrb[140].mxu1  ;;  %v7050_v55 = vpop.f32.mrb[140].mxu0 }
 0x2ca   : > { %v6975_v49 = vpop.f32.mrb[141].mxu1  ;;  %v5786_v57 = vpop.f32.mrb[141].mxu0 }
 0x2cb   : > { %v6976_v36 = vadd.f32 %v6975_v49, %v6974_v54  ;;  %v6977_v27 = vpop.f32.mrb[142].mxu1  ;;  %v5787_v59 = vadd.f32 %v5786_v57, %v5626_v43  ;;  %v7051_v16 = vpop.f32.mrb[142].mxu0 }
 0x2cc   : > { %v6978_v40 = vpop.f32.mrb[143].mxu1  ;;  %v5789_v17 = vpop.f32.mrb[143].mxu0 }
 0x2cd   : > { %v5634_v33 = vadd.f32 %v6976_v36, %v9141_v26  ;;  %v6979_v25 = vadd.f32 %v6978_v40, %v6977_v27  ;;  %5829 = vst [vmem:[%s9157_s19 + $0xe0] sm:$0xff] %v5787_v59  ;;  %v5937_v8 = vadd.f32 %v5936_v52, %v5787_v59  ;;  %v5960_v45 = vmul.f32 %v5787_v59, %v5787_v59 }
 0x2ce   : > { %v5790_v34 = vadd.f32 %v5789_v17, %v5629_v32 }
 0x2cf   : > { %v5795_v14 = vadd.f32 %v7050_v55, %v5634_v33  ;;  %v5637_v10 = vadd.f32 %v6979_v25, %v9147_v30  ;;  %v5975_v29 = vadd.f32 %v5974_v48, %v5960_v45 }
 0x2d0   : > { %5830 = vst [vmem:[%s9157_s19 + $0xe8] sm:$0xff] %v5790_v34  ;;  %v5938_v47 = vadd.f32 %v5937_v8, %v5790_v34  ;;  %v5961_v23 = vmul.f32 %v5790_v34, %v5790_v34 }
 0x2d1   : > { %5831 = vst [vmem:[%s9157_s19 + $0xf0] sm:$0xff] %v5795_v14  ;;  %v5962_v1 = vmul.f32 %v5795_v14, %v5795_v14  ;;  %v5798_v26 = vadd.f32 %v7051_v16, %v5637_v10 }
 0x2d2   : > { %v5976_v56 = vadd.f32 %v5975_v29, %v5961_v23  ;;  %v5939_v58 = vadd.f32 %v5938_v47, %v5795_v14 }
 0x2d3   : > { %5832 = vst [vmem:[%s9157_s19 + $0xf8] sm:$0xff] %v5798_v26  ;;  %v5963_v6 = vmul.f32 %v5798_v26, %v5798_v26 }
 0x2d4   : > { %v5977_v51 = vadd.f32 %v5976_v56, %v5962_v1  ;;  %v5940_v18 = vadd.f32 %v5939_v58, %v5798_v26 }
 0x2d6   : > { %v5941_v30 = vrot.slane %v5940_v18, 4  ;;  %v5978_v28 = vadd.f32 %v5977_v51, %v5963_v6 }
 0x2d8   : > { %v5942_v7 = vadd.f32 %v5941_v30, %v5940_v18  ;;  %v5979_v39 = vrot.slane %v5978_v28, 4 }
 0x2da   : > { %v5943_v46 = vrot.slane %v5942_v7, 2  ;;  %v5980_v9 = vadd.f32 %v5979_v39, %v5978_v28 }
 0x2dc   : > { %v5944_v60 = vadd.f32 %v5943_v46, %v5942_v7  ;;  %v5981_v53 = vrot.slane %v5980_v9, 2 }
 0x2de   : > { %v5945_v15 = vrot.slane %v5944_v60, 1  ;;  %v5982_v5 = vadd.f32 %v5981_v53, %v5980_v9 }
 0x2e0   : > { %v5946_v22 = vadd.f32 %v5945_v15, %v5944_v60  ;;  %v5983_v37 = vrot.slane %v5982_v5, 1 }
 0x2e2   : > { %v5947_v62 = vadd.f32 %v5946_v22, %v5869_v31  ;;  %v5984_v50 = vadd.f32 %v5983_v37, %v5982_v5 }
 0x2e4   : > { %v5985_v24 = vadd.f32 %v5984_v50, %v5907_v19  ;;  %5986 = vst [vmem:[%s265_s23] sm:$0x1] %v5947_v62 }
 0x2e6   : > { %5987 = vst [vmem:[%s268_s26] sm:$0x1] %v5985_v24 }
 0x2e7 PF: > { %s17_s21 = sadd.s32 1, %s7271_s21  }
 0x2e8   : > { %p14_p4 = scmp.ge.s32.totalorder %s17_s21, 4  }
 0x2ea   :  { %16 = sbr.rel (!%p14_p4) target bundleno = 1 (0x1), region = 93 }

</bundles_post_ra>
